<compile_context>
chip_gen: v6e
topology: v6e:2x2x1
jax: 0.10.0
libtpu: 0.0.40
codegen_flags: <defaults>
</compile_context>

<pallas_src>
import math
import functools

import jax
import jax.numpy as jnp
from jax.experimental import pallas as pl
from jax.experimental.pallas import tpu as pltpu

HIDDEN = 32
NUM_HEADS = 4
HEAD_DIM = HIDDEN // NUM_HEADS
INTERMEDIATE = 64
NUM_LAYERS = 2
LN_EPS = 1e-12

# fused/stacked parameter ordering (all arrays have a leading layer axis L)
ATT_KEYS = ('qkvq_w', 'qkvq_b', 'kvo_w', 'kvo_b', 'out_w', 'out_b', 'ln_g', 'ln_b')
FFN_KEYS = ('inter_w', 'inter_b', 'out_w', 'out_b', 'ln_g', 'ln_b')


def _erf(x):
    # Abramowitz & Stegun 7.1.26 polynomial (|err| < 1.5e-7): uses only
    # exp/mul/div so it lowers cleanly inside Mosaic.
    a1, a2, a3, a4, a5 = 0.254829592, -0.284496736, 1.421413741, -1.453152027, 1.061405429
    p = 0.3275911
    s = jnp.where(x >= 0.0, 1.0, -1.0)
    ax = jnp.abs(x)
    t = 1.0 / (1.0 + p * ax)
    y = 1.0 - (((((a5 * t + a4) * t + a3) * t + a2) * t + a1) * t) * jnp.exp(-ax * ax)
    return s * y


def _layernorm(x, g, b):
    u = jnp.mean(x, axis=-1, keepdims=True)
    s = jnp.mean((x - u) ** 2, axis=-1, keepdims=True)
    return g * ((x - u) * jax.lax.rsqrt(s + LN_EPS)) + b


# --------------------------- fused encoder kernel ---------------------------

def _attention_block(x, xo, mask_keys, p, l, ctx_ref, B, S_self, S_other):
    """Dual (self || other) multi-head attention + output projection + Add&LN.

    x:  [B*S_self, H]  queries / self keys-values stream
    xo: [B*S_other, H] other keys-values stream
    mask_keys: [B, S_self+S_other] additive mask over the concatenated key axis
    p: dict of stacked weight refs (leading layer axis), l: layer index (static)
    ctx_ref: VMEM scratch [B*S_self, H] that collects per-head contexts.
    """
    H, dh = HIDDEN, HEAD_DIM
    scale = 1.0 / math.sqrt(dh)
    dn = (((1,), (1,)), ((), ()))  # A @ B^T (contract last dims)

    # fused Q|K|V|Q_other projection: one lane-dense [.,128] matmul
    qkvq = jnp.dot(x, p['qkvq_w'][l], preferred_element_type=jnp.float32) + p['qkvq_b'][l]
    # fused K_other|V_other projection: [., 64]
    kvo = jnp.dot(xo, p['kvo_w'][l], preferred_element_type=jnp.float32) + p['kvo_b'][l]

    for b in range(B):
        r0, r1 = b * S_self, (b + 1) * S_self
        o0, o1 = b * S_other, (b + 1) * S_other
        m_b = mask_keys[b:b + 1, :]                       # (1, S_self+S_other)
        for h in range(NUM_HEADS):
            c0, c1 = h * dh, (h + 1) * dh
            q_h = qkvq[r0:r1, 0 * H + c0:0 * H + c1]
            k_h = qkvq[r0:r1, 1 * H + c0:1 * H + c1]
            v_h = qkvq[r0:r1, 2 * H + c0:2 * H + c1]
            qo_h = qkvq[r0:r1, 3 * H + c0:3 * H + c1]
            ko_h = kvo[o0:o1, 0 * H + c0:0 * H + c1]
            vo_h = kvo[o0:o1, 1 * H + c0:1 * H + c1]

            s_self = jax.lax.dot_general(q_h, k_h, dn, preferred_element_type=jnp.float32)
            s_other = jax.lax.dot_general(qo_h, ko_h, dn, preferred_element_type=jnp.float32)
            scores = jnp.concatenate([s_self, s_other], axis=-1) * scale + m_b
            m_row = jnp.max(scores, axis=-1, keepdims=True)
            e = jnp.exp(scores - m_row)
            probs = e / jnp.sum(e, axis=-1, keepdims=True)   # attn dropout = identity
            v_cat = jnp.concatenate([v_h, vo_h], axis=0)     # [S_self+S_other, dh]
            ctx_ref[r0:r1, c0:c1] = jnp.dot(probs, v_cat, preferred_element_type=jnp.float32)

    att = (jnp.dot(ctx_ref[...], p['out_w'][l], preferred_element_type=jnp.float32)
           + p['out_b'][l] + x)                              # dropout = identity
    return _layernorm(att, p['ln_g'][l], p['ln_b'][l])


def _ffn_block(x, p, l):
    h = jnp.dot(x, p['inter_w'][l], preferred_element_type=jnp.float32) + p['inter_b'][l]
    h = h * 0.5 * (1.0 + _erf(h * (1.0 / math.sqrt(2.0))))   # gelu (erf form)
    o = (jnp.dot(h, p['out_w'][l], preferred_element_type=jnp.float32)
         + p['out_b'][l] + x)                                # dropout = identity
    return _layernorm(o, p['ln_g'][l], p['ln_b'][l])


def _encoder_kernel(*refs, B, S_txt, S_vis, num_layers):
    hs_ref, hso_ref, mtxt_ref, mvis_ref = refs[0:4]
    idx = 4
    att_txt = dict(zip(ATT_KEYS, refs[idx:idx + 8])); idx += 8
    att_vis = dict(zip(ATT_KEYS, refs[idx:idx + 8])); idx += 8
    ffn_txt = dict(zip(FFN_KEYS, refs[idx:idx + 6])); idx += 6
    ffn_vis = dict(zip(FFN_KEYS, refs[idx:idx + 6])); idx += 6
    out_txt_ref, out_vis_ref, ctx_txt_ref, ctx_vis_ref = refs[idx:idx + 4]

    hs = hs_ref[...]          # [B*S_txt, H]
    hso = hso_ref[...]        # [B*S_vis, H]
    mask_txt = mtxt_ref[...]  # [B, S_txt + S_vis]  (mask over txt keys, zeros over vis)
    mask_vis = mvis_ref[...]  # [B, S_vis + S_txt]  (zeros over vis keys, mask over txt)

    for l in range(num_layers):
        a_txt = _attention_block(hs, hso, mask_txt, att_txt, l, ctx_txt_ref, B, S_txt, S_vis)
        a_vis = _attention_block(hso, hs, mask_vis, att_vis, l, ctx_vis_ref, B, S_vis, S_txt)
        hs = _ffn_block(a_txt, ffn_txt, l)
        hso = _ffn_block(a_vis, ffn_vis, l)

    out_txt_ref[...] = hs
    out_vis_ref[...] = hso


# --------------------------- wrapper (jitted) ---------------------------

@jax.jit
def bert_encoder(hidden_states, hidden_states_other, attention_mask, fused_params):
    """fused_params: flat tuple produced by fuse_params(layer_params)."""
    B, S_txt, H = hidden_states.shape
    S_vis = hidden_states_other.shape[1]

    mask2d = attention_mask[:, 0, 0, :].astype(jnp.float32)          # [B, S_txt]
    zeros_vis = jnp.zeros((B, S_vis), jnp.float32)
    mask_txt = jnp.concatenate([mask2d, zeros_vis], axis=1)          # keys = [txt | vis]
    mask_vis = jnp.concatenate([zeros_vis, mask2d], axis=1)          # keys = [vis | txt]

    hs2d = hidden_states.reshape(B * S_txt, H)
    hso2d = hidden_states_other.reshape(B * S_vis, H)

    n_in = 4 + len(fused_params)
    kernel = functools.partial(_encoder_kernel, B=B, S_txt=S_txt, S_vis=S_vis,
                               num_layers=NUM_LAYERS)
    out_txt, out_vis = pl.pallas_call(
        kernel,
        out_shape=(jax.ShapeDtypeStruct((B * S_txt, H), jnp.float32),
                   jax.ShapeDtypeStruct((B * S_vis, H), jnp.float32)),
        in_specs=[pl.BlockSpec(memory_space=pltpu.MemorySpace.VMEM)] * n_in,
        out_specs=(pl.BlockSpec(memory_space=pltpu.MemorySpace.VMEM),
                   pl.BlockSpec(memory_space=pltpu.MemorySpace.VMEM)),
        scratch_shapes=[pltpu.VMEM((B * S_txt, H), jnp.float32),
                        pltpu.VMEM((B * S_vis, H), jnp.float32)],
    )(hs2d, hso2d, mask_txt, mask_vis, *fused_params)

    return [[out_txt.reshape(B, S_txt, H), out_vis.reshape(B, S_vis, H)]]


# --------------------------- params ---------------------------

def _init_linear(key, fan_in, fan_out):
    kw, kb = jax.random.split(key)
    w = jax.random.normal(kw, (fan_in, fan_out), jnp.float32) * 0.02
    b = jax.random.normal(kb, (fan_out,), jnp.float32) * 0.02
    return w, b


def init_layer_params(key):
    keys = iter(jax.random.split(key, 32))

    def attn_params():
        p = {}
        for name in ('q', 'k', 'v', 'qo', 'ko', 'vo', 'out'):
            p[name + '_w'], p[name + '_b'] = _init_linear(next(keys), HIDDEN, HIDDEN)
        p['ln_g'] = jnp.ones((HIDDEN,), jnp.float32)
        p['ln_b'] = jnp.zeros((HIDDEN,), jnp.float32)
        return p

    def ffn_params():
        p = {}
        p['inter_w'], p['inter_b'] = _init_linear(next(keys), HIDDEN, INTERMEDIATE)
        p['out_w'], p['out_b'] = _init_linear(next(keys), INTERMEDIATE, HIDDEN)
        p['ln_g'] = jnp.ones((HIDDEN,), jnp.float32)
        p['ln_b'] = jnp.zeros((HIDDEN,), jnp.float32)
        return p

    return {'att_txt': attn_params(), 'att_vis': attn_params(),
            'ffn_txt': ffn_params(), 'ffn_vis': ffn_params()}


def fuse_params(layer_params):
    """Stack per-layer params along a leading layer axis and fuse projection
    weights: Q|K|V|Q_other -> [32,128], K_other|V_other -> [32,64]."""
    def cat_w(p, names):
        return jnp.concatenate([p[n + '_w'] for n in names], axis=1)

    def cat_b(p, names):
        return jnp.concatenate([p[n + '_b'] for n in names], axis=0).reshape(1, -1)

    flat = []
    for grp in ('att_txt', 'att_vis'):
        flat += [
            jnp.stack([cat_w(lp[grp], ('q', 'k', 'v', 'qo')) for lp in layer_params]),
            jnp.stack([cat_b(lp[grp], ('q', 'k', 'v', 'qo')) for lp in layer_params]),
            jnp.stack([cat_w(lp[grp], ('ko', 'vo')) for lp in layer_params]),
            jnp.stack([cat_b(lp[grp], ('ko', 'vo')) for lp in layer_params]),
            jnp.stack([lp[grp]['out_w'] for lp in layer_params]),
            jnp.stack([lp[grp]['out_b'].reshape(1, -1) for lp in layer_params]),
            jnp.stack([lp[grp]['ln_g'].reshape(1, -1) for lp in layer_params]),
            jnp.stack([lp[grp]['ln_b'].reshape(1, -1) for lp in layer_params]),
        ]
    for grp in ('ffn_txt', 'ffn_vis'):
        flat += [
            jnp.stack([lp[grp]['inter_w'] for lp in layer_params]),
            jnp.stack([lp[grp]['inter_b'].reshape(1, -1) for lp in layer_params]),
            jnp.stack([lp[grp]['out_w'] for lp in layer_params]),
            jnp.stack([lp[grp]['out_b'].reshape(1, -1) for lp in layer_params]),
            jnp.stack([lp[grp]['ln_g'].reshape(1, -1) for lp in layer_params]),
            jnp.stack([lp[grp]['ln_b'].reshape(1, -1) for lp in layer_params]),
        ]
    return tuple(flat)


# --------------------------- pure-JAX reference ---------------------------

def ref_encoder(hs, hs_other, attention_mask, layer_params):
    erf = jax.scipy.special.erf

    def lin(x, w, b): return x @ w + b

    def ln(x, g, b):
        u = x.mean(-1, keepdims=True)
        s = ((x - u) ** 2).mean(-1, keepdims=True)
        return g * (x - u) / jnp.sqrt(s + LN_EPS) + b

    def split_heads(x):
        B, S, H = x.shape
        return x.reshape(B, S, NUM_HEADS, HEAD_DIM).transpose(0, 2, 1, 3)

    def self_attn(a, b_, mask, p, mask_on_self):
        q = split_heads(lin(a, p['q_w'], p['q_b']))
        k = split_heads(lin(a, p['k_w'], p['k_b']))
        v = split_heads(lin(a, p['v_w'], p['v_b']))
        qo = split_heads(lin(a, p['qo_w'], p['qo_b']))
        ko = split_heads(lin(b_, p['ko_w'], p['ko_b']))
        vo = split_heads(lin(b_, p['vo_w'], p['vo_b']))
        s_self = jnp.einsum('bhqd,bhkd->bhqk', q, k) / math.sqrt(HEAD_DIM)
        s_other = jnp.einsum('bhqd,bhkd->bhqk', qo, ko) / math.sqrt(HEAD_DIM)
        if mask_on_self:
            s_self = s_self + mask
        else:
            s_other = s_other + mask
        probs = jax.nn.softmax(jnp.concatenate([s_self, s_other], axis=-1), axis=-1)
        vals = jnp.concatenate([v, vo], axis=2)
        ctx = jnp.einsum('bhqk,bhkd->bhqd', probs, vals)
        B, nh, S, dh = ctx.shape
        return ctx.transpose(0, 2, 1, 3).reshape(B, S, nh * dh)

    def attn_block(a, b_, mask, p, mask_on_self):
        ctx = self_attn(a, b_, mask, p, mask_on_self)
        return ln(lin(ctx, p['out_w'], p['out_b']) + a, p['ln_g'], p['ln_b'])

    def ffn_block(x, p):
        h = lin(x, p['inter_w'], p['inter_b'])
        h = h * 0.5 * (1.0 + erf(h / math.sqrt(2.0)))
        return ln(lin(h, p['out_w'], p['out_b']) + x, p['ln_g'], p['ln_b'])

    for p in layer_params:
        a_t = attn_block(hs, hs_other, attention_mask, p['att_txt'], True)
        a_v = attn_block(hs_other, hs, attention_mask, p['att_vis'], False)
        hs = ffn_block(a_t, p['ffn_txt'])
        hs_other = ffn_block(a_v, p['ffn_vis'])
    return hs, hs_other


# --------------------------- main ---------------------------

if __name__ == "__main__":
    key = jax.random.PRNGKey(0)
    k_txt, k_vis, k_param = jax.random.split(key, 3)

    B, S_TXT, S_VIS = 2, 8, 6
    hidden_states = jax.random.normal(k_txt, (B, S_TXT, HIDDEN), jnp.float32)
    hidden_states_other = jax.random.normal(k_vis, (B, S_VIS, HIDDEN), jnp.float32)

    # BERT-style additive mask over padded text tokens: [B, 1, 1, S_TXT]
    lens = jnp.array([S_TXT, 6])
    valid = (jnp.arange(S_TXT)[None, :] < lens[:, None]).astype(jnp.float32)
    attention_mask = ((1.0 - valid) * -10000.0)[:, None, None, :]

    # BertEncoder deep-copies a single BertLayer -> all layers start with
    # identical weights; mirror that by reusing one param set per layer.
    layer_p = init_layer_params(k_param)
    layer_params = [layer_p] * NUM_LAYERS
    fused_params = fuse_params(layer_params)

    out = bert_encoder(hidden_states, hidden_states_other, attention_mask, fused_params)
    out_txt, out_vis = out[0]
    jax.block_until_ready(out_txt)
    jax.block_until_ready(out_vis)

    with jax.default_matmul_precision("highest"):
        ref_txt, ref_vis = ref_encoder(hidden_states, hidden_states_other,
                                       attention_mask, layer_params)
    assert jnp.allclose(out_txt, ref_txt, atol=1e-2, rtol=1e-2)
    assert jnp.allclose(out_vis, ref_vis, atol=1e-2, rtol=1e-2)

    print("KERNEL_OK")
</pallas_src>

<mosaic_0001>
module attributes {stable_mosaic.version = 11 : i64} {
  func.func @_encoder_kernel(%arg0: memref<16x32xf32, #tpu.memory_space<vmem>>, %arg1: memref<12x32xf32, #tpu.memory_space<vmem>>, %arg2: memref<2x14xf32, #tpu.memory_space<vmem>>, %arg3: memref<2x14xf32, #tpu.memory_space<vmem>>, %arg4: memref<2x32x128xf32, #tpu.memory_space<vmem>>, %arg5: memref<2x1x128xf32, #tpu.memory_space<vmem>>, %arg6: memref<2x32x64xf32, #tpu.memory_space<vmem>>, %arg7: memref<2x1x64xf32, #tpu.memory_space<vmem>>, %arg8: memref<2x32x32xf32, #tpu.memory_space<vmem>>, %arg9: memref<2x1x32xf32, #tpu.memory_space<vmem>>, %arg10: memref<2x1x32xf32, #tpu.memory_space<vmem>>, %arg11: memref<2x1x32xf32, #tpu.memory_space<vmem>>, %arg12: memref<2x32x128xf32, #tpu.memory_space<vmem>>, %arg13: memref<2x1x128xf32, #tpu.memory_space<vmem>>, %arg14: memref<2x32x64xf32, #tpu.memory_space<vmem>>, %arg15: memref<2x1x64xf32, #tpu.memory_space<vmem>>, %arg16: memref<2x32x32xf32, #tpu.memory_space<vmem>>, %arg17: memref<2x1x32xf32, #tpu.memory_space<vmem>>, %arg18: memref<2x1x32xf32, #tpu.memory_space<vmem>>, %arg19: memref<2x1x32xf32, #tpu.memory_space<vmem>>, %arg20: memref<2x32x64xf32, #tpu.memory_space<vmem>>, %arg21: memref<2x1x64xf32, #tpu.memory_space<vmem>>, %arg22: memref<2x64x32xf32, #tpu.memory_space<vmem>>, %arg23: memref<2x1x32xf32, #tpu.memory_space<vmem>>, %arg24: memref<2x1x32xf32, #tpu.memory_space<vmem>>, %arg25: memref<2x1x32xf32, #tpu.memory_space<vmem>>, %arg26: memref<2x32x64xf32, #tpu.memory_space<vmem>>, %arg27: memref<2x1x64xf32, #tpu.memory_space<vmem>>, %arg28: memref<2x64x32xf32, #tpu.memory_space<vmem>>, %arg29: memref<2x1x32xf32, #tpu.memory_space<vmem>>, %arg30: memref<2x1x32xf32, #tpu.memory_space<vmem>>, %arg31: memref<2x1x32xf32, #tpu.memory_space<vmem>>, %arg32: memref<16x32xf32, #tpu.memory_space<vmem>>, %arg33: memref<12x32xf32, #tpu.memory_space<vmem>>, %arg34: memref<16x32xf32, #tpu.memory_space<vmem>>, %arg35: memref<12x32xf32, #tpu.memory_space<vmem>>) attributes {dimension_semantics = [], scalar_prefetch = 0 : i64, scratch_operands = 2 : i64, tpu.core_type = #tpu.core_type<tc>} {
    %c0 = arith.constant 0 : index
    %c0_0 = arith.constant 0 : index
    %0 = vector.load %arg0[%c0, %c0_0] : memref<16x32xf32, #tpu.memory_space<vmem>>, vector<16x32xf32>
    %c0_1 = arith.constant 0 : index
    %c0_2 = arith.constant 0 : index
    %1 = vector.load %arg1[%c0_1, %c0_2] : memref<12x32xf32, #tpu.memory_space<vmem>>, vector<12x32xf32>
    %c0_3 = arith.constant 0 : index
    %c0_4 = arith.constant 0 : index
    %2 = vector.load %arg2[%c0_3, %c0_4] : memref<2x14xf32, #tpu.memory_space<vmem>>, vector<2x14xf32>
    %c0_5 = arith.constant 0 : index
    %c0_6 = arith.constant 0 : index
    %3 = vector.load %arg3[%c0_5, %c0_6] : memref<2x14xf32, #tpu.memory_space<vmem>>, vector<2x14xf32>
    %c0_7 = arith.constant 0 : index
    %c0_8 = arith.constant 0 : index
    %c0_9 = arith.constant 0 : index
    %4 = vector.load %arg4[%c0_7, %c0_8, %c0_9] : memref<2x32x128xf32, #tpu.memory_space<vmem>>, vector<1x32x128xf32>
    %5 = vector.shape_cast %4 : vector<1x32x128xf32> to vector<32x128xf32>
    %cst = arith.constant dense<0.000000e+00> : vector<16x128xf32>
    %6 = tpu.matmul %0, %5, %cst {dimension_numbers = #tpu.dot_dimension_numbers<[1], [0], [0], [1], [0, 0, 1, 1], [], []>} : vector<16x32xf32>, vector<32x128xf32>, vector<16x128xf32> -> vector<16x128xf32>
    %c0_10 = arith.constant 0 : index
    %c0_11 = arith.constant 0 : index
    %c0_12 = arith.constant 0 : index
    %7 = vector.load %arg5[%c0_10, %c0_11, %c0_12] : memref<2x1x128xf32, #tpu.memory_space<vmem>>, vector<1x1x128xf32>
    %8 = vector.shape_cast %7 : vector<1x1x128xf32> to vector<1x128xf32>
    %9 = vector.broadcast %8 : vector<1x128xf32> to vector<16x128xf32>
    %10 = arith.addf %6, %9 : vector<16x128xf32>
    %c0_13 = arith.constant 0 : index
    %c0_14 = arith.constant 0 : index
    %c0_15 = arith.constant 0 : index
    %11 = vector.load %arg6[%c0_13, %c0_14, %c0_15] : memref<2x32x64xf32, #tpu.memory_space<vmem>>, vector<1x32x64xf32>
    %12 = vector.shape_cast %11 : vector<1x32x64xf32> to vector<32x64xf32>
    %cst_16 = arith.constant dense<0.000000e+00> : vector<12x64xf32>
    %13 = tpu.matmul %1, %12, %cst_16 {dimension_numbers = #tpu.dot_dimension_numbers<[1], [0], [0], [1], [0, 0, 1, 1], [], []>} : vector<12x32xf32>, vector<32x64xf32>, vector<12x64xf32> -> vector<12x64xf32>
    %c0_17 = arith.constant 0 : index
    %c0_18 = arith.constant 0 : index
    %c0_19 = arith.constant 0 : index
    %14 = vector.load %arg7[%c0_17, %c0_18, %c0_19] : memref<2x1x64xf32, #tpu.memory_space<vmem>>, vector<1x1x64xf32>
    %15 = vector.shape_cast %14 : vector<1x1x64xf32> to vector<1x64xf32>
    %16 = vector.broadcast %15 : vector<1x64xf32> to vector<12x64xf32>
    %17 = arith.addf %13, %16 : vector<12x64xf32>
    %18 = vector.extract_strided_slice %2 {offsets = [0, 0], sizes = [1, 14], strides = [1, 1]} : vector<2x14xf32> to vector<1x14xf32>
    %19 = vector.extract_strided_slice %10 {offsets = [0, 0], sizes = [8, 8], strides = [1, 1]} : vector<16x128xf32> to vector<8x8xf32>
    %20 = vector.extract_strided_slice %10 {offsets = [0, 32], sizes = [8, 8], strides = [1, 1]} : vector<16x128xf32> to vector<8x8xf32>
    %21 = vector.extract_strided_slice %10 {offsets = [0, 64], sizes = [8, 8], strides = [1, 1]} : vector<16x128xf32> to vector<8x8xf32>
    %22 = vector.extract_strided_slice %10 {offsets = [0, 96], sizes = [8, 8], strides = [1, 1]} : vector<16x128xf32> to vector<8x8xf32>
    %23 = vector.extract_strided_slice %17 {offsets = [0, 0], sizes = [6, 8], strides = [1, 1]} : vector<12x64xf32> to vector<6x8xf32>
    %24 = vector.extract_strided_slice %17 {offsets = [0, 32], sizes = [6, 8], strides = [1, 1]} : vector<12x64xf32> to vector<6x8xf32>
    %cst_20 = arith.constant dense<0.000000e+00> : vector<8x8xf32>
    %25 = tpu.matmul %19, %20, %cst_20 {dimension_numbers = #tpu.dot_dimension_numbers<[1], [1], [0], [0], [0, 0, 1, 0], [], []>} : vector<8x8xf32>, vector<8x8xf32>, vector<8x8xf32> -> vector<8x8xf32>
    %cst_21 = arith.constant dense<0.000000e+00> : vector<8x6xf32>
    %26 = tpu.matmul %22, %23, %cst_21 {dimension_numbers = #tpu.dot_dimension_numbers<[1], [1], [0], [0], [0, 0, 1, 0], [], []>} : vector<8x8xf32>, vector<6x8xf32>, vector<8x6xf32> -> vector<8x6xf32>
    %27 = tpu.concatenate %25, %26 in 1 : vector<8x8xf32>, vector<8x6xf32> -> vector<8x14xf32>
    %cst_22 = arith.constant 0.353553385 : f32
    %28 = vector.broadcast %cst_22 : f32 to vector<8x14xf32>
    %29 = arith.mulf %27, %28 : vector<8x14xf32>
    %30 = vector.broadcast %18 : vector<1x14xf32> to vector<8x14xf32>
    %31 = arith.addf %29, %30 : vector<8x14xf32>
    %cst_23 = arith.constant dense<0xFF800000> : vector<8xf32>
    %32 = vector.multi_reduction <maximumf>, %31, %cst_23 [1] : vector<8x14xf32> to vector<8xf32>
    %33 = vector.shape_cast %32 : vector<8xf32> to vector<8x1xf32>
    %34 = vector.broadcast %33 : vector<8x1xf32> to vector<8x14xf32>
    %35 = arith.subf %31, %34 : vector<8x14xf32>
    %36 = math.exp %35 : vector<8x14xf32>
    %cst_24 = arith.constant dense<0.000000e+00> : vector<8xf32>
    %37 = vector.multi_reduction <add>, %36, %cst_24 [1] : vector<8x14xf32> to vector<8xf32>
    %38 = vector.shape_cast %37 : vector<8xf32> to vector<8x1xf32>
    %39 = vector.broadcast %38 : vector<8x1xf32> to vector<8x14xf32>
    %40 = arith.divf %36, %39 : vector<8x14xf32>
    %41 = tpu.concatenate %21, %24 in 0 : vector<8x8xf32>, vector<6x8xf32> -> vector<14x8xf32>
    %cst_25 = arith.constant dense<0.000000e+00> : vector<8x8xf32>
    %42 = tpu.matmul %40, %41, %cst_25 {dimension_numbers = #tpu.dot_dimension_numbers<[1], [0], [0], [1], [0, 0, 1, 1], [], []>} : vector<8x14xf32>, vector<14x8xf32>, vector<8x8xf32> -> vector<8x8xf32>
    %c0_26 = arith.constant 0 : index
    %c0_27 = arith.constant 0 : index
    %43 = vector.load %arg34[%c0_26, %c0_27] : memref<16x32xf32, #tpu.memory_space<vmem>>, vector<8x8xf32>
    tpu.vector_store %arg34[%c0_26, %c0_27], %42 {strides = array<i32>} : memref<16x32xf32, #tpu.memory_space<vmem>>, vector<8x8xf32>,
    %44 = vector.extract_strided_slice %10 {offsets = [0, 8], sizes = [8, 8], strides = [1, 1]} : vector<16x128xf32> to vector<8x8xf32>
    %45 = vector.extract_strided_slice %10 {offsets = [0, 40], sizes = [8, 8], strides = [1, 1]} : vector<16x128xf32> to vector<8x8xf32>
    %46 = vector.extract_strided_slice %10 {offsets = [0, 72], sizes = [8, 8], strides = [1, 1]} : vector<16x128xf32> to vector<8x8xf32>
    %47 = vector.extract_strided_slice %10 {offsets = [0, 104], sizes = [8, 8], strides = [1, 1]} : vector<16x128xf32> to vector<8x8xf32>
    %48 = vector.extract_strided_slice %17 {offsets = [0, 8], sizes = [6, 8], strides = [1, 1]} : vector<12x64xf32> to vector<6x8xf32>
    %49 = vector.extract_strided_slice %17 {offsets = [0, 40], sizes = [6, 8], strides = [1, 1]} : vector<12x64xf32> to vector<6x8xf32>
    %cst_28 = arith.constant dense<0.000000e+00> : vector<8x8xf32>
    %50 = tpu.matmul %44, %45, %cst_28 {dimension_numbers = #tpu.dot_dimension_numbers<[1], [1], [0], [0], [0, 0, 1, 0], [], []>} : vector<8x8xf32>, vector<8x8xf32>, vector<8x8xf32> -> vector<8x8xf32>
    %cst_29 = arith.constant dense<0.000000e+00> : vector<8x6xf32>
    %51 = tpu.matmul %47, %48, %cst_29 {dimension_numbers = #tpu.dot_dimension_numbers<[1], [1], [0], [0], [0, 0, 1, 0], [], []>} : vector<8x8xf32>, vector<6x8xf32>, vector<8x6xf32> -> vector<8x6xf32>
    %52 = tpu.concatenate %50, %51 in 1 : vector<8x8xf32>, vector<8x6xf32> -> vector<8x14xf32>
    %cst_30 = arith.constant 0.353553385 : f32
    %53 = vector.broadcast %cst_30 : f32 to vector<8x14xf32>
    %54 = arith.mulf %52, %53 : vector<8x14xf32>
    %55 = vector.broadcast %18 : vector<1x14xf32> to vector<8x14xf32>
    %56 = arith.addf %54, %55 : vector<8x14xf32>
    %cst_31 = arith.constant dense<0xFF800000> : vector<8xf32>
    %57 = vector.multi_reduction <maximumf>, %56, %cst_31 [1] : vector<8x14xf32> to vector<8xf32>
    %58 = vector.shape_cast %57 : vector<8xf32> to vector<8x1xf32>
    %59 = vector.broadcast %58 : vector<8x1xf32> to vector<8x14xf32>
    %60 = arith.subf %56, %59 : vector<8x14xf32>
    %61 = math.exp %60 : vector<8x14xf32>
    %cst_32 = arith.constant dense<0.000000e+00> : vector<8xf32>
    %62 = vector.multi_reduction <add>, %61, %cst_32 [1] : vector<8x14xf32> to vector<8xf32>
    %63 = vector.shape_cast %62 : vector<8xf32> to vector<8x1xf32>
    %64 = vector.broadcast %63 : vector<8x1xf32> to vector<8x14xf32>
    %65 = arith.divf %61, %64 : vector<8x14xf32>
    %66 = tpu.concatenate %46, %49 in 0 : vector<8x8xf32>, vector<6x8xf32> -> vector<14x8xf32>
    %cst_33 = arith.constant dense<0.000000e+00> : vector<8x8xf32>
    %67 = tpu.matmul %65, %66, %cst_33 {dimension_numbers = #tpu.dot_dimension_numbers<[1], [0], [0], [1], [0, 0, 1, 1], [], []>} : vector<8x14xf32>, vector<14x8xf32>, vector<8x8xf32> -> vector<8x8xf32>
    %c0_34 = arith.constant 0 : index
    %c8 = arith.constant 8 : index
    %68 = vector.load %arg34[%c0_34, %c8] : memref<16x32xf32, #tpu.memory_space<vmem>>, vector<8x8xf32>
    tpu.vector_store %arg34[%c0_34, %c8], %67 {strides = array<i32>} : memref<16x32xf32, #tpu.memory_space<vmem>>, vector<8x8xf32>,
    %69 = vector.extract_strided_slice %10 {offsets = [0, 16], sizes = [8, 8], strides = [1, 1]} : vector<16x128xf32> to vector<8x8xf32>
    %70 = vector.extract_strided_slice %10 {offsets = [0, 48], sizes = [8, 8], strides = [1, 1]} : vector<16x128xf32> to vector<8x8xf32>
    %71 = vector.extract_strided_slice %10 {offsets = [0, 80], sizes = [8, 8], strides = [1, 1]} : vector<16x128xf32> to vector<8x8xf32>
    %72 = vector.extract_strided_slice %10 {offsets = [0, 112], sizes = [8, 8], strides = [1, 1]} : vector<16x128xf32> to vector<8x8xf32>
    %73 = vector.extract_strided_slice %17 {offsets = [0, 16], sizes = [6, 8], strides = [1, 1]} : vector<12x64xf32> to vector<6x8xf32>
    %74 = vector.extract_strided_slice %17 {offsets = [0, 48], sizes = [6, 8], strides = [1, 1]} : vector<12x64xf32> to vector<6x8xf32>
    %cst_35 = arith.constant dense<0.000000e+00> : vector<8x8xf32>
    %75 = tpu.matmul %69, %70, %cst_35 {dimension_numbers = #tpu.dot_dimension_numbers<[1], [1], [0], [0], [0, 0, 1, 0], [], []>} : vector<8x8xf32>, vector<8x8xf32>, vector<8x8xf32> -> vector<8x8xf32>
    %cst_36 = arith.constant dense<0.000000e+00> : vector<8x6xf32>
    %76 = tpu.matmul %72, %73, %cst_36 {dimension_numbers = #tpu.dot_dimension_numbers<[1], [1], [0], [0], [0, 0, 1, 0], [], []>} : vector<8x8xf32>, vector<6x8xf32>, vector<8x6xf32> -> vector<8x6xf32>
    %77 = tpu.concatenate %75, %76 in 1 : vector<8x8xf32>, vector<8x6xf32> -> vector<8x14xf32>
    %cst_37 = arith.constant 0.353553385 : f32
    %78 = vector.broadcast %cst_37 : f32 to vector<8x14xf32>
    %79 = arith.mulf %77, %78 : vector<8x14xf32>
    %80 = vector.broadcast %18 : vector<1x14xf32> to vector<8x14xf32>
    %81 = arith.addf %79, %80 : vector<8x14xf32>
    %cst_38 = arith.constant dense<0xFF800000> : vector<8xf32>
    %82 = vector.multi_reduction <maximumf>, %81, %cst_38 [1] : vector<8x14xf32> to vector<8xf32>
    %83 = vector.shape_cast %82 : vector<8xf32> to vector<8x1xf32>
    %84 = vector.broadcast %83 : vector<8x1xf32> to vector<8x14xf32>
    %85 = arith.subf %81, %84 : vector<8x14xf32>
    %86 = math.exp %85 : vector<8x14xf32>
    %cst_39 = arith.constant dense<0.000000e+00> : vector<8xf32>
    %87 = vector.multi_reduction <add>, %86, %cst_39 [1] : vector<8x14xf32> to vector<8xf32>
    %88 = vector.shape_cast %87 : vector<8xf32> to vector<8x1xf32>
    %89 = vector.broadcast %88 : vector<8x1xf32> to vector<8x14xf32>
    %90 = arith.divf %86, %89 : vector<8x14xf32>
    %91 = tpu.concatenate %71, %74 in 0 : vector<8x8xf32>, vector<6x8xf32> -> vector<14x8xf32>
    %cst_40 = arith.constant dense<0.000000e+00> : vector<8x8xf32>
    %92 = tpu.matmul %90, %91, %cst_40 {dimension_numbers = #tpu.dot_dimension_numbers<[1], [0], [0], [1], [0, 0, 1, 1], [], []>} : vector<8x14xf32>, vector<14x8xf32>, vector<8x8xf32> -> vector<8x8xf32>
    %c0_41 = arith.constant 0 : index
    %c16 = arith.constant 16 : index
    %93 = vector.load %arg34[%c0_41, %c16] : memref<16x32xf32, #tpu.memory_space<vmem>>, vector<8x8xf32>
    tpu.vector_store %arg34[%c0_41, %c16], %92 {strides = array<i32>} : memref<16x32xf32, #tpu.memory_space<vmem>>, vector<8x8xf32>,
    %94 = vector.extract_strided_slice %10 {offsets = [0, 24], sizes = [8, 8], strides = [1, 1]} : vector<16x128xf32> to vector<8x8xf32>
    %95 = vector.extract_strided_slice %10 {offsets = [0, 56], sizes = [8, 8], strides = [1, 1]} : vector<16x128xf32> to vector<8x8xf32>
    %96 = vector.extract_strided_slice %10 {offsets = [0, 88], sizes = [8, 8], strides = [1, 1]} : vector<16x128xf32> to vector<8x8xf32>
    %97 = vector.extract_strided_slice %10 {offsets = [0, 120], sizes = [8, 8], strides = [1, 1]} : vector<16x128xf32> to vector<8x8xf32>
    %98 = vector.extract_strided_slice %17 {offsets = [0, 24], sizes = [6, 8], strides = [1, 1]} : vector<12x64xf32> to vector<6x8xf32>
    %99 = vector.extract_strided_slice %17 {offsets = [0, 56], sizes = [6, 8], strides = [1, 1]} : vector<12x64xf32> to vector<6x8xf32>
    %cst_42 = arith.constant dense<0.000000e+00> : vector<8x8xf32>
    %100 = tpu.matmul %94, %95, %cst_42 {dimension_numbers = #tpu.dot_dimension_numbers<[1], [1], [0], [0], [0, 0, 1, 0], [], []>} : vector<8x8xf32>, vector<8x8xf32>, vector<8x8xf32> -> vector<8x8xf32>
    %cst_43 = arith.constant dense<0.000000e+00> : vector<8x6xf32>
    %101 = tpu.matmul %97, %98, %cst_43 {dimension_numbers = #tpu.dot_dimension_numbers<[1], [1], [0], [0], [0, 0, 1, 0], [], []>} : vector<8x8xf32>, vector<6x8xf32>, vector<8x6xf32> -> vector<8x6xf32>
    %102 = tpu.concatenate %100, %101 in 1 : vector<8x8xf32>, vector<8x6xf32> -> vector<8x14xf32>
    %cst_44 = arith.constant 0.353553385 : f32
    %103 = vector.broadcast %cst_44 : f32 to vector<8x14xf32>
    %104 = arith.mulf %102, %103 : vector<8x14xf32>
    %105 = vector.broadcast %18 : vector<1x14xf32> to vector<8x14xf32>
    %106 = arith.addf %104, %105 : vector<8x14xf32>
    %cst_45 = arith.constant dense<0xFF800000> : vector<8xf32>
    %107 = vector.multi_reduction <maximumf>, %106, %cst_45 [1] : vector<8x14xf32> to vector<8xf32>
    %108 = vector.shape_cast %107 : vector<8xf32> to vector<8x1xf32>
    %109 = vector.broadcast %108 : vector<8x1xf32> to vector<8x14xf32>
    %110 = arith.subf %106, %109 : vector<8x14xf32>
    %111 = math.exp %110 : vector<8x14xf32>
    %cst_46 = arith.constant dense<0.000000e+00> : vector<8xf32>
    %112 = vector.multi_reduction <add>, %111, %cst_46 [1] : vector<8x14xf32> to vector<8xf32>
    %113 = vector.shape_cast %112 : vector<8xf32> to vector<8x1xf32>
    %114 = vector.broadcast %113 : vector<8x1xf32> to vector<8x14xf32>
    %115 = arith.divf %111, %114 : vector<8x14xf32>
    %116 = tpu.concatenate %96, %99 in 0 : vector<8x8xf32>, vector<6x8xf32> -> vector<14x8xf32>
    %cst_47 = arith.constant dense<0.000000e+00> : vector<8x8xf32>
    %117 = tpu.matmul %115, %116, %cst_47 {dimension_numbers = #tpu.dot_dimension_numbers<[1], [0], [0], [1], [0, 0, 1, 1], [], []>} : vector<8x14xf32>, vector<14x8xf32>, vector<8x8xf32> -> vector<8x8xf32>
    %c0_48 = arith.constant 0 : index
    %c24 = arith.constant 24 : index
    %118 = vector.load %arg34[%c0_48, %c24] : memref<16x32xf32, #tpu.memory_space<vmem>>, vector<8x8xf32>
    tpu.vector_store %arg34[%c0_48, %c24], %117 {strides = array<i32>} : memref<16x32xf32, #tpu.memory_space<vmem>>, vector<8x8xf32>,
    %119 = vector.extract_strided_slice %2 {offsets = [1, 0], sizes = [1, 14], strides = [1, 1]} : vector<2x14xf32> to vector<1x14xf32>
    %120 = vector.extract_strided_slice %10 {offsets = [8, 0], sizes = [8, 8], strides = [1, 1]} : vector<16x128xf32> to vector<8x8xf32>
    %121 = vector.extract_strided_slice %10 {offsets = [8, 32], sizes = [8, 8], strides = [1, 1]} : vector<16x128xf32> to vector<8x8xf32>
    %122 = vector.extract_strided_slice %10 {offsets = [8, 64], sizes = [8, 8], strides = [1, 1]} : vector<16x128xf32> to vector<8x8xf32>
    %123 = vector.extract_strided_slice %10 {offsets = [8, 96], sizes = [8, 8], strides = [1, 1]} : vector<16x128xf32> to vector<8x8xf32>
    %124 = vector.extract_strided_slice %17 {offsets = [6, 0], sizes = [6, 8], strides = [1, 1]} : vector<12x64xf32> to vector<6x8xf32>
    %125 = vector.extract_strided_slice %17 {offsets = [6, 32], sizes = [6, 8], strides = [1, 1]} : vector<12x64xf32> to vector<6x8xf32>
    %cst_49 = arith.constant dense<0.000000e+00> : vector<8x8xf32>
    %126 = tpu.matmul %120, %121, %cst_49 {dimension_numbers = #tpu.dot_dimension_numbers<[1], [1], [0], [0], [0, 0, 1, 0], [], []>} : vector<8x8xf32>, vector<8x8xf32>, vector<8x8xf32> -> vector<8x8xf32>
    %cst_50 = arith.constant dense<0.000000e+00> : vector<8x6xf32>
    %127 = tpu.matmul %123, %124, %cst_50 {dimension_numbers = #tpu.dot_dimension_numbers<[1], [1], [0], [0], [0, 0, 1, 0], [], []>} : vector<8x8xf32>, vector<6x8xf32>, vector<8x6xf32> -> vector<8x6xf32>
    %128 = tpu.concatenate %126, %127 in 1 : vector<8x8xf32>, vector<8x6xf32> -> vector<8x14xf32>
    %cst_51 = arith.constant 0.353553385 : f32
    %129 = vector.broadcast %cst_51 : f32 to vector<8x14xf32>
    %130 = arith.mulf %128, %129 : vector<8x14xf32>
    %131 = vector.broadcast %119 : vector<1x14xf32> to vector<8x14xf32>
    %132 = arith.addf %130, %131 : vector<8x14xf32>
    %cst_52 = arith.constant dense<0xFF800000> : vector<8xf32>
    %133 = vector.multi_reduction <maximumf>, %132, %cst_52 [1] : vector<8x14xf32> to vector<8xf32>
    %134 = vector.shape_cast %133 : vector<8xf32> to vector<8x1xf32>
    %135 = vector.broadcast %134 : vector<8x1xf32> to vector<8x14xf32>
    %136 = arith.subf %132, %135 : vector<8x14xf32>
    %137 = math.exp %136 : vector<8x14xf32>
    %cst_53 = arith.constant dense<0.000000e+00> : vector<8xf32>
    %138 = vector.multi_reduction <add>, %137, %cst_53 [1] : vector<8x14xf32> to vector<8xf32>
    %139 = vector.shape_cast %138 : vector<8xf32> to vector<8x1xf32>
    %140 = vector.broadcast %139 : vector<8x1xf32> to vector<8x14xf32>
    %141 = arith.divf %137, %140 : vector<8x14xf32>
    %142 = tpu.concatenate %122, %125 in 0 : vector<8x8xf32>, vector<6x8xf32> -> vector<14x8xf32>
    %cst_54 = arith.constant dense<0.000000e+00> : vector<8x8xf32>
    %143 = tpu.matmul %141, %142, %cst_54 {dimension_numbers = #tpu.dot_dimension_numbers<[1], [0], [0], [1], [0, 0, 1, 1], [], []>} : vector<8x14xf32>, vector<14x8xf32>, vector<8x8xf32> -> vector<8x8xf32>
    %c8_55 = arith.constant 8 : index
    %c0_56 = arith.constant 0 : index
    %144 = vector.load %arg34[%c8_55, %c0_56] : memref<16x32xf32, #tpu.memory_space<vmem>>, vector<8x8xf32>
    tpu.vector_store %arg34[%c8_55, %c0_56], %143 {strides = array<i32>} : memref<16x32xf32, #tpu.memory_space<vmem>>, vector<8x8xf32>,
    %145 = vector.extract_strided_slice %10 {offsets = [8, 8], sizes = [8, 8], strides = [1, 1]} : vector<16x128xf32> to vector<8x8xf32>
    %146 = vector.extract_strided_slice %10 {offsets = [8, 40], sizes = [8, 8], strides = [1, 1]} : vector<16x128xf32> to vector<8x8xf32>
    %147 = vector.extract_strided_slice %10 {offsets = [8, 72], sizes = [8, 8], strides = [1, 1]} : vector<16x128xf32> to vector<8x8xf32>
    %148 = vector.extract_strided_slice %10 {offsets = [8, 104], sizes = [8, 8], strides = [1, 1]} : vector<16x128xf32> to vector<8x8xf32>
    %149 = vector.extract_strided_slice %17 {offsets = [6, 8], sizes = [6, 8], strides = [1, 1]} : vector<12x64xf32> to vector<6x8xf32>
    %150 = vector.extract_strided_slice %17 {offsets = [6, 40], sizes = [6, 8], strides = [1, 1]} : vector<12x64xf32> to vector<6x8xf32>
    %cst_57 = arith.constant dense<0.000000e+00> : vector<8x8xf32>
    %151 = tpu.matmul %145, %146, %cst_57 {dimension_numbers = #tpu.dot_dimension_numbers<[1], [1], [0], [0], [0, 0, 1, 0], [], []>} : vector<8x8xf32>, vector<8x8xf32>, vector<8x8xf32> -> vector<8x8xf32>
    %cst_58 = arith.constant dense<0.000000e+00> : vector<8x6xf32>
    %152 = tpu.matmul %148, %149, %cst_58 {dimension_numbers = #tpu.dot_dimension_numbers<[1], [1], [0], [0], [0, 0, 1, 0], [], []>} : vector<8x8xf32>, vector<6x8xf32>, vector<8x6xf32> -> vector<8x6xf32>
    %153 = tpu.concatenate %151, %152 in 1 : vector<8x8xf32>, vector<8x6xf32> -> vector<8x14xf32>
    %cst_59 = arith.constant 0.353553385 : f32
    %154 = vector.broadcast %cst_59 : f32 to vector<8x14xf32>
    %155 = arith.mulf %153, %154 : vector<8x14xf32>
    %156 = vector.broadcast %119 : vector<1x14xf32> to vector<8x14xf32>
    %157 = arith.addf %155, %156 : vector<8x14xf32>
    %cst_60 = arith.constant dense<0xFF800000> : vector<8xf32>
    %158 = vector.multi_reduction <maximumf>, %157, %cst_60 [1] : vector<8x14xf32> to vector<8xf32>
    %159 = vector.shape_cast %158 : vector<8xf32> to vector<8x1xf32>
    %160 = vector.broadcast %159 : vector<8x1xf32> to vector<8x14xf32>
    %161 = arith.subf %157, %160 : vector<8x14xf32>
    %162 = math.exp %161 : vector<8x14xf32>
    %cst_61 = arith.constant dense<0.000000e+00> : vector<8xf32>
    %163 = vector.multi_reduction <add>, %162, %cst_61 [1] : vector<8x14xf32> to vector<8xf32>
    %164 = vector.shape_cast %163 : vector<8xf32> to vector<8x1xf32>
    %165 = vector.broadcast %164 : vector<8x1xf32> to vector<8x14xf32>
    %166 = arith.divf %162, %165 : vector<8x14xf32>
    %167 = tpu.concatenate %147, %150 in 0 : vector<8x8xf32>, vector<6x8xf32> -> vector<14x8xf32>
    %cst_62 = arith.constant dense<0.000000e+00> : vector<8x8xf32>
    %168 = tpu.matmul %166, %167, %cst_62 {dimension_numbers = #tpu.dot_dimension_numbers<[1], [0], [0], [1], [0, 0, 1, 1], [], []>} : vector<8x14xf32>, vector<14x8xf32>, vector<8x8xf32> -> vector<8x8xf32>
    %c8_63 = arith.constant 8 : index
    %c8_64 = arith.constant 8 : index
    %169 = vector.load %arg34[%c8_63, %c8_64] : memref<16x32xf32, #tpu.memory_space<vmem>>, vector<8x8xf32>
    tpu.vector_store %arg34[%c8_63, %c8_64], %168 {strides = array<i32>} : memref<16x32xf32, #tpu.memory_space<vmem>>, vector<8x8xf32>,
    %170 = vector.extract_strided_slice %10 {offsets = [8, 16], sizes = [8, 8], strides = [1, 1]} : vector<16x128xf32> to vector<8x8xf32>
    %171 = vector.extract_strided_slice %10 {offsets = [8, 48], sizes = [8, 8], strides = [1, 1]} : vector<16x128xf32> to vector<8x8xf32>
    %172 = vector.extract_strided_slice %10 {offsets = [8, 80], sizes = [8, 8], strides = [1, 1]} : vector<16x128xf32> to vector<8x8xf32>
    %173 = vector.extract_strided_slice %10 {offsets = [8, 112], sizes = [8, 8], strides = [1, 1]} : vector<16x128xf32> to vector<8x8xf32>
    %174 = vector.extract_strided_slice %17 {offsets = [6, 16], sizes = [6, 8], strides = [1, 1]} : vector<12x64xf32> to vector<6x8xf32>
    %175 = vector.extract_strided_slice %17 {offsets = [6, 48], sizes = [6, 8], strides = [1, 1]} : vector<12x64xf32> to vector<6x8xf32>
    %cst_65 = arith.constant dense<0.000000e+00> : vector<8x8xf32>
    %176 = tpu.matmul %170, %171, %cst_65 {dimension_numbers = #tpu.dot_dimension_numbers<[1], [1], [0], [0], [0, 0, 1, 0], [], []>} : vector<8x8xf32>, vector<8x8xf32>, vector<8x8xf32> -> vector<8x8xf32>
    %cst_66 = arith.constant dense<0.000000e+00> : vector<8x6xf32>
    %177 = tpu.matmul %173, %174, %cst_66 {dimension_numbers = #tpu.dot_dimension_numbers<[1], [1], [0], [0], [0, 0, 1, 0], [], []>} : vector<8x8xf32>, vector<6x8xf32>, vector<8x6xf32> -> vector<8x6xf32>
    %178 = tpu.concatenate %176, %177 in 1 : vector<8x8xf32>, vector<8x6xf32> -> vector<8x14xf32>
    %cst_67 = arith.constant 0.353553385 : f32
    %179 = vector.broadcast %cst_67 : f32 to vector<8x14xf32>
    %180 = arith.mulf %178, %179 : vector<8x14xf32>
    %181 = vector.broadcast %119 : vector<1x14xf32> to vector<8x14xf32>
    %182 = arith.addf %180, %181 : vector<8x14xf32>
    %cst_68 = arith.constant dense<0xFF800000> : vector<8xf32>
    %183 = vector.multi_reduction <maximumf>, %182, %cst_68 [1] : vector<8x14xf32> to vector<8xf32>
    %184 = vector.shape_cast %183 : vector<8xf32> to vector<8x1xf32>
    %185 = vector.broadcast %184 : vector<8x1xf32> to vector<8x14xf32>
    %186 = arith.subf %182, %185 : vector<8x14xf32>
    %187 = math.exp %186 : vector<8x14xf32>
    %cst_69 = arith.constant dense<0.000000e+00> : vector<8xf32>
    %188 = vector.multi_reduction <add>, %187, %cst_69 [1] : vector<8x14xf32> to vector<8xf32>
    %189 = vector.shape_cast %188 : vector<8xf32> to vector<8x1xf32>
    %190 = vector.broadcast %189 : vector<8x1xf32> to vector<8x14xf32>
    %191 = arith.divf %187, %190 : vector<8x14xf32>
    %192 = tpu.concatenate %172, %175 in 0 : vector<8x8xf32>, vector<6x8xf32> -> vector<14x8xf32>
    %cst_70 = arith.constant dense<0.000000e+00> : vector<8x8xf32>
    %193 = tpu.matmul %191, %192, %cst_70 {dimension_numbers = #tpu.dot_dimension_numbers<[1], [0], [0], [1], [0, 0, 1, 1], [], []>} : vector<8x14xf32>, vector<14x8xf32>, vector<8x8xf32> -> vector<8x8xf32>
    %c8_71 = arith.constant 8 : index
    %c16_72 = arith.constant 16 : index
    %194 = vector.load %arg34[%c8_71, %c16_72] : memref<16x32xf32, #tpu.memory_space<vmem>>, vector<8x8xf32>
    tpu.vector_store %arg34[%c8_71, %c16_72], %193 {strides = array<i32>} : memref<16x32xf32, #tpu.memory_space<vmem>>, vector<8x8xf32>,
    %195 = vector.extract_strided_slice %10 {offsets = [8, 24], sizes = [8, 8], strides = [1, 1]} : vector<16x128xf32> to vector<8x8xf32>
    %196 = vector.extract_strided_slice %10 {offsets = [8, 56], sizes = [8, 8], strides = [1, 1]} : vector<16x128xf32> to vector<8x8xf32>
    %197 = vector.extract_strided_slice %10 {offsets = [8, 88], sizes = [8, 8], strides = [1, 1]} : vector<16x128xf32> to vector<8x8xf32>
    %198 = vector.extract_strided_slice %10 {offsets = [8, 120], sizes = [8, 8], strides = [1, 1]} : vector<16x128xf32> to vector<8x8xf32>
    %199 = vector.extract_strided_slice %17 {offsets = [6, 24], sizes = [6, 8], strides = [1, 1]} : vector<12x64xf32> to vector<6x8xf32>
    %200 = vector.extract_strided_slice %17 {offsets = [6, 56], sizes = [6, 8], strides = [1, 1]} : vector<12x64xf32> to vector<6x8xf32>
    %cst_73 = arith.constant dense<0.000000e+00> : vector<8x8xf32>
    %201 = tpu.matmul %195, %196, %cst_73 {dimension_numbers = #tpu.dot_dimension_numbers<[1], [1], [0], [0], [0, 0, 1, 0], [], []>} : vector<8x8xf32>, vector<8x8xf32>, vector<8x8xf32> -> vector<8x8xf32>
    %cst_74 = arith.constant dense<0.000000e+00> : vector<8x6xf32>
    %202 = tpu.matmul %198, %199, %cst_74 {dimension_numbers = #tpu.dot_dimension_numbers<[1], [1], [0], [0], [0, 0, 1, 0], [], []>} : vector<8x8xf32>, vector<6x8xf32>, vector<8x6xf32> -> vector<8x6xf32>
    %203 = tpu.concatenate %201, %202 in 1 : vector<8x8xf32>, vector<8x6xf32> -> vector<8x14xf32>
    %cst_75 = arith.constant 0.353553385 : f32
    %204 = vector.broadcast %cst_75 : f32 to vector<8x14xf32>
    %205 = arith.mulf %203, %204 : vector<8x14xf32>
    %206 = vector.broadcast %119 : vector<1x14xf32> to vector<8x14xf32>
    %207 = arith.addf %205, %206 : vector<8x14xf32>
    %cst_76 = arith.constant dense<0xFF800000> : vector<8xf32>
    %208 = vector.multi_reduction <maximumf>, %207, %cst_76 [1] : vector<8x14xf32> to vector<8xf32>
    %209 = vector.shape_cast %208 : vector<8xf32> to vector<8x1xf32>
    %210 = vector.broadcast %209 : vector<8x1xf32> to vector<8x14xf32>
    %211 = arith.subf %207, %210 : vector<8x14xf32>
    %212 = math.exp %211 : vector<8x14xf32>
    %cst_77 = arith.constant dense<0.000000e+00> : vector<8xf32>
    %213 = vector.multi_reduction <add>, %212, %cst_77 [1] : vector<8x14xf32> to vector<8xf32>
    %214 = vector.shape_cast %213 : vector<8xf32> to vector<8x1xf32>
    %215 = vector.broadcast %214 : vector<8x1xf32> to vector<8x14xf32>
    %216 = arith.divf %212, %215 : vector<8x14xf32>
    %217 = tpu.concatenate %197, %200 in 0 : vector<8x8xf32>, vector<6x8xf32> -> vector<14x8xf32>
    %cst_78 = arith.constant dense<0.000000e+00> : vector<8x8xf32>
    %218 = tpu.matmul %216, %217, %cst_78 {dimension_numbers = #tpu.dot_dimension_numbers<[1], [0], [0], [1], [0, 0, 1, 1], [], []>} : vector<8x14xf32>, vector<14x8xf32>, vector<8x8xf32> -> vector<8x8xf32>
    %c8_79 = arith.constant 8 : index
    %c24_80 = arith.constant 24 : index
    %219 = vector.load %arg34[%c8_79, %c24_80] : memref<16x32xf32, #tpu.memory_space<vmem>>, vector<8x8xf32>
    tpu.vector_store %arg34[%c8_79, %c24_80], %218 {strides = array<i32>} : memref<16x32xf32, #tpu.memory_space<vmem>>, vector<8x8xf32>,
    %c0_81 = arith.constant 0 : index
    %c0_82 = arith.constant 0 : index
    %220 = vector.load %arg34[%c0_81, %c0_82] : memref<16x32xf32, #tpu.memory_space<vmem>>, vector<16x32xf32>
    %c0_83 = arith.constant 0 : index
    %c0_84 = arith.constant 0 : index
    %c0_85 = arith.constant 0 : index
    %221 = vector.load %arg8[%c0_83, %c0_84, %c0_85] : memref<2x32x32xf32, #tpu.memory_space<vmem>>, vector<1x32x32xf32>
    %222 = vector.shape_cast %221 : vector<1x32x32xf32> to vector<32x32xf32>
    %cst_86 = arith.constant dense<0.000000e+00> : vector<16x32xf32>
    %223 = tpu.matmul %220, %222, %cst_86 {dimension_numbers = #tpu.dot_dimension_numbers<[1], [0], [0], [1], [0, 0, 1, 1], [], []>} : vector<16x32xf32>, vector<32x32xf32>, vector<16x32xf32> -> vector<16x32xf32>
    %c0_87 = arith.constant 0 : index
    %c0_88 = arith.constant 0 : index
    %c0_89 = arith.constant 0 : index
    %224 = vector.load %arg9[%c0_87, %c0_88, %c0_89] : memref<2x1x32xf32, #tpu.memory_space<vmem>>, vector<1x1x32xf32>
    %225 = vector.shape_cast %224 : vector<1x1x32xf32> to vector<1x32xf32>
    %226 = vector.broadcast %225 : vector<1x32xf32> to vector<16x32xf32>
    %227 = arith.addf %223, %226 : vector<16x32xf32>
    %228 = arith.addf %227, %0 : vector<16x32xf32>
    %c0_90 = arith.constant 0 : index
    %c0_91 = arith.constant 0 : index
    %c0_92 = arith.constant 0 : index
    %229 = vector.load %arg10[%c0_90, %c0_91, %c0_92] : memref<2x1x32xf32, #tpu.memory_space<vmem>>, vector<1x1x32xf32>
    %230 = vector.shape_cast %229 : vector<1x1x32xf32> to vector<1x32xf32>
    %c0_93 = arith.constant 0 : index
    %c0_94 = arith.constant 0 : index
    %c0_95 = arith.constant 0 : index
    %231 = vector.load %arg11[%c0_93, %c0_94, %c0_95] : memref<2x1x32xf32, #tpu.memory_space<vmem>>, vector<1x1x32xf32>
    %232 = vector.shape_cast %231 : vector<1x1x32xf32> to vector<1x32xf32>
    %cst_96 = arith.constant dense<0.000000e+00> : vector<16xf32>
    %233 = vector.multi_reduction <add>, %228, %cst_96 [1] : vector<16x32xf32> to vector<16xf32>
    %234 = vector.shape_cast %233 : vector<16xf32> to vector<16x1xf32>
    %cst_97 = arith.constant 3.200000e+01 : f32
    %235 = vector.broadcast %cst_97 : f32 to vector<16x1xf32>
    %236 = arith.divf %234, %235 : vector<16x1xf32>
    %237 = vector.broadcast %236 : vector<16x1xf32> to vector<16x32xf32>
    %238 = arith.subf %228, %237 : vector<16x32xf32>
    %239 = arith.mulf %238, %238 : vector<16x32xf32>
    %cst_98 = arith.constant dense<0.000000e+00> : vector<16xf32>
    %240 = vector.multi_reduction <add>, %239, %cst_98 [1] : vector<16x32xf32> to vector<16xf32>
    %241 = vector.shape_cast %240 : vector<16xf32> to vector<16x1xf32>
    %cst_99 = arith.constant 3.200000e+01 : f32
    %242 = vector.broadcast %cst_99 : f32 to vector<16x1xf32>
    %243 = arith.divf %241, %242 : vector<16x1xf32>
    %244 = vector.broadcast %236 : vector<16x1xf32> to vector<16x32xf32>
    %245 = arith.subf %228, %244 : vector<16x32xf32>
    %cst_100 = arith.constant 9.99999996E-13 : f32
    %246 = vector.broadcast %cst_100 : f32 to vector<16x1xf32>
    %247 = arith.addf %243, %246 : vector<16x1xf32>
    %248 = math.rsqrt %247 : vector<16x1xf32>
    %249 = vector.broadcast %248 : vector<16x1xf32> to vector<16x32xf32>
    %250 = arith.mulf %245, %249 : vector<16x32xf32>
    %251 = vector.broadcast %230 : vector<1x32xf32> to vector<16x32xf32>
    %252 = arith.mulf %251, %250 : vector<16x32xf32>
    %253 = vector.broadcast %232 : vector<1x32xf32> to vector<16x32xf32>
    %254 = arith.addf %252, %253 : vector<16x32xf32>
    %c0_101 = arith.constant 0 : index
    %c0_102 = arith.constant 0 : index
    %c0_103 = arith.constant 0 : index
    %255 = vector.load %arg12[%c0_101, %c0_102, %c0_103] : memref<2x32x128xf32, #tpu.memory_space<vmem>>, vector<1x32x128xf32>
    %256 = vector.shape_cast %255 : vector<1x32x128xf32> to vector<32x128xf32>
    %cst_104 = arith.constant dense<0.000000e+00> : vector<12x128xf32>
    %257 = tpu.matmul %1, %256, %cst_104 {dimension_numbers = #tpu.dot_dimension_numbers<[1], [0], [0], [1], [0, 0, 1, 1], [], []>} : vector<12x32xf32>, vector<32x128xf32>, vector<12x128xf32> -> vector<12x128xf32>
    %c0_105 = arith.constant 0 : index
    %c0_106 = arith.constant 0 : index
    %c0_107 = arith.constant 0 : index
    %258 = vector.load %arg13[%c0_105, %c0_106, %c0_107] : memref<2x1x128xf32, #tpu.memory_space<vmem>>, vector<1x1x128xf32>
    %259 = vector.shape_cast %258 : vector<1x1x128xf32> to vector<1x128xf32>
    %260 = vector.broadcast %259 : vector<1x128xf32> to vector<12x128xf32>
    %261 = arith.addf %257, %260 : vector<12x128xf32>
    %c0_108 = arith.constant 0 : index
    %c0_109 = arith.constant 0 : index
    %c0_110 = arith.constant 0 : index
    %262 = vector.load %arg14[%c0_108, %c0_109, %c0_110] : memref<2x32x64xf32, #tpu.memory_space<vmem>>, vector<1x32x64xf32>
    %263 = vector.shape_cast %262 : vector<1x32x64xf32> to vector<32x64xf32>
    %cst_111 = arith.constant dense<0.000000e+00> : vector<16x64xf32>
    %264 = tpu.matmul %0, %263, %cst_111 {dimension_numbers = #tpu.dot_dimension_numbers<[1], [0], [0], [1], [0, 0, 1, 1], [], []>} : vector<16x32xf32>, vector<32x64xf32>, vector<16x64xf32> -> vector<16x64xf32>
    %c0_112 = arith.constant 0 : index
    %c0_113 = arith.constant 0 : index
    %c0_114 = arith.constant 0 : index
    %265 = vector.load %arg15[%c0_112, %c0_113, %c0_114] : memref<2x1x64xf32, #tpu.memory_space<vmem>>, vector<1x1x64xf32>
    %266 = vector.shape_cast %265 : vector<1x1x64xf32> to vector<1x64xf32>
    %267 = vector.broadcast %266 : vector<1x64xf32> to vector<16x64xf32>
    %268 = arith.addf %264, %267 : vector<16x64xf32>
    %269 = vector.extract_strided_slice %3 {offsets = [0, 0], sizes = [1, 14], strides = [1, 1]} : vector<2x14xf32> to vector<1x14xf32>
    %270 = vector.extract_strided_slice %261 {offsets = [0, 0], sizes = [6, 8], strides = [1, 1]} : vector<12x128xf32> to vector<6x8xf32>
    %271 = vector.extract_strided_slice %261 {offsets = [0, 32], sizes = [6, 8], strides = [1, 1]} : vector<12x128xf32> to vector<6x8xf32>
    %272 = vector.extract_strided_slice %261 {offsets = [0, 64], sizes = [6, 8], strides = [1, 1]} : vector<12x128xf32> to vector<6x8xf32>
    %273 = vector.extract_strided_slice %261 {offsets = [0, 96], sizes = [6, 8], strides = [1, 1]} : vector<12x128xf32> to vector<6x8xf32>
    %274 = vector.extract_strided_slice %268 {offsets = [0, 0], sizes = [8, 8], strides = [1, 1]} : vector<16x64xf32> to vector<8x8xf32>
    %275 = vector.extract_strided_slice %268 {offsets = [0, 32], sizes = [8, 8], strides = [1, 1]} : vector<16x64xf32> to vector<8x8xf32>
    %cst_115 = arith.constant dense<0.000000e+00> : vector<6x6xf32>
    %276 = tpu.matmul %270, %271, %cst_115 {dimension_numbers = #tpu.dot_dimension_numbers<[1], [1], [0], [0], [0, 0, 1, 0], [], []>} : vector<6x8xf32>, vector<6x8xf32>, vector<6x6xf32> -> vector<6x6xf32>
    %cst_116 = arith.constant dense<0.000000e+00> : vector<6x8xf32>
    %277 = tpu.matmul %273, %274, %cst_116 {dimension_numbers = #tpu.dot_dimension_numbers<[1], [1], [0], [0], [0, 0, 1, 0], [], []>} : vector<6x8xf32>, vector<8x8xf32>, vector<6x8xf32> -> vector<6x8xf32>
    %278 = tpu.concatenate %276, %277 in 1 : vector<6x6xf32>, vector<6x8xf32> -> vector<6x14xf32>
    %cst_117 = arith.constant 0.353553385 : f32
    %279 = vector.broadcast %cst_117 : f32 to vector<6x14xf32>
    %280 = arith.mulf %278, %279 : vector<6x14xf32>
    %281 = vector.broadcast %269 : vector<1x14xf32> to vector<6x14xf32>
    %282 = arith.addf %280, %281 : vector<6x14xf32>
    %cst_118 = arith.constant dense<0xFF800000> : vector<6xf32>
    %283 = vector.multi_reduction <maximumf>, %282, %cst_118 [1] : vector<6x14xf32> to vector<6xf32>
    %284 = vector.shape_cast %283 : vector<6xf32> to vector<6x1xf32>
    %285 = vector.broadcast %284 : vector<6x1xf32> to vector<6x14xf32>
    %286 = arith.subf %282, %285 : vector<6x14xf32>
    %287 = math.exp %286 : vector<6x14xf32>
    %cst_119 = arith.constant dense<0.000000e+00> : vector<6xf32>
    %288 = vector.multi_reduction <add>, %287, %cst_119 [1] : vector<6x14xf32> to vector<6xf32>
    %289 = vector.shape_cast %288 : vector<6xf32> to vector<6x1xf32>
    %290 = vector.broadcast %289 : vector<6x1xf32> to vector<6x14xf32>
    %291 = arith.divf %287, %290 : vector<6x14xf32>
    %292 = tpu.concatenate %272, %275 in 0 : vector<6x8xf32>, vector<8x8xf32> -> vector<14x8xf32>
    %cst_120 = arith.constant dense<0.000000e+00> : vector<6x8xf32>
    %293 = tpu.matmul %291, %292, %cst_120 {dimension_numbers = #tpu.dot_dimension_numbers<[1], [0], [0], [1], [0, 0, 1, 1], [], []>} : vector<6x14xf32>, vector<14x8xf32>, vector<6x8xf32> -> vector<6x8xf32>
    %c0_121 = arith.constant 0 : index
    %c0_122 = arith.constant 0 : index
    %294 = vector.load %arg35[%c0_121, %c0_122] : memref<12x32xf32, #tpu.memory_space<vmem>>, vector<6x8xf32>
    tpu.vector_store %arg35[%c0_121, %c0_122], %293 {strides = array<i32>} : memref<12x32xf32, #tpu.memory_space<vmem>>, vector<6x8xf32>,
    %295 = vector.extract_strided_slice %261 {offsets = [0, 8], sizes = [6, 8], strides = [1, 1]} : vector<12x128xf32> to vector<6x8xf32>
    %296 = vector.extract_strided_slice %261 {offsets = [0, 40], sizes = [6, 8], strides = [1, 1]} : vector<12x128xf32> to vector<6x8xf32>
    %297 = vector.extract_strided_slice %261 {offsets = [0, 72], sizes = [6, 8], strides = [1, 1]} : vector<12x128xf32> to vector<6x8xf32>
    %298 = vector.extract_strided_slice %261 {offsets = [0, 104], sizes = [6, 8], strides = [1, 1]} : vector<12x128xf32> to vector<6x8xf32>
    %299 = vector.extract_strided_slice %268 {offsets = [0, 8], sizes = [8, 8], strides = [1, 1]} : vector<16x64xf32> to vector<8x8xf32>
    %300 = vector.extract_strided_slice %268 {offsets = [0, 40], sizes = [8, 8], strides = [1, 1]} : vector<16x64xf32> to vector<8x8xf32>
    %cst_123 = arith.constant dense<0.000000e+00> : vector<6x6xf32>
    %301 = tpu.matmul %295, %296, %cst_123 {dimension_numbers = #tpu.dot_dimension_numbers<[1], [1], [0], [0], [0, 0, 1, 0], [], []>} : vector<6x8xf32>, vector<6x8xf32>, vector<6x6xf32> -> vector<6x6xf32>
    %cst_124 = arith.constant dense<0.000000e+00> : vector<6x8xf32>
    %302 = tpu.matmul %298, %299, %cst_124 {dimension_numbers = #tpu.dot_dimension_numbers<[1], [1], [0], [0], [0, 0, 1, 0], [], []>} : vector<6x8xf32>, vector<8x8xf32>, vector<6x8xf32> -> vector<6x8xf32>
    %303 = tpu.concatenate %301, %302 in 1 : vector<6x6xf32>, vector<6x8xf32> -> vector<6x14xf32>
    %cst_125 = arith.constant 0.353553385 : f32
    %304 = vector.broadcast %cst_125 : f32 to vector<6x14xf32>
    %305 = arith.mulf %303, %304 : vector<6x14xf32>
    %306 = vector.broadcast %269 : vector<1x14xf32> to vector<6x14xf32>
    %307 = arith.addf %305, %306 : vector<6x14xf32>
    %cst_126 = arith.constant dense<0xFF800000> : vector<6xf32>
    %308 = vector.multi_reduction <maximumf>, %307, %cst_126 [1] : vector<6x14xf32> to vector<6xf32>
    %309 = vector.shape_cast %308 : vector<6xf32> to vector<6x1xf32>
    %310 = vector.broadcast %309 : vector<6x1xf32> to vector<6x14xf32>
    %311 = arith.subf %307, %310 : vector<6x14xf32>
    %312 = math.exp %311 : vector<6x14xf32>
    %cst_127 = arith.constant dense<0.000000e+00> : vector<6xf32>
    %313 = vector.multi_reduction <add>, %312, %cst_127 [1] : vector<6x14xf32> to vector<6xf32>
    %314 = vector.shape_cast %313 : vector<6xf32> to vector<6x1xf32>
    %315 = vector.broadcast %314 : vector<6x1xf32> to vector<6x14xf32>
    %316 = arith.divf %312, %315 : vector<6x14xf32>
    %317 = tpu.concatenate %297, %300 in 0 : vector<6x8xf32>, vector<8x8xf32> -> vector<14x8xf32>
    %cst_128 = arith.constant dense<0.000000e+00> : vector<6x8xf32>
    %318 = tpu.matmul %316, %317, %cst_128 {dimension_numbers = #tpu.dot_dimension_numbers<[1], [0], [0], [1], [0, 0, 1, 1], [], []>} : vector<6x14xf32>, vector<14x8xf32>, vector<6x8xf32> -> vector<6x8xf32>
    %c0_129 = arith.constant 0 : index
    %c8_130 = arith.constant 8 : index
    %319 = vector.load %arg35[%c0_129, %c8_130] : memref<12x32xf32, #tpu.memory_space<vmem>>, vector<6x8xf32>
    tpu.vector_store %arg35[%c0_129, %c8_130], %318 {strides = array<i32>} : memref<12x32xf32, #tpu.memory_space<vmem>>, vector<6x8xf32>,
    %320 = vector.extract_strided_slice %261 {offsets = [0, 16], sizes = [6, 8], strides = [1, 1]} : vector<12x128xf32> to vector<6x8xf32>
    %321 = vector.extract_strided_slice %261 {offsets = [0, 48], sizes = [6, 8], strides = [1, 1]} : vector<12x128xf32> to vector<6x8xf32>
    %322 = vector.extract_strided_slice %261 {offsets = [0, 80], sizes = [6, 8], strides = [1, 1]} : vector<12x128xf32> to vector<6x8xf32>
    %323 = vector.extract_strided_slice %261 {offsets = [0, 112], sizes = [6, 8], strides = [1, 1]} : vector<12x128xf32> to vector<6x8xf32>
    %324 = vector.extract_strided_slice %268 {offsets = [0, 16], sizes = [8, 8], strides = [1, 1]} : vector<16x64xf32> to vector<8x8xf32>
    %325 = vector.extract_strided_slice %268 {offsets = [0, 48], sizes = [8, 8], strides = [1, 1]} : vector<16x64xf32> to vector<8x8xf32>
    %cst_131 = arith.constant dense<0.000000e+00> : vector<6x6xf32>
    %326 = tpu.matmul %320, %321, %cst_131 {dimension_numbers = #tpu.dot_dimension_numbers<[1], [1], [0], [0], [0, 0, 1, 0], [], []>} : vector<6x8xf32>, vector<6x8xf32>, vector<6x6xf32> -> vector<6x6xf32>
    %cst_132 = arith.constant dense<0.000000e+00> : vector<6x8xf32>
    %327 = tpu.matmul %323, %324, %cst_132 {dimension_numbers = #tpu.dot_dimension_numbers<[1], [1], [0], [0], [0, 0, 1, 0], [], []>} : vector<6x8xf32>, vector<8x8xf32>, vector<6x8xf32> -> vector<6x8xf32>
    %328 = tpu.concatenate %326, %327 in 1 : vector<6x6xf32>, vector<6x8xf32> -> vector<6x14xf32>
    %cst_133 = arith.constant 0.353553385 : f32
    %329 = vector.broadcast %cst_133 : f32 to vector<6x14xf32>
    %330 = arith.mulf %328, %329 : vector<6x14xf32>
    %331 = vector.broadcast %269 : vector<1x14xf32> to vector<6x14xf32>
    %332 = arith.addf %330, %331 : vector<6x14xf32>
    %cst_134 = arith.constant dense<0xFF800000> : vector<6xf32>
    %333 = vector.multi_reduction <maximumf>, %332, %cst_134 [1] : vector<6x14xf32> to vector<6xf32>
    %334 = vector.shape_cast %333 : vector<6xf32> to vector<6x1xf32>
    %335 = vector.broadcast %334 : vector<6x1xf32> to vector<6x14xf32>
    %336 = arith.subf %332, %335 : vector<6x14xf32>
    %337 = math.exp %336 : vector<6x14xf32>
    %cst_135 = arith.constant dense<0.000000e+00> : vector<6xf32>
    %338 = vector.multi_reduction <add>, %337, %cst_135 [1] : vector<6x14xf32> to vector<6xf32>
    %339 = vector.shape_cast %338 : vector<6xf32> to vector<6x1xf32>
    %340 = vector.broadcast %339 : vector<6x1xf32> to vector<6x14xf32>
    %341 = arith.divf %337, %340 : vector<6x14xf32>
    %342 = tpu.concatenate %322, %325 in 0 : vector<6x8xf32>, vector<8x8xf32> -> vector<14x8xf32>
    %cst_136 = arith.constant dense<0.000000e+00> : vector<6x8xf32>
    %343 = tpu.matmul %341, %342, %cst_136 {dimension_numbers = #tpu.dot_dimension_numbers<[1], [0], [0], [1], [0, 0, 1, 1], [], []>} : vector<6x14xf32>, vector<14x8xf32>, vector<6x8xf32> -> vector<6x8xf32>
    %c0_137 = arith.constant 0 : index
    %c16_138 = arith.constant 16 : index
    %344 = vector.load %arg35[%c0_137, %c16_138] : memref<12x32xf32, #tpu.memory_space<vmem>>, vector<6x8xf32>
    tpu.vector_store %arg35[%c0_137, %c16_138], %343 {strides = array<i32>} : memref<12x32xf32, #tpu.memory_space<vmem>>, vector<6x8xf32>,
    %345 = vector.extract_strided_slice %261 {offsets = [0, 24], sizes = [6, 8], strides = [1, 1]} : vector<12x128xf32> to vector<6x8xf32>
    %346 = vector.extract_strided_slice %261 {offsets = [0, 56], sizes = [6, 8], strides = [1, 1]} : vector<12x128xf32> to vector<6x8xf32>
    %347 = vector.extract_strided_slice %261 {offsets = [0, 88], sizes = [6, 8], strides = [1, 1]} : vector<12x128xf32> to vector<6x8xf32>
    %348 = vector.extract_strided_slice %261 {offsets = [0, 120], sizes = [6, 8], strides = [1, 1]} : vector<12x128xf32> to vector<6x8xf32>
    %349 = vector.extract_strided_slice %268 {offsets = [0, 24], sizes = [8, 8], strides = [1, 1]} : vector<16x64xf32> to vector<8x8xf32>
    %350 = vector.extract_strided_slice %268 {offsets = [0, 56], sizes = [8, 8], strides = [1, 1]} : vector<16x64xf32> to vector<8x8xf32>
    %cst_139 = arith.constant dense<0.000000e+00> : vector<6x6xf32>
    %351 = tpu.matmul %345, %346, %cst_139 {dimension_numbers = #tpu.dot_dimension_numbers<[1], [1], [0], [0], [0, 0, 1, 0], [], []>} : vector<6x8xf32>, vector<6x8xf32>, vector<6x6xf32> -> vector<6x6xf32>
    %cst_140 = arith.constant dense<0.000000e+00> : vector<6x8xf32>
    %352 = tpu.matmul %348, %349, %cst_140 {dimension_numbers = #tpu.dot_dimension_numbers<[1], [1], [0], [0], [0, 0, 1, 0], [], []>} : vector<6x8xf32>, vector<8x8xf32>, vector<6x8xf32> -> vector<6x8xf32>
    %353 = tpu.concatenate %351, %352 in 1 : vector<6x6xf32>, vector<6x8xf32> -> vector<6x14xf32>
    %cst_141 = arith.constant 0.353553385 : f32
    %354 = vector.broadcast %cst_141 : f32 to vector<6x14xf32>
    %355 = arith.mulf %353, %354 : vector<6x14xf32>
    %356 = vector.broadcast %269 : vector<1x14xf32> to vector<6x14xf32>
    %357 = arith.addf %355, %356 : vector<6x14xf32>
    %cst_142 = arith.constant dense<0xFF800000> : vector<6xf32>
    %358 = vector.multi_reduction <maximumf>, %357, %cst_142 [1] : vector<6x14xf32> to vector<6xf32>
    %359 = vector.shape_cast %358 : vector<6xf32> to vector<6x1xf32>
    %360 = vector.broadcast %359 : vector<6x1xf32> to vector<6x14xf32>
    %361 = arith.subf %357, %360 : vector<6x14xf32>
    %362 = math.exp %361 : vector<6x14xf32>
    %cst_143 = arith.constant dense<0.000000e+00> : vector<6xf32>
    %363 = vector.multi_reduction <add>, %362, %cst_143 [1] : vector<6x14xf32> to vector<6xf32>
    %364 = vector.shape_cast %363 : vector<6xf32> to vector<6x1xf32>
    %365 = vector.broadcast %364 : vector<6x1xf32> to vector<6x14xf32>
    %366 = arith.divf %362, %365 : vector<6x14xf32>
    %367 = tpu.concatenate %347, %350 in 0 : vector<6x8xf32>, vector<8x8xf32> -> vector<14x8xf32>
    %cst_144 = arith.constant dense<0.000000e+00> : vector<6x8xf32>
    %368 = tpu.matmul %366, %367, %cst_144 {dimension_numbers = #tpu.dot_dimension_numbers<[1], [0], [0], [1], [0, 0, 1, 1], [], []>} : vector<6x14xf32>, vector<14x8xf32>, vector<6x8xf32> -> vector<6x8xf32>
    %c0_145 = arith.constant 0 : index
    %c24_146 = arith.constant 24 : index
    %369 = vector.load %arg35[%c0_145, %c24_146] : memref<12x32xf32, #tpu.memory_space<vmem>>, vector<6x8xf32>
    tpu.vector_store %arg35[%c0_145, %c24_146], %368 {strides = array<i32>} : memref<12x32xf32, #tpu.memory_space<vmem>>, vector<6x8xf32>,
    %370 = vector.extract_strided_slice %3 {offsets = [1, 0], sizes = [1, 14], strides = [1, 1]} : vector<2x14xf32> to vector<1x14xf32>
    %371 = vector.extract_strided_slice %261 {offsets = [6, 0], sizes = [6, 8], strides = [1, 1]} : vector<12x128xf32> to vector<6x8xf32>
    %372 = vector.extract_strided_slice %261 {offsets = [6, 32], sizes = [6, 8], strides = [1, 1]} : vector<12x128xf32> to vector<6x8xf32>
    %373 = vector.extract_strided_slice %261 {offsets = [6, 64], sizes = [6, 8], strides = [1, 1]} : vector<12x128xf32> to vector<6x8xf32>
    %374 = vector.extract_strided_slice %261 {offsets = [6, 96], sizes = [6, 8], strides = [1, 1]} : vector<12x128xf32> to vector<6x8xf32>
    %375 = vector.extract_strided_slice %268 {offsets = [8, 0], sizes = [8, 8], strides = [1, 1]} : vector<16x64xf32> to vector<8x8xf32>
    %376 = vector.extract_strided_slice %268 {offsets = [8, 32], sizes = [8, 8], strides = [1, 1]} : vector<16x64xf32> to vector<8x8xf32>
    %cst_147 = arith.constant dense<0.000000e+00> : vector<6x6xf32>
    %377 = tpu.matmul %371, %372, %cst_147 {dimension_numbers = #tpu.dot_dimension_numbers<[1], [1], [0], [0], [0, 0, 1, 0], [], []>} : vector<6x8xf32>, vector<6x8xf32>, vector<6x6xf32> -> vector<6x6xf32>
    %cst_148 = arith.constant dense<0.000000e+00> : vector<6x8xf32>
    %378 = tpu.matmul %374, %375, %cst_148 {dimension_numbers = #tpu.dot_dimension_numbers<[1], [1], [0], [0], [0, 0, 1, 0], [], []>} : vector<6x8xf32>, vector<8x8xf32>, vector<6x8xf32> -> vector<6x8xf32>
    %379 = tpu.concatenate %377, %378 in 1 : vector<6x6xf32>, vector<6x8xf32> -> vector<6x14xf32>
    %cst_149 = arith.constant 0.353553385 : f32
    %380 = vector.broadcast %cst_149 : f32 to vector<6x14xf32>
    %381 = arith.mulf %379, %380 : vector<6x14xf32>
    %382 = vector.broadcast %370 : vector<1x14xf32> to vector<6x14xf32>
    %383 = arith.addf %381, %382 : vector<6x14xf32>
    %cst_150 = arith.constant dense<0xFF800000> : vector<6xf32>
    %384 = vector.multi_reduction <maximumf>, %383, %cst_150 [1] : vector<6x14xf32> to vector<6xf32>
    %385 = vector.shape_cast %384 : vector<6xf32> to vector<6x1xf32>
    %386 = vector.broadcast %385 : vector<6x1xf32> to vector<6x14xf32>
    %387 = arith.subf %383, %386 : vector<6x14xf32>
    %388 = math.exp %387 : vector<6x14xf32>
    %cst_151 = arith.constant dense<0.000000e+00> : vector<6xf32>
    %389 = vector.multi_reduction <add>, %388, %cst_151 [1] : vector<6x14xf32> to vector<6xf32>
    %390 = vector.shape_cast %389 : vector<6xf32> to vector<6x1xf32>
    %391 = vector.broadcast %390 : vector<6x1xf32> to vector<6x14xf32>
    %392 = arith.divf %388, %391 : vector<6x14xf32>
    %393 = tpu.concatenate %373, %376 in 0 : vector<6x8xf32>, vector<8x8xf32> -> vector<14x8xf32>
    %cst_152 = arith.constant dense<0.000000e+00> : vector<6x8xf32>
    %394 = tpu.matmul %392, %393, %cst_152 {dimension_numbers = #tpu.dot_dimension_numbers<[1], [0], [0], [1], [0, 0, 1, 1], [], []>} : vector<6x14xf32>, vector<14x8xf32>, vector<6x8xf32> -> vector<6x8xf32>
    %c6 = arith.constant 6 : index
    %c0_153 = arith.constant 0 : index
    %395 = vector.load %arg35[%c6, %c0_153] : memref<12x32xf32, #tpu.memory_space<vmem>>, vector<6x8xf32>
    tpu.vector_store %arg35[%c6, %c0_153], %394 {strides = array<i32>} : memref<12x32xf32, #tpu.memory_space<vmem>>, vector<6x8xf32>,
    %396 = vector.extract_strided_slice %261 {offsets = [6, 8], sizes = [6, 8], strides = [1, 1]} : vector<12x128xf32> to vector<6x8xf32>
    %397 = vector.extract_strided_slice %261 {offsets = [6, 40], sizes = [6, 8], strides = [1, 1]} : vector<12x128xf32> to vector<6x8xf32>
    %398 = vector.extract_strided_slice %261 {offsets = [6, 72], sizes = [6, 8], strides = [1, 1]} : vector<12x128xf32> to vector<6x8xf32>
    %399 = vector.extract_strided_slice %261 {offsets = [6, 104], sizes = [6, 8], strides = [1, 1]} : vector<12x128xf32> to vector<6x8xf32>
    %400 = vector.extract_strided_slice %268 {offsets = [8, 8], sizes = [8, 8], strides = [1, 1]} : vector<16x64xf32> to vector<8x8xf32>
    %401 = vector.extract_strided_slice %268 {offsets = [8, 40], sizes = [8, 8], strides = [1, 1]} : vector<16x64xf32> to vector<8x8xf32>
    %cst_154 = arith.constant dense<0.000000e+00> : vector<6x6xf32>
    %402 = tpu.matmul %396, %397, %cst_154 {dimension_numbers = #tpu.dot_dimension_numbers<[1], [1], [0], [0], [0, 0, 1, 0], [], []>} : vector<6x8xf32>, vector<6x8xf32>, vector<6x6xf32> -> vector<6x6xf32>
    %cst_155 = arith.constant dense<0.000000e+00> : vector<6x8xf32>
    %403 = tpu.matmul %399, %400, %cst_155 {dimension_numbers = #tpu.dot_dimension_numbers<[1], [1], [0], [0], [0, 0, 1, 0], [], []>} : vector<6x8xf32>, vector<8x8xf32>, vector<6x8xf32> -> vector<6x8xf32>
    %404 = tpu.concatenate %402, %403 in 1 : vector<6x6xf32>, vector<6x8xf32> -> vector<6x14xf32>
    %cst_156 = arith.constant 0.353553385 : f32
    %405 = vector.broadcast %cst_156 : f32 to vector<6x14xf32>
    %406 = arith.mulf %404, %405 : vector<6x14xf32>
    %407 = vector.broadcast %370 : vector<1x14xf32> to vector<6x14xf32>
    %408 = arith.addf %406, %407 : vector<6x14xf32>
    %cst_157 = arith.constant dense<0xFF800000> : vector<6xf32>
    %409 = vector.multi_reduction <maximumf>, %408, %cst_157 [1] : vector<6x14xf32> to vector<6xf32>
    %410 = vector.shape_cast %409 : vector<6xf32> to vector<6x1xf32>
    %411 = vector.broadcast %410 : vector<6x1xf32> to vector<6x14xf32>
    %412 = arith.subf %408, %411 : vector<6x14xf32>
    %413 = math.exp %412 : vector<6x14xf32>
    %cst_158 = arith.constant dense<0.000000e+00> : vector<6xf32>
    %414 = vector.multi_reduction <add>, %413, %cst_158 [1] : vector<6x14xf32> to vector<6xf32>
    %415 = vector.shape_cast %414 : vector<6xf32> to vector<6x1xf32>
    %416 = vector.broadcast %415 : vector<6x1xf32> to vector<6x14xf32>
    %417 = arith.divf %413, %416 : vector<6x14xf32>
    %418 = tpu.concatenate %398, %401 in 0 : vector<6x8xf32>, vector<8x8xf32> -> vector<14x8xf32>
    %cst_159 = arith.constant dense<0.000000e+00> : vector<6x8xf32>
    %419 = tpu.matmul %417, %418, %cst_159 {dimension_numbers = #tpu.dot_dimension_numbers<[1], [0], [0], [1], [0, 0, 1, 1], [], []>} : vector<6x14xf32>, vector<14x8xf32>, vector<6x8xf32> -> vector<6x8xf32>
    %c6_160 = arith.constant 6 : index
    %c8_161 = arith.constant 8 : index
    %420 = vector.load %arg35[%c6_160, %c8_161] : memref<12x32xf32, #tpu.memory_space<vmem>>, vector<6x8xf32>
    tpu.vector_store %arg35[%c6_160, %c8_161], %419 {strides = array<i32>} : memref<12x32xf32, #tpu.memory_space<vmem>>, vector<6x8xf32>,
    %421 = vector.extract_strided_slice %261 {offsets = [6, 16], sizes = [6, 8], strides = [1, 1]} : vector<12x128xf32> to vector<6x8xf32>
    %422 = vector.extract_strided_slice %261 {offsets = [6, 48], sizes = [6, 8], strides = [1, 1]} : vector<12x128xf32> to vector<6x8xf32>
    %423 = vector.extract_strided_slice %261 {offsets = [6, 80], sizes = [6, 8], strides = [1, 1]} : vector<12x128xf32> to vector<6x8xf32>
    %424 = vector.extract_strided_slice %261 {offsets = [6, 112], sizes = [6, 8], strides = [1, 1]} : vector<12x128xf32> to vector<6x8xf32>
    %425 = vector.extract_strided_slice %268 {offsets = [8, 16], sizes = [8, 8], strides = [1, 1]} : vector<16x64xf32> to vector<8x8xf32>
    %426 = vector.extract_strided_slice %268 {offsets = [8, 48], sizes = [8, 8], strides = [1, 1]} : vector<16x64xf32> to vector<8x8xf32>
    %cst_162 = arith.constant dense<0.000000e+00> : vector<6x6xf32>
    %427 = tpu.matmul %421, %422, %cst_162 {dimension_numbers = #tpu.dot_dimension_numbers<[1], [1], [0], [0], [0, 0, 1, 0], [], []>} : vector<6x8xf32>, vector<6x8xf32>, vector<6x6xf32> -> vector<6x6xf32>
    %cst_163 = arith.constant dense<0.000000e+00> : vector<6x8xf32>
    %428 = tpu.matmul %424, %425, %cst_163 {dimension_numbers = #tpu.dot_dimension_numbers<[1], [1], [0], [0], [0, 0, 1, 0], [], []>} : vector<6x8xf32>, vector<8x8xf32>, vector<6x8xf32> -> vector<6x8xf32>
    %429 = tpu.concatenate %427, %428 in 1 : vector<6x6xf32>, vector<6x8xf32> -> vector<6x14xf32>
    %cst_164 = arith.constant 0.353553385 : f32
    %430 = vector.broadcast %cst_164 : f32 to vector<6x14xf32>
    %431 = arith.mulf %429, %430 : vector<6x14xf32>
    %432 = vector.broadcast %370 : vector<1x14xf32> to vector<6x14xf32>
    %433 = arith.addf %431, %432 : vector<6x14xf32>
    %cst_165 = arith.constant dense<0xFF800000> : vector<6xf32>
    %434 = vector.multi_reduction <maximumf>, %433, %cst_165 [1] : vector<6x14xf32> to vector<6xf32>
    %435 = vector.shape_cast %434 : vector<6xf32> to vector<6x1xf32>
    %436 = vector.broadcast %435 : vector<6x1xf32> to vector<6x14xf32>
    %437 = arith.subf %433, %436 : vector<6x14xf32>
    %438 = math.exp %437 : vector<6x14xf32>
    %cst_166 = arith.constant dense<0.000000e+00> : vector<6xf32>
    %439 = vector.multi_reduction <add>, %438, %cst_166 [1] : vector<6x14xf32> to vector<6xf32>
    %440 = vector.shape_cast %439 : vector<6xf32> to vector<6x1xf32>
    %441 = vector.broadcast %440 : vector<6x1xf32> to vector<6x14xf32>
    %442 = arith.divf %438, %441 : vector<6x14xf32>
    %443 = tpu.concatenate %423, %426 in 0 : vector<6x8xf32>, vector<8x8xf32> -> vector<14x8xf32>
    %cst_167 = arith.constant dense<0.000000e+00> : vector<6x8xf32>
    %444 = tpu.matmul %442, %443, %cst_167 {dimension_numbers = #tpu.dot_dimension_numbers<[1], [0], [0], [1], [0, 0, 1, 1], [], []>} : vector<6x14xf32>, vector<14x8xf32>, vector<6x8xf32> -> vector<6x8xf32>
    %c6_168 = arith.constant 6 : index
    %c16_169 = arith.constant 16 : index
    %445 = vector.load %arg35[%c6_168, %c16_169] : memref<12x32xf32, #tpu.memory_space<vmem>>, vector<6x8xf32>
    tpu.vector_store %arg35[%c6_168, %c16_169], %444 {strides = array<i32>} : memref<12x32xf32, #tpu.memory_space<vmem>>, vector<6x8xf32>,
    %446 = vector.extract_strided_slice %261 {offsets = [6, 24], sizes = [6, 8], strides = [1, 1]} : vector<12x128xf32> to vector<6x8xf32>
    %447 = vector.extract_strided_slice %261 {offsets = [6, 56], sizes = [6, 8], strides = [1, 1]} : vector<12x128xf32> to vector<6x8xf32>
    %448 = vector.extract_strided_slice %261 {offsets = [6, 88], sizes = [6, 8], strides = [1, 1]} : vector<12x128xf32> to vector<6x8xf32>
    %449 = vector.extract_strided_slice %261 {offsets = [6, 120], sizes = [6, 8], strides = [1, 1]} : vector<12x128xf32> to vector<6x8xf32>
    %450 = vector.extract_strided_slice %268 {offsets = [8, 24], sizes = [8, 8], strides = [1, 1]} : vector<16x64xf32> to vector<8x8xf32>
    %451 = vector.extract_strided_slice %268 {offsets = [8, 56], sizes = [8, 8], strides = [1, 1]} : vector<16x64xf32> to vector<8x8xf32>
    %cst_170 = arith.constant dense<0.000000e+00> : vector<6x6xf32>
    %452 = tpu.matmul %446, %447, %cst_170 {dimension_numbers = #tpu.dot_dimension_numbers<[1], [1], [0], [0], [0, 0, 1, 0], [], []>} : vector<6x8xf32>, vector<6x8xf32>, vector<6x6xf32> -> vector<6x6xf32>
    %cst_171 = arith.constant dense<0.000000e+00> : vector<6x8xf32>
    %453 = tpu.matmul %449, %450, %cst_171 {dimension_numbers = #tpu.dot_dimension_numbers<[1], [1], [0], [0], [0, 0, 1, 0], [], []>} : vector<6x8xf32>, vector<8x8xf32>, vector<6x8xf32> -> vector<6x8xf32>
    %454 = tpu.concatenate %452, %453 in 1 : vector<6x6xf32>, vector<6x8xf32> -> vector<6x14xf32>
    %cst_172 = arith.constant 0.353553385 : f32
    %455 = vector.broadcast %cst_172 : f32 to vector<6x14xf32>
    %456 = arith.mulf %454, %455 : vector<6x14xf32>
    %457 = vector.broadcast %370 : vector<1x14xf32> to vector<6x14xf32>
    %458 = arith.addf %456, %457 : vector<6x14xf32>
    %cst_173 = arith.constant dense<0xFF800000> : vector<6xf32>
    %459 = vector.multi_reduction <maximumf>, %458, %cst_173 [1] : vector<6x14xf32> to vector<6xf32>
    %460 = vector.shape_cast %459 : vector<6xf32> to vector<6x1xf32>
    %461 = vector.broadcast %460 : vector<6x1xf32> to vector<6x14xf32>
    %462 = arith.subf %458, %461 : vector<6x14xf32>
    %463 = math.exp %462 : vector<6x14xf32>
    %cst_174 = arith.constant dense<0.000000e+00> : vector<6xf32>
    %464 = vector.multi_reduction <add>, %463, %cst_174 [1] : vector<6x14xf32> to vector<6xf32>
    %465 = vector.shape_cast %464 : vector<6xf32> to vector<6x1xf32>
    %466 = vector.broadcast %465 : vector<6x1xf32> to vector<6x14xf32>
    %467 = arith.divf %463, %466 : vector<6x14xf32>
    %468 = tpu.concatenate %448, %451 in 0 : vector<6x8xf32>, vector<8x8xf32> -> vector<14x8xf32>
    %cst_175 = arith.constant dense<0.000000e+00> : vector<6x8xf32>
    %469 = tpu.matmul %467, %468, %cst_175 {dimension_numbers = #tpu.dot_dimension_numbers<[1], [0], [0], [1], [0, 0, 1, 1], [], []>} : vector<6x14xf32>, vector<14x8xf32>, vector<6x8xf32> -> vector<6x8xf32>
    %c6_176 = arith.constant 6 : index
    %c24_177 = arith.constant 24 : index
    %470 = vector.load %arg35[%c6_176, %c24_177] : memref<12x32xf32, #tpu.memory_space<vmem>>, vector<6x8xf32>
    tpu.vector_store %arg35[%c6_176, %c24_177], %469 {strides = array<i32>} : memref<12x32xf32, #tpu.memory_space<vmem>>, vector<6x8xf32>,
    %c0_178 = arith.constant 0 : index
    %c0_179 = arith.constant 0 : index
    %471 = vector.load %arg35[%c0_178, %c0_179] : memref<12x32xf32, #tpu.memory_space<vmem>>, vector<12x32xf32>
    %c0_180 = arith.constant 0 : index
    %c0_181 = arith.constant 0 : index
    %c0_182 = arith.constant 0 : index
    %472 = vector.load %arg16[%c0_180, %c0_181, %c0_182] : memref<2x32x32xf32, #tpu.memory_space<vmem>>, vector<1x32x32xf32>
    %473 = vector.shape_cast %472 : vector<1x32x32xf32> to vector<32x32xf32>
    %cst_183 = arith.constant dense<0.000000e+00> : vector<12x32xf32>
    %474 = tpu.matmul %471, %473, %cst_183 {dimension_numbers = #tpu.dot_dimension_numbers<[1], [0], [0], [1], [0, 0, 1, 1], [], []>} : vector<12x32xf32>, vector<32x32xf32>, vector<12x32xf32> -> vector<12x32xf32>
    %c0_184 = arith.constant 0 : index
    %c0_185 = arith.constant 0 : index
    %c0_186 = arith.constant 0 : index
    %475 = vector.load %arg17[%c0_184, %c0_185, %c0_186] : memref<2x1x32xf32, #tpu.memory_space<vmem>>, vector<1x1x32xf32>
    %476 = vector.shape_cast %475 : vector<1x1x32xf32> to vector<1x32xf32>
    %477 = vector.broadcast %476 : vector<1x32xf32> to vector<12x32xf32>
    %478 = arith.addf %474, %477 : vector<12x32xf32>
    %479 = arith.addf %478, %1 : vector<12x32xf32>
    %c0_187 = arith.constant 0 : index
    %c0_188 = arith.constant 0 : index
    %c0_189 = arith.constant 0 : index
    %480 = vector.load %arg18[%c0_187, %c0_188, %c0_189] : memref<2x1x32xf32, #tpu.memory_space<vmem>>, vector<1x1x32xf32>
    %481 = vector.shape_cast %480 : vector<1x1x32xf32> to vector<1x32xf32>
    %c0_190 = arith.constant 0 : index
    %c0_191 = arith.constant 0 : index
    %c0_192 = arith.constant 0 : index
    %482 = vector.load %arg19[%c0_190, %c0_191, %c0_192] : memref<2x1x32xf32, #tpu.memory_space<vmem>>, vector<1x1x32xf32>
    %483 = vector.shape_cast %482 : vector<1x1x32xf32> to vector<1x32xf32>
    %cst_193 = arith.constant dense<0.000000e+00> : vector<12xf32>
    %484 = vector.multi_reduction <add>, %479, %cst_193 [1] : vector<12x32xf32> to vector<12xf32>
    %485 = vector.shape_cast %484 : vector<12xf32> to vector<12x1xf32>
    %cst_194 = arith.constant 3.200000e+01 : f32
    %486 = vector.broadcast %cst_194 : f32 to vector<12x1xf32>
    %487 = arith.divf %485, %486 : vector<12x1xf32>
    %488 = vector.broadcast %487 : vector<12x1xf32> to vector<12x32xf32>
    %489 = arith.subf %479, %488 : vector<12x32xf32>
    %490 = arith.mulf %489, %489 : vector<12x32xf32>
    %cst_195 = arith.constant dense<0.000000e+00> : vector<12xf32>
    %491 = vector.multi_reduction <add>, %490, %cst_195 [1] : vector<12x32xf32> to vector<12xf32>
    %492 = vector.shape_cast %491 : vector<12xf32> to vector<12x1xf32>
    %cst_196 = arith.constant 3.200000e+01 : f32
    %493 = vector.broadcast %cst_196 : f32 to vector<12x1xf32>
    %494 = arith.divf %492, %493 : vector<12x1xf32>
    %495 = vector.broadcast %487 : vector<12x1xf32> to vector<12x32xf32>
    %496 = arith.subf %479, %495 : vector<12x32xf32>
    %cst_197 = arith.constant 9.99999996E-13 : f32
    %497 = vector.broadcast %cst_197 : f32 to vector<12x1xf32>
    %498 = arith.addf %494, %497 : vector<12x1xf32>
    %499 = math.rsqrt %498 : vector<12x1xf32>
    %500 = vector.broadcast %499 : vector<12x1xf32> to vector<12x32xf32>
    %501 = arith.mulf %496, %500 : vector<12x32xf32>
    %502 = vector.broadcast %481 : vector<1x32xf32> to vector<12x32xf32>
    %503 = arith.mulf %502, %501 : vector<12x32xf32>
    %504 = vector.broadcast %483 : vector<1x32xf32> to vector<12x32xf32>
    %505 = arith.addf %503, %504 : vector<12x32xf32>
    %c0_198 = arith.constant 0 : index
    %c0_199 = arith.constant 0 : index
    %c0_200 = arith.constant 0 : index
    %506 = vector.load %arg20[%c0_198, %c0_199, %c0_200] : memref<2x32x64xf32, #tpu.memory_space<vmem>>, vector<1x32x64xf32>
    %507 = vector.shape_cast %506 : vector<1x32x64xf32> to vector<32x64xf32>
    %cst_201 = arith.constant dense<0.000000e+00> : vector<16x64xf32>
    %508 = tpu.matmul %254, %507, %cst_201 {dimension_numbers = #tpu.dot_dimension_numbers<[1], [0], [0], [1], [0, 0, 1, 1], [], []>} : vector<16x32xf32>, vector<32x64xf32>, vector<16x64xf32> -> vector<16x64xf32>
    %c0_202 = arith.constant 0 : index
    %c0_203 = arith.constant 0 : index
    %c0_204 = arith.constant 0 : index
    %509 = vector.load %arg21[%c0_202, %c0_203, %c0_204] : memref<2x1x64xf32, #tpu.memory_space<vmem>>, vector<1x1x64xf32>
    %510 = vector.shape_cast %509 : vector<1x1x64xf32> to vector<1x64xf32>
    %511 = vector.broadcast %510 : vector<1x64xf32> to vector<16x64xf32>
    %512 = arith.addf %508, %511 : vector<16x64xf32>
    %cst_205 = arith.constant 5.000000e-01 : f32
    %513 = vector.broadcast %cst_205 : f32 to vector<16x64xf32>
    %514 = arith.mulf %512, %513 : vector<16x64xf32>
    %cst_206 = arith.constant 0.707106769 : f32
    %515 = vector.broadcast %cst_206 : f32 to vector<16x64xf32>
    %516 = arith.mulf %512, %515 : vector<16x64xf32>
    %cst_207 = arith.constant 0.000000e+00 : f32
    %517 = vector.broadcast %cst_207 : f32 to vector<16x64xf32>
    %518 = arith.cmpf oge, %516, %517 : vector<16x64xf32>
    %cst_208 = arith.constant 1.000000e+00 : f32
    %cst_209 = arith.constant -1.000000e+00 : f32
    %519 = vector.broadcast %cst_208 : f32 to vector<16x64xf32>
    %520 = vector.broadcast %cst_209 : f32 to vector<16x64xf32>
    %521 = arith.select %518, %519, %520 : vector<16x64xi1>, vector<16x64xf32>
    %522 = math.absf %516 : vector<16x64xf32>
    %cst_210 = arith.constant 0.327591091 : f32
    %523 = vector.broadcast %cst_210 : f32 to vector<16x64xf32>
    %524 = arith.mulf %523, %522 : vector<16x64xf32>
    %cst_211 = arith.constant 1.000000e+00 : f32
    %525 = vector.broadcast %cst_211 : f32 to vector<16x64xf32>
    %526 = arith.addf %525, %524 : vector<16x64xf32>
    %cst_212 = arith.constant 1.000000e+00 : f32
    %527 = vector.broadcast %cst_212 : f32 to vector<16x64xf32>
    %528 = arith.divf %527, %526 : vector<16x64xf32>
    %cst_213 = arith.constant 1.06140542 : f32
    %529 = vector.broadcast %cst_213 : f32 to vector<16x64xf32>
    %530 = arith.mulf %529, %528 : vector<16x64xf32>
    %cst_214 = arith.constant -1.45315206 : f32
    %531 = vector.broadcast %cst_214 : f32 to vector<16x64xf32>
    %532 = arith.addf %530, %531 : vector<16x64xf32>
    %533 = arith.mulf %532, %528 : vector<16x64xf32>
    %cst_215 = arith.constant 1.42141378 : f32
    %534 = vector.broadcast %cst_215 : f32 to vector<16x64xf32>
    %535 = arith.addf %533, %534 : vector<16x64xf32>
    %536 = arith.mulf %535, %528 : vector<16x64xf32>
    %cst_216 = arith.constant -0.284496725 : f32
    %537 = vector.broadcast %cst_216 : f32 to vector<16x64xf32>
    %538 = arith.addf %536, %537 : vector<16x64xf32>
    %539 = arith.mulf %538, %528 : vector<16x64xf32>
    %cst_217 = arith.constant 0.254829586 : f32
    %540 = vector.broadcast %cst_217 : f32 to vector<16x64xf32>
    %541 = arith.addf %539, %540 : vector<16x64xf32>
    %542 = arith.mulf %541, %528 : vector<16x64xf32>
    %cst_218 = arith.constant 0.000000e+00 : f32
    %543 = vector.broadcast %cst_218 : f32 to vector<16x64xf32>
    %544 = arith.subf %543, %522 : vector<16x64xf32>
    %545 = arith.mulf %544, %522 : vector<16x64xf32>
    %546 = math.exp %545 : vector<16x64xf32>
    %547 = arith.mulf %542, %546 : vector<16x64xf32>
    %cst_219 = arith.constant 1.000000e+00 : f32
    %548 = vector.broadcast %cst_219 : f32 to vector<16x64xf32>
    %549 = arith.subf %548, %547 : vector<16x64xf32>
    %550 = arith.mulf %521, %549 : vector<16x64xf32>
    %cst_220 = arith.constant 1.000000e+00 : f32
    %551 = vector.broadcast %cst_220 : f32 to vector<16x64xf32>
    %552 = arith.addf %551, %550 : vector<16x64xf32>
    %553 = arith.mulf %514, %552 : vector<16x64xf32>
    %c0_221 = arith.constant 0 : index
    %c0_222 = arith.constant 0 : index
    %c0_223 = arith.constant 0 : index
    %554 = vector.load %arg22[%c0_221, %c0_222, %c0_223] : memref<2x64x32xf32, #tpu.memory_space<vmem>>, vector<1x64x32xf32>
    %555 = vector.shape_cast %554 : vector<1x64x32xf32> to vector<64x32xf32>
    %cst_224 = arith.constant dense<0.000000e+00> : vector<16x32xf32>
    %556 = tpu.matmul %553, %555, %cst_224 {dimension_numbers = #tpu.dot_dimension_numbers<[1], [0], [0], [1], [0, 0, 1, 1], [], []>} : vector<16x64xf32>, vector<64x32xf32>, vector<16x32xf32> -> vector<16x32xf32>
    %c0_225 = arith.constant 0 : index
    %c0_226 = arith.constant 0 : index
    %c0_227 = arith.constant 0 : index
    %557 = vector.load %arg23[%c0_225, %c0_226, %c0_227] : memref<2x1x32xf32, #tpu.memory_space<vmem>>, vector<1x1x32xf32>
    %558 = vector.shape_cast %557 : vector<1x1x32xf32> to vector<1x32xf32>
    %559 = vector.broadcast %558 : vector<1x32xf32> to vector<16x32xf32>
    %560 = arith.addf %556, %559 : vector<16x32xf32>
    %561 = arith.addf %560, %254 : vector<16x32xf32>
    %c0_228 = arith.constant 0 : index
    %c0_229 = arith.constant 0 : index
    %c0_230 = arith.constant 0 : index
    %562 = vector.load %arg24[%c0_228, %c0_229, %c0_230] : memref<2x1x32xf32, #tpu.memory_space<vmem>>, vector<1x1x32xf32>
    %563 = vector.shape_cast %562 : vector<1x1x32xf32> to vector<1x32xf32>
    %c0_231 = arith.constant 0 : index
    %c0_232 = arith.constant 0 : index
    %c0_233 = arith.constant 0 : index
    %564 = vector.load %arg25[%c0_231, %c0_232, %c0_233] : memref<2x1x32xf32, #tpu.memory_space<vmem>>, vector<1x1x32xf32>
    %565 = vector.shape_cast %564 : vector<1x1x32xf32> to vector<1x32xf32>
    %cst_234 = arith.constant dense<0.000000e+00> : vector<16xf32>
    %566 = vector.multi_reduction <add>, %561, %cst_234 [1] : vector<16x32xf32> to vector<16xf32>
    %567 = vector.shape_cast %566 : vector<16xf32> to vector<16x1xf32>
    %cst_235 = arith.constant 3.200000e+01 : f32
    %568 = vector.broadcast %cst_235 : f32 to vector<16x1xf32>
    %569 = arith.divf %567, %568 : vector<16x1xf32>
    %570 = vector.broadcast %569 : vector<16x1xf32> to vector<16x32xf32>
    %571 = arith.subf %561, %570 : vector<16x32xf32>
    %572 = arith.mulf %571, %571 : vector<16x32xf32>
    %cst_236 = arith.constant dense<0.000000e+00> : vector<16xf32>
    %573 = vector.multi_reduction <add>, %572, %cst_236 [1] : vector<16x32xf32> to vector<16xf32>
    %574 = vector.shape_cast %573 : vector<16xf32> to vector<16x1xf32>
    %cst_237 = arith.constant 3.200000e+01 : f32
    %575 = vector.broadcast %cst_237 : f32 to vector<16x1xf32>
    %576 = arith.divf %574, %575 : vector<16x1xf32>
    %577 = vector.broadcast %569 : vector<16x1xf32> to vector<16x32xf32>
    %578 = arith.subf %561, %577 : vector<16x32xf32>
    %cst_238 = arith.constant 9.99999996E-13 : f32
    %579 = vector.broadcast %cst_238 : f32 to vector<16x1xf32>
    %580 = arith.addf %576, %579 : vector<16x1xf32>
    %581 = math.rsqrt %580 : vector<16x1xf32>
    %582 = vector.broadcast %581 : vector<16x1xf32> to vector<16x32xf32>
    %583 = arith.mulf %578, %582 : vector<16x32xf32>
    %584 = vector.broadcast %563 : vector<1x32xf32> to vector<16x32xf32>
    %585 = arith.mulf %584, %583 : vector<16x32xf32>
    %586 = vector.broadcast %565 : vector<1x32xf32> to vector<16x32xf32>
    %587 = arith.addf %585, %586 : vector<16x32xf32>
    %c0_239 = arith.constant 0 : index
    %c0_240 = arith.constant 0 : index
    %c0_241 = arith.constant 0 : index
    %588 = vector.load %arg26[%c0_239, %c0_240, %c0_241] : memref<2x32x64xf32, #tpu.memory_space<vmem>>, vector<1x32x64xf32>
    %589 = vector.shape_cast %588 : vector<1x32x64xf32> to vector<32x64xf32>
    %cst_242 = arith.constant dense<0.000000e+00> : vector<12x64xf32>
    %590 = tpu.matmul %505, %589, %cst_242 {dimension_numbers = #tpu.dot_dimension_numbers<[1], [0], [0], [1], [0, 0, 1, 1], [], []>} : vector<12x32xf32>, vector<32x64xf32>, vector<12x64xf32> -> vector<12x64xf32>
    %c0_243 = arith.constant 0 : index
    %c0_244 = arith.constant 0 : index
    %c0_245 = arith.constant 0 : index
    %591 = vector.load %arg27[%c0_243, %c0_244, %c0_245] : memref<2x1x64xf32, #tpu.memory_space<vmem>>, vector<1x1x64xf32>
    %592 = vector.shape_cast %591 : vector<1x1x64xf32> to vector<1x64xf32>
    %593 = vector.broadcast %592 : vector<1x64xf32> to vector<12x64xf32>
    %594 = arith.addf %590, %593 : vector<12x64xf32>
    %cst_246 = arith.constant 5.000000e-01 : f32
    %595 = vector.broadcast %cst_246 : f32 to vector<12x64xf32>
    %596 = arith.mulf %594, %595 : vector<12x64xf32>
    %cst_247 = arith.constant 0.707106769 : f32
    %597 = vector.broadcast %cst_247 : f32 to vector<12x64xf32>
    %598 = arith.mulf %594, %597 : vector<12x64xf32>
    %cst_248 = arith.constant 0.000000e+00 : f32
    %599 = vector.broadcast %cst_248 : f32 to vector<12x64xf32>
    %600 = arith.cmpf oge, %598, %599 : vector<12x64xf32>
    %cst_249 = arith.constant 1.000000e+00 : f32
    %cst_250 = arith.constant -1.000000e+00 : f32
    %601 = vector.broadcast %cst_249 : f32 to vector<12x64xf32>
    %602 = vector.broadcast %cst_250 : f32 to vector<12x64xf32>
    %603 = arith.select %600, %601, %602 : vector<12x64xi1>, vector<12x64xf32>
    %604 = math.absf %598 : vector<12x64xf32>
    %cst_251 = arith.constant 0.327591091 : f32
    %605 = vector.broadcast %cst_251 : f32 to vector<12x64xf32>
    %606 = arith.mulf %605, %604 : vector<12x64xf32>
    %cst_252 = arith.constant 1.000000e+00 : f32
    %607 = vector.broadcast %cst_252 : f32 to vector<12x64xf32>
    %608 = arith.addf %607, %606 : vector<12x64xf32>
    %cst_253 = arith.constant 1.000000e+00 : f32
    %609 = vector.broadcast %cst_253 : f32 to vector<12x64xf32>
    %610 = arith.divf %609, %608 : vector<12x64xf32>
    %cst_254 = arith.constant 1.06140542 : f32
    %611 = vector.broadcast %cst_254 : f32 to vector<12x64xf32>
    %612 = arith.mulf %611, %610 : vector<12x64xf32>
    %cst_255 = arith.constant -1.45315206 : f32
    %613 = vector.broadcast %cst_255 : f32 to vector<12x64xf32>
    %614 = arith.addf %612, %613 : vector<12x64xf32>
    %615 = arith.mulf %614, %610 : vector<12x64xf32>
    %cst_256 = arith.constant 1.42141378 : f32
    %616 = vector.broadcast %cst_256 : f32 to vector<12x64xf32>
    %617 = arith.addf %615, %616 : vector<12x64xf32>
    %618 = arith.mulf %617, %610 : vector<12x64xf32>
    %cst_257 = arith.constant -0.284496725 : f32
    %619 = vector.broadcast %cst_257 : f32 to vector<12x64xf32>
    %620 = arith.addf %618, %619 : vector<12x64xf32>
    %621 = arith.mulf %620, %610 : vector<12x64xf32>
    %cst_258 = arith.constant 0.254829586 : f32
    %622 = vector.broadcast %cst_258 : f32 to vector<12x64xf32>
    %623 = arith.addf %621, %622 : vector<12x64xf32>
    %624 = arith.mulf %623, %610 : vector<12x64xf32>
    %cst_259 = arith.constant 0.000000e+00 : f32
    %625 = vector.broadcast %cst_259 : f32 to vector<12x64xf32>
    %626 = arith.subf %625, %604 : vector<12x64xf32>
    %627 = arith.mulf %626, %604 : vector<12x64xf32>
    %628 = math.exp %627 : vector<12x64xf32>
    %629 = arith.mulf %624, %628 : vector<12x64xf32>
    %cst_260 = arith.constant 1.000000e+00 : f32
    %630 = vector.broadcast %cst_260 : f32 to vector<12x64xf32>
    %631 = arith.subf %630, %629 : vector<12x64xf32>
    %632 = arith.mulf %603, %631 : vector<12x64xf32>
    %cst_261 = arith.constant 1.000000e+00 : f32
    %633 = vector.broadcast %cst_261 : f32 to vector<12x64xf32>
    %634 = arith.addf %633, %632 : vector<12x64xf32>
    %635 = arith.mulf %596, %634 : vector<12x64xf32>
    %c0_262 = arith.constant 0 : index
    %c0_263 = arith.constant 0 : index
    %c0_264 = arith.constant 0 : index
    %636 = vector.load %arg28[%c0_262, %c0_263, %c0_264] : memref<2x64x32xf32, #tpu.memory_space<vmem>>, vector<1x64x32xf32>
    %637 = vector.shape_cast %636 : vector<1x64x32xf32> to vector<64x32xf32>
    %cst_265 = arith.constant dense<0.000000e+00> : vector<12x32xf32>
    %638 = tpu.matmul %635, %637, %cst_265 {dimension_numbers = #tpu.dot_dimension_numbers<[1], [0], [0], [1], [0, 0, 1, 1], [], []>} : vector<12x64xf32>, vector<64x32xf32>, vector<12x32xf32> -> vector<12x32xf32>
    %c0_266 = arith.constant 0 : index
    %c0_267 = arith.constant 0 : index
    %c0_268 = arith.constant 0 : index
    %639 = vector.load %arg29[%c0_266, %c0_267, %c0_268] : memref<2x1x32xf32, #tpu.memory_space<vmem>>, vector<1x1x32xf32>
    %640 = vector.shape_cast %639 : vector<1x1x32xf32> to vector<1x32xf32>
    %641 = vector.broadcast %640 : vector<1x32xf32> to vector<12x32xf32>
    %642 = arith.addf %638, %641 : vector<12x32xf32>
    %643 = arith.addf %642, %505 : vector<12x32xf32>
    %c0_269 = arith.constant 0 : index
    %c0_270 = arith.constant 0 : index
    %c0_271 = arith.constant 0 : index
    %644 = vector.load %arg30[%c0_269, %c0_270, %c0_271] : memref<2x1x32xf32, #tpu.memory_space<vmem>>, vector<1x1x32xf32>
    %645 = vector.shape_cast %644 : vector<1x1x32xf32> to vector<1x32xf32>
    %c0_272 = arith.constant 0 : index
    %c0_273 = arith.constant 0 : index
    %c0_274 = arith.constant 0 : index
    %646 = vector.load %arg31[%c0_272, %c0_273, %c0_274] : memref<2x1x32xf32, #tpu.memory_space<vmem>>, vector<1x1x32xf32>
    %647 = vector.shape_cast %646 : vector<1x1x32xf32> to vector<1x32xf32>
    %cst_275 = arith.constant dense<0.000000e+00> : vector<12xf32>
    %648 = vector.multi_reduction <add>, %643, %cst_275 [1] : vector<12x32xf32> to vector<12xf32>
    %649 = vector.shape_cast %648 : vector<12xf32> to vector<12x1xf32>
    %cst_276 = arith.constant 3.200000e+01 : f32
    %650 = vector.broadcast %cst_276 : f32 to vector<12x1xf32>
    %651 = arith.divf %649, %650 : vector<12x1xf32>
    %652 = vector.broadcast %651 : vector<12x1xf32> to vector<12x32xf32>
    %653 = arith.subf %643, %652 : vector<12x32xf32>
    %654 = arith.mulf %653, %653 : vector<12x32xf32>
    %cst_277 = arith.constant dense<0.000000e+00> : vector<12xf32>
    %655 = vector.multi_reduction <add>, %654, %cst_277 [1] : vector<12x32xf32> to vector<12xf32>
    %656 = vector.shape_cast %655 : vector<12xf32> to vector<12x1xf32>
    %cst_278 = arith.constant 3.200000e+01 : f32
    %657 = vector.broadcast %cst_278 : f32 to vector<12x1xf32>
    %658 = arith.divf %656, %657 : vector<12x1xf32>
    %659 = vector.broadcast %651 : vector<12x1xf32> to vector<12x32xf32>
    %660 = arith.subf %643, %659 : vector<12x32xf32>
    %cst_279 = arith.constant 9.99999996E-13 : f32
    %661 = vector.broadcast %cst_279 : f32 to vector<12x1xf32>
    %662 = arith.addf %658, %661 : vector<12x1xf32>
    %663 = math.rsqrt %662 : vector<12x1xf32>
    %664 = vector.broadcast %663 : vector<12x1xf32> to vector<12x32xf32>
    %665 = arith.mulf %660, %664 : vector<12x32xf32>
    %666 = vector.broadcast %645 : vector<1x32xf32> to vector<12x32xf32>
    %667 = arith.mulf %666, %665 : vector<12x32xf32>
    %668 = vector.broadcast %647 : vector<1x32xf32> to vector<12x32xf32>
    %669 = arith.addf %667, %668 : vector<12x32xf32>
    %c1 = arith.constant 1 : index
    %c0_280 = arith.constant 0 : index
    %c0_281 = arith.constant 0 : index
    %670 = vector.load %arg4[%c1, %c0_280, %c0_281] : memref<2x32x128xf32, #tpu.memory_space<vmem>>, vector<1x32x128xf32>
    %671 = vector.shape_cast %670 : vector<1x32x128xf32> to vector<32x128xf32>
    %cst_282 = arith.constant dense<0.000000e+00> : vector<16x128xf32>
    %672 = tpu.matmul %587, %671, %cst_282 {dimension_numbers = #tpu.dot_dimension_numbers<[1], [0], [0], [1], [0, 0, 1, 1], [], []>} : vector<16x32xf32>, vector<32x128xf32>, vector<16x128xf32> -> vector<16x128xf32>
    %c1_283 = arith.constant 1 : index
    %c0_284 = arith.constant 0 : index
    %c0_285 = arith.constant 0 : index
    %673 = vector.load %arg5[%c1_283, %c0_284, %c0_285] : memref<2x1x128xf32, #tpu.memory_space<vmem>>, vector<1x1x128xf32>
    %674 = vector.shape_cast %673 : vector<1x1x128xf32> to vector<1x128xf32>
    %675 = vector.broadcast %674 : vector<1x128xf32> to vector<16x128xf32>
    %676 = arith.addf %672, %675 : vector<16x128xf32>
    %c1_286 = arith.constant 1 : index
    %c0_287 = arith.constant 0 : index
    %c0_288 = arith.constant 0 : index
    %677 = vector.load %arg6[%c1_286, %c0_287, %c0_288] : memref<2x32x64xf32, #tpu.memory_space<vmem>>, vector<1x32x64xf32>
    %678 = vector.shape_cast %677 : vector<1x32x64xf32> to vector<32x64xf32>
    %cst_289 = arith.constant dense<0.000000e+00> : vector<12x64xf32>
    %679 = tpu.matmul %669, %678, %cst_289 {dimension_numbers = #tpu.dot_dimension_numbers<[1], [0], [0], [1], [0, 0, 1, 1], [], []>} : vector<12x32xf32>, vector<32x64xf32>, vector<12x64xf32> -> vector<12x64xf32>
    %c1_290 = arith.constant 1 : index
    %c0_291 = arith.constant 0 : index
    %c0_292 = arith.constant 0 : index
    %680 = vector.load %arg7[%c1_290, %c0_291, %c0_292] : memref<2x1x64xf32, #tpu.memory_space<vmem>>, vector<1x1x64xf32>
    %681 = vector.shape_cast %680 : vector<1x1x64xf32> to vector<1x64xf32>
    %682 = vector.broadcast %681 : vector<1x64xf32> to vector<12x64xf32>
    %683 = arith.addf %679, %682 : vector<12x64xf32>
    %684 = vector.extract_strided_slice %2 {offsets = [0, 0], sizes = [1, 14], strides = [1, 1]} : vector<2x14xf32> to vector<1x14xf32>
    %685 = vector.extract_strided_slice %676 {offsets = [0, 0], sizes = [8, 8], strides = [1, 1]} : vector<16x128xf32> to vector<8x8xf32>
    %686 = vector.extract_strided_slice %676 {offsets = [0, 32], sizes = [8, 8], strides = [1, 1]} : vector<16x128xf32> to vector<8x8xf32>
    %687 = vector.extract_strided_slice %676 {offsets = [0, 64], sizes = [8, 8], strides = [1, 1]} : vector<16x128xf32> to vector<8x8xf32>
    %688 = vector.extract_strided_slice %676 {offsets = [0, 96], sizes = [8, 8], strides = [1, 1]} : vector<16x128xf32> to vector<8x8xf32>
    %689 = vector.extract_strided_slice %683 {offsets = [0, 0], sizes = [6, 8], strides = [1, 1]} : vector<12x64xf32> to vector<6x8xf32>
    %690 = vector.extract_strided_slice %683 {offsets = [0, 32], sizes = [6, 8], strides = [1, 1]} : vector<12x64xf32> to vector<6x8xf32>
    %cst_293 = arith.constant dense<0.000000e+00> : vector<8x8xf32>
    %691 = tpu.matmul %685, %686, %cst_293 {dimension_numbers = #tpu.dot_dimension_numbers<[1], [1], [0], [0], [0, 0, 1, 0], [], []>} : vector<8x8xf32>, vector<8x8xf32>, vector<8x8xf32> -> vector<8x8xf32>
    %cst_294 = arith.constant dense<0.000000e+00> : vector<8x6xf32>
    %692 = tpu.matmul %688, %689, %cst_294 {dimension_numbers = #tpu.dot_dimension_numbers<[1], [1], [0], [0], [0, 0, 1, 0], [], []>} : vector<8x8xf32>, vector<6x8xf32>, vector<8x6xf32> -> vector<8x6xf32>
    %693 = tpu.concatenate %691, %692 in 1 : vector<8x8xf32>, vector<8x6xf32> -> vector<8x14xf32>
    %cst_295 = arith.constant 0.353553385 : f32
    %694 = vector.broadcast %cst_295 : f32 to vector<8x14xf32>
    %695 = arith.mulf %693, %694 : vector<8x14xf32>
    %696 = vector.broadcast %684 : vector<1x14xf32> to vector<8x14xf32>
    %697 = arith.addf %695, %696 : vector<8x14xf32>
    %cst_296 = arith.constant dense<0xFF800000> : vector<8xf32>
    %698 = vector.multi_reduction <maximumf>, %697, %cst_296 [1] : vector<8x14xf32> to vector<8xf32>
    %699 = vector.shape_cast %698 : vector<8xf32> to vector<8x1xf32>
    %700 = vector.broadcast %699 : vector<8x1xf32> to vector<8x14xf32>
    %701 = arith.subf %697, %700 : vector<8x14xf32>
    %702 = math.exp %701 : vector<8x14xf32>
    %cst_297 = arith.constant dense<0.000000e+00> : vector<8xf32>
    %703 = vector.multi_reduction <add>, %702, %cst_297 [1] : vector<8x14xf32> to vector<8xf32>
    %704 = vector.shape_cast %703 : vector<8xf32> to vector<8x1xf32>
    %705 = vector.broadcast %704 : vector<8x1xf32> to vector<8x14xf32>
    %706 = arith.divf %702, %705 : vector<8x14xf32>
    %707 = tpu.concatenate %687, %690 in 0 : vector<8x8xf32>, vector<6x8xf32> -> vector<14x8xf32>
    %cst_298 = arith.constant dense<0.000000e+00> : vector<8x8xf32>
    %708 = tpu.matmul %706, %707, %cst_298 {dimension_numbers = #tpu.dot_dimension_numbers<[1], [0], [0], [1], [0, 0, 1, 1], [], []>} : vector<8x14xf32>, vector<14x8xf32>, vector<8x8xf32> -> vector<8x8xf32>
    %c0_299 = arith.constant 0 : index
    %c0_300 = arith.constant 0 : index
    %709 = vector.load %arg34[%c0_299, %c0_300] : memref<16x32xf32, #tpu.memory_space<vmem>>, vector<8x8xf32>
    tpu.vector_store %arg34[%c0_299, %c0_300], %708 {strides = array<i32>} : memref<16x32xf32, #tpu.memory_space<vmem>>, vector<8x8xf32>,
    %710 = vector.extract_strided_slice %676 {offsets = [0, 8], sizes = [8, 8], strides = [1, 1]} : vector<16x128xf32> to vector<8x8xf32>
    %711 = vector.extract_strided_slice %676 {offsets = [0, 40], sizes = [8, 8], strides = [1, 1]} : vector<16x128xf32> to vector<8x8xf32>
    %712 = vector.extract_strided_slice %676 {offsets = [0, 72], sizes = [8, 8], strides = [1, 1]} : vector<16x128xf32> to vector<8x8xf32>
    %713 = vector.extract_strided_slice %676 {offsets = [0, 104], sizes = [8, 8], strides = [1, 1]} : vector<16x128xf32> to vector<8x8xf32>
    %714 = vector.extract_strided_slice %683 {offsets = [0, 8], sizes = [6, 8], strides = [1, 1]} : vector<12x64xf32> to vector<6x8xf32>
    %715 = vector.extract_strided_slice %683 {offsets = [0, 40], sizes = [6, 8], strides = [1, 1]} : vector<12x64xf32> to vector<6x8xf32>
    %cst_301 = arith.constant dense<0.000000e+00> : vector<8x8xf32>
    %716 = tpu.matmul %710, %711, %cst_301 {dimension_numbers = #tpu.dot_dimension_numbers<[1], [1], [0], [0], [0, 0, 1, 0], [], []>} : vector<8x8xf32>, vector<8x8xf32>, vector<8x8xf32> -> vector<8x8xf32>
    %cst_302 = arith.constant dense<0.000000e+00> : vector<8x6xf32>
    %717 = tpu.matmul %713, %714, %cst_302 {dimension_numbers = #tpu.dot_dimension_numbers<[1], [1], [0], [0], [0, 0, 1, 0], [], []>} : vector<8x8xf32>, vector<6x8xf32>, vector<8x6xf32> -> vector<8x6xf32>
    %718 = tpu.concatenate %716, %717 in 1 : vector<8x8xf32>, vector<8x6xf32> -> vector<8x14xf32>
    %cst_303 = arith.constant 0.353553385 : f32
    %719 = vector.broadcast %cst_303 : f32 to vector<8x14xf32>
    %720 = arith.mulf %718, %719 : vector<8x14xf32>
    %721 = vector.broadcast %684 : vector<1x14xf32> to vector<8x14xf32>
    %722 = arith.addf %720, %721 : vector<8x14xf32>
    %cst_304 = arith.constant dense<0xFF800000> : vector<8xf32>
    %723 = vector.multi_reduction <maximumf>, %722, %cst_304 [1] : vector<8x14xf32> to vector<8xf32>
    %724 = vector.shape_cast %723 : vector<8xf32> to vector<8x1xf32>
    %725 = vector.broadcast %724 : vector<8x1xf32> to vector<8x14xf32>
    %726 = arith.subf %722, %725 : vector<8x14xf32>
    %727 = math.exp %726 : vector<8x14xf32>
    %cst_305 = arith.constant dense<0.000000e+00> : vector<8xf32>
    %728 = vector.multi_reduction <add>, %727, %cst_305 [1] : vector<8x14xf32> to vector<8xf32>
    %729 = vector.shape_cast %728 : vector<8xf32> to vector<8x1xf32>
    %730 = vector.broadcast %729 : vector<8x1xf32> to vector<8x14xf32>
    %731 = arith.divf %727, %730 : vector<8x14xf32>
    %732 = tpu.concatenate %712, %715 in 0 : vector<8x8xf32>, vector<6x8xf32> -> vector<14x8xf32>
    %cst_306 = arith.constant dense<0.000000e+00> : vector<8x8xf32>
    %733 = tpu.matmul %731, %732, %cst_306 {dimension_numbers = #tpu.dot_dimension_numbers<[1], [0], [0], [1], [0, 0, 1, 1], [], []>} : vector<8x14xf32>, vector<14x8xf32>, vector<8x8xf32> -> vector<8x8xf32>
    %c0_307 = arith.constant 0 : index
    %c8_308 = arith.constant 8 : index
    %734 = vector.load %arg34[%c0_307, %c8_308] : memref<16x32xf32, #tpu.memory_space<vmem>>, vector<8x8xf32>
    tpu.vector_store %arg34[%c0_307, %c8_308], %733 {strides = array<i32>} : memref<16x32xf32, #tpu.memory_space<vmem>>, vector<8x8xf32>,
    %735 = vector.extract_strided_slice %676 {offsets = [0, 16], sizes = [8, 8], strides = [1, 1]} : vector<16x128xf32> to vector<8x8xf32>
    %736 = vector.extract_strided_slice %676 {offsets = [0, 48], sizes = [8, 8], strides = [1, 1]} : vector<16x128xf32> to vector<8x8xf32>
    %737 = vector.extract_strided_slice %676 {offsets = [0, 80], sizes = [8, 8], strides = [1, 1]} : vector<16x128xf32> to vector<8x8xf32>
    %738 = vector.extract_strided_slice %676 {offsets = [0, 112], sizes = [8, 8], strides = [1, 1]} : vector<16x128xf32> to vector<8x8xf32>
    %739 = vector.extract_strided_slice %683 {offsets = [0, 16], sizes = [6, 8], strides = [1, 1]} : vector<12x64xf32> to vector<6x8xf32>
    %740 = vector.extract_strided_slice %683 {offsets = [0, 48], sizes = [6, 8], strides = [1, 1]} : vector<12x64xf32> to vector<6x8xf32>
    %cst_309 = arith.constant dense<0.000000e+00> : vector<8x8xf32>
    %741 = tpu.matmul %735, %736, %cst_309 {dimension_numbers = #tpu.dot_dimension_numbers<[1], [1], [0], [0], [0, 0, 1, 0], [], []>} : vector<8x8xf32>, vector<8x8xf32>, vector<8x8xf32> -> vector<8x8xf32>
    %cst_310 = arith.constant dense<0.000000e+00> : vector<8x6xf32>
    %742 = tpu.matmul %738, %739, %cst_310 {dimension_numbers = #tpu.dot_dimension_numbers<[1], [1], [0], [0], [0, 0, 1, 0], [], []>} : vector<8x8xf32>, vector<6x8xf32>, vector<8x6xf32> -> vector<8x6xf32>
    %743 = tpu.concatenate %741, %742 in 1 : vector<8x8xf32>, vector<8x6xf32> -> vector<8x14xf32>
    %cst_311 = arith.constant 0.353553385 : f32
    %744 = vector.broadcast %cst_311 : f32 to vector<8x14xf32>
    %745 = arith.mulf %743, %744 : vector<8x14xf32>
    %746 = vector.broadcast %684 : vector<1x14xf32> to vector<8x14xf32>
    %747 = arith.addf %745, %746 : vector<8x14xf32>
    %cst_312 = arith.constant dense<0xFF800000> : vector<8xf32>
    %748 = vector.multi_reduction <maximumf>, %747, %cst_312 [1] : vector<8x14xf32> to vector<8xf32>
    %749 = vector.shape_cast %748 : vector<8xf32> to vector<8x1xf32>
    %750 = vector.broadcast %749 : vector<8x1xf32> to vector<8x14xf32>
    %751 = arith.subf %747, %750 : vector<8x14xf32>
    %752 = math.exp %751 : vector<8x14xf32>
    %cst_313 = arith.constant dense<0.000000e+00> : vector<8xf32>
    %753 = vector.multi_reduction <add>, %752, %cst_313 [1] : vector<8x14xf32> to vector<8xf32>
    %754 = vector.shape_cast %753 : vector<8xf32> to vector<8x1xf32>
    %755 = vector.broadcast %754 : vector<8x1xf32> to vector<8x14xf32>
    %756 = arith.divf %752, %755 : vector<8x14xf32>
    %757 = tpu.concatenate %737, %740 in 0 : vector<8x8xf32>, vector<6x8xf32> -> vector<14x8xf32>
    %cst_314 = arith.constant dense<0.000000e+00> : vector<8x8xf32>
    %758 = tpu.matmul %756, %757, %cst_314 {dimension_numbers = #tpu.dot_dimension_numbers<[1], [0], [0], [1], [0, 0, 1, 1], [], []>} : vector<8x14xf32>, vector<14x8xf32>, vector<8x8xf32> -> vector<8x8xf32>
    %c0_315 = arith.constant 0 : index
    %c16_316 = arith.constant 16 : index
    %759 = vector.load %arg34[%c0_315, %c16_316] : memref<16x32xf32, #tpu.memory_space<vmem>>, vector<8x8xf32>
    tpu.vector_store %arg34[%c0_315, %c16_316], %758 {strides = array<i32>} : memref<16x32xf32, #tpu.memory_space<vmem>>, vector<8x8xf32>,
    %760 = vector.extract_strided_slice %676 {offsets = [0, 24], sizes = [8, 8], strides = [1, 1]} : vector<16x128xf32> to vector<8x8xf32>
    %761 = vector.extract_strided_slice %676 {offsets = [0, 56], sizes = [8, 8], strides = [1, 1]} : vector<16x128xf32> to vector<8x8xf32>
    %762 = vector.extract_strided_slice %676 {offsets = [0, 88], sizes = [8, 8], strides = [1, 1]} : vector<16x128xf32> to vector<8x8xf32>
    %763 = vector.extract_strided_slice %676 {offsets = [0, 120], sizes = [8, 8], strides = [1, 1]} : vector<16x128xf32> to vector<8x8xf32>
    %764 = vector.extract_strided_slice %683 {offsets = [0, 24], sizes = [6, 8], strides = [1, 1]} : vector<12x64xf32> to vector<6x8xf32>
    %765 = vector.extract_strided_slice %683 {offsets = [0, 56], sizes = [6, 8], strides = [1, 1]} : vector<12x64xf32> to vector<6x8xf32>
    %cst_317 = arith.constant dense<0.000000e+00> : vector<8x8xf32>
    %766 = tpu.matmul %760, %761, %cst_317 {dimension_numbers = #tpu.dot_dimension_numbers<[1], [1], [0], [0], [0, 0, 1, 0], [], []>} : vector<8x8xf32>, vector<8x8xf32>, vector<8x8xf32> -> vector<8x8xf32>
    %cst_318 = arith.constant dense<0.000000e+00> : vector<8x6xf32>
    %767 = tpu.matmul %763, %764, %cst_318 {dimension_numbers = #tpu.dot_dimension_numbers<[1], [1], [0], [0], [0, 0, 1, 0], [], []>} : vector<8x8xf32>, vector<6x8xf32>, vector<8x6xf32> -> vector<8x6xf32>
    %768 = tpu.concatenate %766, %767 in 1 : vector<8x8xf32>, vector<8x6xf32> -> vector<8x14xf32>
    %cst_319 = arith.constant 0.353553385 : f32
    %769 = vector.broadcast %cst_319 : f32 to vector<8x14xf32>
    %770 = arith.mulf %768, %769 : vector<8x14xf32>
    %771 = vector.broadcast %684 : vector<1x14xf32> to vector<8x14xf32>
    %772 = arith.addf %770, %771 : vector<8x14xf32>
    %cst_320 = arith.constant dense<0xFF800000> : vector<8xf32>
    %773 = vector.multi_reduction <maximumf>, %772, %cst_320 [1] : vector<8x14xf32> to vector<8xf32>
    %774 = vector.shape_cast %773 : vector<8xf32> to vector<8x1xf32>
    %775 = vector.broadcast %774 : vector<8x1xf32> to vector<8x14xf32>
    %776 = arith.subf %772, %775 : vector<8x14xf32>
    %777 = math.exp %776 : vector<8x14xf32>
    %cst_321 = arith.constant dense<0.000000e+00> : vector<8xf32>
    %778 = vector.multi_reduction <add>, %777, %cst_321 [1] : vector<8x14xf32> to vector<8xf32>
    %779 = vector.shape_cast %778 : vector<8xf32> to vector<8x1xf32>
    %780 = vector.broadcast %779 : vector<8x1xf32> to vector<8x14xf32>
    %781 = arith.divf %777, %780 : vector<8x14xf32>
    %782 = tpu.concatenate %762, %765 in 0 : vector<8x8xf32>, vector<6x8xf32> -> vector<14x8xf32>
    %cst_322 = arith.constant dense<0.000000e+00> : vector<8x8xf32>
    %783 = tpu.matmul %781, %782, %cst_322 {dimension_numbers = #tpu.dot_dimension_numbers<[1], [0], [0], [1], [0, 0, 1, 1], [], []>} : vector<8x14xf32>, vector<14x8xf32>, vector<8x8xf32> -> vector<8x8xf32>
    %c0_323 = arith.constant 0 : index
    %c24_324 = arith.constant 24 : index
    %784 = vector.load %arg34[%c0_323, %c24_324] : memref<16x32xf32, #tpu.memory_space<vmem>>, vector<8x8xf32>
    tpu.vector_store %arg34[%c0_323, %c24_324], %783 {strides = array<i32>} : memref<16x32xf32, #tpu.memory_space<vmem>>, vector<8x8xf32>,
    %785 = vector.extract_strided_slice %2 {offsets = [1, 0], sizes = [1, 14], strides = [1, 1]} : vector<2x14xf32> to vector<1x14xf32>
    %786 = vector.extract_strided_slice %676 {offsets = [8, 0], sizes = [8, 8], strides = [1, 1]} : vector<16x128xf32> to vector<8x8xf32>
    %787 = vector.extract_strided_slice %676 {offsets = [8, 32], sizes = [8, 8], strides = [1, 1]} : vector<16x128xf32> to vector<8x8xf32>
    %788 = vector.extract_strided_slice %676 {offsets = [8, 64], sizes = [8, 8], strides = [1, 1]} : vector<16x128xf32> to vector<8x8xf32>
    %789 = vector.extract_strided_slice %676 {offsets = [8, 96], sizes = [8, 8], strides = [1, 1]} : vector<16x128xf32> to vector<8x8xf32>
    %790 = vector.extract_strided_slice %683 {offsets = [6, 0], sizes = [6, 8], strides = [1, 1]} : vector<12x64xf32> to vector<6x8xf32>
    %791 = vector.extract_strided_slice %683 {offsets = [6, 32], sizes = [6, 8], strides = [1, 1]} : vector<12x64xf32> to vector<6x8xf32>
    %cst_325 = arith.constant dense<0.000000e+00> : vector<8x8xf32>
    %792 = tpu.matmul %786, %787, %cst_325 {dimension_numbers = #tpu.dot_dimension_numbers<[1], [1], [0], [0], [0, 0, 1, 0], [], []>} : vector<8x8xf32>, vector<8x8xf32>, vector<8x8xf32> -> vector<8x8xf32>
    %cst_326 = arith.constant dense<0.000000e+00> : vector<8x6xf32>
    %793 = tpu.matmul %789, %790, %cst_326 {dimension_numbers = #tpu.dot_dimension_numbers<[1], [1], [0], [0], [0, 0, 1, 0], [], []>} : vector<8x8xf32>, vector<6x8xf32>, vector<8x6xf32> -> vector<8x6xf32>
    %794 = tpu.concatenate %792, %793 in 1 : vector<8x8xf32>, vector<8x6xf32> -> vector<8x14xf32>
    %cst_327 = arith.constant 0.353553385 : f32
    %795 = vector.broadcast %cst_327 : f32 to vector<8x14xf32>
    %796 = arith.mulf %794, %795 : vector<8x14xf32>
    %797 = vector.broadcast %785 : vector<1x14xf32> to vector<8x14xf32>
    %798 = arith.addf %796, %797 : vector<8x14xf32>
    %cst_328 = arith.constant dense<0xFF800000> : vector<8xf32>
    %799 = vector.multi_reduction <maximumf>, %798, %cst_328 [1] : vector<8x14xf32> to vector<8xf32>
    %800 = vector.shape_cast %799 : vector<8xf32> to vector<8x1xf32>
    %801 = vector.broadcast %800 : vector<8x1xf32> to vector<8x14xf32>
    %802 = arith.subf %798, %801 : vector<8x14xf32>
    %803 = math.exp %802 : vector<8x14xf32>
    %cst_329 = arith.constant dense<0.000000e+00> : vector<8xf32>
    %804 = vector.multi_reduction <add>, %803, %cst_329 [1] : vector<8x14xf32> to vector<8xf32>
    %805 = vector.shape_cast %804 : vector<8xf32> to vector<8x1xf32>
    %806 = vector.broadcast %805 : vector<8x1xf32> to vector<8x14xf32>
    %807 = arith.divf %803, %806 : vector<8x14xf32>
    %808 = tpu.concatenate %788, %791 in 0 : vector<8x8xf32>, vector<6x8xf32> -> vector<14x8xf32>
    %cst_330 = arith.constant dense<0.000000e+00> : vector<8x8xf32>
    %809 = tpu.matmul %807, %808, %cst_330 {dimension_numbers = #tpu.dot_dimension_numbers<[1], [0], [0], [1], [0, 0, 1, 1], [], []>} : vector<8x14xf32>, vector<14x8xf32>, vector<8x8xf32> -> vector<8x8xf32>
    %c8_331 = arith.constant 8 : index
    %c0_332 = arith.constant 0 : index
    %810 = vector.load %arg34[%c8_331, %c0_332] : memref<16x32xf32, #tpu.memory_space<vmem>>, vector<8x8xf32>
    tpu.vector_store %arg34[%c8_331, %c0_332], %809 {strides = array<i32>} : memref<16x32xf32, #tpu.memory_space<vmem>>, vector<8x8xf32>,
    %811 = vector.extract_strided_slice %676 {offsets = [8, 8], sizes = [8, 8], strides = [1, 1]} : vector<16x128xf32> to vector<8x8xf32>
    %812 = vector.extract_strided_slice %676 {offsets = [8, 40], sizes = [8, 8], strides = [1, 1]} : vector<16x128xf32> to vector<8x8xf32>
    %813 = vector.extract_strided_slice %676 {offsets = [8, 72], sizes = [8, 8], strides = [1, 1]} : vector<16x128xf32> to vector<8x8xf32>
    %814 = vector.extract_strided_slice %676 {offsets = [8, 104], sizes = [8, 8], strides = [1, 1]} : vector<16x128xf32> to vector<8x8xf32>
    %815 = vector.extract_strided_slice %683 {offsets = [6, 8], sizes = [6, 8], strides = [1, 1]} : vector<12x64xf32> to vector<6x8xf32>
    %816 = vector.extract_strided_slice %683 {offsets = [6, 40], sizes = [6, 8], strides = [1, 1]} : vector<12x64xf32> to vector<6x8xf32>
    %cst_333 = arith.constant dense<0.000000e+00> : vector<8x8xf32>
    %817 = tpu.matmul %811, %812, %cst_333 {dimension_numbers = #tpu.dot_dimension_numbers<[1], [1], [0], [0], [0, 0, 1, 0], [], []>} : vector<8x8xf32>, vector<8x8xf32>, vector<8x8xf32> -> vector<8x8xf32>
    %cst_334 = arith.constant dense<0.000000e+00> : vector<8x6xf32>
    %818 = tpu.matmul %814, %815, %cst_334 {dimension_numbers = #tpu.dot_dimension_numbers<[1], [1], [0], [0], [0, 0, 1, 0], [], []>} : vector<8x8xf32>, vector<6x8xf32>, vector<8x6xf32> -> vector<8x6xf32>
    %819 = tpu.concatenate %817, %818 in 1 : vector<8x8xf32>, vector<8x6xf32> -> vector<8x14xf32>
    %cst_335 = arith.constant 0.353553385 : f32
    %820 = vector.broadcast %cst_335 : f32 to vector<8x14xf32>
    %821 = arith.mulf %819, %820 : vector<8x14xf32>
    %822 = vector.broadcast %785 : vector<1x14xf32> to vector<8x14xf32>
    %823 = arith.addf %821, %822 : vector<8x14xf32>
    %cst_336 = arith.constant dense<0xFF800000> : vector<8xf32>
    %824 = vector.multi_reduction <maximumf>, %823, %cst_336 [1] : vector<8x14xf32> to vector<8xf32>
    %825 = vector.shape_cast %824 : vector<8xf32> to vector<8x1xf32>
    %826 = vector.broadcast %825 : vector<8x1xf32> to vector<8x14xf32>
    %827 = arith.subf %823, %826 : vector<8x14xf32>
    %828 = math.exp %827 : vector<8x14xf32>
    %cst_337 = arith.constant dense<0.000000e+00> : vector<8xf32>
    %829 = vector.multi_reduction <add>, %828, %cst_337 [1] : vector<8x14xf32> to vector<8xf32>
    %830 = vector.shape_cast %829 : vector<8xf32> to vector<8x1xf32>
    %831 = vector.broadcast %830 : vector<8x1xf32> to vector<8x14xf32>
    %832 = arith.divf %828, %831 : vector<8x14xf32>
    %833 = tpu.concatenate %813, %816 in 0 : vector<8x8xf32>, vector<6x8xf32> -> vector<14x8xf32>
    %cst_338 = arith.constant dense<0.000000e+00> : vector<8x8xf32>
    %834 = tpu.matmul %832, %833, %cst_338 {dimension_numbers = #tpu.dot_dimension_numbers<[1], [0], [0], [1], [0, 0, 1, 1], [], []>} : vector<8x14xf32>, vector<14x8xf32>, vector<8x8xf32> -> vector<8x8xf32>
    %c8_339 = arith.constant 8 : index
    %c8_340 = arith.constant 8 : index
    %835 = vector.load %arg34[%c8_339, %c8_340] : memref<16x32xf32, #tpu.memory_space<vmem>>, vector<8x8xf32>
    tpu.vector_store %arg34[%c8_339, %c8_340], %834 {strides = array<i32>} : memref<16x32xf32, #tpu.memory_space<vmem>>, vector<8x8xf32>,
    %836 = vector.extract_strided_slice %676 {offsets = [8, 16], sizes = [8, 8], strides = [1, 1]} : vector<16x128xf32> to vector<8x8xf32>
    %837 = vector.extract_strided_slice %676 {offsets = [8, 48], sizes = [8, 8], strides = [1, 1]} : vector<16x128xf32> to vector<8x8xf32>
    %838 = vector.extract_strided_slice %676 {offsets = [8, 80], sizes = [8, 8], strides = [1, 1]} : vector<16x128xf32> to vector<8x8xf32>
    %839 = vector.extract_strided_slice %676 {offsets = [8, 112], sizes = [8, 8], strides = [1, 1]} : vector<16x128xf32> to vector<8x8xf32>
    %840 = vector.extract_strided_slice %683 {offsets = [6, 16], sizes = [6, 8], strides = [1, 1]} : vector<12x64xf32> to vector<6x8xf32>
    %841 = vector.extract_strided_slice %683 {offsets = [6, 48], sizes = [6, 8], strides = [1, 1]} : vector<12x64xf32> to vector<6x8xf32>
    %cst_341 = arith.constant dense<0.000000e+00> : vector<8x8xf32>
    %842 = tpu.matmul %836, %837, %cst_341 {dimension_numbers = #tpu.dot_dimension_numbers<[1], [1], [0], [0], [0, 0, 1, 0], [], []>} : vector<8x8xf32>, vector<8x8xf32>, vector<8x8xf32> -> vector<8x8xf32>
    %cst_342 = arith.constant dense<0.000000e+00> : vector<8x6xf32>
    %843 = tpu.matmul %839, %840, %cst_342 {dimension_numbers = #tpu.dot_dimension_numbers<[1], [1], [0], [0], [0, 0, 1, 0], [], []>} : vector<8x8xf32>, vector<6x8xf32>, vector<8x6xf32> -> vector<8x6xf32>
    %844 = tpu.concatenate %842, %843 in 1 : vector<8x8xf32>, vector<8x6xf32> -> vector<8x14xf32>
    %cst_343 = arith.constant 0.353553385 : f32
    %845 = vector.broadcast %cst_343 : f32 to vector<8x14xf32>
    %846 = arith.mulf %844, %845 : vector<8x14xf32>
    %847 = vector.broadcast %785 : vector<1x14xf32> to vector<8x14xf32>
    %848 = arith.addf %846, %847 : vector<8x14xf32>
    %cst_344 = arith.constant dense<0xFF800000> : vector<8xf32>
    %849 = vector.multi_reduction <maximumf>, %848, %cst_344 [1] : vector<8x14xf32> to vector<8xf32>
    %850 = vector.shape_cast %849 : vector<8xf32> to vector<8x1xf32>
    %851 = vector.broadcast %850 : vector<8x1xf32> to vector<8x14xf32>
    %852 = arith.subf %848, %851 : vector<8x14xf32>
    %853 = math.exp %852 : vector<8x14xf32>
    %cst_345 = arith.constant dense<0.000000e+00> : vector<8xf32>
    %854 = vector.multi_reduction <add>, %853, %cst_345 [1] : vector<8x14xf32> to vector<8xf32>
    %855 = vector.shape_cast %854 : vector<8xf32> to vector<8x1xf32>
    %856 = vector.broadcast %855 : vector<8x1xf32> to vector<8x14xf32>
    %857 = arith.divf %853, %856 : vector<8x14xf32>
    %858 = tpu.concatenate %838, %841 in 0 : vector<8x8xf32>, vector<6x8xf32> -> vector<14x8xf32>
    %cst_346 = arith.constant dense<0.000000e+00> : vector<8x8xf32>
    %859 = tpu.matmul %857, %858, %cst_346 {dimension_numbers = #tpu.dot_dimension_numbers<[1], [0], [0], [1], [0, 0, 1, 1], [], []>} : vector<8x14xf32>, vector<14x8xf32>, vector<8x8xf32> -> vector<8x8xf32>
    %c8_347 = arith.constant 8 : index
    %c16_348 = arith.constant 16 : index
    %860 = vector.load %arg34[%c8_347, %c16_348] : memref<16x32xf32, #tpu.memory_space<vmem>>, vector<8x8xf32>
    tpu.vector_store %arg34[%c8_347, %c16_348], %859 {strides = array<i32>} : memref<16x32xf32, #tpu.memory_space<vmem>>, vector<8x8xf32>,
    %861 = vector.extract_strided_slice %676 {offsets = [8, 24], sizes = [8, 8], strides = [1, 1]} : vector<16x128xf32> to vector<8x8xf32>
    %862 = vector.extract_strided_slice %676 {offsets = [8, 56], sizes = [8, 8], strides = [1, 1]} : vector<16x128xf32> to vector<8x8xf32>
    %863 = vector.extract_strided_slice %676 {offsets = [8, 88], sizes = [8, 8], strides = [1, 1]} : vector<16x128xf32> to vector<8x8xf32>
    %864 = vector.extract_strided_slice %676 {offsets = [8, 120], sizes = [8, 8], strides = [1, 1]} : vector<16x128xf32> to vector<8x8xf32>
    %865 = vector.extract_strided_slice %683 {offsets = [6, 24], sizes = [6, 8], strides = [1, 1]} : vector<12x64xf32> to vector<6x8xf32>
    %866 = vector.extract_strided_slice %683 {offsets = [6, 56], sizes = [6, 8], strides = [1, 1]} : vector<12x64xf32> to vector<6x8xf32>
    %cst_349 = arith.constant dense<0.000000e+00> : vector<8x8xf32>
    %867 = tpu.matmul %861, %862, %cst_349 {dimension_numbers = #tpu.dot_dimension_numbers<[1], [1], [0], [0], [0, 0, 1, 0], [], []>} : vector<8x8xf32>, vector<8x8xf32>, vector<8x8xf32> -> vector<8x8xf32>
    %cst_350 = arith.constant dense<0.000000e+00> : vector<8x6xf32>
    %868 = tpu.matmul %864, %865, %cst_350 {dimension_numbers = #tpu.dot_dimension_numbers<[1], [1], [0], [0], [0, 0, 1, 0], [], []>} : vector<8x8xf32>, vector<6x8xf32>, vector<8x6xf32> -> vector<8x6xf32>
    %869 = tpu.concatenate %867, %868 in 1 : vector<8x8xf32>, vector<8x6xf32> -> vector<8x14xf32>
    %cst_351 = arith.constant 0.353553385 : f32
    %870 = vector.broadcast %cst_351 : f32 to vector<8x14xf32>
    %871 = arith.mulf %869, %870 : vector<8x14xf32>
    %872 = vector.broadcast %785 : vector<1x14xf32> to vector<8x14xf32>
    %873 = arith.addf %871, %872 : vector<8x14xf32>
    %cst_352 = arith.constant dense<0xFF800000> : vector<8xf32>
    %874 = vector.multi_reduction <maximumf>, %873, %cst_352 [1] : vector<8x14xf32> to vector<8xf32>
    %875 = vector.shape_cast %874 : vector<8xf32> to vector<8x1xf32>
    %876 = vector.broadcast %875 : vector<8x1xf32> to vector<8x14xf32>
    %877 = arith.subf %873, %876 : vector<8x14xf32>
    %878 = math.exp %877 : vector<8x14xf32>
    %cst_353 = arith.constant dense<0.000000e+00> : vector<8xf32>
    %879 = vector.multi_reduction <add>, %878, %cst_353 [1] : vector<8x14xf32> to vector<8xf32>
    %880 = vector.shape_cast %879 : vector<8xf32> to vector<8x1xf32>
    %881 = vector.broadcast %880 : vector<8x1xf32> to vector<8x14xf32>
    %882 = arith.divf %878, %881 : vector<8x14xf32>
    %883 = tpu.concatenate %863, %866 in 0 : vector<8x8xf32>, vector<6x8xf32> -> vector<14x8xf32>
    %cst_354 = arith.constant dense<0.000000e+00> : vector<8x8xf32>
    %884 = tpu.matmul %882, %883, %cst_354 {dimension_numbers = #tpu.dot_dimension_numbers<[1], [0], [0], [1], [0, 0, 1, 1], [], []>} : vector<8x14xf32>, vector<14x8xf32>, vector<8x8xf32> -> vector<8x8xf32>
    %c8_355 = arith.constant 8 : index
    %c24_356 = arith.constant 24 : index
    %885 = vector.load %arg34[%c8_355, %c24_356] : memref<16x32xf32, #tpu.memory_space<vmem>>, vector<8x8xf32>
    tpu.vector_store %arg34[%c8_355, %c24_356], %884 {strides = array<i32>} : memref<16x32xf32, #tpu.memory_space<vmem>>, vector<8x8xf32>,
    %c0_357 = arith.constant 0 : index
    %c0_358 = arith.constant 0 : index
    %886 = vector.load %arg34[%c0_357, %c0_358] : memref<16x32xf32, #tpu.memory_space<vmem>>, vector<16x32xf32>
    %c1_359 = arith.constant 1 : index
    %c0_360 = arith.constant 0 : index
    %c0_361 = arith.constant 0 : index
    %887 = vector.load %arg8[%c1_359, %c0_360, %c0_361] : memref<2x32x32xf32, #tpu.memory_space<vmem>>, vector<1x32x32xf32>
    %888 = vector.shape_cast %887 : vector<1x32x32xf32> to vector<32x32xf32>
    %cst_362 = arith.constant dense<0.000000e+00> : vector<16x32xf32>
    %889 = tpu.matmul %886, %888, %cst_362 {dimension_numbers = #tpu.dot_dimension_numbers<[1], [0], [0], [1], [0, 0, 1, 1], [], []>} : vector<16x32xf32>, vector<32x32xf32>, vector<16x32xf32> -> vector<16x32xf32>
    %c1_363 = arith.constant 1 : index
    %c0_364 = arith.constant 0 : index
    %c0_365 = arith.constant 0 : index
    %890 = vector.load %arg9[%c1_363, %c0_364, %c0_365] : memref<2x1x32xf32, #tpu.memory_space<vmem>>, vector<1x1x32xf32>
    %891 = vector.shape_cast %890 : vector<1x1x32xf32> to vector<1x32xf32>
    %892 = vector.broadcast %891 : vector<1x32xf32> to vector<16x32xf32>
    %893 = arith.addf %889, %892 : vector<16x32xf32>
    %894 = arith.addf %893, %587 : vector<16x32xf32>
    %c1_366 = arith.constant 1 : index
    %c0_367 = arith.constant 0 : index
    %c0_368 = arith.constant 0 : index
    %895 = vector.load %arg10[%c1_366, %c0_367, %c0_368] : memref<2x1x32xf32, #tpu.memory_space<vmem>>, vector<1x1x32xf32>
    %896 = vector.shape_cast %895 : vector<1x1x32xf32> to vector<1x32xf32>
    %c1_369 = arith.constant 1 : index
    %c0_370 = arith.constant 0 : index
    %c0_371 = arith.constant 0 : index
    %897 = vector.load %arg11[%c1_369, %c0_370, %c0_371] : memref<2x1x32xf32, #tpu.memory_space<vmem>>, vector<1x1x32xf32>
    %898 = vector.shape_cast %897 : vector<1x1x32xf32> to vector<1x32xf32>
    %cst_372 = arith.constant dense<0.000000e+00> : vector<16xf32>
    %899 = vector.multi_reduction <add>, %894, %cst_372 [1] : vector<16x32xf32> to vector<16xf32>
    %900 = vector.shape_cast %899 : vector<16xf32> to vector<16x1xf32>
    %cst_373 = arith.constant 3.200000e+01 : f32
    %901 = vector.broadcast %cst_373 : f32 to vector<16x1xf32>
    %902 = arith.divf %900, %901 : vector<16x1xf32>
    %903 = vector.broadcast %902 : vector<16x1xf32> to vector<16x32xf32>
    %904 = arith.subf %894, %903 : vector<16x32xf32>
    %905 = arith.mulf %904, %904 : vector<16x32xf32>
    %cst_374 = arith.constant dense<0.000000e+00> : vector<16xf32>
    %906 = vector.multi_reduction <add>, %905, %cst_374 [1] : vector<16x32xf32> to vector<16xf32>
    %907 = vector.shape_cast %906 : vector<16xf32> to vector<16x1xf32>
    %cst_375 = arith.constant 3.200000e+01 : f32
    %908 = vector.broadcast %cst_375 : f32 to vector<16x1xf32>
    %909 = arith.divf %907, %908 : vector<16x1xf32>
    %910 = vector.broadcast %902 : vector<16x1xf32> to vector<16x32xf32>
    %911 = arith.subf %894, %910 : vector<16x32xf32>
    %cst_376 = arith.constant 9.99999996E-13 : f32
    %912 = vector.broadcast %cst_376 : f32 to vector<16x1xf32>
    %913 = arith.addf %909, %912 : vector<16x1xf32>
    %914 = math.rsqrt %913 : vector<16x1xf32>
    %915 = vector.broadcast %914 : vector<16x1xf32> to vector<16x32xf32>
    %916 = arith.mulf %911, %915 : vector<16x32xf32>
    %917 = vector.broadcast %896 : vector<1x32xf32> to vector<16x32xf32>
    %918 = arith.mulf %917, %916 : vector<16x32xf32>
    %919 = vector.broadcast %898 : vector<1x32xf32> to vector<16x32xf32>
    %920 = arith.addf %918, %919 : vector<16x32xf32>
    %c1_377 = arith.constant 1 : index
    %c0_378 = arith.constant 0 : index
    %c0_379 = arith.constant 0 : index
    %921 = vector.load %arg12[%c1_377, %c0_378, %c0_379] : memref<2x32x128xf32, #tpu.memory_space<vmem>>, vector<1x32x128xf32>
    %922 = vector.shape_cast %921 : vector<1x32x128xf32> to vector<32x128xf32>
    %cst_380 = arith.constant dense<0.000000e+00> : vector<12x128xf32>
    %923 = tpu.matmul %669, %922, %cst_380 {dimension_numbers = #tpu.dot_dimension_numbers<[1], [0], [0], [1], [0, 0, 1, 1], [], []>} : vector<12x32xf32>, vector<32x128xf32>, vector<12x128xf32> -> vector<12x128xf32>
    %c1_381 = arith.constant 1 : index
    %c0_382 = arith.constant 0 : index
    %c0_383 = arith.constant 0 : index
    %924 = vector.load %arg13[%c1_381, %c0_382, %c0_383] : memref<2x1x128xf32, #tpu.memory_space<vmem>>, vector<1x1x128xf32>
    %925 = vector.shape_cast %924 : vector<1x1x128xf32> to vector<1x128xf32>
    %926 = vector.broadcast %925 : vector<1x128xf32> to vector<12x128xf32>
    %927 = arith.addf %923, %926 : vector<12x128xf32>
    %c1_384 = arith.constant 1 : index
    %c0_385 = arith.constant 0 : index
    %c0_386 = arith.constant 0 : index
    %928 = vector.load %arg14[%c1_384, %c0_385, %c0_386] : memref<2x32x64xf32, #tpu.memory_space<vmem>>, vector<1x32x64xf32>
    %929 = vector.shape_cast %928 : vector<1x32x64xf32> to vector<32x64xf32>
    %cst_387 = arith.constant dense<0.000000e+00> : vector<16x64xf32>
    %930 = tpu.matmul %587, %929, %cst_387 {dimension_numbers = #tpu.dot_dimension_numbers<[1], [0], [0], [1], [0, 0, 1, 1], [], []>} : vector<16x32xf32>, vector<32x64xf32>, vector<16x64xf32> -> vector<16x64xf32>
    %c1_388 = arith.constant 1 : index
    %c0_389 = arith.constant 0 : index
    %c0_390 = arith.constant 0 : index
    %931 = vector.load %arg15[%c1_388, %c0_389, %c0_390] : memref<2x1x64xf32, #tpu.memory_space<vmem>>, vector<1x1x64xf32>
    %932 = vector.shape_cast %931 : vector<1x1x64xf32> to vector<1x64xf32>
    %933 = vector.broadcast %932 : vector<1x64xf32> to vector<16x64xf32>
    %934 = arith.addf %930, %933 : vector<16x64xf32>
    %935 = vector.extract_strided_slice %3 {offsets = [0, 0], sizes = [1, 14], strides = [1, 1]} : vector<2x14xf32> to vector<1x14xf32>
    %936 = vector.extract_strided_slice %927 {offsets = [0, 0], sizes = [6, 8], strides = [1, 1]} : vector<12x128xf32> to vector<6x8xf32>
    %937 = vector.extract_strided_slice %927 {offsets = [0, 32], sizes = [6, 8], strides = [1, 1]} : vector<12x128xf32> to vector<6x8xf32>
    %938 = vector.extract_strided_slice %927 {offsets = [0, 64], sizes = [6, 8], strides = [1, 1]} : vector<12x128xf32> to vector<6x8xf32>
    %939 = vector.extract_strided_slice %927 {offsets = [0, 96], sizes = [6, 8], strides = [1, 1]} : vector<12x128xf32> to vector<6x8xf32>
    %940 = vector.extract_strided_slice %934 {offsets = [0, 0], sizes = [8, 8], strides = [1, 1]} : vector<16x64xf32> to vector<8x8xf32>
    %941 = vector.extract_strided_slice %934 {offsets = [0, 32], sizes = [8, 8], strides = [1, 1]} : vector<16x64xf32> to vector<8x8xf32>
    %cst_391 = arith.constant dense<0.000000e+00> : vector<6x6xf32>
    %942 = tpu.matmul %936, %937, %cst_391 {dimension_numbers = #tpu.dot_dimension_numbers<[1], [1], [0], [0], [0, 0, 1, 0], [], []>} : vector<6x8xf32>, vector<6x8xf32>, vector<6x6xf32> -> vector<6x6xf32>
    %cst_392 = arith.constant dense<0.000000e+00> : vector<6x8xf32>
    %943 = tpu.matmul %939, %940, %cst_392 {dimension_numbers = #tpu.dot_dimension_numbers<[1], [1], [0], [0], [0, 0, 1, 0], [], []>} : vector<6x8xf32>, vector<8x8xf32>, vector<6x8xf32> -> vector<6x8xf32>
    %944 = tpu.concatenate %942, %943 in 1 : vector<6x6xf32>, vector<6x8xf32> -> vector<6x14xf32>
    %cst_393 = arith.constant 0.353553385 : f32
    %945 = vector.broadcast %cst_393 : f32 to vector<6x14xf32>
    %946 = arith.mulf %944, %945 : vector<6x14xf32>
    %947 = vector.broadcast %935 : vector<1x14xf32> to vector<6x14xf32>
    %948 = arith.addf %946, %947 : vector<6x14xf32>
    %cst_394 = arith.constant dense<0xFF800000> : vector<6xf32>
    %949 = vector.multi_reduction <maximumf>, %948, %cst_394 [1] : vector<6x14xf32> to vector<6xf32>
    %950 = vector.shape_cast %949 : vector<6xf32> to vector<6x1xf32>
    %951 = vector.broadcast %950 : vector<6x1xf32> to vector<6x14xf32>
    %952 = arith.subf %948, %951 : vector<6x14xf32>
    %953 = math.exp %952 : vector<6x14xf32>
    %cst_395 = arith.constant dense<0.000000e+00> : vector<6xf32>
    %954 = vector.multi_reduction <add>, %953, %cst_395 [1] : vector<6x14xf32> to vector<6xf32>
    %955 = vector.shape_cast %954 : vector<6xf32> to vector<6x1xf32>
    %956 = vector.broadcast %955 : vector<6x1xf32> to vector<6x14xf32>
    %957 = arith.divf %953, %956 : vector<6x14xf32>
    %958 = tpu.concatenate %938, %941 in 0 : vector<6x8xf32>, vector<8x8xf32> -> vector<14x8xf32>
    %cst_396 = arith.constant dense<0.000000e+00> : vector<6x8xf32>
    %959 = tpu.matmul %957, %958, %cst_396 {dimension_numbers = #tpu.dot_dimension_numbers<[1], [0], [0], [1], [0, 0, 1, 1], [], []>} : vector<6x14xf32>, vector<14x8xf32>, vector<6x8xf32> -> vector<6x8xf32>
    %c0_397 = arith.constant 0 : index
    %c0_398 = arith.constant 0 : index
    %960 = vector.load %arg35[%c0_397, %c0_398] : memref<12x32xf32, #tpu.memory_space<vmem>>, vector<6x8xf32>
    tpu.vector_store %arg35[%c0_397, %c0_398], %959 {strides = array<i32>} : memref<12x32xf32, #tpu.memory_space<vmem>>, vector<6x8xf32>,
    %961 = vector.extract_strided_slice %927 {offsets = [0, 8], sizes = [6, 8], strides = [1, 1]} : vector<12x128xf32> to vector<6x8xf32>
    %962 = vector.extract_strided_slice %927 {offsets = [0, 40], sizes = [6, 8], strides = [1, 1]} : vector<12x128xf32> to vector<6x8xf32>
    %963 = vector.extract_strided_slice %927 {offsets = [0, 72], sizes = [6, 8], strides = [1, 1]} : vector<12x128xf32> to vector<6x8xf32>
    %964 = vector.extract_strided_slice %927 {offsets = [0, 104], sizes = [6, 8], strides = [1, 1]} : vector<12x128xf32> to vector<6x8xf32>
    %965 = vector.extract_strided_slice %934 {offsets = [0, 8], sizes = [8, 8], strides = [1, 1]} : vector<16x64xf32> to vector<8x8xf32>
    %966 = vector.extract_strided_slice %934 {offsets = [0, 40], sizes = [8, 8], strides = [1, 1]} : vector<16x64xf32> to vector<8x8xf32>
    %cst_399 = arith.constant dense<0.000000e+00> : vector<6x6xf32>
    %967 = tpu.matmul %961, %962, %cst_399 {dimension_numbers = #tpu.dot_dimension_numbers<[1], [1], [0], [0], [0, 0, 1, 0], [], []>} : vector<6x8xf32>, vector<6x8xf32>, vector<6x6xf32> -> vector<6x6xf32>
    %cst_400 = arith.constant dense<0.000000e+00> : vector<6x8xf32>
    %968 = tpu.matmul %964, %965, %cst_400 {dimension_numbers = #tpu.dot_dimension_numbers<[1], [1], [0], [0], [0, 0, 1, 0], [], []>} : vector<6x8xf32>, vector<8x8xf32>, vector<6x8xf32> -> vector<6x8xf32>
    %969 = tpu.concatenate %967, %968 in 1 : vector<6x6xf32>, vector<6x8xf32> -> vector<6x14xf32>
    %cst_401 = arith.constant 0.353553385 : f32
    %970 = vector.broadcast %cst_401 : f32 to vector<6x14xf32>
    %971 = arith.mulf %969, %970 : vector<6x14xf32>
    %972 = vector.broadcast %935 : vector<1x14xf32> to vector<6x14xf32>
    %973 = arith.addf %971, %972 : vector<6x14xf32>
    %cst_402 = arith.constant dense<0xFF800000> : vector<6xf32>
    %974 = vector.multi_reduction <maximumf>, %973, %cst_402 [1] : vector<6x14xf32> to vector<6xf32>
    %975 = vector.shape_cast %974 : vector<6xf32> to vector<6x1xf32>
    %976 = vector.broadcast %975 : vector<6x1xf32> to vector<6x14xf32>
    %977 = arith.subf %973, %976 : vector<6x14xf32>
    %978 = math.exp %977 : vector<6x14xf32>
    %cst_403 = arith.constant dense<0.000000e+00> : vector<6xf32>
    %979 = vector.multi_reduction <add>, %978, %cst_403 [1] : vector<6x14xf32> to vector<6xf32>
    %980 = vector.shape_cast %979 : vector<6xf32> to vector<6x1xf32>
    %981 = vector.broadcast %980 : vector<6x1xf32> to vector<6x14xf32>
    %982 = arith.divf %978, %981 : vector<6x14xf32>
    %983 = tpu.concatenate %963, %966 in 0 : vector<6x8xf32>, vector<8x8xf32> -> vector<14x8xf32>
    %cst_404 = arith.constant dense<0.000000e+00> : vector<6x8xf32>
    %984 = tpu.matmul %982, %983, %cst_404 {dimension_numbers = #tpu.dot_dimension_numbers<[1], [0], [0], [1], [0, 0, 1, 1], [], []>} : vector<6x14xf32>, vector<14x8xf32>, vector<6x8xf32> -> vector<6x8xf32>
    %c0_405 = arith.constant 0 : index
    %c8_406 = arith.constant 8 : index
    %985 = vector.load %arg35[%c0_405, %c8_406] : memref<12x32xf32, #tpu.memory_space<vmem>>, vector<6x8xf32>
    tpu.vector_store %arg35[%c0_405, %c8_406], %984 {strides = array<i32>} : memref<12x32xf32, #tpu.memory_space<vmem>>, vector<6x8xf32>,
    %986 = vector.extract_strided_slice %927 {offsets = [0, 16], sizes = [6, 8], strides = [1, 1]} : vector<12x128xf32> to vector<6x8xf32>
    %987 = vector.extract_strided_slice %927 {offsets = [0, 48], sizes = [6, 8], strides = [1, 1]} : vector<12x128xf32> to vector<6x8xf32>
    %988 = vector.extract_strided_slice %927 {offsets = [0, 80], sizes = [6, 8], strides = [1, 1]} : vector<12x128xf32> to vector<6x8xf32>
    %989 = vector.extract_strided_slice %927 {offsets = [0, 112], sizes = [6, 8], strides = [1, 1]} : vector<12x128xf32> to vector<6x8xf32>
    %990 = vector.extract_strided_slice %934 {offsets = [0, 16], sizes = [8, 8], strides = [1, 1]} : vector<16x64xf32> to vector<8x8xf32>
    %991 = vector.extract_strided_slice %934 {offsets = [0, 48], sizes = [8, 8], strides = [1, 1]} : vector<16x64xf32> to vector<8x8xf32>
    %cst_407 = arith.constant dense<0.000000e+00> : vector<6x6xf32>
    %992 = tpu.matmul %986, %987, %cst_407 {dimension_numbers = #tpu.dot_dimension_numbers<[1], [1], [0], [0], [0, 0, 1, 0], [], []>} : vector<6x8xf32>, vector<6x8xf32>, vector<6x6xf32> -> vector<6x6xf32>
    %cst_408 = arith.constant dense<0.000000e+00> : vector<6x8xf32>
    %993 = tpu.matmul %989, %990, %cst_408 {dimension_numbers = #tpu.dot_dimension_numbers<[1], [1], [0], [0], [0, 0, 1, 0], [], []>} : vector<6x8xf32>, vector<8x8xf32>, vector<6x8xf32> -> vector<6x8xf32>
    %994 = tpu.concatenate %992, %993 in 1 : vector<6x6xf32>, vector<6x8xf32> -> vector<6x14xf32>
    %cst_409 = arith.constant 0.353553385 : f32
    %995 = vector.broadcast %cst_409 : f32 to vector<6x14xf32>
    %996 = arith.mulf %994, %995 : vector<6x14xf32>
    %997 = vector.broadcast %935 : vector<1x14xf32> to vector<6x14xf32>
    %998 = arith.addf %996, %997 : vector<6x14xf32>
    %cst_410 = arith.constant dense<0xFF800000> : vector<6xf32>
    %999 = vector.multi_reduction <maximumf>, %998, %cst_410 [1] : vector<6x14xf32> to vector<6xf32>
    %1000 = vector.shape_cast %999 : vector<6xf32> to vector<6x1xf32>
    %1001 = vector.broadcast %1000 : vector<6x1xf32> to vector<6x14xf32>
    %1002 = arith.subf %998, %1001 : vector<6x14xf32>
    %1003 = math.exp %1002 : vector<6x14xf32>
    %cst_411 = arith.constant dense<0.000000e+00> : vector<6xf32>
    %1004 = vector.multi_reduction <add>, %1003, %cst_411 [1] : vector<6x14xf32> to vector<6xf32>
    %1005 = vector.shape_cast %1004 : vector<6xf32> to vector<6x1xf32>
    %1006 = vector.broadcast %1005 : vector<6x1xf32> to vector<6x14xf32>
    %1007 = arith.divf %1003, %1006 : vector<6x14xf32>
    %1008 = tpu.concatenate %988, %991 in 0 : vector<6x8xf32>, vector<8x8xf32> -> vector<14x8xf32>
    %cst_412 = arith.constant dense<0.000000e+00> : vector<6x8xf32>
    %1009 = tpu.matmul %1007, %1008, %cst_412 {dimension_numbers = #tpu.dot_dimension_numbers<[1], [0], [0], [1], [0, 0, 1, 1], [], []>} : vector<6x14xf32>, vector<14x8xf32>, vector<6x8xf32> -> vector<6x8xf32>
    %c0_413 = arith.constant 0 : index
    %c16_414 = arith.constant 16 : index
    %1010 = vector.load %arg35[%c0_413, %c16_414] : memref<12x32xf32, #tpu.memory_space<vmem>>, vector<6x8xf32>
    tpu.vector_store %arg35[%c0_413, %c16_414], %1009 {strides = array<i32>} : memref<12x32xf32, #tpu.memory_space<vmem>>, vector<6x8xf32>,
    %1011 = vector.extract_strided_slice %927 {offsets = [0, 24], sizes = [6, 8], strides = [1, 1]} : vector<12x128xf32> to vector<6x8xf32>
    %1012 = vector.extract_strided_slice %927 {offsets = [0, 56], sizes = [6, 8], strides = [1, 1]} : vector<12x128xf32> to vector<6x8xf32>
    %1013 = vector.extract_strided_slice %927 {offsets = [0, 88], sizes = [6, 8], strides = [1, 1]} : vector<12x128xf32> to vector<6x8xf32>
    %1014 = vector.extract_strided_slice %927 {offsets = [0, 120], sizes = [6, 8], strides = [1, 1]} : vector<12x128xf32> to vector<6x8xf32>
    %1015 = vector.extract_strided_slice %934 {offsets = [0, 24], sizes = [8, 8], strides = [1, 1]} : vector<16x64xf32> to vector<8x8xf32>
    %1016 = vector.extract_strided_slice %934 {offsets = [0, 56], sizes = [8, 8], strides = [1, 1]} : vector<16x64xf32> to vector<8x8xf32>
    %cst_415 = arith.constant dense<0.000000e+00> : vector<6x6xf32>
    %1017 = tpu.matmul %1011, %1012, %cst_415 {dimension_numbers = #tpu.dot_dimension_numbers<[1], [1], [0], [0], [0, 0, 1, 0], [], []>} : vector<6x8xf32>, vector<6x8xf32>, vector<6x6xf32> -> vector<6x6xf32>
    %cst_416 = arith.constant dense<0.000000e+00> : vector<6x8xf32>
    %1018 = tpu.matmul %1014, %1015, %cst_416 {dimension_numbers = #tpu.dot_dimension_numbers<[1], [1], [0], [0], [0, 0, 1, 0], [], []>} : vector<6x8xf32>, vector<8x8xf32>, vector<6x8xf32> -> vector<6x8xf32>
    %1019 = tpu.concatenate %1017, %1018 in 1 : vector<6x6xf32>, vector<6x8xf32> -> vector<6x14xf32>
    %cst_417 = arith.constant 0.353553385 : f32
    %1020 = vector.broadcast %cst_417 : f32 to vector<6x14xf32>
    %1021 = arith.mulf %1019, %1020 : vector<6x14xf32>
    %1022 = vector.broadcast %935 : vector<1x14xf32> to vector<6x14xf32>
    %1023 = arith.addf %1021, %1022 : vector<6x14xf32>
    %cst_418 = arith.constant dense<0xFF800000> : vector<6xf32>
    %1024 = vector.multi_reduction <maximumf>, %1023, %cst_418 [1] : vector<6x14xf32> to vector<6xf32>
    %1025 = vector.shape_cast %1024 : vector<6xf32> to vector<6x1xf32>
    %1026 = vector.broadcast %1025 : vector<6x1xf32> to vector<6x14xf32>
    %1027 = arith.subf %1023, %1026 : vector<6x14xf32>
    %1028 = math.exp %1027 : vector<6x14xf32>
    %cst_419 = arith.constant dense<0.000000e+00> : vector<6xf32>
    %1029 = vector.multi_reduction <add>, %1028, %cst_419 [1] : vector<6x14xf32> to vector<6xf32>
    %1030 = vector.shape_cast %1029 : vector<6xf32> to vector<6x1xf32>
    %1031 = vector.broadcast %1030 : vector<6x1xf32> to vector<6x14xf32>
    %1032 = arith.divf %1028, %1031 : vector<6x14xf32>
    %1033 = tpu.concatenate %1013, %1016 in 0 : vector<6x8xf32>, vector<8x8xf32> -> vector<14x8xf32>
    %cst_420 = arith.constant dense<0.000000e+00> : vector<6x8xf32>
    %1034 = tpu.matmul %1032, %1033, %cst_420 {dimension_numbers = #tpu.dot_dimension_numbers<[1], [0], [0], [1], [0, 0, 1, 1], [], []>} : vector<6x14xf32>, vector<14x8xf32>, vector<6x8xf32> -> vector<6x8xf32>
    %c0_421 = arith.constant 0 : index
    %c24_422 = arith.constant 24 : index
    %1035 = vector.load %arg35[%c0_421, %c24_422] : memref<12x32xf32, #tpu.memory_space<vmem>>, vector<6x8xf32>
    tpu.vector_store %arg35[%c0_421, %c24_422], %1034 {strides = array<i32>} : memref<12x32xf32, #tpu.memory_space<vmem>>, vector<6x8xf32>,
    %1036 = vector.extract_strided_slice %3 {offsets = [1, 0], sizes = [1, 14], strides = [1, 1]} : vector<2x14xf32> to vector<1x14xf32>
    %1037 = vector.extract_strided_slice %927 {offsets = [6, 0], sizes = [6, 8], strides = [1, 1]} : vector<12x128xf32> to vector<6x8xf32>
    %1038 = vector.extract_strided_slice %927 {offsets = [6, 32], sizes = [6, 8], strides = [1, 1]} : vector<12x128xf32> to vector<6x8xf32>
    %1039 = vector.extract_strided_slice %927 {offsets = [6, 64], sizes = [6, 8], strides = [1, 1]} : vector<12x128xf32> to vector<6x8xf32>
    %1040 = vector.extract_strided_slice %927 {offsets = [6, 96], sizes = [6, 8], strides = [1, 1]} : vector<12x128xf32> to vector<6x8xf32>
    %1041 = vector.extract_strided_slice %934 {offsets = [8, 0], sizes = [8, 8], strides = [1, 1]} : vector<16x64xf32> to vector<8x8xf32>
    %1042 = vector.extract_strided_slice %934 {offsets = [8, 32], sizes = [8, 8], strides = [1, 1]} : vector<16x64xf32> to vector<8x8xf32>
    %cst_423 = arith.constant dense<0.000000e+00> : vector<6x6xf32>
    %1043 = tpu.matmul %1037, %1038, %cst_423 {dimension_numbers = #tpu.dot_dimension_numbers<[1], [1], [0], [0], [0, 0, 1, 0], [], []>} : vector<6x8xf32>, vector<6x8xf32>, vector<6x6xf32> -> vector<6x6xf32>
    %cst_424 = arith.constant dense<0.000000e+00> : vector<6x8xf32>
    %1044 = tpu.matmul %1040, %1041, %cst_424 {dimension_numbers = #tpu.dot_dimension_numbers<[1], [1], [0], [0], [0, 0, 1, 0], [], []>} : vector<6x8xf32>, vector<8x8xf32>, vector<6x8xf32> -> vector<6x8xf32>
    %1045 = tpu.concatenate %1043, %1044 in 1 : vector<6x6xf32>, vector<6x8xf32> -> vector<6x14xf32>
    %cst_425 = arith.constant 0.353553385 : f32
    %1046 = vector.broadcast %cst_425 : f32 to vector<6x14xf32>
    %1047 = arith.mulf %1045, %1046 : vector<6x14xf32>
    %1048 = vector.broadcast %1036 : vector<1x14xf32> to vector<6x14xf32>
    %1049 = arith.addf %1047, %1048 : vector<6x14xf32>
    %cst_426 = arith.constant dense<0xFF800000> : vector<6xf32>
    %1050 = vector.multi_reduction <maximumf>, %1049, %cst_426 [1] : vector<6x14xf32> to vector<6xf32>
    %1051 = vector.shape_cast %1050 : vector<6xf32> to vector<6x1xf32>
    %1052 = vector.broadcast %1051 : vector<6x1xf32> to vector<6x14xf32>
    %1053 = arith.subf %1049, %1052 : vector<6x14xf32>
    %1054 = math.exp %1053 : vector<6x14xf32>
    %cst_427 = arith.constant dense<0.000000e+00> : vector<6xf32>
    %1055 = vector.multi_reduction <add>, %1054, %cst_427 [1] : vector<6x14xf32> to vector<6xf32>
    %1056 = vector.shape_cast %1055 : vector<6xf32> to vector<6x1xf32>
    %1057 = vector.broadcast %1056 : vector<6x1xf32> to vector<6x14xf32>
    %1058 = arith.divf %1054, %1057 : vector<6x14xf32>
    %1059 = tpu.concatenate %1039, %1042 in 0 : vector<6x8xf32>, vector<8x8xf32> -> vector<14x8xf32>
    %cst_428 = arith.constant dense<0.000000e+00> : vector<6x8xf32>
    %1060 = tpu.matmul %1058, %1059, %cst_428 {dimension_numbers = #tpu.dot_dimension_numbers<[1], [0], [0], [1], [0, 0, 1, 1], [], []>} : vector<6x14xf32>, vector<14x8xf32>, vector<6x8xf32> -> vector<6x8xf32>
    %c6_429 = arith.constant 6 : index
    %c0_430 = arith.constant 0 : index
    %1061 = vector.load %arg35[%c6_429, %c0_430] : memref<12x32xf32, #tpu.memory_space<vmem>>, vector<6x8xf32>
    tpu.vector_store %arg35[%c6_429, %c0_430], %1060 {strides = array<i32>} : memref<12x32xf32, #tpu.memory_space<vmem>>, vector<6x8xf32>,
    %1062 = vector.extract_strided_slice %927 {offsets = [6, 8], sizes = [6, 8], strides = [1, 1]} : vector<12x128xf32> to vector<6x8xf32>
    %1063 = vector.extract_strided_slice %927 {offsets = [6, 40], sizes = [6, 8], strides = [1, 1]} : vector<12x128xf32> to vector<6x8xf32>
    %1064 = vector.extract_strided_slice %927 {offsets = [6, 72], sizes = [6, 8], strides = [1, 1]} : vector<12x128xf32> to vector<6x8xf32>
    %1065 = vector.extract_strided_slice %927 {offsets = [6, 104], sizes = [6, 8], strides = [1, 1]} : vector<12x128xf32> to vector<6x8xf32>
    %1066 = vector.extract_strided_slice %934 {offsets = [8, 8], sizes = [8, 8], strides = [1, 1]} : vector<16x64xf32> to vector<8x8xf32>
    %1067 = vector.extract_strided_slice %934 {offsets = [8, 40], sizes = [8, 8], strides = [1, 1]} : vector<16x64xf32> to vector<8x8xf32>
    %cst_431 = arith.constant dense<0.000000e+00> : vector<6x6xf32>
    %1068 = tpu.matmul %1062, %1063, %cst_431 {dimension_numbers = #tpu.dot_dimension_numbers<[1], [1], [0], [0], [0, 0, 1, 0], [], []>} : vector<6x8xf32>, vector<6x8xf32>, vector<6x6xf32> -> vector<6x6xf32>
    %cst_432 = arith.constant dense<0.000000e+00> : vector<6x8xf32>
    %1069 = tpu.matmul %1065, %1066, %cst_432 {dimension_numbers = #tpu.dot_dimension_numbers<[1], [1], [0], [0], [0, 0, 1, 0], [], []>} : vector<6x8xf32>, vector<8x8xf32>, vector<6x8xf32> -> vector<6x8xf32>
    %1070 = tpu.concatenate %1068, %1069 in 1 : vector<6x6xf32>, vector<6x8xf32> -> vector<6x14xf32>
    %cst_433 = arith.constant 0.353553385 : f32
    %1071 = vector.broadcast %cst_433 : f32 to vector<6x14xf32>
    %1072 = arith.mulf %1070, %1071 : vector<6x14xf32>
    %1073 = vector.broadcast %1036 : vector<1x14xf32> to vector<6x14xf32>
    %1074 = arith.addf %1072, %1073 : vector<6x14xf32>
    %cst_434 = arith.constant dense<0xFF800000> : vector<6xf32>
    %1075 = vector.multi_reduction <maximumf>, %1074, %cst_434 [1] : vector<6x14xf32> to vector<6xf32>
    %1076 = vector.shape_cast %1075 : vector<6xf32> to vector<6x1xf32>
    %1077 = vector.broadcast %1076 : vector<6x1xf32> to vector<6x14xf32>
    %1078 = arith.subf %1074, %1077 : vector<6x14xf32>
    %1079 = math.exp %1078 : vector<6x14xf32>
    %cst_435 = arith.constant dense<0.000000e+00> : vector<6xf32>
    %1080 = vector.multi_reduction <add>, %1079, %cst_435 [1] : vector<6x14xf32> to vector<6xf32>
    %1081 = vector.shape_cast %1080 : vector<6xf32> to vector<6x1xf32>
    %1082 = vector.broadcast %1081 : vector<6x1xf32> to vector<6x14xf32>
    %1083 = arith.divf %1079, %1082 : vector<6x14xf32>
    %1084 = tpu.concatenate %1064, %1067 in 0 : vector<6x8xf32>, vector<8x8xf32> -> vector<14x8xf32>
    %cst_436 = arith.constant dense<0.000000e+00> : vector<6x8xf32>
    %1085 = tpu.matmul %1083, %1084, %cst_436 {dimension_numbers = #tpu.dot_dimension_numbers<[1], [0], [0], [1], [0, 0, 1, 1], [], []>} : vector<6x14xf32>, vector<14x8xf32>, vector<6x8xf32> -> vector<6x8xf32>
    %c6_437 = arith.constant 6 : index
    %c8_438 = arith.constant 8 : index
    %1086 = vector.load %arg35[%c6_437, %c8_438] : memref<12x32xf32, #tpu.memory_space<vmem>>, vector<6x8xf32>
    tpu.vector_store %arg35[%c6_437, %c8_438], %1085 {strides = array<i32>} : memref<12x32xf32, #tpu.memory_space<vmem>>, vector<6x8xf32>,
    %1087 = vector.extract_strided_slice %927 {offsets = [6, 16], sizes = [6, 8], strides = [1, 1]} : vector<12x128xf32> to vector<6x8xf32>
    %1088 = vector.extract_strided_slice %927 {offsets = [6, 48], sizes = [6, 8], strides = [1, 1]} : vector<12x128xf32> to vector<6x8xf32>
    %1089 = vector.extract_strided_slice %927 {offsets = [6, 80], sizes = [6, 8], strides = [1, 1]} : vector<12x128xf32> to vector<6x8xf32>
    %1090 = vector.extract_strided_slice %927 {offsets = [6, 112], sizes = [6, 8], strides = [1, 1]} : vector<12x128xf32> to vector<6x8xf32>
    %1091 = vector.extract_strided_slice %934 {offsets = [8, 16], sizes = [8, 8], strides = [1, 1]} : vector<16x64xf32> to vector<8x8xf32>
    %1092 = vector.extract_strided_slice %934 {offsets = [8, 48], sizes = [8, 8], strides = [1, 1]} : vector<16x64xf32> to vector<8x8xf32>
    %cst_439 = arith.constant dense<0.000000e+00> : vector<6x6xf32>
    %1093 = tpu.matmul %1087, %1088, %cst_439 {dimension_numbers = #tpu.dot_dimension_numbers<[1], [1], [0], [0], [0, 0, 1, 0], [], []>} : vector<6x8xf32>, vector<6x8xf32>, vector<6x6xf32> -> vector<6x6xf32>
    %cst_440 = arith.constant dense<0.000000e+00> : vector<6x8xf32>
    %1094 = tpu.matmul %1090, %1091, %cst_440 {dimension_numbers = #tpu.dot_dimension_numbers<[1], [1], [0], [0], [0, 0, 1, 0], [], []>} : vector<6x8xf32>, vector<8x8xf32>, vector<6x8xf32> -> vector<6x8xf32>
    %1095 = tpu.concatenate %1093, %1094 in 1 : vector<6x6xf32>, vector<6x8xf32> -> vector<6x14xf32>
    %cst_441 = arith.constant 0.353553385 : f32
    %1096 = vector.broadcast %cst_441 : f32 to vector<6x14xf32>
    %1097 = arith.mulf %1095, %1096 : vector<6x14xf32>
    %1098 = vector.broadcast %1036 : vector<1x14xf32> to vector<6x14xf32>
    %1099 = arith.addf %1097, %1098 : vector<6x14xf32>
    %cst_442 = arith.constant dense<0xFF800000> : vector<6xf32>
    %1100 = vector.multi_reduction <maximumf>, %1099, %cst_442 [1] : vector<6x14xf32> to vector<6xf32>
    %1101 = vector.shape_cast %1100 : vector<6xf32> to vector<6x1xf32>
    %1102 = vector.broadcast %1101 : vector<6x1xf32> to vector<6x14xf32>
    %1103 = arith.subf %1099, %1102 : vector<6x14xf32>
    %1104 = math.exp %1103 : vector<6x14xf32>
    %cst_443 = arith.constant dense<0.000000e+00> : vector<6xf32>
    %1105 = vector.multi_reduction <add>, %1104, %cst_443 [1] : vector<6x14xf32> to vector<6xf32>
    %1106 = vector.shape_cast %1105 : vector<6xf32> to vector<6x1xf32>
    %1107 = vector.broadcast %1106 : vector<6x1xf32> to vector<6x14xf32>
    %1108 = arith.divf %1104, %1107 : vector<6x14xf32>
    %1109 = tpu.concatenate %1089, %1092 in 0 : vector<6x8xf32>, vector<8x8xf32> -> vector<14x8xf32>
    %cst_444 = arith.constant dense<0.000000e+00> : vector<6x8xf32>
    %1110 = tpu.matmul %1108, %1109, %cst_444 {dimension_numbers = #tpu.dot_dimension_numbers<[1], [0], [0], [1], [0, 0, 1, 1], [], []>} : vector<6x14xf32>, vector<14x8xf32>, vector<6x8xf32> -> vector<6x8xf32>
    %c6_445 = arith.constant 6 : index
    %c16_446 = arith.constant 16 : index
    %1111 = vector.load %arg35[%c6_445, %c16_446] : memref<12x32xf32, #tpu.memory_space<vmem>>, vector<6x8xf32>
    tpu.vector_store %arg35[%c6_445, %c16_446], %1110 {strides = array<i32>} : memref<12x32xf32, #tpu.memory_space<vmem>>, vector<6x8xf32>,
    %1112 = vector.extract_strided_slice %927 {offsets = [6, 24], sizes = [6, 8], strides = [1, 1]} : vector<12x128xf32> to vector<6x8xf32>
    %1113 = vector.extract_strided_slice %927 {offsets = [6, 56], sizes = [6, 8], strides = [1, 1]} : vector<12x128xf32> to vector<6x8xf32>
    %1114 = vector.extract_strided_slice %927 {offsets = [6, 88], sizes = [6, 8], strides = [1, 1]} : vector<12x128xf32> to vector<6x8xf32>
    %1115 = vector.extract_strided_slice %927 {offsets = [6, 120], sizes = [6, 8], strides = [1, 1]} : vector<12x128xf32> to vector<6x8xf32>
    %1116 = vector.extract_strided_slice %934 {offsets = [8, 24], sizes = [8, 8], strides = [1, 1]} : vector<16x64xf32> to vector<8x8xf32>
    %1117 = vector.extract_strided_slice %934 {offsets = [8, 56], sizes = [8, 8], strides = [1, 1]} : vector<16x64xf32> to vector<8x8xf32>
    %cst_447 = arith.constant dense<0.000000e+00> : vector<6x6xf32>
    %1118 = tpu.matmul %1112, %1113, %cst_447 {dimension_numbers = #tpu.dot_dimension_numbers<[1], [1], [0], [0], [0, 0, 1, 0], [], []>} : vector<6x8xf32>, vector<6x8xf32>, vector<6x6xf32> -> vector<6x6xf32>
    %cst_448 = arith.constant dense<0.000000e+00> : vector<6x8xf32>
    %1119 = tpu.matmul %1115, %1116, %cst_448 {dimension_numbers = #tpu.dot_dimension_numbers<[1], [1], [0], [0], [0, 0, 1, 0], [], []>} : vector<6x8xf32>, vector<8x8xf32>, vector<6x8xf32> -> vector<6x8xf32>
    %1120 = tpu.concatenate %1118, %1119 in 1 : vector<6x6xf32>, vector<6x8xf32> -> vector<6x14xf32>
    %cst_449 = arith.constant 0.353553385 : f32
    %1121 = vector.broadcast %cst_449 : f32 to vector<6x14xf32>
    %1122 = arith.mulf %1120, %1121 : vector<6x14xf32>
    %1123 = vector.broadcast %1036 : vector<1x14xf32> to vector<6x14xf32>
    %1124 = arith.addf %1122, %1123 : vector<6x14xf32>
    %cst_450 = arith.constant dense<0xFF800000> : vector<6xf32>
    %1125 = vector.multi_reduction <maximumf>, %1124, %cst_450 [1] : vector<6x14xf32> to vector<6xf32>
    %1126 = vector.shape_cast %1125 : vector<6xf32> to vector<6x1xf32>
    %1127 = vector.broadcast %1126 : vector<6x1xf32> to vector<6x14xf32>
    %1128 = arith.subf %1124, %1127 : vector<6x14xf32>
    %1129 = math.exp %1128 : vector<6x14xf32>
    %cst_451 = arith.constant dense<0.000000e+00> : vector<6xf32>
    %1130 = vector.multi_reduction <add>, %1129, %cst_451 [1] : vector<6x14xf32> to vector<6xf32>
    %1131 = vector.shape_cast %1130 : vector<6xf32> to vector<6x1xf32>
    %1132 = vector.broadcast %1131 : vector<6x1xf32> to vector<6x14xf32>
    %1133 = arith.divf %1129, %1132 : vector<6x14xf32>
    %1134 = tpu.concatenate %1114, %1117 in 0 : vector<6x8xf32>, vector<8x8xf32> -> vector<14x8xf32>
    %cst_452 = arith.constant dense<0.000000e+00> : vector<6x8xf32>
    %1135 = tpu.matmul %1133, %1134, %cst_452 {dimension_numbers = #tpu.dot_dimension_numbers<[1], [0], [0], [1], [0, 0, 1, 1], [], []>} : vector<6x14xf32>, vector<14x8xf32>, vector<6x8xf32> -> vector<6x8xf32>
    %c6_453 = arith.constant 6 : index
    %c24_454 = arith.constant 24 : index
    %1136 = vector.load %arg35[%c6_453, %c24_454] : memref<12x32xf32, #tpu.memory_space<vmem>>, vector<6x8xf32>
    tpu.vector_store %arg35[%c6_453, %c24_454], %1135 {strides = array<i32>} : memref<12x32xf32, #tpu.memory_space<vmem>>, vector<6x8xf32>,
    %c0_455 = arith.constant 0 : index
    %c0_456 = arith.constant 0 : index
    %1137 = vector.load %arg35[%c0_455, %c0_456] : memref<12x32xf32, #tpu.memory_space<vmem>>, vector<12x32xf32>
    %c1_457 = arith.constant 1 : index
    %c0_458 = arith.constant 0 : index
    %c0_459 = arith.constant 0 : index
    %1138 = vector.load %arg16[%c1_457, %c0_458, %c0_459] : memref<2x32x32xf32, #tpu.memory_space<vmem>>, vector<1x32x32xf32>
    %1139 = vector.shape_cast %1138 : vector<1x32x32xf32> to vector<32x32xf32>
    %cst_460 = arith.constant dense<0.000000e+00> : vector<12x32xf32>
    %1140 = tpu.matmul %1137, %1139, %cst_460 {dimension_numbers = #tpu.dot_dimension_numbers<[1], [0], [0], [1], [0, 0, 1, 1], [], []>} : vector<12x32xf32>, vector<32x32xf32>, vector<12x32xf32> -> vector<12x32xf32>
    %c1_461 = arith.constant 1 : index
    %c0_462 = arith.constant 0 : index
    %c0_463 = arith.constant 0 : index
    %1141 = vector.load %arg17[%c1_461, %c0_462, %c0_463] : memref<2x1x32xf32, #tpu.memory_space<vmem>>, vector<1x1x32xf32>
    %1142 = vector.shape_cast %1141 : vector<1x1x32xf32> to vector<1x32xf32>
    %1143 = vector.broadcast %1142 : vector<1x32xf32> to vector<12x32xf32>
    %1144 = arith.addf %1140, %1143 : vector<12x32xf32>
    %1145 = arith.addf %1144, %669 : vector<12x32xf32>
    %c1_464 = arith.constant 1 : index
    %c0_465 = arith.constant 0 : index
    %c0_466 = arith.constant 0 : index
    %1146 = vector.load %arg18[%c1_464, %c0_465, %c0_466] : memref<2x1x32xf32, #tpu.memory_space<vmem>>, vector<1x1x32xf32>
    %1147 = vector.shape_cast %1146 : vector<1x1x32xf32> to vector<1x32xf32>
    %c1_467 = arith.constant 1 : index
    %c0_468 = arith.constant 0 : index
    %c0_469 = arith.constant 0 : index
    %1148 = vector.load %arg19[%c1_467, %c0_468, %c0_469] : memref<2x1x32xf32, #tpu.memory_space<vmem>>, vector<1x1x32xf32>
    %1149 = vector.shape_cast %1148 : vector<1x1x32xf32> to vector<1x32xf32>
    %cst_470 = arith.constant dense<0.000000e+00> : vector<12xf32>
    %1150 = vector.multi_reduction <add>, %1145, %cst_470 [1] : vector<12x32xf32> to vector<12xf32>
    %1151 = vector.shape_cast %1150 : vector<12xf32> to vector<12x1xf32>
    %cst_471 = arith.constant 3.200000e+01 : f32
    %1152 = vector.broadcast %cst_471 : f32 to vector<12x1xf32>
    %1153 = arith.divf %1151, %1152 : vector<12x1xf32>
    %1154 = vector.broadcast %1153 : vector<12x1xf32> to vector<12x32xf32>
    %1155 = arith.subf %1145, %1154 : vector<12x32xf32>
    %1156 = arith.mulf %1155, %1155 : vector<12x32xf32>
    %cst_472 = arith.constant dense<0.000000e+00> : vector<12xf32>
    %1157 = vector.multi_reduction <add>, %1156, %cst_472 [1] : vector<12x32xf32> to vector<12xf32>
    %1158 = vector.shape_cast %1157 : vector<12xf32> to vector<12x1xf32>
    %cst_473 = arith.constant 3.200000e+01 : f32
    %1159 = vector.broadcast %cst_473 : f32 to vector<12x1xf32>
    %1160 = arith.divf %1158, %1159 : vector<12x1xf32>
    %1161 = vector.broadcast %1153 : vector<12x1xf32> to vector<12x32xf32>
    %1162 = arith.subf %1145, %1161 : vector<12x32xf32>
    %cst_474 = arith.constant 9.99999996E-13 : f32
    %1163 = vector.broadcast %cst_474 : f32 to vector<12x1xf32>
    %1164 = arith.addf %1160, %1163 : vector<12x1xf32>
    %1165 = math.rsqrt %1164 : vector<12x1xf32>
    %1166 = vector.broadcast %1165 : vector<12x1xf32> to vector<12x32xf32>
    %1167 = arith.mulf %1162, %1166 : vector<12x32xf32>
    %1168 = vector.broadcast %1147 : vector<1x32xf32> to vector<12x32xf32>
    %1169 = arith.mulf %1168, %1167 : vector<12x32xf32>
    %1170 = vector.broadcast %1149 : vector<1x32xf32> to vector<12x32xf32>
    %1171 = arith.addf %1169, %1170 : vector<12x32xf32>
    %c1_475 = arith.constant 1 : index
    %c0_476 = arith.constant 0 : index
    %c0_477 = arith.constant 0 : index
    %1172 = vector.load %arg20[%c1_475, %c0_476, %c0_477] : memref<2x32x64xf32, #tpu.memory_space<vmem>>, vector<1x32x64xf32>
    %1173 = vector.shape_cast %1172 : vector<1x32x64xf32> to vector<32x64xf32>
    %cst_478 = arith.constant dense<0.000000e+00> : vector<16x64xf32>
    %1174 = tpu.matmul %920, %1173, %cst_478 {dimension_numbers = #tpu.dot_dimension_numbers<[1], [0], [0], [1], [0, 0, 1, 1], [], []>} : vector<16x32xf32>, vector<32x64xf32>, vector<16x64xf32> -> vector<16x64xf32>
    %c1_479 = arith.constant 1 : index
    %c0_480 = arith.constant 0 : index
    %c0_481 = arith.constant 0 : index
    %1175 = vector.load %arg21[%c1_479, %c0_480, %c0_481] : memref<2x1x64xf32, #tpu.memory_space<vmem>>, vector<1x1x64xf32>
    %1176 = vector.shape_cast %1175 : vector<1x1x64xf32> to vector<1x64xf32>
    %1177 = vector.broadcast %1176 : vector<1x64xf32> to vector<16x64xf32>
    %1178 = arith.addf %1174, %1177 : vector<16x64xf32>
    %cst_482 = arith.constant 5.000000e-01 : f32
    %1179 = vector.broadcast %cst_482 : f32 to vector<16x64xf32>
    %1180 = arith.mulf %1178, %1179 : vector<16x64xf32>
    %cst_483 = arith.constant 0.707106769 : f32
    %1181 = vector.broadcast %cst_483 : f32 to vector<16x64xf32>
    %1182 = arith.mulf %1178, %1181 : vector<16x64xf32>
    %cst_484 = arith.constant 0.000000e+00 : f32
    %1183 = vector.broadcast %cst_484 : f32 to vector<16x64xf32>
    %1184 = arith.cmpf oge, %1182, %1183 : vector<16x64xf32>
    %cst_485 = arith.constant 1.000000e+00 : f32
    %cst_486 = arith.constant -1.000000e+00 : f32
    %1185 = vector.broadcast %cst_485 : f32 to vector<16x64xf32>
    %1186 = vector.broadcast %cst_486 : f32 to vector<16x64xf32>
    %1187 = arith.select %1184, %1185, %1186 : vector<16x64xi1>, vector<16x64xf32>
    %1188 = math.absf %1182 : vector<16x64xf32>
    %cst_487 = arith.constant 0.327591091 : f32
    %1189 = vector.broadcast %cst_487 : f32 to vector<16x64xf32>
    %1190 = arith.mulf %1189, %1188 : vector<16x64xf32>
    %cst_488 = arith.constant 1.000000e+00 : f32
    %1191 = vector.broadcast %cst_488 : f32 to vector<16x64xf32>
    %1192 = arith.addf %1191, %1190 : vector<16x64xf32>
    %cst_489 = arith.constant 1.000000e+00 : f32
    %1193 = vector.broadcast %cst_489 : f32 to vector<16x64xf32>
    %1194 = arith.divf %1193, %1192 : vector<16x64xf32>
    %cst_490 = arith.constant 1.06140542 : f32
    %1195 = vector.broadcast %cst_490 : f32 to vector<16x64xf32>
    %1196 = arith.mulf %1195, %1194 : vector<16x64xf32>
    %cst_491 = arith.constant -1.45315206 : f32
    %1197 = vector.broadcast %cst_491 : f32 to vector<16x64xf32>
    %1198 = arith.addf %1196, %1197 : vector<16x64xf32>
    %1199 = arith.mulf %1198, %1194 : vector<16x64xf32>
    %cst_492 = arith.constant 1.42141378 : f32
    %1200 = vector.broadcast %cst_492 : f32 to vector<16x64xf32>
    %1201 = arith.addf %1199, %1200 : vector<16x64xf32>
    %1202 = arith.mulf %1201, %1194 : vector<16x64xf32>
    %cst_493 = arith.constant -0.284496725 : f32
    %1203 = vector.broadcast %cst_493 : f32 to vector<16x64xf32>
    %1204 = arith.addf %1202, %1203 : vector<16x64xf32>
    %1205 = arith.mulf %1204, %1194 : vector<16x64xf32>
    %cst_494 = arith.constant 0.254829586 : f32
    %1206 = vector.broadcast %cst_494 : f32 to vector<16x64xf32>
    %1207 = arith.addf %1205, %1206 : vector<16x64xf32>
    %1208 = arith.mulf %1207, %1194 : vector<16x64xf32>
    %cst_495 = arith.constant 0.000000e+00 : f32
    %1209 = vector.broadcast %cst_495 : f32 to vector<16x64xf32>
    %1210 = arith.subf %1209, %1188 : vector<16x64xf32>
    %1211 = arith.mulf %1210, %1188 : vector<16x64xf32>
    %1212 = math.exp %1211 : vector<16x64xf32>
    %1213 = arith.mulf %1208, %1212 : vector<16x64xf32>
    %cst_496 = arith.constant 1.000000e+00 : f32
    %1214 = vector.broadcast %cst_496 : f32 to vector<16x64xf32>
    %1215 = arith.subf %1214, %1213 : vector<16x64xf32>
    %1216 = arith.mulf %1187, %1215 : vector<16x64xf32>
    %cst_497 = arith.constant 1.000000e+00 : f32
    %1217 = vector.broadcast %cst_497 : f32 to vector<16x64xf32>
    %1218 = arith.addf %1217, %1216 : vector<16x64xf32>
    %1219 = arith.mulf %1180, %1218 : vector<16x64xf32>
    %c1_498 = arith.constant 1 : index
    %c0_499 = arith.constant 0 : index
    %c0_500 = arith.constant 0 : index
    %1220 = vector.load %arg22[%c1_498, %c0_499, %c0_500] : memref<2x64x32xf32, #tpu.memory_space<vmem>>, vector<1x64x32xf32>
    %1221 = vector.shape_cast %1220 : vector<1x64x32xf32> to vector<64x32xf32>
    %cst_501 = arith.constant dense<0.000000e+00> : vector<16x32xf32>
    %1222 = tpu.matmul %1219, %1221, %cst_501 {dimension_numbers = #tpu.dot_dimension_numbers<[1], [0], [0], [1], [0, 0, 1, 1], [], []>} : vector<16x64xf32>, vector<64x32xf32>, vector<16x32xf32> -> vector<16x32xf32>
    %c1_502 = arith.constant 1 : index
    %c0_503 = arith.constant 0 : index
    %c0_504 = arith.constant 0 : index
    %1223 = vector.load %arg23[%c1_502, %c0_503, %c0_504] : memref<2x1x32xf32, #tpu.memory_space<vmem>>, vector<1x1x32xf32>
    %1224 = vector.shape_cast %1223 : vector<1x1x32xf32> to vector<1x32xf32>
    %1225 = vector.broadcast %1224 : vector<1x32xf32> to vector<16x32xf32>
    %1226 = arith.addf %1222, %1225 : vector<16x32xf32>
    %1227 = arith.addf %1226, %920 : vector<16x32xf32>
    %c1_505 = arith.constant 1 : index
    %c0_506 = arith.constant 0 : index
    %c0_507 = arith.constant 0 : index
    %1228 = vector.load %arg24[%c1_505, %c0_506, %c0_507] : memref<2x1x32xf32, #tpu.memory_space<vmem>>, vector<1x1x32xf32>
    %1229 = vector.shape_cast %1228 : vector<1x1x32xf32> to vector<1x32xf32>
    %c1_508 = arith.constant 1 : index
    %c0_509 = arith.constant 0 : index
    %c0_510 = arith.constant 0 : index
    %1230 = vector.load %arg25[%c1_508, %c0_509, %c0_510] : memref<2x1x32xf32, #tpu.memory_space<vmem>>, vector<1x1x32xf32>
    %1231 = vector.shape_cast %1230 : vector<1x1x32xf32> to vector<1x32xf32>
    %cst_511 = arith.constant dense<0.000000e+00> : vector<16xf32>
    %1232 = vector.multi_reduction <add>, %1227, %cst_511 [1] : vector<16x32xf32> to vector<16xf32>
    %1233 = vector.shape_cast %1232 : vector<16xf32> to vector<16x1xf32>
    %cst_512 = arith.constant 3.200000e+01 : f32
    %1234 = vector.broadcast %cst_512 : f32 to vector<16x1xf32>
    %1235 = arith.divf %1233, %1234 : vector<16x1xf32>
    %1236 = vector.broadcast %1235 : vector<16x1xf32> to vector<16x32xf32>
    %1237 = arith.subf %1227, %1236 : vector<16x32xf32>
    %1238 = arith.mulf %1237, %1237 : vector<16x32xf32>
    %cst_513 = arith.constant dense<0.000000e+00> : vector<16xf32>
    %1239 = vector.multi_reduction <add>, %1238, %cst_513 [1] : vector<16x32xf32> to vector<16xf32>
    %1240 = vector.shape_cast %1239 : vector<16xf32> to vector<16x1xf32>
    %cst_514 = arith.constant 3.200000e+01 : f32
    %1241 = vector.broadcast %cst_514 : f32 to vector<16x1xf32>
    %1242 = arith.divf %1240, %1241 : vector<16x1xf32>
    %1243 = vector.broadcast %1235 : vector<16x1xf32> to vector<16x32xf32>
    %1244 = arith.subf %1227, %1243 : vector<16x32xf32>
    %cst_515 = arith.constant 9.99999996E-13 : f32
    %1245 = vector.broadcast %cst_515 : f32 to vector<16x1xf32>
    %1246 = arith.addf %1242, %1245 : vector<16x1xf32>
    %1247 = math.rsqrt %1246 : vector<16x1xf32>
    %1248 = vector.broadcast %1247 : vector<16x1xf32> to vector<16x32xf32>
    %1249 = arith.mulf %1244, %1248 : vector<16x32xf32>
    %1250 = vector.broadcast %1229 : vector<1x32xf32> to vector<16x32xf32>
    %1251 = arith.mulf %1250, %1249 : vector<16x32xf32>
    %1252 = vector.broadcast %1231 : vector<1x32xf32> to vector<16x32xf32>
    %1253 = arith.addf %1251, %1252 : vector<16x32xf32>
    %c1_516 = arith.constant 1 : index
    %c0_517 = arith.constant 0 : index
    %c0_518 = arith.constant 0 : index
    %1254 = vector.load %arg26[%c1_516, %c0_517, %c0_518] : memref<2x32x64xf32, #tpu.memory_space<vmem>>, vector<1x32x64xf32>
    %1255 = vector.shape_cast %1254 : vector<1x32x64xf32> to vector<32x64xf32>
    %cst_519 = arith.constant dense<0.000000e+00> : vector<12x64xf32>
    %1256 = tpu.matmul %1171, %1255, %cst_519 {dimension_numbers = #tpu.dot_dimension_numbers<[1], [0], [0], [1], [0, 0, 1, 1], [], []>} : vector<12x32xf32>, vector<32x64xf32>, vector<12x64xf32> -> vector<12x64xf32>
    %c1_520 = arith.constant 1 : index
    %c0_521 = arith.constant 0 : index
    %c0_522 = arith.constant 0 : index
    %1257 = vector.load %arg27[%c1_520, %c0_521, %c0_522] : memref<2x1x64xf32, #tpu.memory_space<vmem>>, vector<1x1x64xf32>
    %1258 = vector.shape_cast %1257 : vector<1x1x64xf32> to vector<1x64xf32>
    %1259 = vector.broadcast %1258 : vector<1x64xf32> to vector<12x64xf32>
    %1260 = arith.addf %1256, %1259 : vector<12x64xf32>
    %cst_523 = arith.constant 5.000000e-01 : f32
    %1261 = vector.broadcast %cst_523 : f32 to vector<12x64xf32>
    %1262 = arith.mulf %1260, %1261 : vector<12x64xf32>
    %cst_524 = arith.constant 0.707106769 : f32
    %1263 = vector.broadcast %cst_524 : f32 to vector<12x64xf32>
    %1264 = arith.mulf %1260, %1263 : vector<12x64xf32>
    %cst_525 = arith.constant 0.000000e+00 : f32
    %1265 = vector.broadcast %cst_525 : f32 to vector<12x64xf32>
    %1266 = arith.cmpf oge, %1264, %1265 : vector<12x64xf32>
    %cst_526 = arith.constant 1.000000e+00 : f32
    %cst_527 = arith.constant -1.000000e+00 : f32
    %1267 = vector.broadcast %cst_526 : f32 to vector<12x64xf32>
    %1268 = vector.broadcast %cst_527 : f32 to vector<12x64xf32>
    %1269 = arith.select %1266, %1267, %1268 : vector<12x64xi1>, vector<12x64xf32>
    %1270 = math.absf %1264 : vector<12x64xf32>
    %cst_528 = arith.constant 0.327591091 : f32
    %1271 = vector.broadcast %cst_528 : f32 to vector<12x64xf32>
    %1272 = arith.mulf %1271, %1270 : vector<12x64xf32>
    %cst_529 = arith.constant 1.000000e+00 : f32
    %1273 = vector.broadcast %cst_529 : f32 to vector<12x64xf32>
    %1274 = arith.addf %1273, %1272 : vector<12x64xf32>
    %cst_530 = arith.constant 1.000000e+00 : f32
    %1275 = vector.broadcast %cst_530 : f32 to vector<12x64xf32>
    %1276 = arith.divf %1275, %1274 : vector<12x64xf32>
    %cst_531 = arith.constant 1.06140542 : f32
    %1277 = vector.broadcast %cst_531 : f32 to vector<12x64xf32>
    %1278 = arith.mulf %1277, %1276 : vector<12x64xf32>
    %cst_532 = arith.constant -1.45315206 : f32
    %1279 = vector.broadcast %cst_532 : f32 to vector<12x64xf32>
    %1280 = arith.addf %1278, %1279 : vector<12x64xf32>
    %1281 = arith.mulf %1280, %1276 : vector<12x64xf32>
    %cst_533 = arith.constant 1.42141378 : f32
    %1282 = vector.broadcast %cst_533 : f32 to vector<12x64xf32>
    %1283 = arith.addf %1281, %1282 : vector<12x64xf32>
    %1284 = arith.mulf %1283, %1276 : vector<12x64xf32>
    %cst_534 = arith.constant -0.284496725 : f32
    %1285 = vector.broadcast %cst_534 : f32 to vector<12x64xf32>
    %1286 = arith.addf %1284, %1285 : vector<12x64xf32>
    %1287 = arith.mulf %1286, %1276 : vector<12x64xf32>
    %cst_535 = arith.constant 0.254829586 : f32
    %1288 = vector.broadcast %cst_535 : f32 to vector<12x64xf32>
    %1289 = arith.addf %1287, %1288 : vector<12x64xf32>
    %1290 = arith.mulf %1289, %1276 : vector<12x64xf32>
    %cst_536 = arith.constant 0.000000e+00 : f32
    %1291 = vector.broadcast %cst_536 : f32 to vector<12x64xf32>
    %1292 = arith.subf %1291, %1270 : vector<12x64xf32>
    %1293 = arith.mulf %1292, %1270 : vector<12x64xf32>
    %1294 = math.exp %1293 : vector<12x64xf32>
    %1295 = arith.mulf %1290, %1294 : vector<12x64xf32>
    %cst_537 = arith.constant 1.000000e+00 : f32
    %1296 = vector.broadcast %cst_537 : f32 to vector<12x64xf32>
    %1297 = arith.subf %1296, %1295 : vector<12x64xf32>
    %1298 = arith.mulf %1269, %1297 : vector<12x64xf32>
    %cst_538 = arith.constant 1.000000e+00 : f32
    %1299 = vector.broadcast %cst_538 : f32 to vector<12x64xf32>
    %1300 = arith.addf %1299, %1298 : vector<12x64xf32>
    %1301 = arith.mulf %1262, %1300 : vector<12x64xf32>
    %c1_539 = arith.constant 1 : index
    %c0_540 = arith.constant 0 : index
    %c0_541 = arith.constant 0 : index
    %1302 = vector.load %arg28[%c1_539, %c0_540, %c0_541] : memref<2x64x32xf32, #tpu.memory_space<vmem>>, vector<1x64x32xf32>
    %1303 = vector.shape_cast %1302 : vector<1x64x32xf32> to vector<64x32xf32>
    %cst_542 = arith.constant dense<0.000000e+00> : vector<12x32xf32>
    %1304 = tpu.matmul %1301, %1303, %cst_542 {dimension_numbers = #tpu.dot_dimension_numbers<[1], [0], [0], [1], [0, 0, 1, 1], [], []>} : vector<12x64xf32>, vector<64x32xf32>, vector<12x32xf32> -> vector<12x32xf32>
    %c1_543 = arith.constant 1 : index
    %c0_544 = arith.constant 0 : index
    %c0_545 = arith.constant 0 : index
    %1305 = vector.load %arg29[%c1_543, %c0_544, %c0_545] : memref<2x1x32xf32, #tpu.memory_space<vmem>>, vector<1x1x32xf32>
    %1306 = vector.shape_cast %1305 : vector<1x1x32xf32> to vector<1x32xf32>
    %1307 = vector.broadcast %1306 : vector<1x32xf32> to vector<12x32xf32>
    %1308 = arith.addf %1304, %1307 : vector<12x32xf32>
    %1309 = arith.addf %1308, %1171 : vector<12x32xf32>
    %c1_546 = arith.constant 1 : index
    %c0_547 = arith.constant 0 : index
    %c0_548 = arith.constant 0 : index
    %1310 = vector.load %arg30[%c1_546, %c0_547, %c0_548] : memref<2x1x32xf32, #tpu.memory_space<vmem>>, vector<1x1x32xf32>
    %1311 = vector.shape_cast %1310 : vector<1x1x32xf32> to vector<1x32xf32>
    %c1_549 = arith.constant 1 : index
    %c0_550 = arith.constant 0 : index
    %c0_551 = arith.constant 0 : index
    %1312 = vector.load %arg31[%c1_549, %c0_550, %c0_551] : memref<2x1x32xf32, #tpu.memory_space<vmem>>, vector<1x1x32xf32>
    %1313 = vector.shape_cast %1312 : vector<1x1x32xf32> to vector<1x32xf32>
    %cst_552 = arith.constant dense<0.000000e+00> : vector<12xf32>
    %1314 = vector.multi_reduction <add>, %1309, %cst_552 [1] : vector<12x32xf32> to vector<12xf32>
    %1315 = vector.shape_cast %1314 : vector<12xf32> to vector<12x1xf32>
    %cst_553 = arith.constant 3.200000e+01 : f32
    %1316 = vector.broadcast %cst_553 : f32 to vector<12x1xf32>
    %1317 = arith.divf %1315, %1316 : vector<12x1xf32>
    %1318 = vector.broadcast %1317 : vector<12x1xf32> to vector<12x32xf32>
    %1319 = arith.subf %1309, %1318 : vector<12x32xf32>
    %1320 = arith.mulf %1319, %1319 : vector<12x32xf32>
    %cst_554 = arith.constant dense<0.000000e+00> : vector<12xf32>
    %1321 = vector.multi_reduction <add>, %1320, %cst_554 [1] : vector<12x32xf32> to vector<12xf32>
    %1322 = vector.shape_cast %1321 : vector<12xf32> to vector<12x1xf32>
    %cst_555 = arith.constant 3.200000e+01 : f32
    %1323 = vector.broadcast %cst_555 : f32 to vector<12x1xf32>
    %1324 = arith.divf %1322, %1323 : vector<12x1xf32>
    %1325 = vector.broadcast %1317 : vector<12x1xf32> to vector<12x32xf32>
    %1326 = arith.subf %1309, %1325 : vector<12x32xf32>
    %cst_556 = arith.constant 9.99999996E-13 : f32
    %1327 = vector.broadcast %cst_556 : f32 to vector<12x1xf32>
    %1328 = arith.addf %1324, %1327 : vector<12x1xf32>
    %1329 = math.rsqrt %1328 : vector<12x1xf32>
    %1330 = vector.broadcast %1329 : vector<12x1xf32> to vector<12x32xf32>
    %1331 = arith.mulf %1326, %1330 : vector<12x32xf32>
    %1332 = vector.broadcast %1311 : vector<1x32xf32> to vector<12x32xf32>
    %1333 = arith.mulf %1332, %1331 : vector<12x32xf32>
    %1334 = vector.broadcast %1313 : vector<1x32xf32> to vector<12x32xf32>
    %1335 = arith.addf %1333, %1334 : vector<12x32xf32>
    %c0_557 = arith.constant 0 : index
    %c0_558 = arith.constant 0 : index
    %1336 = vector.load %arg32[%c0_557, %c0_558] : memref<16x32xf32, #tpu.memory_space<vmem>>, vector<16x32xf32>
    tpu.vector_store %arg32[%c0_557, %c0_558], %1253 {strides = array<i32>} : memref<16x32xf32, #tpu.memory_space<vmem>>, vector<16x32xf32>,
    %c0_559 = arith.constant 0 : index
    %c0_560 = arith.constant 0 : index
    %1337 = vector.load %arg33[%c0_559, %c0_560] : memref<12x32xf32, #tpu.memory_space<vmem>>, vector<12x32xf32>
    tpu.vector_store %arg33[%c0_559, %c0_560], %1335 {strides = array<i32>} : memref<12x32xf32, #tpu.memory_space<vmem>>, vector<12x32xf32>,
    return
  }
}

</mosaic_0001>

<bundles_post_ra>
// kernel: bert_encoder.1
= control target key start
LH: loop header
LB: loop body
LE: loop exit
PB: predicated region body
PF: predicated region fallthrough
CT: control target
= control target key end

     0   :  { %s12832_s6 = smov 1   ;;  %s12833_s10 = smov 2   ;;  %s14662_s0 = inlined_call_operand.smem [shape: u32[34], index: -1, kind: input, shape index: {}] }
   0x1   :  { %s12897_s5 = sld [smem:[%s14662_s0]]   ;;  %s12834_s14 = smov 3  }
   0x2   :  { %s12902_s9 = sld [smem:[%s14662_s0 + %s12832_s6]]   ;;  %s12835_s18 = smov 4  }
   0x3   :  { %s12907_s13 = sld [smem:[%s14662_s0 + %s12833_s10]]   ;;  %s12836_s22 = smov 5  }
   0x4   :  { %s12912_s17 = sld [smem:[%s14662_s0 + %s12834_s14]]   ;;  %s12837_s26 = smov 6  }
   0x5   :  { %s12917_s21 = sld [smem:[%s14662_s0 + %s12835_s18]]   ;;  %s12838_s30 = smov 7  }
   0x6   :  { %s12922_s25 = sld [smem:[%s14662_s0 + %s12836_s22]]   ;;  %s12839_s4 = smov 8  }
   0x7   :  { %s12927_s29 = sld [smem:[%s14662_s0 + %s12837_s26]]   ;;  %s12840_s10 = smov 9  }
   0x8   :  { %s12932_s3 = sld [smem:[%s14662_s0 + %s12838_s30]]   ;;  %s12841_s15 = smov 10  }
   0x9   :  { %s12937_s8 = sld [smem:[%s14662_s0 + %s12839_s4]]   ;;  %s12842_s20 = smov 11  }
   0xa   :  { %14717 = sst [smem:[#allocation14_spill]] %s12912_s17  ;;  %s12843_s26 = smov 12  }
   0xb   :  { %s12942_s14 = sld [smem:[%s14662_s0 + %s12840_s10]]   ;;  %s12844_s1 = smov 13  }
   0xc   :  { %s12947_s19 = sld [smem:[%s14662_s0 + %s12841_s15]]   ;;  %s12845_s7 = smov 14  }
   0xd   :  { %s12952_s24 = sld [smem:[%s14662_s0 + %s12842_s20]]   ;;  %s12846_s15 = smov 15  }
   0xe   :  { %s12957_s30 = sld [smem:[%s14662_s0 + %s12843_s26]]   ;;  %s12847_s22 = smov 16  }
   0xf   :  { %s12962_s6 = sld [smem:[%s14662_s0 + %s12844_s1]]   ;;  %s12848_s28 = smov 17  }
  0x10   :  { %s12967_s12 = sld [smem:[%s14662_s0 + %s12845_s7]]   ;;  %s12849_s7 = smov 18  }
  0x11   :  { %14718 = sst [smem:[#allocation15_spill]] %s12942_s14 }
  0x12   :  { %14719 = sst [smem:[#allocation16_spill]] %s12947_s19 }
  0x13   :  { %14720 = sst [smem:[#allocation17_spill]] %s12952_s24 }
  0x14   :  { %s12972_s20 = sld [smem:[%s14662_s0 + %s12846_s15]]   ;;  %s12850_s15 = smov 19  }
  0x15   :  { %s12977_s27 = sld [smem:[%s14662_s0 + %s12847_s22]]   ;;  %s12851_s22 = smov 20  }
  0x16   :  { %s12982_s4 = sld [smem:[%s14662_s0 + %s12848_s28]]   ;;  %s12852_s28 = smov 21  }
  0x17   :  { %s12987_s24 = sld [smem:[%s14662_s0 + %s12849_s7]]   ;;  %s12853_s7 = smov 22  }
  0x18   :  { %s12992_s19 = sld [smem:[%s14662_s0 + %s12850_s15]]   ;;  %s12854_s15 = smov 23  }
  0x19   :  { %s12997_s17 = sld [smem:[%s14662_s0 + %s12851_s22]]   ;;  %s12855_s22 = smov 24  }
  0x1a   :  { %14721 = sst [smem:[#allocation18_spill]] %s12972_s20 }
  0x1b   :  { %s13017_s20 = sld [smem:[%s14662_s0 + %s12855_s22]]   ;;  %s12859_s22 = smov 28  }
  0x1c   :  { %14722 = sst [smem:[#allocation19_spill]] %s12982_s4 }
  0x1d   :  { %14723 = sst [smem:[#allocation20_spill]] %s12987_s24 }
  0x1e   :  { %14724 = sst [smem:[#allocation21_spill]] %s12992_s19 }
  0x1f   :  { %s13002_s4 = sld [smem:[%s14662_s0 + %s12852_s28]]   ;;  %s12856_s28 = smov 25  }
  0x20   :  { %s13007_s24 = sld [smem:[%s14662_s0 + %s12853_s7]]   ;;  %s12857_s7 = smov 26  }
  0x21   :  { %s13012_s19 = sld [smem:[%s14662_s0 + %s12854_s15]]   ;;  %s12858_s15 = smov 27  }
  0x22   :  { %14728 = sst [smem:[#allocation25_spill]] %s13017_s20 }
  0x23   :  { %s13037_s20 = sld [smem:[%s14662_s0 + %s12859_s22]]   ;;  %s12863_s22 = smov 32  }
  0x25   :  { %14725 = sst [smem:[#allocation22_spill]] %s13002_s4 }
  0x26   :  { %14726 = sst [smem:[#allocation23_spill]] %s13007_s24 }
  0x27   :  { %14727 = sst [smem:[#allocation24_spill]] %s13012_s19 }
  0x28   :  { %s13022_s4 = sld [smem:[%s14662_s0 + %s12856_s28]]   ;;  %s12860_s28 = smov 29  }
  0x29   :  { %s13027_s24 = sld [smem:[%s14662_s0 + %s12857_s7]]   ;;  %s12861_s7 = smov 30  }
  0x2a   :  { %s13032_s19 = sld [smem:[%s14662_s0 + %s12858_s15]]   ;;  %s12862_s15 = smov 31  }
  0x2b   :  { %14731 = sst [smem:[#allocation28_spill]] %s13037_s20 }
  0x2c   :  { %s13047_s14 = sld [smem:[%s14662_s0 + %s12861_s7]]  }
  0x2d   :  { %s13057_s20 = sld [smem:[%s14662_s0 + %s12863_s22]]  }
  0x2e   :  { %14729 = sst [smem:[#allocation26_spill]] %s13022_s4 }
  0x2f   :  { %s13042_s4 = sld [smem:[%s14662_s0 + %s12860_s28]]   ;;  %s12864_s28 = smov 33  }
  0x30   :  { %14730 = sst [smem:[#allocation27_spill]] %s13032_s19 }
  0x31   :  { %s13052_s19 = sld [smem:[%s14662_s0 + %s12862_s15]]  }
  0x32   :  { %14733 = sst [smem:[#allocation30_spill]] %s13047_s14 }
  0x33   :  { %14735 = sst [smem:[#allocation32_spill]] %s13057_s20 }
  0x35   :  { %14732 = sst [smem:[#allocation29_spill]] %s13042_s4 }
  0x36   :  { %s13062_s4 = sld [smem:[%s14662_s0 + %s12864_s28]]  }
  0x37   :  { %14734 = sst [smem:[#allocation31_spill]] %s13052_s19 }
  0x3c   :  { %14736 = sst [smem:[#allocation33_spill]] %s13062_s4 }
  0x3d   :  { %73 = vsyncpa [#allocation5], 0 }
  0x3e   :  { %74 = vsyncpa [#allocation8], 0 }
  0x3f   :  { %75 = vsyncpa [#allocation6], 0  ;;  %s12865_s7 = smov [#allocation7]   ;;  %s12866_s11 = smov [#allocation4]  }
  0x40   :  { %s131_s10 = sshll.u32 %s12865_s7, 4  ;;  %s113_s15 = sshll.u32 %s12866_s11, 4  ;;  %s132_s10 = int_to_ptr.vmem [resolvable:$true] %s131_s10  ;;  %s114_s15 = int_to_ptr.vmem [resolvable:$true] %s113_s15 }
  0x41   :  { %s12754_s16 = scalar_lea.vmem %s132_s10, 1024  ;;  %p12759_p1 = scmp.lt.s32.totalorder %s132_s10, %s132_s10 }
  0x42   :  { %p12755_p0 = scmp.ne.s32.totalorder %s132_s10, %s12754_s16  ;;  %p12760_p2 = scmp.lt.s32.totalorder %s12754_s16, %s12754_s16 }
  0x44   :  { %p12761_p3 = por %p12760_p2, %p12759_p1 }
  0x46   :  { %p12762_p4 = pnand %p12761_p3, %p12755_p0 }
  0x48   :  { %12765 = shalt.err (!%p12762_p4)
}
  0x49   :  { %s14678_s18 = smov 128   ;;  %s14714_s0 = smov 8  }
  0x4a   :  { %137 = dma.hbm_to_vmem [thread:$0]  %s12997_s17, 1024, %s132_s10, [#allocation8], %s14678_s18, %s14678_s18, %s14714_s0  }
  0x4b   :  { %s12774_s22 = scalar_lea.vmem %s114_s15, 1024  ;;  %p12779_p6 = scmp.lt.s32.totalorder %s114_s15, %s114_s15 }
  0x4c   :  { %p12775_p5 = scmp.ne.s32.totalorder %s114_s15, %s12774_s22  ;;  %p12780_p7 = scmp.lt.s32.totalorder %s12774_s22, %s12774_s22 }
  0x4e   :  { %p12781_p8 = por %p12780_p7, %p12779_p6 }
  0x50   :  { %p12782_p9 = pnand %p12781_p8, %p12775_p5 }
  0x52   :  { %12785 = shalt.err (!%p12782_p9)
}
  0x53   :  { %119 = dma.hbm_to_vmem [thread:$0]  %s12977_s27, 1024, %s114_s15, [#allocation5], %s14678_s18, %s14678_s18, %s14714_s0  }
  0x54   :  { %s12869_s23 = smov [#allocation9]  }
  0x55   :  { %s153_s26 = sshll.u32 %s12869_s23, 4  ;;  %s154_s26 = int_to_ptr.vmem [resolvable:$true] %s153_s26 }
  0x56   :  { %s12794_s28 = scalar_lea.vmem %s154_s26, 1024  ;;  %p12799_p11 = scmp.lt.s32.totalorder %s154_s26, %s154_s26 }
  0x57   :  { %p12795_p10 = scmp.ne.s32.totalorder %s154_s26, %s12794_s28  ;;  %p12800_p12 = scmp.lt.s32.totalorder %s12794_s28, %s12794_s28 }
  0x59   :  { %p12801_p13 = por %p12800_p12, %p12799_p11 }
  0x5b   :  { %p12802_p0 = pnand %p12801_p13, %p12795_p10 }
  0x5d   :  { %12805 = shalt.err (!%p12802_p0)
}
  0x5e   :  { %159 = dma.hbm_to_vmem [thread:$0]  %s13027_s24, 1024, %s154_s26, [#allocation8], %s14678_s18, %s14678_s18, %s14714_s0  }
  0x5f   :  { %12826 = dma.done.wait [#allocation5], 1024  }
  0x60   :  { %12827 = vsyncadd [#allocation5], 4294966272 }
  0x61   :  { %12828 = dma.done.wait [#allocation8], 2048  }
  0x62   :  { %12829 = vsyncadd [#allocation8], 4294965248  ;;  %vm196_vm0 = vcmask 261120   ;;  %v188_v0 = vld [vmem:[%s12917_s21 + $0x18] sm:$0xff]  ;;  %v187_v1 = vld [vmem:[%s12917_s21 + $0x10] sm:$0xff]  ;;  %v12870_v12 = vmov 0.0   ;;  %v531_v29 = vlaneseq }
  0x63   :  { %11697 = vmatprep.subr.mxu0 %v188_v0  ;;  %v179_v2 = vld [vmem:[%s12897_s5] sm:$0xff]  ;;  %v186_v3 = vld [vmem:[%s12917_s21 + $0x8] sm:$0xff]  ;;  %v281_v4 = vld [vmem:[%s12927_s29 + $0x18] sm:$0xff]  ;;  %vm12871_vm1 = vmmov 0   ;;  %s14679_s17 = smov 96   ;;  %s14710_s24 = smov 32  }
  0x64   :  { %11698 = vmatpush3.msra.mxu0 %v188_v0  ;;  %11705 = vmatprep.mubr.msk.f32.mxu0 %vm196_vm0, %v179_v2  ;;  %v280_v5 = vld [vmem:[%s12927_s29 + $0x10] sm:$0xff]  ;;  %v185_v6 = vld [vmem:[%s12917_s21] sm:$0xff]  ;;  %v279_v7 = vld [vmem:[%s12927_s29 + $0x8] sm:$0xff]  ;;  %vm373_vm2 = vcmask 64512   ;;  %v13133_v30 = vshrl.u32 %v531_v29, 7  ;;  %vm536_vm3 = vcmask 113664  }
  0x65   :  { %11699 = vmatprep.subr.mxu0 %v187_v1  ;;  %11708 = vmatprep.subr.mxu1 %v281_v4  ;;  %v180_v8 = vld [vmem:[%s12897_s5 + $0x8] sm:$0xff]  ;;  %v278_v9 = vld [vmem:[%s12927_s29] sm:$0xff]  ;;  %s14708_s27 = smov 64   ;;  %s14704_s1 = smov 24   ;;  %vm558_vm4 = vcmask 1045504   ;;  %vm1492_vm5 = vcmask 1041408  }
  0x66   :  { %11700 = vmatpush3.msra.mxu0 %v187_v1  ;;  %11709 = vmatpush3.msra.mxu1 %v281_v4  ;;  %v13088_v10 = vld [vmem:[%s12902_s9] sm:$0xff]  ;;  %v13091_v11 = vld [vmem:[%s12902_s9 + $0x8] sm:$0xf]  ;;  %v533_v31 = vsub.s32 0, %v13133_v30  ;;  %s14702_s2 = smov 88   ;;  %s14700_s7 = smov 56  }
  0x67   :  { %11701 = vmatprep.subr.mxu0 %v186_v3  ;;  %11710 = vmatprep.subr.mxu1 %v280_v5  ;;  %v11015_v13 = vld [vmem:[%s12922_s25] ss:$0 sm:$0xff]  ;;  %s14698_s10 = smov 112   ;;  %s14694_s11 = smov 80   ;;  %vm890_vm6 = vcmask 130112   ;;  %vm1150_vm7 = vcmask 195712  }
  0x68   :  { %11702 = vmatpush3.msra.mxu0 %v186_v3  ;;  %11711 = vmatpush3.msra.mxu1 %v280_v5  ;;  %v11018_v15 = vld [vmem:[%s12932_s3] ss:$0 sm:$0xff]  ;;  %s14691_s15 = smov 16   ;;  %s14689_s16 = smov 48   ;;  %vm1410_vm8 = vcmask 261312   ;;  %vm2923_vm9 = vcmask 48128  }
  0x69   :  { %11703 = vmatprep.subr.mxu0 %v185_v6  ;;  %11712 = vmatprep.subr.mxu1 %v279_v7  ;;  %v13137_v32 = vld [vmem:[%s12907_s13] sm:$0x3]  ;;  %s14706_s13 = smov 120   ;;  %s14687_s22 = smov 104   ;;  %vm2931_vm10 = vcmask 111616   ;;  %vm3029_vm11 = vcmask 62464  }
  0x6a   :  { %11704 = vmatpush3.msra.mxu0 %v185_v6  ;;  %11713 = vmatpush3.msra.mxu1 %v279_v7  ;;  %v13142_v34 = vrot.slane %v13137_v32, %v533_v31  ;;  %s14685_s23 = smov 72   ;;  %s14683_s26 = smov 40   ;;  %vm14697_vm12 = vcmask 128064   ;;  %vm14696_vm13 = vcmask 193664   ;;  %vm14693_vm14 = vcmask 259264  }
  0x6b   :  { %11706 = vmatmul.mubr.msk.f32.vlgmr.msra.gmra.mxu0 %vm196_vm0, %v180_v8  ;;  %11714 = vmatprep.subr.mxu1 %v278_v9  ;;  %s14737_s28 = sld [smem:[#allocation15_spill]]  ;;  %vm4956_vm15 = vcmask 257024   ;;  %s14760_s4 = smov 48  }
  0x6c   :  { %11715 = vmatpush3.msra.mxu1 %v278_v9  ;;  %11716 = vmatprep.mubr.msk.f32.mxu1 %vm196_vm0, %v13088_v10  ;;  %s14738_s18 = sld [smem:[#allocation18_spill]]  ;;  %s14764_s20 = smov 40  }
  0x6d   :  { %11717 = vmatmul.mubr.msk.f32.vlgmr.msra.gmra.mxu1 %vm196_vm0, %v13091_v11  ;;  %11719 = vmatprep.subr.mxu0 %v12870_v12 }
  0x6e   :  { %11736 = vmatprep.subr.mxu1 %v12870_v12  ;;  %11721 = vmatprep.mubr.msk.f32.mxu0 %vm12871_vm1, %v12870_v12 }
  0x6f   :  { %11738 = vmatprep.mubr.msk.f32.mxu1 %vm12871_vm1, %v12870_v12 }
 0x12b   :  { %v11707_v14 = vpop.f32.mrf.mxu0 }
 0x12c   :  { %v13106_v16 = vadd.f32 %v11707_v14, %v11015_v13 }
 0x12d   :  { %v269_v17 = vpop.f32.mrf.mxu0  ;;  %v11718_v18 = vpop.f32.mrf.mxu1 }
 0x12e   :  { %v13108_v19 = vadd.f32 %v11015_v13, %v269_v17  ;;  %v13110_v20 = vadd.f32 %v11718_v18, %v11018_v15 }
 0x12f   :  { %v361_v21 = vpop.f32.mrf.mxu1 }
 0x130   :  { %371 = vrot.lane.b32.xlu0 %v13108_v19, %s14679_s17  ;;  %v13116_v22 = vadd.f32 %v11018_v15, %v361_v21 }
 0x134   :  { %448 = vrot.lane.b32.xlu0 %v13108_v19, %s14710_s24 }
 0x138   :  { %548 = vrot.lane.b32.xlu0 %v13116_v22, %s14710_s24 }
 0x1a2   :  { %v372_v23 = vpop.permute.xlu0 %371 }
 0x1a3   :  { %11720 = vmatpush3.xpose.msk.msra.mxu0 %vm373_vm2, %v372_v23 }
 0x1a4   :  { %11724 = vmatprep.subr.mxu0 %v12870_v12 }
 0x1a6   :  { %11722 = vmatmul.mubr.msk.f32.vlgmr.msra.gmra.mxu0 %vm373_vm2, %v13108_v19  ;;  %v449_v24 = vpop.permute.xlu0 %448 }
 0x1a7   :  { %11725 = vmatpush3.xpose.msk.msra.mxu0 %vm373_vm2, %v13116_v22  ;;  %11726 = vmatprep.mubr.msk.f32.mxu0 %vm12871_vm1, %v12870_v12 }
 0x1a8   :  { %11729 = vmatprep.subr.mxu0 %v12870_v12 }
 0x1aa   :  { %11727 = vmatmul.mubr.msk.f32.vlgmr.msra.gmra.mxu0 %vm373_vm2, %v449_v24  ;;  %v13147_v39 = vpop.permute.xlu0 %548 }
 0x1ab   :  { %11733 = vmatprep.mubr.msk.f32.mxu0 %vm12871_vm1, %v12870_v12 }
 0x266   :  { %v444_v25 = vpop.f32.mrf.mxu0 }
 0x268   :  { %v11723_v26 = vpop.f32.mrf.mxu0 }
 0x26a   :  { %v521_v27 = vpop.f32.mrf.mxu0 }
 0x26b   :  { %526 = vrot.lane.b32.xlu1 %v521_v27, %s14714_s0 }
 0x26c   :  { %v11728_v28 = vpop.f32.mrf.mxu0 }
 0x2dd   :  { %v527_v33 = vpop.permute.xlu1 %526 }
 0x2de   :  { %v529_v35 = vsel %vm373_vm2, %v444_v25, %v527_v33 }
 0x2df   :  { %v530_v36 = vmul.f32 0.35355338, %v529_v35 }
 0x2e1   :  { %v535_v37 = vadd.f32 %v13142_v34, %v530_v36 }
 0x2e3   :  { %v537_v38 = vsel %vm536_vm3, %v535_v37, -inf }
 0x2e4   :  { %538 = vmax.xlane.f32.xlu1 %v537_v38 }
 0x2f5   :  { %552 = vrot.lane.b32.xlu1 %v13147_v39, %s14708_s27 }
 0x2f9   :  { %712 = vrot.lane.b32.xlu1 %v13116_v22, %s14706_s13 }
 0x2fd   :  { %710 = vrot.lane.b32.xlu1 %v13108_v19, %s14704_s1 }
 0x301   :  { %632 = vrot.lane.b32.xlu1 %v13108_v19, %s14706_s13 }
 0x36d   :  { %v539_v40 = vpop.xlane.xlu1 %538 }
 0x36e   :  { %v540_v41 = vsub.f32 %v535_v37, %v539_v40 }
 0x370   :  { %v541_v42 = vmul.f32 1.442695, %v540_v41 }
 0x371   :  { %v553_v43 = vpop.permute.xlu1 %552 }
 0x372   :  { %12550 = vpow2.f32 %v541_v42  ;;  %11730 = vmatpush3.msk.msra.mxu0 %vm558_vm4, %v553_v43 }
 0x373   :  { %11731 = vmatprep.subr.mxu0 %v12870_v12 }
 0x375   :  { %v713_v46 = vpop.permute.xlu1 %712 }
 0x379   :  { %v711_v49 = vpop.permute.xlu1 %710 }
 0x37d   :  { %v633_v51 = vpop.permute.xlu1 %632 }
 0x37f   :  { %v12551_v44 = vpop.eup %12550 }
 0x380   :  { %v543_v45 = vsel %vm536_vm3, %v12551_v44, 0.0 }
 0x381   :  { %544 = vadd.xlane.f32.xlu0 %v543_v45 }
 0x397   :  { %550 = vrot.lane.b32.xlu0 %v13108_v19, %s14708_s27 }
 0x39b   :  { %634 = vrot.lane.b32.xlu0 %v13108_v19, %s14702_s2 }
 0x40a   :  { %v545_v47 = vpop.xlane.xlu0 %544 }
 0x40b   :  { %12552 = vrcp.f32 %v545_v47 }
 0x40e   :  { %v551_v48 = vpop.permute.xlu0 %550 }
 0x40f   :  { %11732 = vmatpush3.msra.mxu0 %v551_v48 }
 0x410   :  { %11741 = vmatprep.subr.mxu0 %v12870_v12 }
 0x412   :  { %v635_v50 = vpop.permute.xlu0 %634 }
 0x413   :  { %11737 = vmatpush3.xpose.msk.msra.mxu1 %vm373_vm2, %v635_v50 }
 0x414   :  { %11746 = vmatprep.subr.mxu1 %v12870_v12 }
 0x416   :  { %11739 = vmatmul.mubr.msk.f32.vlgmr.msra.gmra.mxu1 %vm373_vm2, %v633_v51 }
 0x417   :  { %11750 = vmatprep.mubr.msk.f32.mxu1 %vm12871_vm1, %v12870_v12 }
 0x418   :  { %v12553_v52 = vpop.eup %12552 }
 0x419   :  { %v547_v53 = vmul.f32 %v12553_v52, %v12551_v44 }
 0x41b   :  { %11734 = vmatmul.mubr.msk.f32.vlgmr.msra.gmra.mxu0 %vm536_vm3, %v547_v53 }
 0x41c   :  { %11742 = vmatpush3.xpose.msk.msra.mxu0 %vm373_vm2, %v713_v46  ;;  %11743 = vmatprep.mubr.msk.f32.mxu0 %vm12871_vm1, %v12870_v12 }
 0x41d   :  { %11753 = vmatprep.subr.mxu0 %v12870_v12 }
 0x41f   :  { %11744 = vmatmul.mubr.msk.f32.vlgmr.msra.gmra.mxu0 %vm373_vm2, %v711_v49 }
 0x420   :  { %11755 = vmatprep.mubr.msk.f32.mxu0 %vm12871_vm1, %v12870_v12 }
 0x4d6   :  { %v706_v54 = vpop.f32.mrf.mxu1 }
 0x4d8   :  { %v11740_v55 = vpop.f32.mrf.mxu1 }
 0x4db   :  { %v627_v56 = vpop.f32.mrf.mxu0 }
 0x4dc   :  { %631 = vst.msk [vmem:[#allocation2] sm:$0xff] %vm373_vm2, %v627_v56 }
 0x4dd   :  { %v11735_v57 = vpop.f32.mrf.mxu0 }
 0x4df   :  { %v784_v58 = vpop.f32.mrf.mxu0 }
 0x4e0   :  { %789 = vrot.lane.b32.xlu0 %v784_v58, %s14714_s0 }
 0x4e1   :  { %v11745_v59 = vpop.f32.mrf.mxu0 }
 0x552   :  { %v790_v60 = vpop.permute.xlu0 %789 }
 0x553   :  { %v792_v61 = vsel %vm373_vm2, %v706_v54, %v790_v60 }
 0x554   :  { %v793_v62 = vmul.f32 0.35355338, %v792_v61 }
 0x556   :  { %v794_v63 = vadd.f32 %v793_v62, %v13142_v34 }
 0x558   :  { %v795_v0 = vsel %vm536_vm3, %v794_v63, -inf }
 0x559   :  { %796 = vmax.xlane.f32.xlu1 %v795_v0 }
 0x56a   :  { %806 = vrot.lane.b32.xlu1 %v13108_v19, %s14700_s7 }
 0x56e   :  { %972 = vrot.lane.b32.xlu1 %v13116_v22, %s14698_s10 }
 0x572   :  { %894 = vrot.lane.b32.xlu1 %v13108_v19, %s14694_s11 }
 0x5e2   :  { %v797_v1 = vpop.xlane.xlu1 %796 }
 0x5e3   :  { %v798_v2 = vsub.f32 %v794_v63, %v797_v1 }
 0x5e5   :  { %v799_v3 = vmul.f32 1.442695, %v798_v2 }
 0x5e6   :  { %v807_v4 = vpop.permute.xlu1 %806 }
 0x5e7   :  { %12554 = vpow2.f32 %v799_v3 }
 0x5ea   :  { %v973_v5 = vpop.permute.xlu1 %972 }
 0x5ee   :  { %v895_v6 = vpop.permute.xlu1 %894 }
 0x5ef   :  { %11754 = vmatpush3.xpose.msk.msra.mxu0 %vm373_vm2, %v895_v6 }
 0x5f0   :  { %11763 = vmatprep.subr.mxu0 %v12870_v12 }
 0x5f4   :  { %v12555_v7 = vpop.eup %12554 }
 0x5f5   :  { %v801_v8 = vsel %vm536_vm3, %v12555_v7, 0.0 }
 0x5f6   :  { %802 = vadd.xlane.f32.xlu0 %v801_v8 }
 0x60c   :  { %808 = vrot.lane.b32.xlu0 %v13147_v39, %s14700_s7 }
 0x610   :  { %970 = vrot.lane.b32.xlu0 %v13108_v19, %s14691_s15 }
 0x614   :  { %892 = vrot.lane.b32.xlu0 %v13108_v19, %s14698_s10 }
 0x67f   :  { %v803_v9 = vpop.xlane.xlu0 %802 }
 0x680   :  { %12556 = vrcp.f32 %v803_v9 }
 0x683   :  { %v809_v13 = vpop.permute.xlu0 %808 }
 0x684   :  { %11747 = vmatpush3.msk.msra.mxu1 %vm558_vm4, %v809_v13 }
 0x685   :  { %11748 = vmatprep.subr.mxu1 %v12870_v12 }
 0x686   :  { %11749 = vmatpush3.msra.mxu1 %v807_v4 }
 0x687   :  { %v971_v14 = vpop.permute.xlu0 %970  ;;  %11758 = vmatprep.subr.mxu1 %v12870_v12 }
 0x68b   :  { %v893_v15 = vpop.permute.xlu0 %892 }
 0x68c   :  { %11756 = vmatmul.mubr.msk.f32.vlgmr.msra.gmra.mxu0 %vm373_vm2, %v893_v15 }
 0x68d   :  { %v12557_v17 = vpop.eup %12556  ;;  %11767 = vmatprep.mubr.msk.f32.mxu0 %vm12871_vm1, %v12870_v12 }
 0x68e   :  { %v805_v18 = vmul.f32 %v12557_v17, %v12555_v7  ;;  %v1493_v7 = vrot.slane %v13116_v22, 6 }
 0x690   :  { %11751 = vmatmul.mubr.msk.f32.vlgmr.msra.gmra.mxu1 %vm536_vm3, %v805_v18 }
 0x691   :  { %11759 = vmatpush3.xpose.msk.msra.mxu1 %vm373_vm2, %v973_v5  ;;  %11760 = vmatprep.mubr.msk.f32.mxu1 %vm12871_vm1, %v12870_v12 }
 0x692   :  { %11770 = vmatprep.subr.mxu1 %v12870_v12 }
 0x694   :  { %11761 = vmatmul.mubr.msk.f32.vlgmr.msra.gmra.mxu1 %vm373_vm2, %v971_v14 }
 0x695   :  { %11772 = vmatprep.mubr.msk.f32.mxu1 %vm12871_vm1, %v12870_v12 }
 0x74c   :  { %v966_v21 = vpop.f32.mrf.mxu0 }
 0x74e   :  { %v11757_v23 = vpop.f32.mrf.mxu0 }
 0x74f   :  { %v1578_v23 = vsub.s32 1, %v13133_v30 }
 0x750   :  { %v13212_v24 = vpop.f32.mrf.mxu1 }
 0x752   :  { %v11752_v25 = vpop.f32.mrf.mxu1 }
 0x754   :  { %v1044_v26 = vpop.f32.mrf.mxu1 }
 0x755   :  { %1049 = vrot.lane.b32.xlu1 %v1044_v26, %s14714_s0  ;;  %v13294_v26 = vrot.slane %v13137_v32, %v1578_v23 }
 0x756   :  { %v11762_v27 = vpop.f32.mrf.mxu1 }
 0x759   :  { %1066 = vrot.lane.b32.xlu1 %v13108_v19, %s14689_s16 }
 0x7c7   :  { %v1050_v28 = vpop.permute.xlu1 %1049 }
 0x7c8   :  { %v1052_v29 = vsel %vm373_vm2, %v966_v21, %v1050_v28 }
 0x7c9   :  { %v1053_v33 = vmul.f32 0.35355338, %v1052_v29 }
 0x7cb   :  { %v1054_v35 = vadd.f32 %v1053_v33, %v13142_v34  ;;  %v1067_v42 = vpop.permute.xlu1 %1066 }
 0x7cd   :  { %v1055_v36 = vsel %vm536_vm3, %v1054_v35, -inf }
 0x7ce   :  { %1056 = vmax.xlane.f32.xlu0 %v1055_v36 }
 0x7e4   :  { %1068 = vrot.lane.b32.xlu0 %v13147_v39, %s14689_s16 }
 0x7e8   :  { %1232 = vrot.lane.b32.xlu0 %v13116_v22, %s14687_s22 }
 0x7ec   :  { %1154 = vrot.lane.b32.xlu0 %v13108_v19, %s14685_s23 }
 0x857   :  { %v1057_v37 = vpop.xlane.xlu0 %1056 }
 0x858   :  { %v1058_v38 = vsub.f32 %v1054_v35, %v1057_v37 }
 0x85a   :  { %v1059_v40 = vmul.f32 1.442695, %v1058_v38 }
 0x85b   :  { %v1069_v41 = vpop.permute.xlu0 %1068 }
 0x85c   :  { %12558 = vpow2.f32 %v1059_v40  ;;  %11764 = vmatpush3.msk.msra.mxu0 %vm558_vm4, %v1069_v41 }
 0x85d   :  { %11765 = vmatprep.subr.mxu0 %v12870_v12 }
 0x85e   :  { %11766 = vmatpush3.msra.mxu0 %v1067_v42 }
 0x85f   :  { %v1233_v43 = vpop.permute.xlu0 %1232  ;;  %11775 = vmatprep.subr.mxu0 %v12870_v12 }
 0x863   :  { %v1155_v44 = vpop.permute.xlu0 %1154 }
 0x864   :  { %11771 = vmatpush3.xpose.msk.msra.mxu1 %vm373_vm2, %v1155_v44 }
 0x865   :  { %11780 = vmatprep.subr.mxu1 %v12870_v12 }
 0x869   :  { %v12559_v45 = vpop.eup %12558 }
 0x86a   :  { %v1061_v46 = vsel %vm536_vm3, %v12559_v45, 0.0 }
 0x86b   :  { %1062 = vadd.xlane.f32.xlu1 %v1061_v46 }
 0x87c   :  { %1230 = vrot.lane.b32.xlu1 %v13108_v19, %s14714_s0 }
 0x880   :  { %1152 = vrot.lane.b32.xlu1 %v13108_v19, %s14687_s22 }
 0x8f4   :  { %v1063_v47 = vpop.xlane.xlu1 %1062 }
 0x8f5   :  { %12560 = vrcp.f32 %v1063_v47 }
 0x8f8   :  { %v1231_v48 = vpop.permute.xlu1 %1230 }
 0x8fc   :  { %v1153_v49 = vpop.permute.xlu1 %1152 }
 0x8fd   :  { %11773 = vmatmul.mubr.msk.f32.vlgmr.msra.gmra.mxu1 %vm373_vm2, %v1153_v49 }
 0x8fe   :  { %11784 = vmatprep.mubr.msk.f32.mxu1 %vm12871_vm1, %v12870_v12 }
 0x902   :  { %v12561_v50 = vpop.eup %12560 }
 0x903   :  { %v1065_v51 = vmul.f32 %v12561_v50, %v12559_v45 }
 0x905   :  { %11768 = vmatmul.mubr.msk.f32.vlgmr.msra.gmra.mxu0 %vm536_vm3, %v1065_v51 }
 0x906   :  { %11776 = vmatpush3.xpose.msk.msra.mxu0 %vm373_vm2, %v1233_v43  ;;  %11777 = vmatprep.mubr.msk.f32.mxu0 %vm12871_vm1, %v12870_v12 }
 0x907   :  { %11787 = vmatprep.subr.mxu0 %v12870_v12 }
 0x909   :  { %11778 = vmatmul.mubr.msk.f32.vlgmr.msra.gmra.mxu0 %vm373_vm2, %v1231_v48 }
 0x90a   :  { %11789 = vmatprep.mubr.msk.f32.mxu0 %vm12871_vm1, %v12870_v12 }
 0x9bd   :  { %v1226_v52 = vpop.f32.mrf.mxu1 }
 0x9bf   :  { %v11774_v53 = vpop.f32.mrf.mxu1 }
 0x9c5   :  { %v13247_v54 = vpop.f32.mrf.mxu0 }
 0x9c7   :  { %v11769_v55 = vpop.f32.mrf.mxu0 }
 0x9c9   :  { %v1304_v56 = vpop.f32.mrf.mxu0 }
 0x9ca   :  { %1309 = vrot.lane.b32.xlu0 %v1304_v56, %s14714_s0 }
 0x9cb   :  { %v11779_v57 = vpop.f32.mrf.mxu0 }
 0xa3c   :  { %v1310_v58 = vpop.permute.xlu0 %1309 }
 0xa3d   :  { %v1312_v59 = vsel %vm373_vm2, %v1226_v52, %v1310_v58 }
 0xa3e   :  { %v1313_v60 = vmul.f32 0.35355338, %v1312_v59 }
 0xa40   :  { %v1314_v61 = vadd.f32 %v1313_v60, %v13142_v34 }
 0xa42   :  { %v1315_v62 = vsel %vm536_vm3, %v1314_v61, -inf }
 0xa43   :  { %1316 = vmax.xlane.f32.xlu1 %v1315_v62 }
 0xa54   :  { %1326 = vrot.lane.b32.xlu1 %v13108_v19, %s14683_s26 }
 0xa58   :  { %1489 = vrot.lane.b32.xlu1 %v13106_v16, %s14710_s24 }
 0xacc   :  { %v1317_v63 = vpop.xlane.xlu1 %1316 }
 0xacd   :  { %v1318_v0 = vsub.f32 %v1314_v61, %v1317_v63 }
 0xacf   :  { %v1319_v1 = vmul.f32 1.442695, %v1318_v0 }
 0xad0   :  { %v1327_v5 = vpop.permute.xlu1 %1326 }
 0xad1   :  { %12562 = vpow2.f32 %v1319_v1 }
 0xade   :  { %v12563_v2 = vpop.eup %12562 }
 0xadf   :  { %v1321_v3 = vsel %vm536_vm3, %v12563_v2, 0.0 }
 0xae0   :  { %1322 = vadd.xlane.f32.xlu0 %v1321_v3 }
 0xaf6   :  { %1328 = vrot.lane.b32.xlu0 %v13147_v39, %s14683_s26  ;;  %v1494_v39 = vrot.slane %v13110_v20, 6  ;;  %v1490_v20 = vpop.permute.xlu1 %1489 }
 0xaf8   :  { %v13275_v13 = vsel %vm1492_vm5, %v1493_v7, %v1494_v39 }
 0xafa   :  { %1413 = vrot.lane.b32.xlu0 %v13106_v16, %s14679_s17 }
 0xb69   :  { %v1323_v4 = vpop.xlane.xlu0 %1322 }
 0xb6a   :  { %12564 = vrcp.f32 %v1323_v4 }
 0xb6d   :  { %v1329_v19 = vpop.permute.xlu0 %1328 }
 0xb6e   :  { %11781 = vmatpush3.msk.msra.mxu1 %vm558_vm4, %v1329_v19 }
 0xb6f   :  { %11782 = vmatprep.subr.mxu1 %v12870_v12 }
 0xb70   :  { %11783 = vmatpush3.msra.mxu1 %v1327_v5 }
 0xb71   :  { %v1414_v6 = vpop.permute.xlu0 %1413  ;;  %11792 = vmatprep.subr.mxu1 %v12870_v12 }
 0xb72   :  { %11788 = vmatpush3.xpose.msk.msra.mxu0 %vm373_vm2, %v1414_v6 }
 0xb73   :  { %11797 = vmatprep.subr.mxu0 %v12870_v12 }
 0xb75   :  { %11790 = vmatmul.mubr.msk.f32.vlgmr.msra.gmra.mxu0 %vm373_vm2, %v13106_v16 }
 0xb76   :  { %11801 = vmatprep.mubr.msk.f32.mxu0 %vm12871_vm1, %v12870_v12 }
 0xb77   :  { %v12565_v8 = vpop.eup %12564 }
 0xb78   :  { %v1325_v9 = vmul.f32 %v12565_v8, %v12563_v2 }
 0xb7a   :  { %11785 = vmatmul.mubr.msk.f32.vlgmr.msra.gmra.mxu1 %vm536_vm3, %v1325_v9 }
 0xb7b   :  { %11793 = vmatpush3.xpose.msk.msra.mxu1 %vm373_vm2, %v13275_v13  ;;  %11794 = vmatprep.mubr.msk.f32.mxu1 %vm12871_vm1, %v12870_v12 }
 0xb7c   :  { %11804 = vmatprep.subr.mxu1 %v12870_v12 }
 0xb7e   :  { %11795 = vmatmul.mubr.msk.f32.vlgmr.msra.gmra.mxu1 %vm373_vm2, %v1490_v20 }
 0xb7f   :  { %11806 = vmatprep.mubr.msk.f32.mxu1 %vm12871_vm1, %v12870_v12 }
 0xc35   :  { %v1485_v22 = vpop.f32.mrf.mxu0 }
 0xc37   :  { %v11791_v14 = vpop.f32.mrf.mxu0 }
 0xc3a   :  { %v13285_v15 = vpop.f32.mrf.mxu1 }
 0xc3c   :  { %v11786_v17 = vpop.f32.mrf.mxu1 }
 0xc3e   :  { %v1566_v18 = vpop.f32.mrf.mxu1 }
 0xc3f   :  { %1571 = vrot.lane.b32.xlu1 %v1566_v18, %s14714_s0 }
 0xc40   :  { %v11796_v21 = vpop.f32.mrf.mxu1 }
 0xc43   :  { %1592 = vrot.lane.b32.xlu1 %v13275_v13, %s14710_s24 }
 0xcb1   :  { %v1572_v25 = vpop.permute.xlu1 %1571 }
 0xcb2   :  { %v1574_v27 = vsel %vm373_vm2, %v1485_v22, %v1572_v25 }
 0xcb3   :  { %v1575_v28 = vmul.f32 0.35355338, %v1574_v27 }
 0xcb5   :  { %v1580_v29 = vadd.f32 %v13294_v26, %v1575_v28  ;;  %v13299_v35 = vpop.permute.xlu1 %1592 }
 0xcb7   :  { %v1581_v33 = vsel %vm536_vm3, %v1580_v29, -inf }
 0xcb8   :  { %1582 = vmax.xlane.f32.xlu0 %v1581_v33 }
 0xcce   :  { %1596 = vrot.lane.b32.xlu0 %v13299_v35, %s14708_s27 }
 0xcd2   :  { %1755 = vrot.lane.b32.xlu0 %v13275_v13, %s14706_s13 }
 0xcd6   :  { %1753 = vrot.lane.b32.xlu0 %v13106_v16, %s14704_s1 }
 0xcda   :  { %1675 = vrot.lane.b32.xlu0 %v13106_v16, %s14706_s13 }
 0xd41   :  { %v1583_v32 = vpop.xlane.xlu0 %1582 }
 0xd42   :  { %v1584_v36 = vsub.f32 %v1580_v29, %v1583_v32 }
 0xd44   :  { %v1585_v37 = vmul.f32 1.442695, %v1584_v36 }
 0xd45   :  { %v1597_v38 = vpop.permute.xlu0 %1596 }
 0xd46   :  { %12566 = vpow2.f32 %v1585_v37  ;;  %11798 = vmatpush3.msk.msra.mxu0 %vm558_vm4, %v1597_v38 }
 0xd47   :  { %11799 = vmatprep.subr.mxu0 %v12870_v12 }
 0xd49   :  { %v1756_v42 = vpop.permute.xlu0 %1755 }
 0xd4d   :  { %v1754_v45 = vpop.permute.xlu0 %1753 }
 0xd51   :  { %v1676_v47 = vpop.permute.xlu0 %1675 }
 0xd53   :  { %v12567_v40 = vpop.eup %12566 }
 0xd54   :  { %v1587_v41 = vsel %vm536_vm3, %v12567_v40, 0.0 }
 0xd55   :  { %1588 = vadd.xlane.f32.xlu1 %v1587_v41 }
 0xd66   :  { %1594 = vrot.lane.b32.xlu1 %v13106_v16, %s14708_s27 }
 0xd6a   :  { %1677 = vrot.lane.b32.xlu1 %v13106_v16, %s14702_s2 }
 0xdde   :  { %v1589_v43 = vpop.xlane.xlu1 %1588 }
 0xddf   :  { %12568 = vrcp.f32 %v1589_v43 }
 0xde2   :  { %v1595_v44 = vpop.permute.xlu1 %1594 }
 0xde3   :  { %11800 = vmatpush3.msra.mxu0 %v1595_v44 }
 0xde4   :  { %11809 = vmatprep.subr.mxu0 %v12870_v12 }
 0xde6   :  { %v1678_v46 = vpop.permute.xlu1 %1677 }
 0xde7   :  { %11805 = vmatpush3.xpose.msk.msra.mxu1 %vm373_vm2, %v1678_v46 }
 0xde8   :  { %11814 = vmatprep.subr.mxu1 %v12870_v12 }
 0xdea   :  { %11807 = vmatmul.mubr.msk.f32.vlgmr.msra.gmra.mxu1 %vm373_vm2, %v1676_v47 }
 0xdeb   :  { %11818 = vmatprep.mubr.msk.f32.mxu1 %vm12871_vm1, %v12870_v12 }
 0xdec   :  { %v12569_v48 = vpop.eup %12568 }
 0xded   :  { %v1591_v49 = vmul.f32 %v12569_v48, %v12567_v40 }
 0xdef   :  { %11802 = vmatmul.mubr.msk.f32.vlgmr.msra.gmra.mxu0 %vm536_vm3, %v1591_v49 }
 0xdf0   :  { %11810 = vmatpush3.xpose.msk.msra.mxu0 %vm373_vm2, %v1756_v42  ;;  %11811 = vmatprep.mubr.msk.f32.mxu0 %vm12871_vm1, %v12870_v12 }
 0xdf1   :  { %11821 = vmatprep.subr.mxu0 %v12870_v12 }
 0xdf3   :  { %11812 = vmatmul.mubr.msk.f32.vlgmr.msra.gmra.mxu0 %vm373_vm2, %v1754_v45 }
 0xdf4   :  { %11823 = vmatprep.mubr.msk.f32.mxu0 %vm12871_vm1, %v12870_v12 }
 0xeaa   :  { %v1749_v50 = vpop.f32.mrf.mxu1 }
 0xeac   :  { %v11808_v51 = vpop.f32.mrf.mxu1 }
 0xeaf   :  { %v1670_v52 = vpop.f32.mrf.mxu0 }
 0xeb0   :  { %1674 = vst.msk [vmem:[#allocation2 + $0x8] sm:$0xff] %vm373_vm2, %v1670_v52 }
 0xeb1   :  { %v11803_v53 = vpop.f32.mrf.mxu0 }
 0xeb3   :  { %v1827_v55 = vpop.f32.mrf.mxu0 }
 0xeb4   :  { %1832 = vrot.lane.b32.xlu1 %v1827_v55, %s14714_s0 }
 0xeb5   :  { %v11813_v56 = vpop.f32.mrf.mxu0 }
 0xeb8   :  { %1849 = vrot.lane.b32.xlu1 %v13106_v16, %s14700_s7 }
 0xf26   :  { %v1833_v57 = vpop.permute.xlu1 %1832 }
 0xf27   :  { %v1835_v58 = vsel %vm373_vm2, %v1749_v50, %v1833_v57 }
 0xf28   :  { %v1836_v59 = vmul.f32 0.35355338, %v1835_v58 }
 0xf2a   :  { %v1837_v60 = vadd.f32 %v1836_v59, %v13294_v26  ;;  %v1850_v2 = vpop.permute.xlu1 %1849 }
 0xf2c   :  { %v1838_v61 = vsel %vm536_vm3, %v1837_v60, -inf }
 0xf2d   :  { %1839 = vmax.xlane.f32.xlu0 %v1838_v61 }
 0xf43   :  { %1851 = vrot.lane.b32.xlu0 %v13299_v35, %s14700_s7 }
 0xf47   :  { %2014 = vrot.lane.b32.xlu0 %v13275_v13, %s14698_s10 }
 0xf4b   :  { %1936 = vrot.lane.b32.xlu0 %v13106_v16, %s14694_s11 }
 0xfb6   :  { %v1840_v62 = vpop.xlane.xlu0 %1839 }
 0xfb7   :  { %v1841_v63 = vsub.f32 %v1837_v60, %v1840_v62 }
 0xfb9   :  { %v1842_v0 = vmul.f32 1.442695, %v1841_v63 }
 0xfba   :  { %v1852_v1 = vpop.permute.xlu0 %1851 }
 0xfbb   :  { %12570 = vpow2.f32 %v1842_v0  ;;  %11815 = vmatpush3.msk.msra.mxu1 %vm558_vm4, %v1852_v1 }
 0xfbc   :  { %11816 = vmatprep.subr.mxu1 %v12870_v12 }
 0xfbd   :  { %11817 = vmatpush3.msra.mxu1 %v1850_v2 }
 0xfbe   :  { %v2015_v3 = vpop.permute.xlu0 %2014  ;;  %11826 = vmatprep.subr.mxu1 %v12870_v12 }
 0xfc2   :  { %v1937_v4 = vpop.permute.xlu0 %1936 }
 0xfc3   :  { %11822 = vmatpush3.xpose.msk.msra.mxu0 %vm373_vm2, %v1937_v4 }
 0xfc4   :  { %11831 = vmatprep.subr.mxu0 %v12870_v12 }
 0xfc8   :  { %v12571_v19 = vpop.eup %12570 }
 0xfc9   :  { %v1844_v5 = vsel %vm536_vm3, %v12571_v19, 0.0 }
 0xfca   :  { %1845 = vadd.xlane.f32.xlu1 %v1844_v5 }
 0xfdb   :  { %2012 = vrot.lane.b32.xlu1 %v13106_v16, %s14691_s15 }
 0xfdf   :  { %1934 = vrot.lane.b32.xlu1 %v13106_v16, %s14698_s10 }
0x1053   :  { %v1846_v6 = vpop.xlane.xlu1 %1845 }
0x1054   :  { %12572 = vrcp.f32 %v1846_v6 }
0x1057   :  { %v2013_v39 = vpop.permute.xlu1 %2012 }
0x105b   :  { %v1935_v7 = vpop.permute.xlu1 %1934 }
0x105c   :  { %11824 = vmatmul.mubr.msk.f32.vlgmr.msra.gmra.mxu0 %vm373_vm2, %v1935_v7  ;;  %v2595_v7 = vld [vmem:[%s12957_s30 + $0x10] sm:$0xff] }
0x105d   :  { %11835 = vmatprep.mubr.msk.f32.mxu0 %vm12871_vm1, %v12870_v12 }
0x1061   :  { %v12573_v8 = vpop.eup %12572 }
0x1062   :  { %v1848_v9 = vmul.f32 %v12573_v8, %v12571_v19  ;;  %v2596_v19 = vld [vmem:[%s12957_s30 + $0x18] sm:$0xff] }
0x1064   :  { %11819 = vmatmul.mubr.msk.f32.vlgmr.msra.gmra.mxu1 %vm536_vm3, %v1848_v9  ;;  %v2593_v9 = vld [vmem:[%s12957_s30] sm:$0xff] }
0x1065   :  { %11827 = vmatpush3.xpose.msk.msra.mxu1 %vm373_vm2, %v2015_v3  ;;  %11828 = vmatprep.mubr.msk.f32.mxu1 %vm12871_vm1, %v12870_v12 }
0x1066   :  { %11838 = vmatprep.subr.mxu1 %v12870_v12 }
0x1068   :  { %11829 = vmatmul.mubr.msk.f32.vlgmr.msra.gmra.mxu1 %vm373_vm2, %v2013_v39 }
0x1069   :  { %11840 = vmatprep.mubr.msk.f32.mxu1 %vm12871_vm1, %v12870_v12 }
0x111c   :  { %v2008_v20 = vpop.f32.mrf.mxu0 }
0x111e   :  { %v11825_v22 = vpop.f32.mrf.mxu0 }
0x111f   :  { %v2455_v22 = vld [vmem:[%s12937_s8 + $0x8] sm:$0xff] }
0x1124   :  { %v1925_v14 = vpop.f32.mrf.mxu1 }
0x1126   :  { %v11820_v17 = vpop.f32.mrf.mxu1 }
0x1127   :  { %v2682_v17 = vld [vmem:[%s12967_s12 + $0x18] sm:$0xff] }
0x1128   :  { %v2086_v18 = vpop.f32.mrf.mxu1 }
0x1129   :  { %2091 = vrot.lane.b32.xlu0 %v2086_v18, %s14714_s0 }
0x112a   :  { %v11830_v21 = vpop.f32.mrf.mxu1 }
0x119b   :  { %v2092_v25 = vpop.permute.xlu0 %2091 }
0x119c   :  { %v2094_v27 = vsel %vm373_vm2, %v2008_v20, %v2092_v25  ;;  %v2456_v20 = vld [vmem:[%s12937_s8 + $0x10] sm:$0xff]  ;;  %v11074_v25 = vld [vmem:[%s12962_s6] ss:$0 sm:$0xff] }
0x119d   :  { %v2095_v28 = vmul.f32 0.35355338, %v2094_v27 }
0x119f   :  { %v2096_v29 = vadd.f32 %v2095_v28, %v13294_v26 }
0x11a1   :  { %v2097_v33 = vsel %vm536_vm3, %v2096_v29, -inf }
0x11a2   :  { %2098 = vmax.xlane.f32.xlu1 %v2097_v33 }
0x11b3   :  { %2108 = vrot.lane.b32.xlu1 %v13106_v16, %s14689_s16 }
0x11b7   :  { %2273 = vrot.lane.b32.xlu1 %v13275_v13, %s14687_s22 }
0x11bb   :  { %2195 = vrot.lane.b32.xlu1 %v13106_v16, %s14685_s23 }
0x122b   :  { %v2099_v32 = vpop.xlane.xlu1 %2098 }
0x122c   :  { %v2100_v36 = vsub.f32 %v2096_v29, %v2099_v32 }
0x122e   :  { %v2101_v37 = vmul.f32 1.442695, %v2100_v36  ;;  %v2681_v36 = vld [vmem:[%s12967_s12 + $0x10] sm:$0xff] }
0x122f   :  { %v2109_v38 = vpop.permute.xlu1 %2108 }
0x1230   :  { %12574 = vpow2.f32 %v2101_v37  ;;  %v2680_v37 = vld [vmem:[%s12967_s12 + $0x8] sm:$0xff] }
0x1233   :  { %v2274_v40 = vpop.permute.xlu1 %2273 }
0x1237   :  { %v2196_v41 = vpop.permute.xlu1 %2195 }
0x1238   :  { %11839 = vmatpush3.xpose.msk.msra.mxu1 %vm373_vm2, %v2196_v41 }
0x1239   :  { %11848 = vmatprep.subr.mxu1 %v12870_v12 }
0x123d   :  { %v12575_v42 = vpop.eup %12574 }
0x123e   :  { %v2103_v43 = vsel %vm536_vm3, %v12575_v42, 0.0 }
0x123f   :  { %2104 = vadd.xlane.f32.xlu0 %v2103_v43  ;;  %v13471_v43 = vld [vmem:[%s14737_s28] ss:$0 sm:$0xff] }
0x1255   :  { %2110 = vrot.lane.b32.xlu0 %v13299_v35, %s14689_s16 }
0x1259   :  { %2271 = vrot.lane.b32.xlu0 %v13106_v16, %s14714_s0 }
0x125d   :  { %2193 = vrot.lane.b32.xlu0 %v13106_v16, %s14687_s22 }
0x12c8   :  { %v2105_v13 = vpop.xlane.xlu0 %2104 }
0x12c9   :  { %12576 = vrcp.f32 %v2105_v13 }
0x12cc   :  { %v2111_v44 = vpop.permute.xlu0 %2110 }
0x12cd   :  { %11832 = vmatpush3.msk.msra.mxu0 %vm558_vm4, %v2111_v44 }
0x12ce   :  { %11833 = vmatprep.subr.mxu0 %v12870_v12 }
0x12cf   :  { %11834 = vmatpush3.msra.mxu0 %v2109_v38  ;;  %v13451_v38 = vld [vmem:[%s12897_s5] sm:$0xff] }
0x12d0   :  { %v2272_v45 = vpop.permute.xlu0 %2271  ;;  %11843 = vmatprep.subr.mxu0 %v12870_v12 }
0x12d4   :  { %v2194_v46 = vpop.permute.xlu0 %2193 }
0x12d5   :  { %11841 = vmatmul.mubr.msk.f32.vlgmr.msra.gmra.mxu1 %vm373_vm2, %v2194_v46  ;;  %v11077_v46 = vld [vmem:[%s14738_s18] ss:$0 sm:$0xff] }
0x12d6   :  { %v12577_v47 = vpop.eup %12576  ;;  %11852 = vmatprep.mubr.msk.f32.mxu1 %vm12871_vm1, %v12870_v12 }
0x12d7   :  { %v2107_v48 = vmul.f32 %v12577_v47, %v12575_v42  ;;  %v13461_v42 = vld [vmem:[%s12897_s5 + $0x8] sm:$0xff]  ;;  %s14739_s5 = sld [smem:[#allocation14_spill]] }
0x12d9   :  { %11836 = vmatmul.mubr.msk.f32.vlgmr.msra.gmra.mxu0 %vm536_vm3, %v2107_v48 }
0x12da   :  { %11844 = vmatpush3.xpose.msk.msra.mxu0 %vm373_vm2, %v2274_v40  ;;  %11845 = vmatprep.mubr.msk.f32.mxu0 %vm12871_vm1, %v12870_v12  ;;  %v2679_v40 = vld [vmem:[%s12967_s12] sm:$0xff] }
0x12dd   :  { %11846 = vmatmul.mubr.msk.f32.vlgmr.msra.gmra.mxu0 %vm373_vm2, %v2272_v45 }
0x1395   :  { %v2267_v49 = vpop.f32.mrf.mxu1 }
0x1397   :  { %v11842_v50 = vpop.f32.mrf.mxu1 }
0x1399   :  { %v2184_v51 = vpop.f32.mrf.mxu0 }
0x139b   :  { %v11837_v52 = vpop.f32.mrf.mxu0 }
0x139d   :  { %v2345_v53 = vpop.f32.mrf.mxu0 }
0x139e   :  { %2350 = vrot.lane.b32.xlu1 %v2345_v53, %s14714_s0 }
0x139f   :  { %v11847_v55 = vpop.f32.mrf.mxu0 }
0x1410   :  { %v2351_v56 = vpop.permute.xlu1 %2350 }
0x1411   :  { %v2353_v57 = vsel %vm373_vm2, %v2267_v49, %v2351_v56 }
0x1412   :  { %v2354_v58 = vmul.f32 0.35355338, %v2353_v57 }
0x1414   :  { %v2355_v59 = vadd.f32 %v2354_v58, %v13294_v26  ;;  %v13493_v58 = vld [vmem:[%s14739_s5] sm:$0x3]  ;;  %s14740_s5 = smov 96  }
0x1416   :  { %v2356_v60 = vsel %vm536_vm3, %v2355_v59, -inf }
0x1417   :  { %2357 = vmax.xlane.f32.xlu0 %v2356_v60  ;;  %v13498_v60 = vrot.slane %v13493_v58, %v533_v31 }
0x142d   :  { %2369 = vrot.lane.b32.xlu0 %v13299_v35, %s14683_s26 }
0x1431   :  { %887 = vrot.lane.b32.xlu0 %v13212_v24, %s14714_s0 }
0x1435   :  { %1930 = vrot.lane.b32.xlu0 %v1925_v14, %s14714_s0  ;;  %v2454_v14 = vld [vmem:[%s12937_s8] sm:$0xff] }
0x1439   :  { %2189 = vrot.lane.b32.xlu0 %v2184_v51, %s14691_s15 }
0x14a0   :  { %v2358_v61 = vpop.xlane.xlu0 %2357 }
0x14a1   :  { %v2359_v62 = vsub.f32 %v2355_v59, %v2358_v61 }
0x14a3   :  { %v2360_v63 = vmul.f32 1.442695, %v2359_v62 }
0x14a4   :  { %v2370_v0 = vpop.permute.xlu0 %2369 }
0x14a5   :  { %12578 = vpow2.f32 %v2360_v63  ;;  %11849 = vmatpush3.msk.msra.mxu1 %vm558_vm4, %v2370_v0 }
0x14a6   :  { %11850 = vmatprep.subr.mxu1 %v12870_v12 }
0x14a8   :  { %v888_v1 = vpop.permute.xlu0 %887 }
0x14a9   :  { %891 = vst.msk [vmem:[#allocation2] sm:$0xff] %vm890_vm6, %v888_v1 }
0x14ac   :  { %v1931_v35 = vpop.permute.xlu0 %1930 }
0x14ad   :  { %1933 = vst.msk [vmem:[#allocation2 + $0x8] sm:$0xff] %vm890_vm6, %v1931_v35 }
0x14b0   :  { %v2190_v24 = vpop.permute.xlu0 %2189 }
0x14b1   :  { %2192 = vst.msk [vmem:[#allocation2 + $0x8] sm:$0xff] %vm1150_vm7, %v2190_v24 }
0x14b2   :  { %v12579_v2 = vpop.eup %12578 }
0x14b3   :  { %v2362_v3 = vsel %vm536_vm3, %v12579_v2, 0.0 }
0x14b4   :  { %2363 = vadd.xlane.f32.xlu1 %v2362_v3 }
0x14c5   :  { %2367 = vrot.lane.b32.xlu1 %v13106_v16, %s14683_s26 }
0x14c9   :  { %1147 = vrot.lane.b32.xlu1 %v13247_v54, %s14691_s15 }
0x14cd   :  { %1407 = vrot.lane.b32.xlu1 %v13285_v15, %s14704_s1  ;;  %v2594_v15 = vld [vmem:[%s12957_s30 + $0x8] sm:$0xff] }
0x153d   :  { %v2364_v4 = vpop.xlane.xlu1 %2363 }
0x153e   :  { %12580 = vrcp.f32 %v2364_v4 }
0x1541   :  { %v2368_v5 = vpop.permute.xlu1 %2367 }
0x1542   :  { %11851 = vmatpush3.msra.mxu1 %v2368_v5 }
0x1543   :  { %11866 = vmatprep.subr.mxu1 %v2596_v19 }
0x1545   :  { %v1148_v6 = vpop.permute.xlu1 %1147 }
0x1546   :  { %1151 = vst.msk [vmem:[#allocation2] sm:$0xff] %vm1150_vm7, %v1148_v6 }
0x1549   :  { %v1408_v16 = vpop.permute.xlu1 %1407 }
0x154a   :  { %1411 = vst.msk [vmem:[#allocation2] sm:$0xff] %vm1410_vm8, %v1408_v16 }
0x154b   :  { %v12581_v39 = vpop.eup %12580 }
0x154c   :  { %v2366_v54 = vmul.f32 %v12581_v39, %v12579_v2 }
0x154e   :  { %11853 = vmatmul.mubr.msk.f32.vlgmr.msra.gmra.mxu1 %vm536_vm3, %v2366_v54 }
0x154f   :  { %11867 = vmatpush3.msra.mxu1 %v2596_v19  ;;  %11874 = vmatprep.mubr.msk.f32.mxu1 %vm196_vm0, %v13088_v10  ;;  %v2457_v10 = vld [vmem:[%s12937_s8 + $0x18] sm:$0xff] }
0x1550   :  { %11868 = vmatprep.subr.mxu1 %v2595_v7  ;;  %11855 = vmatprep.subr.mxu0 %v2457_v10 }
0x1551   :  { %v2452_v8 = vld [vmem:[#allocation2] sm:$0xff]  ;;  %11869 = vmatpush3.msra.mxu1 %v2595_v7  ;;  %11856 = vmatpush3.msra.mxu0 %v2457_v10 }
0x1552   :  { %11863 = vmatprep.mubr.msk.f32.mxu0 %vm196_vm0, %v2452_v8  ;;  %11870 = vmatprep.subr.mxu1 %v2594_v15 }
0x1553   :  { %11871 = vmatpush3.msra.mxu1 %v2594_v15  ;;  %11857 = vmatprep.subr.mxu0 %v2456_v20 }
0x1554   :  { %11872 = vmatprep.subr.mxu1 %v2593_v9  ;;  %11858 = vmatpush3.msra.mxu0 %v2456_v20 }
0x1555   :  { %11873 = vmatpush3.msra.mxu1 %v2593_v9  ;;  %11859 = vmatprep.subr.mxu0 %v2455_v22 }
0x1556   :  { %11875 = vmatmul.mubr.msk.f32.vlgmr.msra.gmra.mxu1 %vm196_vm0, %v13091_v11  ;;  %11888 = vmatprep.subr.mxu1 %v12870_v12 }
0x1557   :  { %11890 = vmatprep.mubr.msk.f32.mxu1 %vm12871_vm1, %v12870_v12  ;;  %11860 = vmatpush3.msra.mxu0 %v2455_v22 }
0x1558   :  { %11861 = vmatprep.subr.mxu0 %v2454_v14 }
0x1559   :  { %11862 = vmatpush3.msra.mxu0 %v2454_v14 }
0x155a   :  { %11877 = vmatprep.subr.mxu0 %v2682_v17 }
0x160e   :  { %v2443_v11 = vpop.f32.mrf.mxu1 }
0x160f   :  { %2448 = vrot.lane.b32.xlu1 %v2443_v11, %s14704_s1 }
0x1610   :  { %v11854_v18 = vpop.f32.mrf.mxu1 }
0x1616   :  { %v11876_v21 = vpop.f32.mrf.mxu1 }
0x1617   :  { %v13438_v27 = vadd.f32 %v11876_v21, %v11074_v25 }
0x1618   :  { %v2670_v28 = vpop.f32.mrf.mxu1 }
0x1619   :  { %v13440_v29 = vadd.f32 %v11074_v25, %v2670_v28 }
0x161b   :  { %2766 = vrot.lane.b32.xlu0 %v13440_v29, %s14679_s17  ;;  %2842 = vrot.lane.b32.xlu1 %v13440_v29, %s14710_s24  ;;  %s14681_s17 = smov 6  }
0x1681   :  { %v2449_v33 = vpop.permute.xlu1 %2448 }
0x1682   :  { %2451 = vst.msk [vmem:[#allocation2 + $0x8] sm:$0xff] %vm1410_vm8, %v2449_v33 }
0x1689   :  { %v2453_v32 = vld [vmem:[#allocation2 + $0x8] sm:$0xff] }
0x168a   :  { %11864 = vmatmul.mubr.msk.f32.vlgmr.msra.gmra.mxu0 %vm196_vm0, %v2453_v32 }
0x168b   :  { %11878 = vmatpush3.msra.mxu0 %v2682_v17  ;;  %11885 = vmatprep.mubr.msk.f32.mxu0 %vm196_vm0, %v13451_v38 }
0x168c   :  { %11879 = vmatprep.subr.mxu0 %v2681_v36 }
0x168d   :  { %11880 = vmatpush3.msra.mxu0 %v2681_v36  ;;  %v2767_v41 = vpop.permute.xlu0 %2766  ;;  %v2843_v53 = vpop.permute.xlu1 %2842 }
0x168e   :  { %11881 = vmatprep.subr.mxu0 %v2680_v37  ;;  %11889 = vmatpush3.xpose.msk.msra.mxu1 %vm373_vm2, %v2767_v41 }
0x168f   :  { %11882 = vmatpush3.msra.mxu0 %v2680_v37  ;;  %11893 = vmatprep.subr.mxu1 %v12870_v12 }
0x1690   :  { %11883 = vmatprep.subr.mxu0 %v2679_v40 }
0x1691   :  { %11884 = vmatpush3.msra.mxu0 %v2679_v40  ;;  %11891 = vmatmul.mubr.msk.f32.vlgmr.msra.gmra.mxu1 %vm373_vm2, %v13440_v29 }
0x1692   :  { %11886 = vmatmul.mubr.msk.f32.vlgmr.msra.gmra.mxu0 %vm196_vm0, %v13461_v42  ;;  %11895 = vmatprep.mubr.msk.f32.mxu1 %vm12871_vm1, %v12870_v12 }
0x1693   :  { %11898 = vmatprep.subr.mxu0 %v12870_v12  ;;  %11902 = vmatprep.mubr.msk.f32.mxu0 %vm12871_vm1, %v12870_v12 }
0x174a   :  { %v11865_v13 = vpop.f32.mrf.mxu0 }
0x174b   :  { %v13474_v44 = vadd.f32 %v11865_v13, %v13471_v43 }
0x174c   :  { %v13476_v45 = vpop.f32.mrf.mxu0 }
0x1751   :  { %v2838_v47 = vpop.f32.mrf.mxu1 }
0x1752   :  { %v11887_v48 = vpop.f32.mrf.mxu0 }
0x1753   :  { %v13479_v49 = vadd.f32 %v11887_v48, %v11077_v46  ;;  %v11892_v50 = vpop.f32.mrf.mxu1 }
0x1754   :  { %v2756_v51 = vpop.f32.mrf.mxu0 }
0x1755   :  { %v13481_v52 = vadd.f32 %v11077_v46, %v2756_v51 }
0x1757   :  { %11894 = vmatpush3.xpose.msk.msra.mxu1 %vm373_vm2, %v13481_v52  ;;  %v2943_v57 = vrot.slane %v13481_v52, 2 }
0x1758   :  { %11905 = vmatprep.subr.mxu1 %v12870_v12 }
0x175a   :  { %11896 = vmatmul.mubr.msk.f32.vlgmr.msra.gmra.mxu1 %vm373_vm2, %v2843_v53 }
0x175b   :  { %11907 = vmatprep.mubr.msk.f32.mxu1 %vm12871_vm1, %v12870_v12 }
0x181a   :  { %v2915_v55 = vpop.f32.mrf.mxu1 }
0x181b   :  { %2920 = vrot.lane.b32.xlu0 %v2915_v55, %s14681_s17 }
0x181c   :  { %v11897_v56 = vpop.f32.mrf.mxu1 }
0x181f   :  { %2944 = vrot.lane.b32.xlu0 %v2943_v57, %s14710_s24 }
0x188d   :  { %v2921_v59 = vpop.permute.xlu0 %2920 }
0x188e   :  { %v2924_v61 = vsel %vm2923_vm9, %v2838_v47, %v2921_v59 }
0x188f   :  { %v2925_v62 = vmul.f32 0.35355338, %v2924_v61 }
0x1891   :  { %v2930_v63 = vadd.f32 %v13498_v60, %v2925_v62  ;;  %v13503_v1 = vpop.permute.xlu0 %2944 }
0x1892   :  { %v13519_v19 = vsel %vm558_vm4, %v13440_v29, %v13503_v1 }
0x1893   :  { %v2932_v0 = vsel %vm2931_vm10, %v2930_v63, -inf }
0x1894   :  { %2933 = vmax.xlane.f32.xlu1 %v2932_v0 }
0x18a5   :  { %2951 = vrot.lane.b32.xlu1 %v13503_v1, %s14708_s27 }
0x18a9   :  { %3111 = vrot.lane.b32.xlu1 %v13481_v52, %s14706_s13 }
0x18ad   :  { %3109 = vrot.lane.b32.xlu1 %v13440_v29, %s14704_s1 }
0x18b1   :  { %3031 = vrot.lane.b32.xlu1 %v13440_v29, %s14706_s13 }
0x191d   :  { %v2934_v31 = vpop.xlane.xlu1 %2933 }
0x191e   :  { %v2935_v35 = vsub.f32 %v2930_v63, %v2934_v31 }
0x1920   :  { %v2936_v24 = vmul.f32 1.442695, %v2935_v35 }
0x1921   :  { %v2952_v2 = vpop.permute.xlu1 %2951 }
0x1922   :  { %12582 = vpow2.f32 %v2936_v24  ;;  %11899 = vmatpush3.msk.msra.mxu0 %vm558_vm4, %v2952_v2 }
0x1923   :  { %11900 = vmatprep.subr.mxu0 %v12870_v12 }
0x1925   :  { %v3112_v5 = vpop.permute.xlu1 %3111 }
0x1929   :  { %v3110_v39 = vpop.permute.xlu1 %3109 }
0x192d   :  { %v3032_v7 = vpop.permute.xlu1 %3031 }
0x192f   :  { %v12583_v3 = vpop.eup %12582 }
0x1930   :  { %v2938_v4 = vsel %vm2931_vm10, %v12583_v3, 0.0 }
0x1931   :  { %2939 = vadd.xlane.f32.xlu0 %v2938_v4 }
0x1947   :  { %2949 = vrot.lane.b32.xlu0 %v13519_v19, %s14708_s27 }
0x194b   :  { %3033 = vrot.lane.b32.xlu0 %v13440_v29, %s14702_s2 }
0x19ba   :  { %v2940_v6 = vpop.xlane.xlu0 %2939 }
0x19bb   :  { %12584 = vrcp.f32 %v2940_v6 }
0x19be   :  { %v2950_v16 = vpop.permute.xlu0 %2949 }
0x19bf   :  { %11901 = vmatpush3.msra.mxu0 %v2950_v16 }
0x19c0   :  { %11910 = vmatprep.subr.mxu0 %v12870_v12 }
0x19c2   :  { %v3034_v54 = vpop.permute.xlu0 %3033 }
0x19c3   :  { %11906 = vmatpush3.xpose.msk.msra.mxu1 %vm373_vm2, %v3034_v54 }
0x19c4   :  { %11915 = vmatprep.subr.mxu1 %v12870_v12 }
0x19c6   :  { %11908 = vmatmul.mubr.msk.f32.vlgmr.msra.gmra.mxu1 %vm373_vm2, %v3032_v7 }
0x19c7   :  { %11919 = vmatprep.mubr.msk.f32.mxu1 %vm12871_vm1, %v12870_v12 }
0x19c8   :  { %v12585_v15 = vpop.eup %12584 }
0x19c9   :  { %v2942_v8 = vmul.f32 %v12585_v15, %v12583_v3 }
0x19cb   :  { %11903 = vmatmul.mubr.msk.f32.vlgmr.msra.gmra.mxu0 %vm536_vm3, %v2942_v8 }
0x19cc   :  { %11911 = vmatpush3.xpose.msk.msra.mxu0 %vm373_vm2, %v3112_v5  ;;  %11912 = vmatprep.mubr.msk.f32.mxu0 %vm12871_vm1, %v12870_v12 }
0x19cd   :  { %11922 = vmatprep.subr.mxu0 %v12870_v12 }
0x19cf   :  { %11913 = vmatmul.mubr.msk.f32.vlgmr.msra.gmra.mxu0 %vm373_vm2, %v3110_v39 }
0x19d0   :  { %11924 = vmatprep.mubr.msk.f32.mxu0 %vm12871_vm1, %v12870_v12 }
0x1a86   :  { %v3105_v9 = vpop.f32.mrf.mxu1 }
0x1a88   :  { %v11909_v10 = vpop.f32.mrf.mxu1 }
0x1a8b   :  { %v3025_v20 = vpop.f32.mrf.mxu0 }
0x1a8c   :  { %3030 = vst.msk [vmem:[#allocation3] sm:$0x3f] %vm3029_vm11, %v3025_v20 }
0x1a8d   :  { %v11904_v22 = vpop.f32.mrf.mxu0 }
0x1a8f   :  { %v3183_v14 = vpop.f32.mrf.mxu0 }
0x1a90   :  { %3188 = vrot.lane.b32.xlu0 %v3183_v14, %s14681_s17 }
0x1a91   :  { %v11914_v17 = vpop.f32.mrf.mxu0 }
0x1b02   :  { %v3189_v11 = vpop.permute.xlu0 %3188 }
0x1b03   :  { %v3191_v18 = vsel %vm2923_vm9, %v3105_v9, %v3189_v11 }
0x1b04   :  { %v3192_v21 = vmul.f32 0.35355338, %v3191_v18 }
0x1b06   :  { %v3193_v25 = vadd.f32 %v3192_v21, %v13498_v60 }
0x1b08   :  { %v3194_v28 = vsel %vm2931_vm10, %v3193_v25, -inf }
0x1b09   :  { %3195 = vmax.xlane.f32.xlu1 %v3194_v28 }
0x1b1a   :  { %3205 = vrot.lane.b32.xlu1 %v13519_v19, %s14700_s7 }
0x1b1e   :  { %3371 = vrot.lane.b32.xlu1 %v13481_v52, %s14698_s10 }
0x1b22   :  { %3293 = vrot.lane.b32.xlu1 %v13440_v29, %s14694_s11 }
0x1b92   :  { %v3196_v33 = vpop.xlane.xlu1 %3195 }
0x1b93   :  { %v3197_v32 = vsub.f32 %v3193_v25, %v3196_v33 }
0x1b95   :  { %v3198_v36 = vmul.f32 1.442695, %v3197_v32 }
0x1b96   :  { %v3206_v37 = vpop.permute.xlu1 %3205 }
0x1b97   :  { %12586 = vpow2.f32 %v3198_v36 }
0x1b9a   :  { %v3372_v40 = vpop.permute.xlu1 %3371 }
0x1b9e   :  { %v3294_v41 = vpop.permute.xlu1 %3293 }
0x1b9f   :  { %11923 = vmatpush3.xpose.msk.msra.mxu0 %vm373_vm2, %v3294_v41 }
0x1ba0   :  { %11932 = vmatprep.subr.mxu0 %v12870_v12 }
0x1ba4   :  { %v12587_v13 = vpop.eup %12586 }
0x1ba5   :  { %v3200_v46 = vsel %vm2931_vm10, %v12587_v13, 0.0 }
0x1ba6   :  { %3201 = vadd.xlane.f32.xlu0 %v3200_v46 }
0x1bbc   :  { %3207 = vrot.lane.b32.xlu0 %v13503_v1, %s14700_s7 }
0x1bc0   :  { %3369 = vrot.lane.b32.xlu0 %v13440_v29, %s14691_s15 }
0x1bc4   :  { %3291 = vrot.lane.b32.xlu0 %v13440_v29, %s14698_s10 }
0x1c2f   :  { %v3202_v47 = vpop.xlane.xlu0 %3201 }
0x1c30   :  { %12588 = vrcp.f32 %v3202_v47 }
0x1c33   :  { %v3208_v48 = vpop.permute.xlu0 %3207 }
0x1c34   :  { %11916 = vmatpush3.msk.msra.mxu1 %vm558_vm4, %v3208_v48 }
0x1c35   :  { %11917 = vmatprep.subr.mxu1 %v12870_v12 }
0x1c36   :  { %11918 = vmatpush3.msra.mxu1 %v3206_v37  ;;  %v3813_v37 = vrot.slane %v13438_v27, 6 }
0x1c37   :  { %v3370_v50 = vpop.permute.xlu0 %3369  ;;  %11927 = vmatprep.subr.mxu1 %v12870_v12 }
0x1c3b   :  { %v3292_v51 = vpop.permute.xlu0 %3291 }
0x1c3c   :  { %11925 = vmatmul.mubr.msk.f32.vlgmr.msra.gmra.mxu0 %vm373_vm2, %v3292_v51 }
0x1c3d   :  { %v12589_v53 = vpop.eup %12588  ;;  %11936 = vmatprep.mubr.msk.f32.mxu0 %vm12871_vm1, %v12870_v12 }
0x1c3e   :  { %v3204_v55 = vmul.f32 %v12589_v53, %v12587_v13 }
0x1c40   :  { %11920 = vmatmul.mubr.msk.f32.vlgmr.msra.gmra.mxu1 %vm536_vm3, %v3204_v55 }
0x1c41   :  { %11928 = vmatpush3.xpose.msk.msra.mxu1 %vm373_vm2, %v3372_v40  ;;  %11929 = vmatprep.mubr.msk.f32.mxu1 %vm12871_vm1, %v12870_v12  ;;  %v3812_v40 = vrot.slane %v13440_v29, 6 }
0x1c42   :  { %11939 = vmatprep.subr.mxu1 %v12870_v12 }
0x1c43   :  { %v13619_v41 = vsel %vm1492_vm5, %v3812_v40, %v3813_v37 }
0x1c44   :  { %11930 = vmatmul.mubr.msk.f32.vlgmr.msra.gmra.mxu1 %vm373_vm2, %v3370_v50 }
0x1c45   :  { %11941 = vmatprep.mubr.msk.f32.mxu1 %vm12871_vm1, %v12870_v12 }
0x1cfc   :  { %v3365_v56 = vpop.f32.mrf.mxu0 }
0x1cfe   :  { %v11926_v57 = vpop.f32.mrf.mxu0 }
0x1d00   :  { %v13573_v59 = vpop.f32.mrf.mxu1 }
0x1d02   :  { %v11921_v61 = vpop.f32.mrf.mxu1 }
0x1d04   :  { %v3443_v62 = vpop.f32.mrf.mxu1 }
0x1d05   :  { %3448 = vrot.lane.b32.xlu1 %v3443_v62, %s14681_s17 }
0x1d06   :  { %v11931_v63 = vpop.f32.mrf.mxu1 }
0x1d09   :  { %3465 = vrot.lane.b32.xlu1 %v13519_v19, %s14689_s16 }
0x1d77   :  { %v3449_v0 = vpop.permute.xlu1 %3448 }
0x1d78   :  { %v3451_v31 = vsel %vm2923_vm9, %v3365_v56, %v3449_v0 }
0x1d79   :  { %v3452_v35 = vmul.f32 0.35355338, %v3451_v31  ;;  %v3991_v31 = vrot.slane %v13479_v49, 2 }
0x1d7b   :  { %v3453_v24 = vadd.f32 %v3452_v35, %v13498_v60  ;;  %v3466_v16 = vpop.permute.xlu1 %3465 }
0x1d7d   :  { %v3454_v2 = vsel %vm2931_vm10, %v3453_v24, -inf }
0x1d7e   :  { %3455 = vmax.xlane.f32.xlu0 %v3454_v2 }
0x1d94   :  { %3467 = vrot.lane.b32.xlu0 %v13503_v1, %s14689_s16 }
0x1d98   :  { %3631 = vrot.lane.b32.xlu0 %v13481_v52, %s14687_s22 }
0x1d9c   :  { %3553 = vrot.lane.b32.xlu0 %v13440_v29, %s14685_s23 }
0x1e07   :  { %v3456_v3 = vpop.xlane.xlu0 %3455 }
0x1e08   :  { %v3457_v4 = vsub.f32 %v3453_v24, %v3456_v3  ;;  %v13654_v24 = vrot.slane %v13493_v58, %v1578_v23 }
0x1e0a   :  { %v3458_v5 = vmul.f32 1.442695, %v3457_v4 }
0x1e0b   :  { %v3468_v6 = vpop.permute.xlu0 %3467 }
0x1e0c   :  { %12590 = vpow2.f32 %v3458_v5  ;;  %11933 = vmatpush3.msk.msra.mxu0 %vm558_vm4, %v3468_v6 }
0x1e0d   :  { %11934 = vmatprep.subr.mxu0 %v12870_v12 }
0x1e0e   :  { %11935 = vmatpush3.msra.mxu0 %v3466_v16 }
0x1e0f   :  { %v3632_v39 = vpop.permute.xlu0 %3631  ;;  %11944 = vmatprep.subr.mxu0 %v12870_v12 }
0x1e13   :  { %v3554_v54 = vpop.permute.xlu0 %3553 }
0x1e14   :  { %11940 = vmatpush3.xpose.msk.msra.mxu1 %vm373_vm2, %v3554_v54 }
0x1e15   :  { %11949 = vmatprep.subr.mxu1 %v12870_v12 }
0x1e19   :  { %v12591_v52 = vpop.eup %12590 }
0x1e1a   :  { %v3460_v7 = vsel %vm2931_vm10, %v12591_v52, 0.0 }
0x1e1b   :  { %3461 = vadd.xlane.f32.xlu1 %v3460_v7 }
0x1e2c   :  { %3629 = vrot.lane.b32.xlu1 %v13440_v29, %s14714_s0 }
0x1e30   :  { %3551 = vrot.lane.b32.xlu1 %v13440_v29, %s14687_s22 }
0x1ea4   :  { %v3462_v15 = vpop.xlane.xlu1 %3461 }
0x1ea5   :  { %12592 = vrcp.f32 %v3462_v15 }
0x1ea8   :  { %v3630_v8 = vpop.permute.xlu1 %3629 }
0x1eac   :  { %v3552_v9 = vpop.permute.xlu1 %3551 }
0x1ead   :  { %11942 = vmatmul.mubr.msk.f32.vlgmr.msra.gmra.mxu1 %vm373_vm2, %v3552_v9 }
0x1eae   :  { %11953 = vmatprep.mubr.msk.f32.mxu1 %vm12871_vm1, %v12870_v12 }
0x1eb2   :  { %v12593_v10 = vpop.eup %12592 }
0x1eb3   :  { %v3464_v20 = vmul.f32 %v12593_v10, %v12591_v52 }
0x1eb5   :  { %11937 = vmatmul.mubr.msk.f32.vlgmr.msra.gmra.mxu0 %vm536_vm3, %v3464_v20 }
0x1eb6   :  { %11945 = vmatpush3.xpose.msk.msra.mxu0 %vm373_vm2, %v3632_v39  ;;  %11946 = vmatprep.mubr.msk.f32.mxu0 %vm12871_vm1, %v12870_v12 }
0x1eb7   :  { %11956 = vmatprep.subr.mxu0 %v12870_v12 }
0x1eb9   :  { %11947 = vmatmul.mubr.msk.f32.vlgmr.msra.gmra.mxu0 %vm373_vm2, %v3630_v8 }
0x1eba   :  { %11958 = vmatprep.mubr.msk.f32.mxu0 %vm12871_vm1, %v12870_v12 }
0x1f6d   :  { %v3625_v22 = vpop.f32.mrf.mxu1 }
0x1f6f   :  { %v11943_v14 = vpop.f32.mrf.mxu1 }
0x1f75   :  { %v13608_v17 = vpop.f32.mrf.mxu0 }
0x1f77   :  { %v11938_v11 = vpop.f32.mrf.mxu0 }
0x1f79   :  { %v3703_v18 = vpop.f32.mrf.mxu0 }
0x1f7a   :  { %3708 = vrot.lane.b32.xlu0 %v3703_v18, %s14681_s17 }
0x1f7b   :  { %v11948_v21 = vpop.f32.mrf.mxu0 }
0x1fec   :  { %v3709_v25 = vpop.permute.xlu0 %3708 }
0x1fed   :  { %v3711_v28 = vsel %vm2923_vm9, %v3625_v22, %v3709_v25 }
0x1fee   :  { %v3712_v33 = vmul.f32 0.35355338, %v3711_v28 }
0x1ff0   :  { %v3713_v32 = vadd.f32 %v3712_v33, %v13498_v60 }
0x1ff2   :  { %v3714_v36 = vsel %vm2931_vm10, %v3713_v32, -inf }
0x1ff3   :  { %3715 = vmax.xlane.f32.xlu1 %v3714_v36 }
0x2004   :  { %3725 = vrot.lane.b32.xlu1 %v13519_v19, %s14683_s26 }
0x2008   :  { %3891 = vrot.lane.b32.xlu1 %v13619_v41, %s14710_s24 }
0x207c   :  { %v3716_v13 = vpop.xlane.xlu1 %3715 }
0x207d   :  { %v3717_v46 = vsub.f32 %v3713_v32, %v3716_v13 }
0x207f   :  { %v3718_v47 = vmul.f32 1.442695, %v3717_v46 }
0x2080   :  { %v3726_v19 = vpop.permute.xlu1 %3725 }
0x2081   :  { %12594 = vpow2.f32 %v3718_v47 }
0x2084   :  { %v3892_v55 = vpop.permute.xlu1 %3891 }
0x208e   :  { %v12595_v48 = vpop.eup %12594 }
0x208f   :  { %v3720_v50 = vsel %vm2931_vm10, %v12595_v48, 0.0 }
0x2090   :  { %3721 = vadd.xlane.f32.xlu0 %v3720_v50 }
0x20a6   :  { %3727 = vrot.lane.b32.xlu0 %v13503_v1, %s14683_s26 }
0x20aa   :  { %3815 = vrot.lane.b32.xlu0 %v13619_v41, %s14740_s5 }
0x2119   :  { %v3722_v27 = vpop.xlane.xlu0 %3721 }
0x211a   :  { %12596 = vrcp.f32 %v3722_v27 }
0x211d   :  { %v3728_v29 = vpop.permute.xlu0 %3727 }
0x211e   :  { %11950 = vmatpush3.msk.msra.mxu1 %vm558_vm4, %v3728_v29 }
0x211f   :  { %11951 = vmatprep.subr.mxu1 %v12870_v12 }
0x2120   :  { %11952 = vmatpush3.msra.mxu1 %v3726_v19 }
0x2121   :  { %v3816_v51 = vpop.permute.xlu0 %3815  ;;  %11961 = vmatprep.subr.mxu1 %v12870_v12 }
0x2122   :  { %11957 = vmatpush3.xpose.msk.msra.mxu0 %vm373_vm2, %v3816_v51 }
0x2123   :  { %11966 = vmatprep.subr.mxu0 %v12870_v12 }
0x2125   :  { %11959 = vmatmul.mubr.msk.f32.vlgmr.msra.gmra.mxu0 %vm373_vm2, %v13619_v41 }
0x2126   :  { %11970 = vmatprep.mubr.msk.f32.mxu0 %vm12871_vm1, %v12870_v12 }
0x2127   :  { %v12597_v1 = vpop.eup %12596 }
0x2128   :  { %v3724_v53 = vmul.f32 %v12597_v1, %v12595_v48 }
0x212a   :  { %11954 = vmatmul.mubr.msk.f32.vlgmr.msra.gmra.mxu1 %vm536_vm3, %v3724_v53 }
0x212b   :  { %11962 = vmatpush3.xpose.msk.msra.mxu1 %vm373_vm2, %v13479_v49  ;;  %11963 = vmatprep.mubr.msk.f32.mxu1 %vm12871_vm1, %v12870_v12 }
0x212c   :  { %11973 = vmatprep.subr.mxu1 %v12870_v12 }
0x212e   :  { %11964 = vmatmul.mubr.msk.f32.vlgmr.msra.gmra.mxu1 %vm373_vm2, %v3892_v55 }
0x212f   :  { %11975 = vmatprep.mubr.msk.f32.mxu1 %vm12871_vm1, %v12870_v12 }
0x21e5   :  { %v3887_v56 = vpop.f32.mrf.mxu0 }
0x21e7   :  { %v11960_v57 = vpop.f32.mrf.mxu0 }
0x21ea   :  { %v13646_v61 = vpop.f32.mrf.mxu1 }
0x21ec   :  { %v11955_v62 = vpop.f32.mrf.mxu1 }
0x21ee   :  { %v3964_v63 = vpop.f32.mrf.mxu1 }
0x21ef   :  { %3969 = vrot.lane.b32.xlu1 %v3964_v63, %s14681_s17 }
0x21f0   :  { %v11965_v0 = vpop.f32.mrf.mxu1 }
0x21f3   :  { %3992 = vrot.lane.b32.xlu1 %v3991_v31, %s14710_s24 }
0x2261   :  { %v3970_v35 = vpop.permute.xlu1 %3969 }
0x2262   :  { %v3972_v2 = vsel %vm2923_vm9, %v3887_v56, %v3970_v35 }
0x2263   :  { %v3973_v3 = vmul.f32 0.35355338, %v3972_v2 }
0x2265   :  { %v3978_v4 = vadd.f32 %v13654_v24, %v3973_v3  ;;  %v13659_v6 = vpop.permute.xlu1 %3992 }
0x2266   :  { %v13675_v52 = vsel %vm558_vm4, %v13619_v41, %v13659_v6 }
0x2267   :  { %v3979_v5 = vsel %vm2931_vm10, %v3978_v4, -inf }
0x2268   :  { %3980 = vmax.xlane.f32.xlu0 %v3979_v5 }
0x227e   :  { %3999 = vrot.lane.b32.xlu0 %v13659_v6, %s14708_s27 }
0x2282   :  { %4158 = vrot.lane.b32.xlu0 %v13479_v49, %s14706_s13 }
0x2286   :  { %4156 = vrot.lane.b32.xlu0 %v13619_v41, %s14704_s1 }
0x228a   :  { %4078 = vrot.lane.b32.xlu0 %v13619_v41, %s14706_s13 }
0x22f1   :  { %v3981_v30 = vpop.xlane.xlu0 %3980 }
0x22f2   :  { %v3982_v23 = vsub.f32 %v3978_v4, %v3981_v30 }
0x22f4   :  { %v3983_v58 = vmul.f32 1.442695, %v3982_v23 }
0x22f5   :  { %v4000_v16 = vpop.permute.xlu0 %3999 }
0x22f6   :  { %12598 = vpow2.f32 %v3983_v58  ;;  %11967 = vmatpush3.msk.msra.mxu0 %vm558_vm4, %v4000_v16 }
0x22f7   :  { %11968 = vmatprep.subr.mxu0 %v12870_v12 }
0x22f9   :  { %v4159_v7 = vpop.permute.xlu0 %4158 }
0x22fd   :  { %v4157_v9 = vpop.permute.xlu0 %4156 }
0x2301   :  { %v4079_v20 = vpop.permute.xlu0 %4078 }
0x2303   :  { %v12599_v39 = vpop.eup %12598 }
0x2304   :  { %v3985_v54 = vsel %vm2931_vm10, %v12599_v39, 0.0 }
0x2305   :  { %3986 = vadd.xlane.f32.xlu1 %v3985_v54 }
0x2316   :  { %3997 = vrot.lane.b32.xlu1 %v13675_v52, %s14708_s27 }
0x231a   :  { %4080 = vrot.lane.b32.xlu1 %v13619_v41, %s14702_s2  ;;  %s14751_s2 = sld [smem:[#allocation29_spill]] }
0x238e   :  { %v3987_v15 = vpop.xlane.xlu1 %3986 }
0x238f   :  { %12600 = vrcp.f32 %v3987_v15 }
0x2392   :  { %v3998_v8 = vpop.permute.xlu1 %3997 }
0x2393   :  { %11969 = vmatpush3.msra.mxu0 %v3998_v8 }
0x2394   :  { %11978 = vmatprep.subr.mxu0 %v12870_v12 }
0x2396   :  { %v4081_v10 = vpop.permute.xlu1 %4080 }
0x2397   :  { %11974 = vmatpush3.xpose.msk.msra.mxu1 %vm373_vm2, %v4081_v10 }
0x2398   :  { %11983 = vmatprep.subr.mxu1 %v12870_v12 }
0x239a   :  { %11976 = vmatmul.mubr.msk.f32.vlgmr.msra.gmra.mxu1 %vm373_vm2, %v4079_v20 }
0x239b   :  { %11987 = vmatprep.mubr.msk.f32.mxu1 %vm12871_vm1, %v12870_v12 }
0x239c   :  { %v12601_v22 = vpop.eup %12600 }
0x239d   :  { %v3989_v14 = vmul.f32 %v12601_v22, %v12599_v39 }
0x239f   :  { %11971 = vmatmul.mubr.msk.f32.vlgmr.msra.gmra.mxu0 %vm536_vm3, %v3989_v14 }
0x23a0   :  { %11979 = vmatpush3.xpose.msk.msra.mxu0 %vm373_vm2, %v4159_v7  ;;  %11980 = vmatprep.mubr.msk.f32.mxu0 %vm12871_vm1, %v12870_v12 }
0x23a1   :  { %11990 = vmatprep.subr.mxu0 %v12870_v12 }
0x23a3   :  { %11981 = vmatmul.mubr.msk.f32.vlgmr.msra.gmra.mxu0 %vm373_vm2, %v4157_v9 }
0x23a4   :  { %11992 = vmatprep.mubr.msk.f32.mxu0 %vm12871_vm1, %v12870_v12 }
0x245a   :  { %v4152_v11 = vpop.f32.mrf.mxu1 }
0x245c   :  { %v11977_v18 = vpop.f32.mrf.mxu1 }
0x245f   :  { %v4073_v21 = vpop.f32.mrf.mxu0 }
0x2460   :  { %4077 = vst.msk [vmem:[#allocation3 + $0x6] sm:$0x3f] %vm3029_vm11, %v4073_v21 }
0x2461   :  { %v11972_v25 = vpop.f32.mrf.mxu0 }
0x2463   :  { %v4230_v28 = vpop.f32.mrf.mxu0 }
0x2464   :  { %4235 = vrot.lane.b32.xlu1 %v4230_v28, %s14681_s17 }
0x2465   :  { %v11982_v33 = vpop.f32.mrf.mxu0 }
0x2468   :  { %4252 = vrot.lane.b32.xlu1 %v13675_v52, %s14700_s7 }
0x24d6   :  { %v4236_v32 = vpop.permute.xlu1 %4235 }
0x24d7   :  { %v4238_v36 = vsel %vm2923_vm9, %v4152_v11, %v4236_v32 }
0x24d8   :  { %v4239_v37 = vmul.f32 0.35355338, %v4238_v36 }
0x24da   :  { %v4240_v40 = vadd.f32 %v4239_v37, %v13654_v24  ;;  %v4253_v27 = vpop.permute.xlu1 %4252 }
0x24dc   :  { %v4241_v13 = vsel %vm2931_vm10, %v4240_v40, -inf }
0x24dd   :  { %4242 = vmax.xlane.f32.xlu0 %v4241_v13 }
0x24f3   :  { %4254 = vrot.lane.b32.xlu0 %v13659_v6, %s14700_s7  ;;  %s14750_s7 = sld [smem:[#allocation24_spill]] }
0x24f7   :  { %4417 = vrot.lane.b32.xlu0 %v13479_v49, %s14698_s10 }
0x24fb   :  { %4339 = vrot.lane.b32.xlu0 %v13619_v41, %s14694_s11  ;;  %s14748_s11 = sld [smem:[#allocation28_spill]] }
0x2566   :  { %v4243_v46 = vpop.xlane.xlu0 %4242 }
0x2567   :  { %v4244_v47 = vsub.f32 %v4240_v40, %v4243_v46 }
0x2569   :  { %v4245_v48 = vmul.f32 1.442695, %v4244_v47  ;;  %v2538_v47 = vadd.f32 %v13471_v43, %v13476_v45 }
0x256a   :  { %v4255_v50 = vpop.permute.xlu0 %4254 }
0x256b   :  { %12602 = vpow2.f32 %v4245_v48  ;;  %11984 = vmatpush3.msk.msra.mxu1 %vm558_vm4, %v4255_v50  ;;  %v2546_v48 = vadd.f32 %v13451_v38, %v2538_v47  ;;  %v4999_v47 = vld [vmem:[#allocation7 + $0x18] sm:$0xff] }
0x256c   :  { %11985 = vmatprep.subr.mxu1 %v12870_v12 }
0x256d   :  { %11986 = vmatpush3.msra.mxu1 %v4253_v27  ;;  %v2550_v50 = vsel %vm196_vm0, %v2546_v48, 0.0 }
0x256e   :  { %v4418_v29 = vpop.permute.xlu0 %4417  ;;  %11995 = vmatprep.subr.mxu1 %v12870_v12 }
0x2572   :  { %v4340_v19 = vpop.permute.xlu0 %4339 }
0x2573   :  { %11991 = vmatpush3.xpose.msk.msra.mxu0 %vm373_vm2, %v4340_v19 }
0x2574   :  { %12000 = vmatprep.subr.mxu0 %v12870_v12 }
0x2578   :  { %v12603_v51 = vpop.eup %12602 }
0x2579   :  { %v4247_v1 = vsel %vm2931_vm10, %v12603_v51, 0.0 }
0x257a   :  { %4248 = vadd.xlane.f32.xlu1 %v4247_v1 }
0x258b   :  { %4415 = vrot.lane.b32.xlu1 %v13619_v41, %s14691_s15 }
0x258f   :  { %4337 = vrot.lane.b32.xlu1 %v13619_v41, %s14698_s10  ;;  %s14749_s10 = sld [smem:[#allocation27_spill]] }
0x2603   :  { %v4249_v53 = vpop.xlane.xlu1 %4248 }
0x2604   :  { %12604 = vrcp.f32 %v4249_v53 }
0x2607   :  { %v4416_v55 = vpop.permute.xlu1 %4415 }
0x260b   :  { %v4338_v56 = vpop.permute.xlu1 %4337 }
0x260c   :  { %11993 = vmatmul.mubr.msk.f32.vlgmr.msra.gmra.mxu0 %vm373_vm2, %v4338_v56 }
0x260d   :  { %12004 = vmatprep.mubr.msk.f32.mxu0 %vm12871_vm1, %v12870_v12 }
0x2611   :  { %v12605_v57 = vpop.eup %12604 }
0x2612   :  { %v4251_v62 = vmul.f32 %v12605_v57, %v12603_v51  ;;  %v4859_v57 = vld [vmem:[#allocation4 + $0x10] sm:$0xff] }
0x2614   :  { %11988 = vmatmul.mubr.msk.f32.vlgmr.msra.gmra.mxu1 %vm536_vm3, %v4251_v62  ;;  %v4858_v62 = vld [vmem:[#allocation4 + $0x8] sm:$0xff] }
0x2615   :  { %11996 = vmatpush3.xpose.msk.msra.mxu1 %vm373_vm2, %v4418_v29  ;;  %11997 = vmatprep.mubr.msk.f32.mxu1 %vm12871_vm1, %v12870_v12 }
0x2616   :  { %12007 = vmatprep.subr.mxu1 %v12870_v12 }
0x2618   :  { %11998 = vmatmul.mubr.msk.f32.vlgmr.msra.gmra.mxu1 %vm373_vm2, %v4416_v55 }
0x2619   :  { %12009 = vmatprep.mubr.msk.f32.mxu1 %vm12871_vm1, %v12870_v12 }
0x26cc   :  { %v4411_v63 = vpop.f32.mrf.mxu0 }
0x26ce   :  { %v11994_v0 = vpop.f32.mrf.mxu0 }
0x26d4   :  { %v13729_v31 = vpop.f32.mrf.mxu1 }
0x26d6   :  { %v11989_v35 = vpop.f32.mrf.mxu1 }
0x26d8   :  { %v4489_v2 = vpop.f32.mrf.mxu1 }
0x26d9   :  { %4494 = vrot.lane.b32.xlu0 %v4489_v2, %s14681_s17 }
0x26da   :  { %v11999_v3 = vpop.f32.mrf.mxu1 }
0x26db   :  { %v2547_v3 = vadd.f32 %v13461_v42, %v13474_v44 }
0x274b   :  { %v4495_v4 = vpop.permute.xlu0 %4494 }
0x274c   :  { %v4497_v5 = vsel %vm2923_vm9, %v4411_v63, %v4495_v4  ;;  %v4857_v63 = vld [vmem:[#allocation4] sm:$0xff] }
0x274d   :  { %v4498_v30 = vmul.f32 0.35355338, %v4497_v5  ;;  %v2553_v5 = vsel %vm196_vm0, %v2547_v3, 0.0 }
0x274f   :  { %v4499_v23 = vadd.f32 %v4498_v30, %v13654_v24 }
0x2751   :  { %v4500_v58 = vsel %vm2931_vm10, %v4499_v23, -inf }
0x2752   :  { %4501 = vmax.xlane.f32.xlu1 %v4500_v58 }
0x2763   :  { %4511 = vrot.lane.b32.xlu1 %v13675_v52, %s14689_s16 }
0x2767   :  { %4676 = vrot.lane.b32.xlu1 %v13479_v49, %s14687_s22 }
0x276b   :  { %4598 = vrot.lane.b32.xlu1 %v13619_v41, %s14685_s23  ;;  %s14743_s23 = sld [smem:[#allocation19_spill]] }
0x27db   :  { %v4502_v16 = vpop.xlane.xlu1 %4501 }
0x27dc   :  { %v4503_v39 = vsub.f32 %v4499_v23, %v4502_v16 }
0x27de   :  { %v4504_v54 = vmul.f32 1.442695, %v4503_v39 }
0x27df   :  { %v4512_v7 = vpop.permute.xlu1 %4511 }
0x27e0   :  { %12606 = vpow2.f32 %v4504_v54 }
0x27e3   :  { %v4677_v15 = vpop.permute.xlu1 %4676 }
0x27e7   :  { %v4599_v8 = vpop.permute.xlu1 %4598 }
0x27e8   :  { %12008 = vmatpush3.xpose.msk.msra.mxu1 %vm373_vm2, %v4599_v8 }
0x27e9   :  { %12017 = vmatprep.subr.mxu1 %v12870_v12 }
0x27ed   :  { %v12607_v9 = vpop.eup %12606 }
0x27ee   :  { %v4506_v10 = vsel %vm2931_vm10, %v12607_v9, 0.0 }
0x27ef   :  { %4507 = vadd.xlane.f32.xlu0 %v4506_v10 }
0x2805   :  { %4513 = vrot.lane.b32.xlu0 %v13659_v6, %s14689_s16  ;;  %s14746_s16 = sld [smem:[#allocation21_spill]] }
0x2809   :  { %4674 = vrot.lane.b32.xlu0 %v13619_v41, %s14714_s0 }
0x280d   :  { %4596 = vrot.lane.b32.xlu0 %v13619_v41, %s14687_s22  ;;  %s14745_s22 = sld [smem:[#allocation20_spill]] }
0x2878   :  { %v4508_v49 = vpop.xlane.xlu0 %4507 }
0x2879   :  { %12608 = vrcp.f32 %v4508_v49 }
0x287c   :  { %v4514_v20 = vpop.permute.xlu0 %4513 }
0x287d   :  { %12001 = vmatpush3.msk.msra.mxu0 %vm558_vm4, %v4514_v20 }
0x287e   :  { %12002 = vmatprep.subr.mxu0 %v12870_v12 }
0x287f   :  { %12003 = vmatpush3.msra.mxu0 %v4512_v7 }
0x2880   :  { %v4675_v22 = vpop.permute.xlu0 %4674  ;;  %12012 = vmatprep.subr.mxu0 %v12870_v12 }
0x2884   :  { %v4597_v14 = vpop.permute.xlu0 %4596 }
0x2885   :  { %12010 = vmatmul.mubr.msk.f32.vlgmr.msra.gmra.mxu1 %vm373_vm2, %v4597_v14  ;;  %v11128_v14 = vld [vmem:[%s14743_s23] ss:$0 sm:$0xff] }
0x2886   :  { %v12609_v11 = vpop.eup %12608  ;;  %12021 = vmatprep.mubr.msk.f32.mxu1 %vm12871_vm1, %v12870_v12 }
0x2887   :  { %v4510_v18 = vmul.f32 %v12609_v11, %v12607_v9 }
0x2889   :  { %12005 = vmatmul.mubr.msk.f32.vlgmr.msra.gmra.mxu0 %vm536_vm3, %v4510_v18 }
0x288a   :  { %12013 = vmatpush3.xpose.msk.msra.mxu0 %vm373_vm2, %v4677_v15  ;;  %12014 = vmatprep.mubr.msk.f32.mxu0 %vm12871_vm1, %v12870_v12 }
0x288d   :  { %12015 = vmatmul.mubr.msk.f32.vlgmr.msra.gmra.mxu0 %vm373_vm2, %v4675_v22 }
0x2945   :  { %v4670_v41 = vpop.f32.mrf.mxu1 }
0x2947   :  { %v12011_v21 = vpop.f32.mrf.mxu1 }
0x2949   :  { %v4587_v25 = vpop.f32.mrf.mxu0 }
0x294b   :  { %v12006_v28 = vpop.f32.mrf.mxu0 }
0x294d   :  { %v4748_v33 = vpop.f32.mrf.mxu0 }
0x294e   :  { %4753 = vrot.lane.b32.xlu1 %v4748_v33, %s14681_s17  ;;  %s14741_s17 = sld [smem:[#allocation16_spill]] }
0x294f   :  { %v12016_v32 = vpop.f32.mrf.mxu0 }
0x2950   :  { %v12745_v32 = vld [vmem:[%s12902_s9 + $0x8] sm:$0xf] }
0x2954   :  { %v11072_v8 = vld [vmem:[%s14741_s17] ss:$0 sm:$0xff] }
0x29c0   :  { %v4754_v36 = vpop.permute.xlu1 %4753 }
0x29c1   :  { %v4756_v37 = vsel %vm2923_vm9, %v4670_v41, %v4754_v36 }
0x29c2   :  { %v4757_v40 = vmul.f32 0.35355338, %v4756_v37 }
0x29c4   :  { %v4758_v13 = vadd.f32 %v4757_v40, %v13654_v24 }
0x29c6   :  { %v4759_v46 = vsel %vm2931_vm10, %v4758_v13, -inf }
0x29c7   :  { %4760 = vmax.xlane.f32.xlu0 %v4759_v46 }
0x29dd   :  { %4772 = vrot.lane.b32.xlu0 %v13659_v6, %s14683_s26 }
0x29e1   :  { %3286 = vrot.lane.b32.xlu0 %v13573_v59, %s14714_s0 }
0x29e5   :  { %3546 = vrot.lane.b32.xlu0 %v13608_v17, %s14691_s15 }
0x29e9   :  { %3806 = vrot.lane.b32.xlu0 %v13646_v61, %s14704_s1 }
0x2a08   :  { %2551 = vadd.xlane.f32.xlu0 %v2550_v50  ;;  %v4997_v50 = vld [vmem:[#allocation7 + $0x8] sm:$0xff] }
0x2a50   :  { %v4761_v27 = vpop.xlane.xlu0 %4760 }
0x2a51   :  { %v4762_v29 = vsub.f32 %v4758_v13, %v4761_v27  ;;  %v4996_v27 = vld [vmem:[#allocation7] sm:$0xff] }
0x2a53   :  { %v4763_v6 = vmul.f32 1.442695, %v4762_v29 }
0x2a54   :  { %v4773_v19 = vpop.permute.xlu0 %4772 }
0x2a55   :  { %12610 = vpow2.f32 %v4763_v6  ;;  %12018 = vmatpush3.msk.msra.mxu1 %vm558_vm4, %v4773_v19 }
0x2a56   :  { %12019 = vmatprep.subr.mxu1 %v12870_v12 }
0x2a58   :  { %v3287_v59 = vpop.permute.xlu0 %3286 }
0x2a59   :  { %3290 = vst.msk [vmem:[#allocation3] sm:$0x3f] %vm14697_vm12, %v3287_v59 }
0x2a5c   :  { %v3547_v43 = vpop.permute.xlu0 %3546 }
0x2a5d   :  { %3550 = vst.msk [vmem:[#allocation3] sm:$0x3f] %vm14696_vm13, %v3547_v43 }
0x2a60   :  { %v3807_v38 = vpop.permute.xlu0 %3806 }
0x2a61   :  { %3810 = vst.msk [vmem:[#allocation3] sm:$0x3f] %vm14693_vm14, %v3807_v38 }
0x2a62   :  { %v12611_v45 = vpop.eup %12610 }
0x2a63   :  { %v4765_v17 = vsel %vm2931_vm10, %v12611_v45, 0.0 }
0x2a64   :  { %4766 = vadd.xlane.f32.xlu1 %v4765_v17 }
0x2a75   :  { %4770 = vrot.lane.b32.xlu1 %v13675_v52, %s14683_s26  ;;  %v4860_v52 = vld [vmem:[#allocation4 + $0x18] sm:$0xff]  ;;  %s14742_s26 = sld [smem:[#allocation17_spill]] }
0x2a76   :  { %12024 = vmatprep.subr.mxu0 %v4860_v52 }
0x2a77   :  { %12025 = vmatpush3.msra.mxu0 %v4860_v52  ;;  %v5288_v52 = vld [vmem:[#allocation9 + $0x18] sm:$0xff] }
0x2a78   :  { %12026 = vmatprep.subr.mxu0 %v4859_v57 }
0x2a79   :  { %4333 = vrot.lane.b32.xlu1 %v13729_v31, %s14714_s0  ;;  %12027 = vmatpush3.msra.mxu0 %v4859_v57 }
0x2a7a   :  { %12028 = vmatprep.subr.mxu0 %v4858_v62 }
0x2a7b   :  { %12029 = vmatpush3.msra.mxu0 %v4858_v62  ;;  %v11073_v10 = vld [vmem:[%s14742_s26] ss:$0 sm:$0xff] }
0x2a7c   :  { %12030 = vmatprep.subr.mxu0 %v4857_v63 }
0x2a7d   :  { %4592 = vrot.lane.b32.xlu1 %v4587_v25, %s14691_s15  ;;  %12031 = vmatpush3.msra.mxu0 %v4857_v63  ;;  %v12744_v25 = vld [vmem:[%s12902_s9] sm:$0xff]  ;;  %s14744_s9 = sld [smem:[#allocation23_spill]] }
0x2a7e   :  { %s14747_s15 = sld [smem:[#allocation22_spill]] }
0x2a91   :  { %v2552_v35 = vpop.xlane.xlu0 %2551 }
0x2a92   :  { %v2557_v2 = vmul.f32 0.03125, %v2552_v35  ;;  %v5285_v35 = vld [vmem:[#allocation9] sm:$0xff] }
0x2a94   :  { %v2559_v4 = vsub.f32 %v2546_v48, %v2557_v2  ;;  %v4998_v48 = vld [vmem:[#allocation7 + $0x10] sm:$0xff]  ;;  %v5149_v2 = vld [vmem:[%s14744_s9 + $0x38] sm:$0xff] }
0x2a95   :  { %12046 = vmatprep.subr.mxu0 %v5149_v2 }
0x2a96   :  { %v2561_v30 = vmul.f32 %v2559_v4, %v2559_v4 }
0x2a98   :  { %v2563_v23 = vsel %vm196_vm0, %v2561_v30, 0.0 }
0x2aed   :  { %v4767_v61 = vpop.xlane.xlu1 %4766 }
0x2aee   :  { %12612 = vrcp.f32 %v4767_v61 }
0x2af1   :  { %v4771_v51 = vpop.permute.xlu1 %4770 }
0x2af2   :  { %12020 = vmatpush3.msra.mxu1 %v4771_v51 }
0x2af3   :  { %12035 = vmatprep.subr.mxu1 %v4999_v47 }
0x2af5   :  { %v4334_v1 = vpop.permute.xlu1 %4333 }
0x2af6   :  { %4336 = vst.msk [vmem:[#allocation3 + $0x6] sm:$0x3f] %vm14697_vm12, %v4334_v1  ;;  %vm5157_vm12 = vcmask 523264  }
0x2af9   :  { %v4593_v53 = vpop.permute.xlu1 %4592 }
0x2afa   :  { %4595 = vst.msk [vmem:[#allocation3 + $0x6] sm:$0x3f] %vm14696_vm13, %v4593_v53 }
0x2afb   :  { %v12613_v55 = vpop.eup %12612 }
0x2afc   :  { %v4769_v56 = vmul.f32 %v12613_v55, %v12611_v45 }
0x2afe   :  { %12022 = vmatmul.mubr.msk.f32.vlgmr.msra.gmra.mxu1 %vm536_vm3, %v4769_v56 }
0x2aff   :  { %12036 = vmatpush3.msra.mxu1 %v4999_v47 }
0x2b00   :  { %12037 = vmatprep.subr.mxu1 %v4998_v48 }
0x2b01   :  { %12038 = vmatpush3.msra.mxu1 %v4998_v48 }
0x2b02   :  { %12039 = vmatprep.subr.mxu1 %v4997_v50 }
0x2b03   :  { %12040 = vmatpush3.msra.mxu1 %v4997_v50 }
0x2b04   :  { %12041 = vmatprep.subr.mxu1 %v4996_v27 }
0x2b05   :  { %12042 = vmatpush3.msra.mxu1 %v4996_v27 }
0x2b06   :  { %12065 = vmatprep.subr.mxu1 %v5288_v52 }
0x2bbe   :  { %v4846_v0 = vpop.f32.mrf.mxu1 }
0x2bbf   :  { %4851 = vrot.lane.b32.xlu1 %v4846_v0, %s14704_s1  ;;  %v5287_v0 = vld [vmem:[#allocation9 + $0x10] sm:$0xff]  ;;  %s14752_s1 = sld [smem:[#allocation25_spill]] }
0x2bc0   :  { %v12023_v31 = vpop.f32.mrf.mxu1 }
0x2bc1   :  { %v5286_v31 = vld [vmem:[#allocation9 + $0x8] sm:$0xff] }
0x2be3   :  { %2554 = vadd.xlane.f32.xlu1 %v2553_v5  ;;  %v5146_v5 = vld [vmem:[%s14744_s9 + $0x20] sm:$0xff] }
0x2be7   :  { %2564 = vadd.xlane.f32.xlu1 %v2563_v23  ;;  %v5145_v23 = vld [vmem:[%s14744_s9 + $0x18] sm:$0xff] }
0x2c31   :  { %v4852_v58 = vpop.permute.xlu1 %4851 }
0x2c32   :  { %4854 = vst.msk [vmem:[#allocation3 + $0x6] sm:$0x3f] %vm14693_vm14, %v4852_v58 }
0x2c39   :  { %v4855_v16 = vld [vmem:[#allocation3] sm:$0xff]  ;;  %v4856_v39 = vld [vmem:[#allocation3 + $0x8] sm:$0xf] }
0x2c3a   :  { %12032 = vmatprep.mubr.msk.f32.mxu0 %vm196_vm0, %v4855_v16  ;;  %v5144_v16 = vld [vmem:[%s14744_s9 + $0x10] sm:$0xff] }
0x2c3b   :  { %12033 = vmatmul.mubr.msk.f32.vlgmr.msra.gmra.mxu0 %vm196_vm0, %v4856_v39 }
0x2c3c   :  { %12047 = vmatpush3.msra.mxu0 %v5149_v2 }
0x2c6c   :  { %v2555_v42 = vpop.xlane.xlu1 %2554 }
0x2c6d   :  { %v2558_v18 = vmul.f32 0.03125, %v2555_v42 }
0x2c6f   :  { %v2560_v33 = vsub.f32 %v2547_v3, %v2558_v18  ;;  %v5148_v3 = vld [vmem:[%s14744_s9 + $0x30] sm:$0xff] }
0x2c70   :  { %v2565_v44 = vpop.xlane.xlu1 %2564  ;;  %12048 = vmatprep.subr.mxu0 %v5148_v3 }
0x2c71   :  { %v2569_v54 = vmul.f32 0.03125, %v2565_v44  ;;  %v2562_v13 = vmul.f32 %v2560_v33, %v2560_v33  ;;  %12049 = vmatpush3.msra.mxu0 %v5148_v3  ;;  %v5143_v44 = vld [vmem:[%s14744_s9 + $0x8] sm:$0xff] }
0x2c73   :  { %v2571_v7 = vadd.f32 1e-12, %v2569_v54  ;;  %v2566_v46 = vsel %vm196_vm0, %v2562_v13, 0.0 }
0x2c75   :  { %12614 = vrsqrt.f32 %v2571_v7  ;;  %v5142_v7 = vld [vmem:[%s14744_s9] sm:$0xff] }
0x2c82   :  { %v12615_v15 = vpop.eup %12614 }
0x2c83   :  { %v2575_v9 = vmul.f32 %v12615_v15, %v2559_v4  ;;  %v5147_v4 = vld [vmem:[%s14744_s9 + $0x28] sm:$0xff] }
0x2c84   :  { %12050 = vmatprep.subr.mxu0 %v5147_v4 }
0x2c85   :  { %v2583_v49 = vmul.f32 %v11072_v8, %v2575_v9  ;;  %12051 = vmatpush3.msra.mxu0 %v5147_v4  ;;  %v11131_v9 = vld [vmem:[%s14745_s22] ss:$0 sm:$0xff] }
0x2c86   :  { %12052 = vmatprep.subr.mxu0 %v5146_v5 }
0x2c87   :  { %v13801_v20 = vadd.f32 %v11073_v10, %v2583_v49  ;;  %12053 = vmatpush3.msra.mxu0 %v5146_v5  ;;  %v11132_v49 = vld [vmem:[%s14746_s16] ss:$0 sm:$0xff] }
0x2c88   :  { %12054 = vmatprep.subr.mxu0 %v5145_v23 }
0x2c89   :  { %12043 = vmatprep.mubr.msk.f32.mxu1 %vm196_vm0, %v13801_v20  ;;  %12055 = vmatpush3.msra.mxu0 %v5145_v23 }
0x2c8a   :  { %12056 = vmatprep.subr.mxu0 %v5144_v16 }
0x2c8b   :  { %12057 = vmatpush3.msra.mxu0 %v5144_v16 }
0x2c8c   :  { %12058 = vmatprep.subr.mxu0 %v5143_v44 }
0x2c8d   :  { %12059 = vmatpush3.msra.mxu0 %v5143_v44  ;;  %v12887_v44 = vmov -1.0  }
0x2c8e   :  { %12060 = vmatprep.subr.mxu0 %v5142_v7 }
0x2c8f   :  { %12061 = vmatpush3.msra.mxu0 %v5142_v7 }
0x2cfb   :  { %v12034_v22 = vpop.f32.mrf.mxu0 }
0x2cfc   :  { %v4946_v41 = vadd.f32 %v12034_v22, %v11128_v14 }
0x2cfd   :  { %v4940_v11 = vpop.f32.mrf.mxu0 }
0x2cfe   :  { %v4941_v21 = vadd.f32 %v11128_v14, %v4940_v11  ;;  %v4950_v36 = vadd.f32 %v12745_v32, %v4946_v41 }
0x2d00   :  { %v4949_v28 = vadd.f32 %v12744_v25, %v4941_v21  ;;  %v4957_v40 = vsel %vm4956_vm15, %v4950_v36, 0.0  ;;  %v11133_v25 = vld [vmem:[%s14747_s15] ss:$0 sm:$0xff] }
0x2d02   :  { %v4953_v37 = vsel %vm196_vm0, %v4949_v28, 0.0 }
0x2d03   :  { %4954 = vadd.xlane.f32.xlu0 %v4953_v37 }
0x2d07   :  { %4958 = vadd.xlane.f32.xlu0 %v4957_v40 }
0x2d0b   :  { %2567 = vadd.xlane.f32.xlu0 %v2566_v46 }
0x2d8c   :  { %v4955_v29 = vpop.xlane.xlu0 %4954 }
0x2d8d   :  { %v4960_v6 = vmul.f32 0.03125, %v4955_v29 }
0x2d8f   :  { %v13811_v19 = vsub.f32 %v4949_v28, %v4960_v6 }
0x2d90   :  { %v4959_v59 = vpop.xlane.xlu0 %4958 }
0x2d91   :  { %v4961_v43 = vmul.f32 0.03125, %v4959_v59  ;;  %v4964_v38 = vmul.f32 %v13811_v19, %v13811_v19 }
0x2d93   :  { %v13815_v45 = vsub.f32 %v4950_v36, %v4961_v43  ;;  %v4966_v17 = vsel %vm196_vm0, %v4964_v38, 0.0 }
0x2d94   :  { %4967 = vadd.xlane.f32.xlu1 %v4966_v17  ;;  %v2568_v61 = vpop.xlane.xlu0 %2567 }
0x2d95   :  { %v2570_v51 = vmul.f32 0.03125, %v2568_v61  ;;  %v4965_v1 = vmul.f32 %v13815_v45, %v13815_v45 }
0x2d97   :  { %v2572_v53 = vadd.f32 1e-12, %v2570_v51  ;;  %v4969_v55 = vsel %vm4956_vm15, %v4965_v1, 0.0 }
0x2d98   :  { %4970 = vadd.xlane.f32.xlu0 %v4969_v55 }
0x2d99   :  { %12616 = vrsqrt.f32 %v2572_v53 }
0x2da6   :  { %v12617_v56 = vpop.eup %12616 }
0x2da7   :  { %v2576_v57 = vmul.f32 %v12617_v56, %v2560_v33 }
0x2da9   :  { %v2584_v62 = vmul.f32 %v11072_v8, %v2576_v57 }
0x2dab   :  { %v13821_v63 = vadd.f32 %v11073_v10, %v2584_v62 }
0x2dad   :  { %12044 = vmatmul.mubr.msk.f32.vlgmr.msra.gmra.mxu1 %vm196_vm0, %v13821_v63 }
0x2dae   :  { %12066 = vmatpush3.msra.mxu1 %v5288_v52 }
0x2daf   :  { %12067 = vmatprep.subr.mxu1 %v5287_v0 }
0x2db0   :  { %12068 = vmatpush3.msra.mxu1 %v5287_v0 }
0x2db1   :  { %12069 = vmatprep.subr.mxu1 %v5286_v31 }
0x2db2   :  { %12070 = vmatpush3.msra.mxu1 %v5286_v31 }
0x2db3   :  { %12071 = vmatprep.subr.mxu1 %v5285_v35 }
0x2db4   :  { %12072 = vmatpush3.msra.mxu1 %v5285_v35 }
0x2e1d   :  { %v4968_v30 = vpop.xlane.xlu1 %4967 }
0x2e1e   :  { %v4972_v58 = vmul.f32 0.03125, %v4968_v30 }
0x2e20   :  { %v4974_v39 = vadd.f32 1e-12, %v4972_v58 }
0x2e21   :  { %v4971_v42 = vpop.xlane.xlu0 %4970 }
0x2e22   :  { %12618 = vrsqrt.f32 %v4974_v39  ;;  %v4973_v54 = vmul.f32 0.03125, %v4971_v42 }
0x2e24   :  { %v4975_v15 = vadd.f32 1e-12, %v4973_v54 }
0x2e26   :  { %12620 = vrsqrt.f32 %v4975_v15 }
0x2e2f   :  { %v12619_v8 = vpop.eup %12618 }
0x2e30   :  { %v4978_v10 = vmul.f32 %v12619_v8, %v13811_v19 }
0x2e32   :  { %v4986_v22 = vmul.f32 %v11131_v9, %v4978_v10 }
0x2e33   :  { %v12621_v14 = vpop.eup %12620 }
0x2e34   :  { %v4979_v11 = vmul.f32 %v12621_v14, %v13815_v45  ;;  %v13837_v18 = vadd.f32 %v11132_v49, %v4986_v22 }
0x2e36   :  { %v4987_v41 = vmul.f32 %v11131_v9, %v4979_v11  ;;  %12073 = vmatprep.mubr.msk.f32.mxu1 %vm196_vm0, %v13837_v18 }
0x2e38   :  { %v13841_v21 = vadd.f32 %v11132_v49, %v4987_v41  ;;  %v5438_v41 = vld [vmem:[%s14748_s11 + $0x38] sm:$0xff] }
0x2e39   :  { %12076 = vmatprep.subr.mxu1 %v5438_v41 }
0x2e3a   :  { %12074 = vmatmul.mubr.msk.f32.vlgmr.msra.gmra.mxu1 %vm196_vm0, %v13841_v21 }
0x2e3b   :  { %12077 = vmatpush3.msra.mxu1 %v5438_v41 }
0x2e6d   :  { %v12045_v28 = vpop.f32.mrf.mxu1 }
0x2e6e   :  { %v5085_v33 = vadd.f32 %v12045_v28, %v11133_v25 }
0x2e6f   :  { %v5079_v32 = vpop.f32.mrf.mxu1 }
0x2e70   :  { %v5091_v36 = vmul.f32 0.70710677, %v5085_v33  ;;  %v5080_v37 = vadd.f32 %v11133_v25, %v5079_v32  ;;  %v5089_v11 = vmul.f32 0.5, %v5085_v33  ;;  %v5437_v32 = vld [vmem:[%s14748_s11 + $0x30] sm:$0xff]  ;;  %v5435_v33 = vld [vmem:[%s14748_s11 + $0x20] sm:$0xff] }
0x2e71   :  { %12078 = vmatprep.subr.mxu1 %v5437_v32 }
0x2e72   :  { %v5097_v40 = vand.u32 2147483647, %v5091_v36  ;;  %v5090_v13 = vmul.f32 0.70710677, %v5080_v37  ;;  %vm5093_vm14 = vcmp.ge.f32.partialorder %v5091_v36, 0.0  ;;  %v5088_v22 = vmul.f32 0.5, %v5080_v37  ;;  %12079 = vmatpush3.msra.mxu1 %v5437_v32 }
0x2e73   :  { %v5095_v54 = vsel %vm5093_vm14, 1.0, %v12887_v44  ;;  %v5436_v36 = vld [vmem:[%s14748_s11 + $0x28] sm:$0xff]  ;;  %v5434_v37 = vld [vmem:[%s14748_s11 + $0x18] sm:$0xff] }
0x2e74   :  { %v5099_v46 = vmul.f32 0.3275911, %v5097_v40  ;;  %v5096_v47 = vand.u32 2147483647, %v5090_v13  ;;  %v5125_v29 = vsub.f32 0.0, %v5097_v40  ;;  %vm5092_vm13 = vcmp.ge.f32.partialorder %v5090_v13, 0.0  ;;  %12080 = vmatprep.subr.mxu1 %v5436_v36 }
0x2e75   :  { %v5094_v9 = vsel %vm5092_vm13, 1.0, %v12887_v44  ;;  %12081 = vmatpush3.msra.mxu1 %v5436_v36  ;;  %v5432_v13 = vld [vmem:[%s14748_s11 + $0x8] sm:$0xff] }
0x2e76   :  { %v5101_v48 = vadd.f32 1.0, %v5099_v46  ;;  %v5098_v50 = vmul.f32 0.3275911, %v5096_v47  ;;  %v5124_v6 = vsub.f32 0.0, %v5096_v47  ;;  %v5127_v19 = vmul.f32 %v5125_v29, %v5097_v40  ;;  %12082 = vmatprep.subr.mxu1 %v5435_v33  ;;  %v5433_v40 = vld [vmem:[%s14748_s11 + $0x10] sm:$0xff]  ;;  %v5431_v46 = vld [vmem:[%s14748_s11] sm:$0xff] }
0x2e77   :  { %12083 = vmatpush3.msra.mxu1 %v5435_v33 }
0x2e78   :  { %12622 = vrcp.f32 %v5101_v48  ;;  %v5100_v27 = vadd.f32 1.0, %v5098_v50  ;;  %v5126_v43 = vmul.f32 %v5124_v6, %v5096_v47  ;;  %v5130_v45 = vmul.f32 1.442695, %v5127_v19  ;;  %12084 = vmatprep.subr.mxu1 %v5434_v37  ;;  %v11141_v47 = vld [vmem:[%s14749_s10] ss:$0 sm:$0xff] }
0x2e79   :  { %12085 = vmatpush3.msra.mxu1 %v5434_v37 }
0x2e7a   :  { %12624 = vrcp.f32 %v5100_v27  ;;  %v5128_v1 = vmul.f32 1.442695, %v5126_v43  ;;  %12086 = vmatprep.subr.mxu1 %v5433_v40 }
0x2e7b   :  { %12626 = vpow2.f32 %v5130_v45  ;;  %12087 = vmatpush3.msra.mxu1 %v5433_v40 }
0x2e7c   :  { %12628 = vpow2.f32 %v5128_v1  ;;  %12088 = vmatprep.subr.mxu1 %v5432_v13 }
0x2e7d   :  { %12089 = vmatpush3.msra.mxu1 %v5432_v13 }
0x2e7e   :  { %12090 = vmatprep.subr.mxu1 %v5431_v46 }
0x2e7f   :  { %12091 = vmatpush3.msra.mxu1 %v5431_v46 }
0x2e80   :  { %12117 = vmatprep.subr.mxu1 %v12870_v12 }
0x2e85   :  { %v12623_v59 = vpop.eup %12622 }
0x2e86   :  { %v5107_v38 = vmul.f32 1.0614054, %v12623_v59 }
0x2e87   :  { %v12625_v17 = vpop.eup %12624 }
0x2e88   :  { %v5109_v61 = vadd.f32 -1.4531521, %v5107_v38  ;;  %v5106_v51 = vmul.f32 1.0614054, %v12625_v17  ;;  %v12627_v30 = vpop.eup %12626 }
0x2e89   :  { %v12629_v39 = vpop.eup %12628 }
0x2e8a   :  { %v5111_v53 = vmul.f32 %v12623_v59, %v5109_v61  ;;  %v5108_v55 = vadd.f32 -1.4531521, %v5106_v51 }
0x2e8c   :  { %v5113_v56 = vadd.f32 1.4214138, %v5111_v53  ;;  %v5110_v52 = vmul.f32 %v12625_v17, %v5108_v55 }
0x2e8e   :  { %v5115_v57 = vmul.f32 %v12623_v59, %v5113_v56  ;;  %v5112_v62 = vadd.f32 1.4214138, %v5110_v52 }
0x2e90   :  { %v5117_v0 = vadd.f32 -0.28449672, %v5115_v57  ;;  %v5114_v31 = vmul.f32 %v12625_v17, %v5112_v62 }
0x2e92   :  { %v5119_v35 = vmul.f32 %v12623_v59, %v5117_v0  ;;  %v5116_v2 = vadd.f32 -0.28449672, %v5114_v31 }
0x2e94   :  { %v5121_v3 = vadd.f32 0.2548296, %v5119_v35  ;;  %v5118_v4 = vmul.f32 %v12625_v17, %v5116_v2 }
0x2e96   :  { %v5123_v5 = vmul.f32 %v12623_v59, %v5121_v3  ;;  %v5120_v23 = vadd.f32 0.2548296, %v5118_v4 }
0x2e98   :  { %v5133_v58 = vmul.f32 %v12627_v30, %v5123_v5  ;;  %v5122_v16 = vmul.f32 %v12625_v17, %v5120_v23 }
0x2e9a   :  { %v5135_v42 = vsub.f32 1.0, %v5133_v58  ;;  %v5132_v7 = vmul.f32 %v12629_v39, %v5122_v16 }
0x2e9c   :  { %v5137_v15 = vmul.f32 %v5135_v42, %v5095_v54  ;;  %v5134_v8 = vsub.f32 1.0, %v5132_v7 }
0x2e9e   :  { %v5136_v10 = vmul.f32 %v5134_v8, %v5094_v9  ;;  %v5139_v49 = vadd.f32 1.0, %v5137_v15 }
0x2ea0   :  { %v5138_v14 = vadd.f32 1.0, %v5136_v10  ;;  %v5141_v28 = vmul.f32 %v5139_v49, %v5089_v11 }
0x2ea2   :  { %v5140_v25 = vmul.f32 %v5138_v14, %v5088_v22 }
0x2ea4   :  { %12062 = vmatprep.mubr.msk.f32.mxu0 %vm5157_vm12, %v5140_v25 }
0x2ea5   :  { %12063 = vmatmul.mubr.msk.f32.vlgmr.msra.gmra.mxu0 %vm5157_vm12, %v5141_v28 }
0x2efa   :  { %v12075_v48 = vpop.f32.mrf.mxu1 }
0x2efb   :  { %v5374_v50 = vadd.f32 %v12075_v48, %v11141_v47  ;;  %v11136_v48 = vld [vmem:[%s14750_s7] ss:$0 sm:$0xff] }
0x2efc   :  { %v5368_v27 = vpop.f32.mrf.mxu1 }
0x2efd   :  { %v5380_v29 = vmul.f32 0.70710677, %v5374_v50  ;;  %v5369_v6 = vadd.f32 %v11141_v47, %v5368_v27  ;;  %v5378_v13 = vmul.f32 0.5, %v5374_v50 }
0x2eff   :  { %v5386_v19 = vand.u32 2147483647, %v5380_v29  ;;  %v5379_v59 = vmul.f32 0.70710677, %v5369_v6  ;;  %vm5382_vm13 = vcmp.ge.f32.partialorder %v5380_v29, 0.0  ;;  %v5377_v37 = vmul.f32 0.5, %v5369_v6 }
0x2f00   :  { %v5384_v11 = vsel %vm5382_vm13, 1.0, %v12887_v44 }
0x2f01   :  { %v5388_v43 = vmul.f32 0.3275911, %v5386_v19  ;;  %v5385_v38 = vand.u32 2147483647, %v5379_v59  ;;  %v5414_v51 = vsub.f32 0.0, %v5386_v19  ;;  %vm5381_vm14 = vcmp.ge.f32.partialorder %v5379_v59, 0.0 }
0x2f02   :  { %v5383_v32 = vsel %vm5381_vm14, 1.0, %v12887_v44 }
0x2f03   :  { %v5390_v45 = vadd.f32 1.0, %v5388_v43  ;;  %v5387_v17 = vmul.f32 0.3275911, %v5385_v38  ;;  %v5413_v1 = vsub.f32 0.0, %v5385_v38  ;;  %v5416_v53 = vmul.f32 %v5414_v51, %v5386_v19 }
0x2f05   :  { %12630 = vrcp.f32 %v5390_v45  ;;  %v5389_v61 = vadd.f32 1.0, %v5387_v17  ;;  %v5415_v56 = vmul.f32 %v5413_v1, %v5385_v38  ;;  %v5419_v57 = vmul.f32 1.442695, %v5416_v53  ;;  %v11144_v45 = vld [vmem:[%s14751_s2] ss:$0 sm:$0xff]  ;;  %s14767_s2 = smov 120  }
0x2f07   :  { %12632 = vrcp.f32 %v5389_v61  ;;  %v5417_v35 = vmul.f32 1.442695, %v5415_v56 }
0x2f08   :  { %12634 = vpow2.f32 %v5419_v57 }
0x2f09   :  { %12636 = vpow2.f32 %v5417_v35 }
0x2f12   :  { %v12631_v55 = vpop.eup %12630 }
0x2f13   :  { %v5396_v52 = vmul.f32 1.0614054, %v12631_v55 }
0x2f14   :  { %v12633_v62 = vpop.eup %12632 }
0x2f15   :  { %v5398_v0 = vadd.f32 -1.4531521, %v5396_v52  ;;  %v5395_v31 = vmul.f32 1.0614054, %v12633_v62  ;;  %v12635_v8 = vpop.eup %12634 }
0x2f16   :  { %v12637_v22 = vpop.eup %12636 }
0x2f17   :  { %v5400_v2 = vmul.f32 %v12631_v55, %v5398_v0  ;;  %v5397_v3 = vadd.f32 -1.4531521, %v5395_v31 }
0x2f19   :  { %v5402_v4 = vadd.f32 1.4214138, %v5400_v2  ;;  %v5399_v5 = vmul.f32 %v12633_v62, %v5397_v3 }
0x2f1b   :  { %v5404_v30 = vmul.f32 %v12631_v55, %v5402_v4  ;;  %v5401_v23 = vadd.f32 1.4214138, %v5399_v5  ;;  %v11151_v4 = vld [vmem:[%s12917_s21 + $0x30] sm:$0xff]  ;;  %v11150_v5 = vld [vmem:[%s12917_s21 + $0x28] sm:$0xff] }
0x2f1d   :  { %v5406_v58 = vadd.f32 -0.28449672, %v5404_v30  ;;  %v5403_v16 = vmul.f32 %v12633_v62, %v5401_v23  ;;  %v11149_v30 = vld [vmem:[%s12917_s21 + $0x20] sm:$0xff] }
0x2f1f   :  { %v5408_v39 = vmul.f32 %v12631_v55, %v5406_v58  ;;  %v5405_v42 = vadd.f32 -0.28449672, %v5403_v16 }
0x2f21   :  { %v5410_v54 = vadd.f32 0.2548296, %v5408_v39  ;;  %v5407_v7 = vmul.f32 %v12633_v62, %v5405_v42 }
0x2f23   :  { %v5412_v15 = vmul.f32 %v12631_v55, %v5410_v54  ;;  %v5409_v9 = vadd.f32 0.2548296, %v5407_v7 }
0x2f25   :  { %v5422_v10 = vmul.f32 %v12635_v8, %v5412_v15  ;;  %v5411_v49 = vmul.f32 %v12633_v62, %v5409_v9 }
0x2f27   :  { %v5424_v14 = vsub.f32 1.0, %v5422_v10  ;;  %v5421_v41 = vmul.f32 %v12637_v22, %v5411_v49 }
0x2f29   :  { %v5426_v25 = vmul.f32 %v5424_v14, %v5384_v11  ;;  %v5423_v28 = vsub.f32 1.0, %v5421_v41 }
0x2f2b   :  { %v5425_v36 = vmul.f32 %v5423_v28, %v5383_v32  ;;  %v5428_v33 = vadd.f32 1.0, %v5426_v25  ;;  %v11139_v28 = vld [vmem:[%s14752_s1] ss:$0 sm:$0xff]  ;;  %s14766_s1 = smov 64  }
0x2f2d   :  { %v5427_v40 = vadd.f32 1.0, %v5425_v36  ;;  %v5430_v47 = vmul.f32 %v5428_v33, %v5378_v13  ;;  %v11160_v33 = vld [vmem:[%s12927_s29 + $0x38] sm:$0xff] }
0x2f2f   :  { %v5429_v46 = vmul.f32 %v5427_v40, %v5377_v37 }
0x2f31   :  { %12092 = vmatprep.mubr.msk.f32.mxu1 %vm5157_vm12, %v5429_v46 }
0x2f32   :  { %12093 = vmatmul.mubr.msk.f32.vlgmr.msra.gmra.mxu1 %vm5157_vm12, %v5430_v47 }
0x2f33   :  { %12119 = vmatprep.mubr.msk.f32.mxu1 %vm12871_vm1, %v12870_v12 }
0x2f65   :  { %v12064_v27 = vpop.f32.mrf.mxu0 }
0x2f66   :  { %v5236_v29 = vadd.f32 %v12064_v27, %v11136_v48  ;;  %v11159_v27 = vld [vmem:[%s12927_s29 + $0x30] sm:$0xff] }
0x2f67   :  { %v5230_v19 = vpop.f32.mrf.mxu0 }
0x2f68   :  { %v5240_v59 = vadd.f32 %v5236_v29, %v13821_v63  ;;  %v5231_v43 = vadd.f32 %v11136_v48, %v5230_v19  ;;  %v11158_v29 = vld [vmem:[%s12927_s29 + $0x28] sm:$0xff]  ;;  %v11157_v19 = vld [vmem:[%s12927_s29 + $0x20] sm:$0xff]  ;;  %s14755_s29 = smov 88  }
0x2f6a   :  { %v5239_v6 = vadd.f32 %v5231_v43, %v13801_v20  ;;  %v5246_v50 = vsel %vm196_vm0, %v5240_v59, 0.0 }
0x2f6b   :  { %5247 = vadd.xlane.f32.xlu0 %v5246_v50 }
0x2f6c   :  { %v5243_v38 = vsel %vm196_vm0, %v5239_v6, 0.0 }
0x2f6d   :  { %5244 = vadd.xlane.f32.xlu1 %v5243_v38 }
0x2ff2   :  { %v12094_v17 = vpop.f32.mrf.mxu1 }
0x2ff3   :  { %v5524_v61 = vadd.f32 %v12094_v17, %v11144_v45 }
0x2ff4   :  { %v5518_v51 = vpop.f32.mrf.mxu1  ;;  %v5248_v1 = vpop.xlane.xlu0 %5247 }
0x2ff5   :  { %v5528_v53 = vadd.f32 %v5524_v61, %v13841_v21  ;;  %v5519_v55 = vadd.f32 %v11144_v45, %v5518_v51  ;;  %v5250_v56 = vmul.f32 0.03125, %v5248_v1  ;;  %v11147_v61 = vld [vmem:[%s13047_s14] ss:$0 sm:$0xff]  ;;  %s14763_s14 = smov 8  }
0x2ff6   :  { %v5245_v63 = vpop.xlane.xlu1 %5244 }
0x2ff7   :  { %v5527_v20 = vadd.f32 %v5519_v55, %v13837_v18  ;;  %v5252_v52 = vsub.f32 %v5240_v59, %v5250_v56  ;;  %v5249_v57 = vmul.f32 0.03125, %v5245_v63  ;;  %v5534_v62 = vsel %vm4956_vm15, %v5528_v53, 0.0  ;;  %v11152_v18 = vld [vmem:[%s12917_s21 + $0x38] sm:$0xff]  ;;  %s14753_s21 = sld [smem:[#allocation26_spill]]  ;;  %v11148_v56 = vld [vmem:[%s13052_s19] ss:$0 sm:$0xff] }
0x2ff8   :  { %5535 = vadd.xlane.f32.xlu0 %v5534_v62  ;;  %12095 = vmatprep.subr.mxu0 %v11152_v18  ;;  %s14761_s19 = smov 104  }
0x2ff9   :  { %v5251_v0 = vsub.f32 %v5239_v6, %v5249_v57  ;;  %v5531_v31 = vsel %vm196_vm0, %v5527_v20, 0.0  ;;  %v5254_v35 = vmul.f32 %v5252_v52, %v5252_v52  ;;  %12096 = vmatpush3.msra.mxu0 %v11152_v18  ;;  %v11154_v57 = vld [vmem:[%s12922_s25 + $0x1] ss:$0 sm:$0xff]  ;;  %s14754_s25 = smov 24  }
0x2ffa   :  { %5532 = vadd.xlane.f32.xlu1 %v5531_v31  ;;  %12097 = vmatprep.subr.mxu0 %v11151_v4 }
0x2ffb   :  { %v5258_v21 = vsel %vm196_vm0, %v5254_v35, 0.0  ;;  %v5253_v2 = vmul.f32 %v5251_v0, %v5251_v0  ;;  %12098 = vmatpush3.msra.mxu0 %v11151_v4 }
0x2ffc   :  { %5259 = vadd.xlane.f32.xlu0 %v5258_v21  ;;  %12099 = vmatprep.subr.mxu0 %v11150_v5 }
0x2ffd   :  { %v5255_v3 = vsel %vm196_vm0, %v5253_v2, 0.0  ;;  %12100 = vmatpush3.msra.mxu0 %v11150_v5  ;;  %v11140_v13 = vld [vmem:[%s14753_s21] ss:$0 sm:$0xff]  ;;  %v11162_v2 = vld [vmem:[%s12932_s3 + $0x1] ss:$0 sm:$0xff]  ;;  %s14756_s3 = smov 56  }
0x2ffe   :  { %5256 = vadd.xlane.f32.xlu1 %v5255_v3  ;;  %12101 = vmatprep.subr.mxu0 %v11149_v30  ;;  %s14765_s21 = smov 32  }
0x2fff   :  { %12102 = vmatpush3.msra.mxu0 %v11149_v30 }
0x3000   :  { %12106 = vmatprep.subr.mxu0 %v11160_v33 }
0x3081   :  { %v5536_v23 = vpop.xlane.xlu0 %5535 }
0x3082   :  { %v5538_v58 = vmul.f32 0.03125, %v5536_v23 }
0x3083   :  { %v5533_v16 = vpop.xlane.xlu1 %5532 }
0x3084   :  { %v5540_v39 = vsub.f32 %v5528_v53, %v5538_v58  ;;  %v5537_v42 = vmul.f32 0.03125, %v5533_v16 }
0x3085   :  { %v5260_v54 = vpop.xlane.xlu0 %5259 }
0x3086   :  { %v5539_v7 = vsub.f32 %v5527_v20, %v5537_v42  ;;  %v5262_v15 = vmul.f32 0.03125, %v5260_v54  ;;  %v5542_v8 = vmul.f32 %v5540_v39, %v5540_v39 }
0x3087   :  { %v5257_v9 = vpop.xlane.xlu1 %5256 }
0x3088   :  { %v5264_v10 = vadd.f32 1e-12, %v5262_v15  ;;  %v5261_v49 = vmul.f32 0.03125, %v5257_v9  ;;  %v5546_v22 = vsel %vm4956_vm15, %v5542_v8, 0.0  ;;  %v5541_v14 = vmul.f32 %v5539_v7, %v5539_v7 }
0x3089   :  { %5547 = vadd.xlane.f32.xlu0 %v5546_v22 }
0x308a   :  { %12638 = vrsqrt.f32 %v5264_v10  ;;  %v5263_v11 = vadd.f32 1e-12, %v5261_v49  ;;  %v5543_v41 = vsel %vm196_vm0, %v5541_v14, 0.0 }
0x308b   :  { %5544 = vadd.xlane.f32.xlu1 %v5543_v41 }
0x308c   :  { %12640 = vrsqrt.f32 %v5263_v11 }
0x3097   :  { %v12639_v25 = vpop.eup %12638 }
0x3098   :  { %v5268_v32 = vmul.f32 %v12639_v25, %v5252_v52 }
0x3099   :  { %v12641_v36 = vpop.eup %12640 }
0x309a   :  { %v5267_v37 = vmul.f32 %v12641_v36, %v5251_v0  ;;  %v5276_v40 = vmul.f32 %v11139_v28, %v5268_v32 }
0x309c   :  { %v5275_v46 = vmul.f32 %v11139_v28, %v5267_v37  ;;  %v13889_v48 = vadd.f32 %v11140_v13, %v5276_v40 }
0x309e   :  { %v13887_v47 = vadd.f32 %v11140_v13, %v5275_v46 }
0x30a0   :  { %12103 = vmatprep.mubr.msk.f32.mxu0 %vm196_vm0, %v13887_v47 }
0x30a1   :  { %12104 = vmatmul.mubr.msk.f32.vlgmr.msra.gmra.mxu0 %vm196_vm0, %v13889_v48 }
0x30a2   :  { %12107 = vmatpush3.msra.mxu0 %v11160_v33 }
0x30a3   :  { %12108 = vmatprep.subr.mxu0 %v11159_v27 }
0x30a4   :  { %12109 = vmatpush3.msra.mxu0 %v11159_v27 }
0x30a5   :  { %12110 = vmatprep.subr.mxu0 %v11158_v29 }
0x30a6   :  { %12111 = vmatpush3.msra.mxu0 %v11158_v29 }
0x30a7   :  { %12112 = vmatprep.subr.mxu0 %v11157_v19 }
0x30a8   :  { %12113 = vmatpush3.msra.mxu0 %v11157_v19 }
0x30a9   :  { %12127 = vmatprep.subr.mxu0 %v12870_v12 }
0x3112   :  { %v5548_v59 = vpop.xlane.xlu0 %5547 }
0x3113   :  { %v5550_v43 = vmul.f32 0.03125, %v5548_v59 }
0x3114   :  { %v5545_v6 = vpop.xlane.xlu1 %5544 }
0x3115   :  { %v5552_v50 = vadd.f32 1e-12, %v5550_v43  ;;  %v5549_v38 = vmul.f32 0.03125, %v5545_v6 }
0x3117   :  { %12642 = vrsqrt.f32 %v5552_v50  ;;  %v5551_v45 = vadd.f32 1e-12, %v5549_v38 }
0x3119   :  { %12644 = vrsqrt.f32 %v5551_v45 }
0x3124   :  { %v12643_v17 = vpop.eup %12642 }
0x3125   :  { %v5556_v51 = vmul.f32 %v12643_v17, %v5540_v39 }
0x3126   :  { %v12645_v1 = vpop.eup %12644 }
0x3127   :  { %v5555_v53 = vmul.f32 %v12645_v1, %v5539_v7  ;;  %v5564_v55 = vmul.f32 %v11147_v61, %v5556_v51 }
0x3129   :  { %v5563_v63 = vmul.f32 %v11147_v61, %v5555_v53  ;;  %v13903_v52 = vadd.f32 %v11148_v56, %v5564_v55 }
0x312b   :  { %v13901_v20 = vadd.f32 %v11148_v56, %v5563_v63 }
0x312d   :  { %12114 = vmatprep.mubr.msk.f32.mxu0 %vm196_vm0, %v13901_v20 }
0x312e   :  { %12115 = vmatmul.mubr.msk.f32.vlgmr.msra.gmra.mxu0 %vm196_vm0, %v13903_v52 }
0x312f   :  { %12131 = vmatprep.mubr.msk.f32.mxu0 %vm12871_vm1, %v12870_v12 }
0x3161   :  { %v12105_v62 = vpop.f32.mrf.mxu0 }
0x3162   :  { %v13912_v0 = vadd.f32 %v12105_v62, %v11154_v57 }
0x3163   :  { %v5658_v31 = vpop.f32.mrf.mxu0 }
0x3164   :  { %v13914_v35 = vadd.f32 %v11154_v57, %v5658_v31 }
0x3166   :  { %5838 = vrot.lane.b32.xlu0 %v13914_v35, %s14710_s24  ;;  %5762 = vrot.lane.b32.xlu1 %v13914_v35, %s14740_s5 }
0x31d8   :  { %v5763_v21 = vpop.permute.xlu1 %5762  ;;  %v5839_v30 = vpop.permute.xlu0 %5838 }
0x31d9   :  { %12118 = vmatpush3.xpose.msk.msra.mxu1 %vm373_vm2, %v5763_v21 }
0x31da   :  { %12122 = vmatprep.subr.mxu1 %v12870_v12 }
0x31dc   :  { %12120 = vmatmul.mubr.msk.f32.vlgmr.msra.gmra.mxu1 %vm373_vm2, %v13914_v35 }
0x31dd   :  { %12124 = vmatprep.mubr.msk.f32.mxu1 %vm12871_vm1, %v12870_v12 }
0x31ee   :  { %v12116_v3 = vpop.f32.mrf.mxu0 }
0x31ef   :  { %v13927_v18 = vadd.f32 %v12116_v3, %v11162_v2 }
0x31f0   :  { %v5752_v4 = vpop.f32.mrf.mxu0 }
0x31f1   :  { %v13929_v5 = vadd.f32 %v11162_v2, %v5752_v4 }
0x31f3   :  { %5933 = vrot.lane.b32.xlu0 %v13929_v5, %s14710_s24  ;;  %12123 = vmatpush3.xpose.msk.msra.mxu1 %vm373_vm2, %v13929_v5  ;;  %s14759_s24 = smov 16  }
0x31f4   :  { %12134 = vmatprep.subr.mxu1 %v12870_v12 }
0x31f6   :  { %12125 = vmatmul.mubr.msk.f32.vlgmr.msra.gmra.mxu1 %vm373_vm2, %v5839_v30 }
0x31f7   :  { %12136 = vmatprep.mubr.msk.f32.mxu1 %vm12871_vm1, %v12870_v12 }
0x3265   :  { %v13943_v9 = vpop.permute.xlu0 %5933 }
0x329c   :  { %v5834_v23 = vpop.f32.mrf.mxu1 }
0x329e   :  { %v12121_v58 = vpop.f32.mrf.mxu1 }
0x32b6   :  { %v5911_v16 = vpop.f32.mrf.mxu1 }
0x32b7   :  { %5916 = vrot.lane.b32.xlu1 %v5911_v16, %s14714_s0 }
0x32b8   :  { %v12126_v39 = vpop.f32.mrf.mxu1 }
0x3329   :  { %v5917_v42 = vpop.permute.xlu1 %5916 }
0x332a   :  { %v5919_v54 = vsel %vm373_vm2, %v5834_v23, %v5917_v42 }
0x332b   :  { %v5920_v7 = vmul.f32 0.35355338, %v5919_v54 }
0x332d   :  { %v5921_v15 = vadd.f32 %v5920_v7, %v13142_v34 }
0x332f   :  { %v5922_v8 = vsel %vm536_vm3, %v5921_v15, -inf }
0x3330   :  { %5923 = vmax.xlane.f32.xlu1 %v5922_v8 }
0x3341   :  { %5937 = vrot.lane.b32.xlu1 %v13943_v9, %s14708_s27 }
0x3345   :  { %6096 = vrot.lane.b32.xlu1 %v13929_v5, %s14706_s13 }
0x3349   :  { %6094 = vrot.lane.b32.xlu1 %v13914_v35, %s14754_s25 }
0x334d   :  { %6016 = vrot.lane.b32.xlu1 %v13914_v35, %s14706_s13  ;;  %s14757_s13 = smov 112  }
0x33b9   :  { %v5924_v10 = vpop.xlane.xlu1 %5923 }
0x33ba   :  { %v5925_v49 = vsub.f32 %v5921_v15, %v5924_v10 }
0x33bc   :  { %v5926_v22 = vmul.f32 1.442695, %v5925_v49 }
0x33bd   :  { %v5938_v14 = vpop.permute.xlu1 %5937 }
0x33be   :  { %12646 = vpow2.f32 %v5926_v22  ;;  %12128 = vmatpush3.msk.msra.mxu0 %vm558_vm4, %v5938_v14 }
0x33bf   :  { %12129 = vmatprep.subr.mxu0 %v12870_v12 }
0x33c1   :  { %v6097_v25 = vpop.permute.xlu1 %6096 }
0x33c5   :  { %v6095_v36 = vpop.permute.xlu1 %6094 }
0x33c9   :  { %v6017_v37 = vpop.permute.xlu1 %6016 }
0x33cb   :  { %v12647_v11 = vpop.eup %12646 }
0x33cc   :  { %v5928_v41 = vsel %vm536_vm3, %v12647_v11, 0.0 }
0x33cd   :  { %5929 = vadd.xlane.f32.xlu0 %v5928_v41 }
0x33e3   :  { %5935 = vrot.lane.b32.xlu0 %v13914_v35, %s14708_s27  ;;  %s14758_s27 = smov 80  }
0x33e7   :  { %6018 = vrot.lane.b32.xlu0 %v13914_v35, %s14755_s29 }
0x3456   :  { %v5930_v28 = vpop.xlane.xlu0 %5929 }
0x3457   :  { %12648 = vrcp.f32 %v5930_v28 }
0x345a   :  { %v5936_v32 = vpop.permute.xlu0 %5935 }
0x345b   :  { %12130 = vmatpush3.msra.mxu0 %v5936_v32 }
0x345c   :  { %12139 = vmatprep.subr.mxu0 %v12870_v12 }
0x345e   :  { %v6019_v33 = vpop.permute.xlu0 %6018 }
0x345f   :  { %12135 = vmatpush3.xpose.msk.msra.mxu1 %vm373_vm2, %v6019_v33 }
0x3460   :  { %12144 = vmatprep.subr.mxu1 %v12870_v12 }
0x3462   :  { %12137 = vmatmul.mubr.msk.f32.vlgmr.msra.gmra.mxu1 %vm373_vm2, %v6017_v37 }
0x3463   :  { %12148 = vmatprep.mubr.msk.f32.mxu1 %vm12871_vm1, %v12870_v12 }
0x3464   :  { %v12649_v40 = vpop.eup %12648 }
0x3465   :  { %v5932_v13 = vmul.f32 %v12649_v40, %v12647_v11 }
0x3467   :  { %12132 = vmatmul.mubr.msk.f32.vlgmr.msra.gmra.mxu0 %vm536_vm3, %v5932_v13 }
0x3468   :  { %12140 = vmatpush3.xpose.msk.msra.mxu0 %vm373_vm2, %v6097_v25  ;;  %12141 = vmatprep.mubr.msk.f32.mxu0 %vm12871_vm1, %v12870_v12 }
0x3469   :  { %12151 = vmatprep.subr.mxu0 %v12870_v12 }
0x346b   :  { %12142 = vmatmul.mubr.msk.f32.vlgmr.msra.gmra.mxu0 %vm373_vm2, %v6095_v36 }
0x346c   :  { %12153 = vmatprep.mubr.msk.f32.mxu0 %vm12871_vm1, %v12870_v12 }
0x3522   :  { %v6090_v46 = vpop.f32.mrf.mxu1 }
0x3524   :  { %v12138_v27 = vpop.f32.mrf.mxu1 }
0x3527   :  { %v6011_v29 = vpop.f32.mrf.mxu0 }
0x3528   :  { %6015 = vst.msk [vmem:[#allocation2] sm:$0xff] %vm373_vm2, %v6011_v29 }
0x3529   :  { %v12133_v19 = vpop.f32.mrf.mxu0 }
0x352b   :  { %v6168_v59 = vpop.f32.mrf.mxu0 }
0x352c   :  { %6173 = vrot.lane.b32.xlu0 %v6168_v59, %s14714_s0 }
0x352d   :  { %v12143_v43 = vpop.f32.mrf.mxu0 }
0x359e   :  { %v6174_v6 = vpop.permute.xlu0 %6173 }
0x359f   :  { %v6176_v50 = vsel %vm373_vm2, %v6090_v46, %v6174_v6 }
0x35a0   :  { %v6177_v38 = vmul.f32 0.35355338, %v6176_v50 }
0x35a2   :  { %v6178_v45 = vadd.f32 %v6177_v38, %v13142_v34 }
0x35a4   :  { %v6179_v17 = vsel %vm536_vm3, %v6178_v45, -inf }
0x35a5   :  { %6180 = vmax.xlane.f32.xlu1 %v6179_v17 }
0x35b6   :  { %6190 = vrot.lane.b32.xlu1 %v13914_v35, %s14756_s3 }
0x35ba   :  { %6355 = vrot.lane.b32.xlu1 %v13929_v5, %s14757_s13 }
0x35be   :  { %6277 = vrot.lane.b32.xlu1 %v13914_v35, %s14758_s27 }
0x362e   :  { %v6181_v61 = vpop.xlane.xlu1 %6180 }
0x362f   :  { %v6182_v51 = vsub.f32 %v6178_v45, %v6181_v61 }
0x3631   :  { %v6183_v1 = vmul.f32 1.442695, %v6182_v51 }
0x3632   :  { %v6191_v53 = vpop.permute.xlu1 %6190 }
0x3633   :  { %12650 = vpow2.f32 %v6183_v1 }
0x3636   :  { %v6356_v55 = vpop.permute.xlu1 %6355 }
0x363a   :  { %v6278_v56 = vpop.permute.xlu1 %6277 }
0x363b   :  { %12152 = vmatpush3.xpose.msk.msra.mxu0 %vm373_vm2, %v6278_v56 }
0x363c   :  { %12161 = vmatprep.subr.mxu0 %v12870_v12 }
0x3640   :  { %v12651_v63 = vpop.eup %12650 }
0x3641   :  { %v6185_v57 = vsel %vm536_vm3, %v12651_v63, 0.0 }
0x3642   :  { %6186 = vadd.xlane.f32.xlu0 %v6185_v57 }
0x3658   :  { %6192 = vrot.lane.b32.xlu0 %v13943_v9, %s14756_s3 }
0x365c   :  { %6353 = vrot.lane.b32.xlu0 %v13914_v35, %s14759_s24 }
0x3660   :  { %6275 = vrot.lane.b32.xlu0 %v13914_v35, %s14757_s13 }
0x36cb   :  { %v6187_v62 = vpop.xlane.xlu0 %6186 }
0x36cc   :  { %12652 = vrcp.f32 %v6187_v62 }
0x36cf   :  { %v6193_v31 = vpop.permute.xlu0 %6192 }
0x36d0   :  { %12145 = vmatpush3.msk.msra.mxu1 %vm558_vm4, %v6193_v31  ;;  %v6874_v31 = vrot.slane %v13927_v18, 6 }
0x36d1   :  { %12146 = vmatprep.subr.mxu1 %v12870_v12 }
0x36d2   :  { %12147 = vmatpush3.msra.mxu1 %v6191_v53 }
0x36d3   :  { %v6354_v21 = vpop.permute.xlu0 %6353  ;;  %12156 = vmatprep.subr.mxu1 %v12870_v12 }
0x36d7   :  { %v6276_v2 = vpop.permute.xlu0 %6275 }
0x36d8   :  { %12154 = vmatmul.mubr.msk.f32.vlgmr.msra.gmra.mxu0 %vm373_vm2, %v6276_v2 }
0x36d9   :  { %v12653_v3 = vpop.eup %12652  ;;  %12165 = vmatprep.mubr.msk.f32.mxu0 %vm12871_vm1, %v12870_v12 }
0x36da   :  { %v6189_v4 = vmul.f32 %v12653_v3, %v12651_v63 }
0x36dc   :  { %12149 = vmatmul.mubr.msk.f32.vlgmr.msra.gmra.mxu1 %vm536_vm3, %v6189_v4 }
0x36dd   :  { %12157 = vmatpush3.xpose.msk.msra.mxu1 %vm373_vm2, %v6356_v55  ;;  %12158 = vmatprep.mubr.msk.f32.mxu1 %vm12871_vm1, %v12870_v12 }
0x36de   :  { %12168 = vmatprep.subr.mxu1 %v12870_v12 }
0x36e0   :  { %12159 = vmatmul.mubr.msk.f32.vlgmr.msra.gmra.mxu1 %vm373_vm2, %v6354_v21 }
0x36e1   :  { %12170 = vmatprep.mubr.msk.f32.mxu1 %vm12871_vm1, %v12870_v12 }
0x3798   :  { %v6349_v30 = vpop.f32.mrf.mxu0 }
0x379a   :  { %v12155_v23 = vpop.f32.mrf.mxu0 }
0x379c   :  { %v14008_v58 = vpop.f32.mrf.mxu1 }
0x379e   :  { %v12150_v16 = vpop.f32.mrf.mxu1 }
0x37a0   :  { %v6427_v39 = vpop.f32.mrf.mxu1 }
0x37a1   :  { %6432 = vrot.lane.b32.xlu1 %v6427_v39, %s14714_s0  ;;  %s14762_s0 = smov 72  }
0x37a2   :  { %v12160_v42 = vpop.f32.mrf.mxu1 }
0x37a5   :  { %6449 = vrot.lane.b32.xlu1 %v13914_v35, %s14760_s4 }
0x3813   :  { %v6433_v54 = vpop.permute.xlu1 %6432 }
0x3814   :  { %v6435_v7 = vsel %vm373_vm2, %v6349_v30, %v6433_v54 }
0x3815   :  { %v6436_v15 = vmul.f32 0.35355338, %v6435_v7 }
0x3817   :  { %v6437_v8 = vadd.f32 %v6436_v15, %v13142_v34  ;;  %v6450_v41 = vpop.permute.xlu1 %6449 }
0x3819   :  { %v6438_v10 = vsel %vm536_vm3, %v6437_v8, -inf }
0x381a   :  { %6439 = vmax.xlane.f32.xlu0 %v6438_v10 }
0x3830   :  { %6451 = vrot.lane.b32.xlu0 %v13943_v9, %s14760_s4 }
0x3834   :  { %6614 = vrot.lane.b32.xlu0 %v13929_v5, %s14761_s19 }
0x3838   :  { %6536 = vrot.lane.b32.xlu0 %v13914_v35, %s14762_s0 }
0x38a3   :  { %v6440_v49 = vpop.xlane.xlu0 %6439 }
0x38a4   :  { %v6441_v22 = vsub.f32 %v6437_v8, %v6440_v49 }
0x38a6   :  { %v6442_v14 = vmul.f32 1.442695, %v6441_v22 }
0x38a7   :  { %v6452_v11 = vpop.permute.xlu0 %6451 }
0x38a8   :  { %12654 = vpow2.f32 %v6442_v14  ;;  %12162 = vmatpush3.msk.msra.mxu0 %vm558_vm4, %v6452_v11 }
0x38a9   :  { %12163 = vmatprep.subr.mxu0 %v12870_v12 }
0x38aa   :  { %12164 = vmatpush3.msra.mxu0 %v6450_v41 }
0x38ab   :  { %v6615_v25 = vpop.permute.xlu0 %6614  ;;  %12173 = vmatprep.subr.mxu0 %v12870_v12 }
0x38af   :  { %v6537_v28 = vpop.permute.xlu0 %6536 }
0x38b0   :  { %12169 = vmatpush3.xpose.msk.msra.mxu1 %vm373_vm2, %v6537_v28 }
0x38b1   :  { %12178 = vmatprep.subr.mxu1 %v12870_v12 }
0x38b5   :  { %v12655_v32 = vpop.eup %12654 }
0x38b6   :  { %v6444_v36 = vsel %vm536_vm3, %v12655_v32, 0.0 }
0x38b7   :  { %6445 = vadd.xlane.f32.xlu1 %v6444_v36 }
0x38c8   :  { %6612 = vrot.lane.b32.xlu1 %v13914_v35, %s14763_s14 }
0x38cc   :  { %6534 = vrot.lane.b32.xlu1 %v13914_v35, %s14761_s19 }
0x3940   :  { %v6446_v33 = vpop.xlane.xlu1 %6445 }
0x3941   :  { %12656 = vrcp.f32 %v6446_v33 }
0x3944   :  { %v6613_v37 = vpop.permute.xlu1 %6612 }
0x3948   :  { %v6535_v40 = vpop.permute.xlu1 %6534 }
0x3949   :  { %12171 = vmatmul.mubr.msk.f32.vlgmr.msra.gmra.mxu1 %vm373_vm2, %v6535_v40 }
0x394a   :  { %12182 = vmatprep.mubr.msk.f32.mxu1 %vm12871_vm1, %v12870_v12 }
0x394e   :  { %v12657_v13 = vpop.eup %12656 }
0x394f   :  { %v6448_v46 = vmul.f32 %v12657_v13, %v12655_v32 }
0x3951   :  { %12166 = vmatmul.mubr.msk.f32.vlgmr.msra.gmra.mxu0 %vm536_vm3, %v6448_v46 }
0x3952   :  { %12174 = vmatpush3.xpose.msk.msra.mxu0 %vm373_vm2, %v6615_v25  ;;  %12175 = vmatprep.mubr.msk.f32.mxu0 %vm12871_vm1, %v12870_v12 }
0x3953   :  { %12185 = vmatprep.subr.mxu0 %v12870_v12 }
0x3955   :  { %12176 = vmatmul.mubr.msk.f32.vlgmr.msra.gmra.mxu0 %vm373_vm2, %v6613_v37 }
0x3956   :  { %12187 = vmatprep.mubr.msk.f32.mxu0 %vm12871_vm1, %v12870_v12 }
0x3a09   :  { %v6608_v27 = vpop.f32.mrf.mxu1 }
0x3a0b   :  { %v12172_v29 = vpop.f32.mrf.mxu1 }
0x3a11   :  { %v14043_v19 = vpop.f32.mrf.mxu0 }
0x3a13   :  { %v12167_v59 = vpop.f32.mrf.mxu0 }
0x3a15   :  { %v6686_v43 = vpop.f32.mrf.mxu0 }
0x3a16   :  { %6691 = vrot.lane.b32.xlu0 %v6686_v43, %s14763_s14 }
0x3a17   :  { %v12177_v6 = vpop.f32.mrf.mxu0 }
0x3a88   :  { %v6692_v50 = vpop.permute.xlu0 %6691 }
0x3a89   :  { %v6694_v38 = vsel %vm373_vm2, %v6608_v27, %v6692_v50 }
0x3a8a   :  { %v6695_v45 = vmul.f32 0.35355338, %v6694_v38 }
0x3a8c   :  { %v6696_v17 = vadd.f32 %v6695_v45, %v13142_v34 }
0x3a8e   :  { %v6697_v61 = vsel %vm536_vm3, %v6696_v17, -inf }
0x3a8f   :  { %6698 = vmax.xlane.f32.xlu1 %v6697_v61 }
0x3aa0   :  { %6708 = vrot.lane.b32.xlu1 %v13914_v35, %s14764_s20 }
0x3aa4   :  { %6870 = vrot.lane.b32.xlu1 %v13912_v0, %s14765_s21 }
0x3b18   :  { %v6699_v51 = vpop.xlane.xlu1 %6698 }
0x3b19   :  { %v6700_v1 = vsub.f32 %v6696_v17, %v6699_v51 }
0x3b1b   :  { %v6701_v53 = vmul.f32 1.442695, %v6700_v1 }
0x3b1c   :  { %v6709_v63 = vpop.permute.xlu1 %6708 }
0x3b1d   :  { %12658 = vpow2.f32 %v6701_v53 }
0x3b2a   :  { %v12659_v55 = vpop.eup %12658 }
0x3b2b   :  { %v6703_v56 = vsel %vm536_vm3, %v12659_v55, 0.0 }
0x3b2c   :  { %6704 = vadd.xlane.f32.xlu0 %v6703_v56 }
0x3b42   :  { %6710 = vrot.lane.b32.xlu0 %v13943_v9, %s14764_s20  ;;  %v6873_v9 = vrot.slane %v13929_v5, 6  ;;  %v6871_v5 = vpop.permute.xlu1 %6870 }
0x3b44   :  { %v14071_v2 = vsel %vm1492_vm5, %v6873_v9, %v6874_v31 }
0x3b46   :  { %6794 = vrot.lane.b32.xlu0 %v13912_v0, %s14740_s5 }
0x3bb5   :  { %v6705_v34 = vpop.xlane.xlu0 %6704 }
0x3bb6   :  { %12660 = vrcp.f32 %v6705_v34 }
0x3bb9   :  { %v6711_v35 = vpop.permute.xlu0 %6710 }
0x3bba   :  { %12179 = vmatpush3.msk.msra.mxu1 %vm558_vm4, %v6711_v35 }
0x3bbb   :  { %12180 = vmatprep.subr.mxu1 %v12870_v12 }
0x3bbc   :  { %12181 = vmatpush3.msra.mxu1 %v6709_v63 }
0x3bbd   :  { %v6795_v57 = vpop.permute.xlu0 %6794  ;;  %12190 = vmatprep.subr.mxu1 %v12870_v12 }
0x3bbe   :  { %12186 = vmatpush3.xpose.msk.msra.mxu0 %vm373_vm2, %v6795_v57 }
0x3bbf   :  { %12195 = vmatprep.subr.mxu0 %v12870_v12 }
0x3bc1   :  { %12188 = vmatmul.mubr.msk.f32.vlgmr.msra.gmra.mxu0 %vm373_vm2, %v13912_v0 }
0x3bc2   :  { %12199 = vmatprep.mubr.msk.f32.mxu0 %vm12871_vm1, %v12870_v12 }
0x3bc3   :  { %v12661_v62 = vpop.eup %12660 }
0x3bc4   :  { %v6707_v21 = vmul.f32 %v12661_v62, %v12659_v55 }
0x3bc6   :  { %12183 = vmatmul.mubr.msk.f32.vlgmr.msra.gmra.mxu1 %vm536_vm3, %v6707_v21 }
0x3bc7   :  { %12191 = vmatpush3.xpose.msk.msra.mxu1 %vm373_vm2, %v14071_v2  ;;  %12192 = vmatprep.mubr.msk.f32.mxu1 %vm12871_vm1, %v12870_v12 }
0x3bc8   :  { %12202 = vmatprep.subr.mxu1 %v12870_v12 }
0x3bca   :  { %12193 = vmatmul.mubr.msk.f32.vlgmr.msra.gmra.mxu1 %vm373_vm2, %v6871_v5 }
0x3bcb   :  { %12204 = vmatprep.mubr.msk.f32.mxu1 %vm12871_vm1, %v12870_v12 }
0x3c81   :  { %v6866_v18 = vpop.f32.mrf.mxu0 }
0x3c83   :  { %v12189_v3 = vpop.f32.mrf.mxu0 }
0x3c86   :  { %v14081_v4 = vpop.f32.mrf.mxu1 }
0x3c88   :  { %v12184_v30 = vpop.f32.mrf.mxu1 }
0x3c8a   :  { %v6946_v23 = vpop.f32.mrf.mxu1 }
0x3c8b   :  { %6951 = vrot.lane.b32.xlu1 %v6946_v23, %s14763_s14 }
0x3c8c   :  { %v12194_v16 = vpop.f32.mrf.mxu1 }
0x3c8f   :  { %6968 = vrot.lane.b32.xlu1 %v14071_v2, %s14765_s21 }
0x3cfd   :  { %v6952_v39 = vpop.permute.xlu1 %6951 }
0x3cfe   :  { %v6954_v42 = vsel %vm373_vm2, %v6866_v18, %v6952_v39 }
0x3cff   :  { %v6955_v54 = vmul.f32 0.35355338, %v6954_v42 }
0x3d01   :  { %v6956_v7 = vadd.f32 %v6955_v54, %v13294_v26  ;;  %v14089_v8 = vpop.permute.xlu1 %6968 }
0x3d03   :  { %v6957_v15 = vsel %vm536_vm3, %v6956_v7, -inf }
0x3d04   :  { %6958 = vmax.xlane.f32.xlu0 %v6957_v15 }
0x3d1a   :  { %6972 = vrot.lane.b32.xlu0 %v14089_v8, %s14766_s1 }
0x3d1e   :  { %7131 = vrot.lane.b32.xlu0 %v14071_v2, %s14767_s2 }
0x3d22   :  { %7129 = vrot.lane.b32.xlu0 %v13912_v0, %s14754_s25 }
0x3d26   :  { %7051 = vrot.lane.b32.xlu0 %v13912_v0, %s14767_s2 }
0x3d8d   :  { %v6959_v10 = vpop.xlane.xlu0 %6958 }
0x3d8e   :  { %v6960_v49 = vsub.f32 %v6956_v7, %v6959_v10 }
0x3d90   :  { %v6961_v22 = vmul.f32 1.442695, %v6960_v49 }
0x3d91   :  { %v6973_v14 = vpop.permute.xlu0 %6972 }
0x3d92   :  { %12662 = vpow2.f32 %v6961_v22  ;;  %12196 = vmatpush3.msk.msra.mxu0 %vm558_vm4, %v6973_v14 }
0x3d93   :  { %12197 = vmatprep.subr.mxu0 %v12870_v12 }
0x3d95   :  { %v7132_v25 = vpop.permute.xlu0 %7131 }
0x3d99   :  { %v7130_v36 = vpop.permute.xlu0 %7129 }
0x3d9d   :  { %v7052_v37 = vpop.permute.xlu0 %7051 }
0x3d9f   :  { %v12663_v11 = vpop.eup %12662 }
0x3da0   :  { %v6963_v41 = vsel %vm536_vm3, %v12663_v11, 0.0 }
0x3da1   :  { %6964 = vadd.xlane.f32.xlu1 %v6963_v41 }
0x3db2   :  { %6970 = vrot.lane.b32.xlu1 %v13912_v0, %s14766_s1 }
0x3db6   :  { %7053 = vrot.lane.b32.xlu1 %v13912_v0, %s14755_s29 }
0x3e2a   :  { %v6965_v28 = vpop.xlane.xlu1 %6964 }
0x3e2b   :  { %12664 = vrcp.f32 %v6965_v28 }
0x3e2e   :  { %v6971_v32 = vpop.permute.xlu1 %6970 }
0x3e2f   :  { %12198 = vmatpush3.msra.mxu0 %v6971_v32 }
0x3e30   :  { %12207 = vmatprep.subr.mxu0 %v12870_v12 }
0x3e32   :  { %v7054_v33 = vpop.permute.xlu1 %7053 }
0x3e33   :  { %12203 = vmatpush3.xpose.msk.msra.mxu1 %vm373_vm2, %v7054_v33 }
0x3e34   :  { %12212 = vmatprep.subr.mxu1 %v12870_v12 }
0x3e36   :  { %12205 = vmatmul.mubr.msk.f32.vlgmr.msra.gmra.mxu1 %vm373_vm2, %v7052_v37 }
0x3e37   :  { %12216 = vmatprep.mubr.msk.f32.mxu1 %vm12871_vm1, %v12870_v12 }
0x3e38   :  { %v12665_v40 = vpop.eup %12664 }
0x3e39   :  { %v6967_v13 = vmul.f32 %v12665_v40, %v12663_v11 }
0x3e3b   :  { %12200 = vmatmul.mubr.msk.f32.vlgmr.msra.gmra.mxu0 %vm536_vm3, %v6967_v13 }
0x3e3c   :  { %12208 = vmatpush3.xpose.msk.msra.mxu0 %vm373_vm2, %v7132_v25  ;;  %12209 = vmatprep.mubr.msk.f32.mxu0 %vm12871_vm1, %v12870_v12 }
0x3e3d   :  { %12219 = vmatprep.subr.mxu0 %v12870_v12 }
0x3e3f   :  { %12210 = vmatmul.mubr.msk.f32.vlgmr.msra.gmra.mxu0 %vm373_vm2, %v7130_v36 }
0x3e40   :  { %12221 = vmatprep.mubr.msk.f32.mxu0 %vm12871_vm1, %v12870_v12 }
0x3ef6   :  { %v7125_v46 = vpop.f32.mrf.mxu1 }
0x3ef8   :  { %v12206_v27 = vpop.f32.mrf.mxu1 }
0x3efb   :  { %v7046_v29 = vpop.f32.mrf.mxu0 }
0x3efc   :  { %7050 = vst.msk [vmem:[#allocation2 + $0x8] sm:$0xff] %vm373_vm2, %v7046_v29 }
0x3efd   :  { %v12201_v59 = vpop.f32.mrf.mxu0 }
0x3eff   :  { %v7203_v43 = vpop.f32.mrf.mxu0 }
0x3f00   :  { %7208 = vrot.lane.b32.xlu1 %v7203_v43, %s14763_s14 }
0x3f01   :  { %v12211_v6 = vpop.f32.mrf.mxu0 }
0x3f04   :  { %7225 = vrot.lane.b32.xlu1 %v13912_v0, %s14756_s3 }
0x3f72   :  { %v7209_v50 = vpop.permute.xlu1 %7208 }
0x3f73   :  { %v7211_v38 = vsel %vm373_vm2, %v7125_v46, %v7209_v50 }
0x3f74   :  { %v7212_v45 = vmul.f32 0.35355338, %v7211_v38 }
0x3f76   :  { %v7213_v17 = vadd.f32 %v7212_v45, %v13294_v26  ;;  %v7226_v56 = vpop.permute.xlu1 %7225 }
0x3f78   :  { %v7214_v61 = vsel %vm536_vm3, %v7213_v17, -inf }
0x3f79   :  { %7215 = vmax.xlane.f32.xlu0 %v7214_v61 }
0x3f8f   :  { %7227 = vrot.lane.b32.xlu0 %v14089_v8, %s14756_s3 }
0x3f93   :  { %7390 = vrot.lane.b32.xlu0 %v14071_v2, %s14757_s13 }
0x3f97   :  { %7312 = vrot.lane.b32.xlu0 %v13912_v0, %s14758_s27 }
0x4002   :  { %v7216_v51 = vpop.xlane.xlu0 %7215 }
0x4003   :  { %v7217_v1 = vsub.f32 %v7213_v17, %v7216_v51 }
0x4005   :  { %v7218_v53 = vmul.f32 1.442695, %v7217_v1 }
0x4006   :  { %v7228_v55 = vpop.permute.xlu0 %7227 }
0x4007   :  { %12666 = vpow2.f32 %v7218_v53  ;;  %12213 = vmatpush3.msk.msra.mxu1 %vm558_vm4, %v7228_v55 }
0x4008   :  { %12214 = vmatprep.subr.mxu1 %v12870_v12 }
0x4009   :  { %12215 = vmatpush3.msra.mxu1 %v7226_v56 }
0x400a   :  { %v7391_v34 = vpop.permute.xlu0 %7390  ;;  %12224 = vmatprep.subr.mxu1 %v12870_v12 }
0x400e   :  { %v7313_v35 = vpop.permute.xlu0 %7312 }
0x400f   :  { %12220 = vmatpush3.xpose.msk.msra.mxu0 %vm373_vm2, %v7313_v35 }
0x4010   :  { %12229 = vmatprep.subr.mxu0 %v12870_v12 }
0x4014   :  { %v12667_v63 = vpop.eup %12666 }
0x4015   :  { %v7220_v57 = vsel %vm536_vm3, %v12667_v63, 0.0 }
0x4016   :  { %7221 = vadd.xlane.f32.xlu1 %v7220_v57 }
0x4027   :  { %7388 = vrot.lane.b32.xlu1 %v13912_v0, %s14759_s24 }
0x402b   :  { %7310 = vrot.lane.b32.xlu1 %v13912_v0, %s14757_s13 }
0x409f   :  { %v7222_v9 = vpop.xlane.xlu1 %7221 }
0x40a0   :  { %12668 = vrcp.f32 %v7222_v9 }
0x40a3   :  { %v7389_v62 = vpop.permute.xlu1 %7388 }
0x40a7   :  { %v7311_v31 = vpop.permute.xlu1 %7310 }
0x40a8   :  { %12222 = vmatmul.mubr.msk.f32.vlgmr.msra.gmra.mxu0 %vm373_vm2, %v7311_v31 }
0x40a9   :  { %12233 = vmatprep.mubr.msk.f32.mxu0 %vm12871_vm1, %v12870_v12 }
0x40ad   :  { %v12669_v21 = vpop.eup %12668 }
0x40ae   :  { %v7224_v5 = vmul.f32 %v12669_v21, %v12667_v63  ;;  %v11228_v63 = vld [vmem:[%s12957_s30 + $0x38] sm:$0xff] }
0x40b0   :  { %12217 = vmatmul.mubr.msk.f32.vlgmr.msra.gmra.mxu1 %vm536_vm3, %v7224_v5  ;;  %v11225_v5 = vld [vmem:[%s12957_s30 + $0x20] sm:$0xff] }
0x40b1   :  { %12225 = vmatpush3.xpose.msk.msra.mxu1 %vm373_vm2, %v7391_v34  ;;  %12226 = vmatprep.mubr.msk.f32.mxu1 %vm12871_vm1, %v12870_v12 }
0x40b2   :  { %12236 = vmatprep.subr.mxu1 %v12870_v12 }
0x40b4   :  { %12227 = vmatmul.mubr.msk.f32.vlgmr.msra.gmra.mxu1 %vm373_vm2, %v7389_v62 }
0x40b5   :  { %12238 = vmatprep.mubr.msk.f32.mxu1 %vm12871_vm1, %v12870_v12 }
0x4168   :  { %v7384_v18 = vpop.f32.mrf.mxu0 }
0x416a   :  { %v12223_v3 = vpop.f32.mrf.mxu0 }
0x416b   :  { %v11215_v3 = vld [vmem:[%s12937_s8 + $0x30] sm:$0xff] }
0x4170   :  { %v7301_v30 = vpop.f32.mrf.mxu1 }
0x4172   :  { %v12218_v23 = vpop.f32.mrf.mxu1 }
0x4173   :  { %v11213_v23 = vld [vmem:[%s12937_s8 + $0x20] sm:$0xff] }
0x4174   :  { %v7462_v16 = vpop.f32.mrf.mxu1 }
0x4175   :  { %7467 = vrot.lane.b32.xlu0 %v7462_v16, %s14763_s14  ;;  %v11236_v16 = vld [vmem:[%s12967_s12 + $0x38] sm:$0xff] }
0x4176   :  { %v12228_v39 = vpop.f32.mrf.mxu1 }
0x41e7   :  { %v7468_v42 = vpop.permute.xlu0 %7467 }
0x41e8   :  { %v7470_v54 = vsel %vm373_vm2, %v7384_v18, %v7468_v42  ;;  %v11216_v18 = vld [vmem:[%s12937_s8 + $0x38] sm:$0xff] }
0x41e9   :  { %v7471_v7 = vmul.f32 0.35355338, %v7470_v54  ;;  %v11230_v54 = vld [vmem:[%s12962_s6 + $0x1] ss:$0 sm:$0xff]  ;;  %s14777_s6 = sld [smem:[#allocation26_spill]] }
0x41eb   :  { %v7472_v15 = vadd.f32 %v7471_v7, %v13294_v26 }
0x41ed   :  { %v7473_v10 = vsel %vm536_vm3, %v7472_v15, -inf }
0x41ee   :  { %7474 = vmax.xlane.f32.xlu1 %v7473_v10 }
0x41ff   :  { %7484 = vrot.lane.b32.xlu1 %v13912_v0, %s14760_s4 }
0x4203   :  { %7649 = vrot.lane.b32.xlu1 %v14071_v2, %s14761_s19 }
0x4207   :  { %7571 = vrot.lane.b32.xlu1 %v13912_v0, %s14762_s0 }
0x4277   :  { %v7475_v49 = vpop.xlane.xlu1 %7474 }
0x4278   :  { %v7476_v22 = vsub.f32 %v7472_v15, %v7475_v49 }
0x427a   :  { %v7477_v14 = vmul.f32 1.442695, %v7476_v22 }
0x427b   :  { %v7485_v11 = vpop.permute.xlu1 %7484 }
0x427c   :  { %12670 = vpow2.f32 %v7477_v14 }
0x427f   :  { %v7650_v41 = vpop.permute.xlu1 %7649 }
0x4283   :  { %v7572_v25 = vpop.permute.xlu1 %7571 }
0x4284   :  { %12237 = vmatpush3.xpose.msk.msra.mxu1 %vm373_vm2, %v7572_v25 }
0x4285   :  { %12246 = vmatprep.subr.mxu1 %v12870_v12 }
0x4289   :  { %v12671_v28 = vpop.eup %12670 }
0x428a   :  { %v7479_v32 = vsel %vm536_vm3, %v12671_v28, 0.0 }
0x428b   :  { %7480 = vadd.xlane.f32.xlu0 %v7479_v32  ;;  %v14255_v32 = vld [vmem:[%s14737_s28 + $0x1] ss:$0 sm:$0xff] }
0x42a1   :  { %7486 = vrot.lane.b32.xlu0 %v14089_v8, %s14760_s4 }
0x42a5   :  { %7647 = vrot.lane.b32.xlu0 %v13912_v0, %s14763_s14 }
0x42a9   :  { %7569 = vrot.lane.b32.xlu0 %v13912_v0, %s14761_s19 }
0x4314   :  { %v7481_v2 = vpop.xlane.xlu0 %7480 }
0x4315   :  { %12672 = vrcp.f32 %v7481_v2 }
0x4318   :  { %v7487_v36 = vpop.permute.xlu0 %7486 }
0x4319   :  { %12230 = vmatpush3.msk.msra.mxu0 %vm558_vm4, %v7487_v36 }
0x431a   :  { %12231 = vmatprep.subr.mxu0 %v12870_v12 }
0x431b   :  { %12232 = vmatpush3.msra.mxu0 %v7485_v11  ;;  %v11235_v11 = vld [vmem:[%s12967_s12 + $0x30] sm:$0xff] }
0x431c   :  { %v7648_v33 = vpop.permute.xlu0 %7647  ;;  %12241 = vmatprep.subr.mxu0 %v12870_v12 }
0x4320   :  { %v7570_v37 = vpop.permute.xlu0 %7569 }
0x4321   :  { %12239 = vmatmul.mubr.msk.f32.vlgmr.msra.gmra.mxu1 %vm373_vm2, %v7570_v37  ;;  %v11238_v37 = vld [vmem:[%s14738_s18 + $0x1] ss:$0 sm:$0xff] }
0x4322   :  { %v12673_v40 = vpop.eup %12672  ;;  %12250 = vmatprep.mubr.msk.f32.mxu1 %vm12871_vm1, %v12870_v12 }
0x4323   :  { %v7483_v13 = vmul.f32 %v12673_v40, %v12671_v28  ;;  %v11233_v28 = vld [vmem:[%s12967_s12 + $0x20] sm:$0xff] }
0x4325   :  { %12234 = vmatmul.mubr.msk.f32.vlgmr.msra.gmra.mxu0 %vm536_vm3, %v7483_v13 }
0x4326   :  { %12242 = vmatpush3.xpose.msk.msra.mxu0 %vm373_vm2, %v7650_v41  ;;  %12243 = vmatprep.mubr.msk.f32.mxu0 %vm12871_vm1, %v12870_v12  ;;  %v11234_v41 = vld [vmem:[%s12967_s12 + $0x28] sm:$0xff]  ;;  %s12888_s12 = smov [#allocation10]  }
0x4327   :  { %12253 = vmatprep.subr.mxu0 %v11216_v18 }
0x4329   :  { %12244 = vmatmul.mubr.msk.f32.vlgmr.msra.gmra.mxu0 %vm373_vm2, %v7648_v33 }
0x432a   :  { %12254 = vmatpush3.msra.mxu0 %v11216_v18 }
0x432b   :  { %12255 = vmatprep.subr.mxu0 %v11215_v3 }
0x432c   :  { %12256 = vmatpush3.msra.mxu0 %v11215_v3 }
0x43e1   :  { %v7643_v46 = vpop.f32.mrf.mxu1 }
0x43e3   :  { %v12240_v27 = vpop.f32.mrf.mxu1 }
0x43e5   :  { %v7560_v29 = vpop.f32.mrf.mxu0 }
0x43e7   :  { %v12235_v59 = vpop.f32.mrf.mxu0 }
0x43e9   :  { %v7721_v43 = vpop.f32.mrf.mxu0 }
0x43ea   :  { %7726 = vrot.lane.b32.xlu1 %v7721_v43, %s14763_s14 }
0x43eb   :  { %v12245_v6 = vpop.f32.mrf.mxu0 }
0x445c   :  { %v7727_v50 = vpop.permute.xlu1 %7726 }
0x445d   :  { %v7729_v38 = vsel %vm373_vm2, %v7643_v46, %v7727_v50 }
0x445e   :  { %v7730_v45 = vmul.f32 0.35355338, %v7729_v38 }
0x4460   :  { %v7731_v17 = vadd.f32 %v7730_v45, %v13294_v26 }
0x4462   :  { %v7732_v61 = vsel %vm536_vm3, %v7731_v17, -inf }
0x4463   :  { %7733 = vmax.xlane.f32.xlu0 %v7732_v61 }
0x4479   :  { %7745 = vrot.lane.b32.xlu0 %v14089_v8, %s14764_s20 }
0x447d   :  { %6271 = vrot.lane.b32.xlu0 %v14008_v58, %s14763_s14 }
0x4481   :  { %7306 = vrot.lane.b32.xlu0 %v7301_v30, %s14763_s14  ;;  %v11214_v30 = vld [vmem:[%s12937_s8 + $0x28] sm:$0xff]  ;;  %s14768_s8 = smov 6  }
0x4482   :  { %12257 = vmatprep.subr.mxu0 %v11214_v30 }
0x4483   :  { %12258 = vmatpush3.msra.mxu0 %v11214_v30 }
0x4484   :  { %12259 = vmatprep.subr.mxu0 %v11213_v23 }
0x4485   :  { %7565 = vrot.lane.b32.xlu0 %v7560_v29, %s14759_s24  ;;  %12260 = vmatpush3.msra.mxu0 %v11213_v23 }
0x4486   :  { %12275 = vmatprep.subr.mxu0 %v11236_v16 }
0x44ec   :  { %v7734_v51 = vpop.xlane.xlu0 %7733 }
0x44ed   :  { %v7735_v1 = vsub.f32 %v7731_v17, %v7734_v51 }
0x44ef   :  { %v7736_v53 = vmul.f32 1.442695, %v7735_v1 }
0x44f0   :  { %v7746_v55 = vpop.permute.xlu0 %7745 }
0x44f1   :  { %12674 = vpow2.f32 %v7736_v53  ;;  %12247 = vmatpush3.msk.msra.mxu1 %vm558_vm4, %v7746_v55 }
0x44f2   :  { %12248 = vmatprep.subr.mxu1 %v12870_v12 }
0x44f4   :  { %v6272_v26 = vpop.permute.xlu0 %6271 }
0x44f5   :  { %6274 = vst.msk [vmem:[#allocation2] sm:$0xff] %vm890_vm6, %v6272_v26 }
0x44f8   :  { %v7307_v8 = vpop.permute.xlu0 %7306 }
0x44f9   :  { %7309 = vst.msk [vmem:[#allocation2 + $0x8] sm:$0xff] %vm890_vm6, %v7307_v8 }
0x44fc   :  { %v7566_v58 = vpop.permute.xlu0 %7565 }
0x44fd   :  { %7568 = vst.msk [vmem:[#allocation2 + $0x8] sm:$0xff] %vm1150_vm7, %v7566_v58 }
0x44fe   :  { %v12675_v56 = vpop.eup %12674 }
0x44ff   :  { %v7738_v34 = vsel %vm536_vm3, %v12675_v56, 0.0 }
0x4500   :  { %7739 = vadd.xlane.f32.xlu1 %v7738_v34 }
0x4511   :  { %7743 = vrot.lane.b32.xlu1 %v13912_v0, %s14764_s20 }
0x4515   :  { %6530 = vrot.lane.b32.xlu1 %v14043_v19, %s14759_s24  ;;  %v11227_v19 = vld [vmem:[%s12957_s30 + $0x30] sm:$0xff] }
0x4519   :  { %6789 = vrot.lane.b32.xlu1 %v14081_v4, %s14754_s25  ;;  %v11226_v4 = vld [vmem:[%s12957_s30 + $0x28] sm:$0xff]  ;;  %s14776_s30 = sld [smem:[#allocation25_spill]] }
0x4589   :  { %v7740_v35 = vpop.xlane.xlu1 %7739 }
0x458a   :  { %12676 = vrcp.f32 %v7740_v35 }
0x458d   :  { %v7744_v57 = vpop.permute.xlu1 %7743 }
0x458e   :  { %12249 = vmatpush3.msra.mxu1 %v7744_v57 }
0x458f   :  { %12264 = vmatprep.subr.mxu1 %v11228_v63 }
0x4591   :  { %v6531_v9 = vpop.permute.xlu1 %6530 }
0x4592   :  { %6533 = vst.msk [vmem:[#allocation2] sm:$0xff] %vm1150_vm7, %v6531_v9 }
0x4595   :  { %v6790_v62 = vpop.permute.xlu1 %6789 }
0x4596   :  { %6792 = vst.msk [vmem:[#allocation2] sm:$0xff] %vm1410_vm8, %v6790_v62 }
0x4597   :  { %v12677_v0 = vpop.eup %12676 }
0x4598   :  { %v7742_v31 = vmul.f32 %v12677_v0, %v12675_v56 }
0x459a   :  { %12251 = vmatmul.mubr.msk.f32.vlgmr.msra.gmra.mxu1 %vm536_vm3, %v7742_v31 }
0x459b   :  { %12265 = vmatpush3.msra.mxu1 %v11228_v63  ;;  %12272 = vmatprep.mubr.msk.f32.mxu1 %vm196_vm0, %v13901_v20 }
0x459c   :  { %12266 = vmatprep.subr.mxu1 %v11227_v19 }
0x459d   :  { %12267 = vmatpush3.msra.mxu1 %v11227_v19  ;;  %v7828_v21 = vld [vmem:[#allocation2] sm:$0xff] }
0x459e   :  { %12268 = vmatprep.subr.mxu1 %v11226_v4  ;;  %12261 = vmatprep.mubr.msk.f32.mxu0 %vm196_vm0, %v7828_v21 }
0x459f   :  { %12269 = vmatpush3.msra.mxu1 %v11226_v4 }
0x45a0   :  { %12270 = vmatprep.subr.mxu1 %v11225_v5 }
0x45a1   :  { %12271 = vmatpush3.msra.mxu1 %v11225_v5 }
0x45a2   :  { %12273 = vmatmul.mubr.msk.f32.vlgmr.msra.gmra.mxu1 %vm196_vm0, %v13903_v52  ;;  %12286 = vmatprep.subr.mxu1 %v12870_v12 }
0x45a3   :  { %12288 = vmatprep.mubr.msk.f32.mxu1 %vm12871_vm1, %v12870_v12 }
0x465a   :  { %v7819_v39 = vpop.f32.mrf.mxu1 }
0x465b   :  { %7824 = vrot.lane.b32.xlu1 %v7819_v39, %s14754_s25 }
0x465c   :  { %v12252_v42 = vpop.f32.mrf.mxu1 }
0x4662   :  { %v12274_v7 = vpop.f32.mrf.mxu1 }
0x4663   :  { %v14228_v15 = vadd.f32 %v12274_v7, %v11230_v54 }
0x4664   :  { %v8051_v10 = vpop.f32.mrf.mxu1 }
0x4665   :  { %v14230_v49 = vadd.f32 %v11230_v54, %v8051_v10 }
0x4667   :  { %8225 = vrot.lane.b32.xlu1 %v14230_v49, %s14765_s21  ;;  %8149 = vrot.lane.b32.xlu0 %v14230_v49, %s14740_s5 }
0x46cd   :  { %v7825_v22 = vpop.permute.xlu1 %7824 }
0x46ce   :  { %7827 = vst.msk [vmem:[#allocation2 + $0x8] sm:$0xff] %vm1410_vm8, %v7825_v22 }
0x46d5   :  { %v7829_v14 = vld [vmem:[#allocation2 + $0x8] sm:$0xff] }
0x46d6   :  { %12262 = vmatmul.mubr.msk.f32.vlgmr.msra.gmra.mxu0 %vm196_vm0, %v7829_v14 }
0x46d7   :  { %12276 = vmatpush3.msra.mxu0 %v11236_v16  ;;  %12283 = vmatprep.mubr.msk.f32.mxu0 %vm196_vm0, %v13887_v47 }
0x46d8   :  { %12277 = vmatprep.subr.mxu0 %v11235_v11 }
0x46d9   :  { %12278 = vmatpush3.msra.mxu0 %v11235_v11  ;;  %v8150_v25 = vpop.permute.xlu0 %8149  ;;  %v8226_v43 = vpop.permute.xlu1 %8225 }
0x46da   :  { %12279 = vmatprep.subr.mxu0 %v11234_v41  ;;  %12287 = vmatpush3.xpose.msk.msra.mxu1 %vm373_vm2, %v8150_v25 }
0x46db   :  { %12280 = vmatpush3.msra.mxu0 %v11234_v41  ;;  %12291 = vmatprep.subr.mxu1 %v12870_v12 }
0x46dc   :  { %12281 = vmatprep.subr.mxu0 %v11233_v28 }
0x46dd   :  { %12282 = vmatpush3.msra.mxu0 %v11233_v28  ;;  %12289 = vmatmul.mubr.msk.f32.vlgmr.msra.gmra.mxu1 %vm373_vm2, %v14230_v49 }
0x46de   :  { %12284 = vmatmul.mubr.msk.f32.vlgmr.msra.gmra.mxu0 %vm196_vm0, %v13889_v48  ;;  %12293 = vmatprep.mubr.msk.f32.mxu1 %vm12871_vm1, %v12870_v12 }
0x46df   :  { %12296 = vmatprep.subr.mxu0 %v12870_v12  ;;  %12300 = vmatprep.mubr.msk.f32.mxu0 %vm12871_vm1, %v12870_v12 }
0x4796   :  { %v12263_v2 = vpop.f32.mrf.mxu0 }
0x4797   :  { %v14258_v36 = vadd.f32 %v12263_v2, %v14255_v32 }
0x4798   :  { %v14260_v33 = vpop.f32.mrf.mxu0 }
0x479d   :  { %v8221_v40 = vpop.f32.mrf.mxu1 }
0x479e   :  { %v12285_v13 = vpop.f32.mrf.mxu0 }
0x479f   :  { %v14263_v46 = vadd.f32 %v12285_v13, %v11238_v37  ;;  %v12290_v27 = vpop.f32.mrf.mxu1 }
0x47a0   :  { %v8139_v29 = vpop.f32.mrf.mxu0 }
0x47a1   :  { %v14265_v59 = vadd.f32 %v11238_v37, %v8139_v29 }
0x47a3   :  { %12292 = vmatpush3.xpose.msk.msra.mxu1 %vm373_vm2, %v14265_v59  ;;  %v8320_v38 = vrot.slane %v14265_v59, 2 }
0x47a4   :  { %12303 = vmatprep.subr.mxu1 %v12870_v12 }
0x47a6   :  { %12294 = vmatmul.mubr.msk.f32.vlgmr.msra.gmra.mxu1 %vm373_vm2, %v8226_v43 }
0x47a7   :  { %12305 = vmatprep.mubr.msk.f32.mxu1 %vm12871_vm1, %v12870_v12 }
0x4866   :  { %v8298_v6 = vpop.f32.mrf.mxu1 }
0x4867   :  { %8303 = vrot.lane.b32.xlu0 %v8298_v6, %s14768_s8 }
0x4868   :  { %v12295_v50 = vpop.f32.mrf.mxu1 }
0x486b   :  { %8321 = vrot.lane.b32.xlu0 %v8320_v38, %s14765_s21 }
0x48d9   :  { %v8304_v45 = vpop.permute.xlu0 %8303 }
0x48da   :  { %v8306_v17 = vsel %vm2923_vm9, %v8221_v40, %v8304_v45 }
0x48db   :  { %v8307_v61 = vmul.f32 0.35355338, %v8306_v17 }
0x48dd   :  { %v8308_v51 = vadd.f32 %v8307_v61, %v13498_v60  ;;  %v14279_v53 = vpop.permute.xlu0 %8321 }
0x48de   :  { %v14295_v35 = vsel %vm558_vm4, %v14230_v49, %v14279_v53 }
0x48df   :  { %v8309_v1 = vsel %vm2931_vm10, %v8308_v51, -inf }
0x48e0   :  { %8310 = vmax.xlane.f32.xlu1 %v8309_v1 }
0x48f1   :  { %8328 = vrot.lane.b32.xlu1 %v14279_v53, %s14766_s1 }
0x48f5   :  { %8487 = vrot.lane.b32.xlu1 %v14265_v59, %s14767_s2 }
0x48f9   :  { %8485 = vrot.lane.b32.xlu1 %v14230_v49, %s14754_s25 }
0x48fd   :  { %8407 = vrot.lane.b32.xlu1 %v14230_v49, %s14767_s2 }
0x4969   :  { %v8311_v55 = vpop.xlane.xlu1 %8310 }
0x496a   :  { %v8312_v26 = vsub.f32 %v8308_v51, %v8311_v55 }
0x496c   :  { %v8313_v8 = vmul.f32 1.442695, %v8312_v26 }
0x496d   :  { %v8329_v58 = vpop.permute.xlu1 %8328 }
0x496e   :  { %12678 = vpow2.f32 %v8313_v8  ;;  %12297 = vmatpush3.msk.msra.mxu0 %vm558_vm4, %v8329_v58 }
0x496f   :  { %12298 = vmatprep.subr.mxu0 %v12870_v12 }
0x4971   :  { %v8488_v63 = vpop.permute.xlu1 %8487 }
0x4975   :  { %v8486_v62 = vpop.permute.xlu1 %8485 }
0x4979   :  { %v8408_v31 = vpop.permute.xlu1 %8407 }
0x497b   :  { %v12679_v56 = vpop.eup %12678 }
0x497c   :  { %v8315_v34 = vsel %vm2931_vm10, %v12679_v56, 0.0 }
0x497d   :  { %8316 = vadd.xlane.f32.xlu0 %v8315_v34 }
0x4993   :  { %8326 = vrot.lane.b32.xlu0 %v14295_v35, %s14766_s1 }
0x4997   :  { %8409 = vrot.lane.b32.xlu0 %v14230_v49, %s14755_s29 }
0x4a06   :  { %v8317_v57 = vpop.xlane.xlu0 %8316 }
0x4a07   :  { %12680 = vrcp.f32 %v8317_v57 }
0x4a0a   :  { %v8327_v9 = vpop.permute.xlu0 %8326 }
0x4a0b   :  { %12299 = vmatpush3.msra.mxu0 %v8327_v9 }
0x4a0c   :  { %12308 = vmatprep.subr.mxu0 %v12870_v12 }
0x4a0e   :  { %v8410_v0 = vpop.permute.xlu0 %8409 }
0x4a0f   :  { %12304 = vmatpush3.xpose.msk.msra.mxu1 %vm373_vm2, %v8410_v0 }
0x4a10   :  { %12313 = vmatprep.subr.mxu1 %v12870_v12 }
0x4a12   :  { %12306 = vmatmul.mubr.msk.f32.vlgmr.msra.gmra.mxu1 %vm373_vm2, %v8408_v31 }
0x4a13   :  { %12317 = vmatprep.mubr.msk.f32.mxu1 %vm12871_vm1, %v12870_v12 }
0x4a14   :  { %v12681_v19 = vpop.eup %12680 }
0x4a15   :  { %v8319_v4 = vmul.f32 %v12681_v19, %v12679_v56 }
0x4a17   :  { %12301 = vmatmul.mubr.msk.f32.vlgmr.msra.gmra.mxu0 %vm536_vm3, %v8319_v4 }
0x4a18   :  { %12309 = vmatpush3.xpose.msk.msra.mxu0 %vm373_vm2, %v8488_v63  ;;  %12310 = vmatprep.mubr.msk.f32.mxu0 %vm12871_vm1, %v12870_v12 }
0x4a19   :  { %12320 = vmatprep.subr.mxu0 %v12870_v12 }
0x4a1b   :  { %12311 = vmatmul.mubr.msk.f32.vlgmr.msra.gmra.mxu0 %vm373_vm2, %v8486_v62 }
0x4a1c   :  { %12322 = vmatprep.mubr.msk.f32.mxu0 %vm12871_vm1, %v12870_v12 }
0x4ad2   :  { %v8481_v21 = vpop.f32.mrf.mxu1 }
0x4ad4   :  { %v12307_v5 = vpop.f32.mrf.mxu1 }
0x4ad7   :  { %v8402_v18 = vpop.f32.mrf.mxu0 }
0x4ad8   :  { %8406 = vst.msk [vmem:[#allocation3] sm:$0x3f] %vm3029_vm11, %v8402_v18 }
0x4ad9   :  { %v12302_v3 = vpop.f32.mrf.mxu0 }
0x4adb   :  { %v8559_v30 = vpop.f32.mrf.mxu0 }
0x4adc   :  { %8564 = vrot.lane.b32.xlu0 %v8559_v30, %s14768_s8 }
0x4add   :  { %v12312_v23 = vpop.f32.mrf.mxu0 }
0x4b4e   :  { %v8565_v16 = vpop.permute.xlu0 %8564 }
0x4b4f   :  { %v8567_v39 = vsel %vm2923_vm9, %v8481_v21, %v8565_v16 }
0x4b50   :  { %v8568_v42 = vmul.f32 0.35355338, %v8567_v39 }
0x4b52   :  { %v8569_v54 = vadd.f32 %v8568_v42, %v13498_v60 }
0x4b54   :  { %v8570_v7 = vsel %vm2931_vm10, %v8569_v54, -inf }
0x4b55   :  { %8571 = vmax.xlane.f32.xlu1 %v8570_v7 }
0x4b66   :  { %8581 = vrot.lane.b32.xlu1 %v14295_v35, %s14756_s3 }
0x4b6a   :  { %8746 = vrot.lane.b32.xlu1 %v14265_v59, %s14757_s13 }
0x4b6e   :  { %8668 = vrot.lane.b32.xlu1 %v14230_v49, %s14758_s27 }
0x4bde   :  { %v8572_v10 = vpop.xlane.xlu1 %8571 }
0x4bdf   :  { %v8573_v22 = vsub.f32 %v8569_v54, %v8572_v10 }
0x4be1   :  { %v8574_v14 = vmul.f32 1.442695, %v8573_v22 }
0x4be2   :  { %v8582_v11 = vpop.permute.xlu1 %8581 }
0x4be3   :  { %12682 = vpow2.f32 %v8574_v14  ;;  %v9185_v14 = vrot.slane %v14230_v49, 6 }
0x4be6   :  { %v8747_v41 = vpop.permute.xlu1 %8746 }
0x4bea   :  { %v8669_v25 = vpop.permute.xlu1 %8668 }
0x4beb   :  { %12321 = vmatpush3.xpose.msk.msra.mxu0 %vm373_vm2, %v8669_v25 }
0x4bec   :  { %12330 = vmatprep.subr.mxu0 %v12870_v12 }
0x4bf0   :  { %v12683_v28 = vpop.eup %12682 }
0x4bf1   :  { %v8576_v2 = vsel %vm2931_vm10, %v12683_v28, 0.0 }
0x4bf2   :  { %8577 = vadd.xlane.f32.xlu0 %v8576_v2 }
0x4c08   :  { %8583 = vrot.lane.b32.xlu0 %v14279_v53, %s14756_s3 }
0x4c0c   :  { %8744 = vrot.lane.b32.xlu0 %v14230_v49, %s14759_s24 }
0x4c10   :  { %8666 = vrot.lane.b32.xlu0 %v14230_v49, %s14757_s13 }
0x4c7b   :  { %v8578_v37 = vpop.xlane.xlu0 %8577 }
0x4c7c   :  { %12684 = vrcp.f32 %v8578_v37 }
0x4c7f   :  { %v8584_v40 = vpop.permute.xlu0 %8583 }
0x4c80   :  { %12314 = vmatpush3.msk.msra.mxu1 %vm558_vm4, %v8584_v40 }
0x4c81   :  { %12315 = vmatprep.subr.mxu1 %v12870_v12 }
0x4c82   :  { %12316 = vmatpush3.msra.mxu1 %v8582_v11  ;;  %v9186_v11 = vrot.slane %v14228_v15, 6 }
0x4c83   :  { %v8745_v13 = vpop.permute.xlu0 %8744  ;;  %12325 = vmatprep.subr.mxu1 %v12870_v12 }
0x4c87   :  { %v8667_v27 = vpop.permute.xlu0 %8666 }
0x4c88   :  { %12323 = vmatmul.mubr.msk.f32.vlgmr.msra.gmra.mxu0 %vm373_vm2, %v8667_v27 }
0x4c89   :  { %v12685_v29 = vpop.eup %12684  ;;  %12334 = vmatprep.mubr.msk.f32.mxu0 %vm12871_vm1, %v12870_v12 }
0x4c8a   :  { %v8580_v43 = vmul.f32 %v12685_v29, %v12683_v28 }
0x4c8c   :  { %12318 = vmatmul.mubr.msk.f32.vlgmr.msra.gmra.mxu1 %vm536_vm3, %v8580_v43 }
0x4c8d   :  { %12326 = vmatpush3.xpose.msk.msra.mxu1 %vm373_vm2, %v8747_v41  ;;  %12327 = vmatprep.mubr.msk.f32.mxu1 %vm12871_vm1, %v12870_v12  ;;  %v14395_v41 = vsel %vm1492_vm5, %v9185_v14, %v9186_v11  ;;  %vm14771_vm5 = vcmask 259264  }
0x4c8e   :  { %12337 = vmatprep.subr.mxu1 %v12870_v12 }
0x4c90   :  { %12328 = vmatmul.mubr.msk.f32.vlgmr.msra.gmra.mxu1 %vm373_vm2, %v8745_v13 }
0x4c91   :  { %12339 = vmatprep.mubr.msk.f32.mxu1 %vm12871_vm1, %v12870_v12 }
0x4d48   :  { %v8740_v6 = vpop.f32.mrf.mxu0 }
0x4d4a   :  { %v12324_v50 = vpop.f32.mrf.mxu0 }
0x4d4c   :  { %v14349_v38 = vpop.f32.mrf.mxu1 }
0x4d4e   :  { %v12319_v45 = vpop.f32.mrf.mxu1 }
0x4d50   :  { %v8818_v17 = vpop.f32.mrf.mxu1 }
0x4d51   :  { %8823 = vrot.lane.b32.xlu1 %v8818_v17, %s14768_s8 }
0x4d52   :  { %v12329_v61 = vpop.f32.mrf.mxu1 }
0x4d53   :  { %v9360_v61 = vrot.slane %v14263_v46, 2 }
0x4d55   :  { %8840 = vrot.lane.b32.xlu1 %v14295_v35, %s14760_s4 }
0x4dc3   :  { %v8824_v51 = vpop.permute.xlu1 %8823 }
0x4dc4   :  { %v8826_v1 = vsel %vm2923_vm9, %v8740_v6, %v8824_v51 }
0x4dc5   :  { %v8827_v55 = vmul.f32 0.35355338, %v8826_v1 }
0x4dc7   :  { %v8828_v26 = vadd.f32 %v8827_v55, %v13498_v60  ;;  %v8841_v57 = vpop.permute.xlu1 %8840 }
0x4dc9   :  { %v8829_v8 = vsel %vm2931_vm10, %v8828_v26, -inf }
0x4dca   :  { %8830 = vmax.xlane.f32.xlu0 %v8829_v8 }
0x4de0   :  { %8842 = vrot.lane.b32.xlu0 %v14279_v53, %s14760_s4 }
0x4de4   :  { %9005 = vrot.lane.b32.xlu0 %v14265_v59, %s14761_s19 }
0x4de8   :  { %8927 = vrot.lane.b32.xlu0 %v14230_v49, %s14762_s0 }
0x4e53   :  { %v8831_v58 = vpop.xlane.xlu0 %8830 }
0x4e54   :  { %v8832_v56 = vsub.f32 %v8828_v26, %v8831_v58 }
0x4e56   :  { %v8833_v34 = vmul.f32 1.442695, %v8832_v56 }
0x4e57   :  { %v8843_v63 = vpop.permute.xlu0 %8842 }
0x4e58   :  { %12686 = vpow2.f32 %v8833_v34  ;;  %12331 = vmatpush3.msk.msra.mxu0 %vm558_vm4, %v8843_v63 }
0x4e59   :  { %12332 = vmatprep.subr.mxu0 %v12870_v12 }
0x4e5a   :  { %12333 = vmatpush3.msra.mxu0 %v8841_v57 }
0x4e5b   :  { %v9006_v9 = vpop.permute.xlu0 %9005  ;;  %12342 = vmatprep.subr.mxu0 %v12870_v12 }
0x4e5f   :  { %v8928_v62 = vpop.permute.xlu0 %8927 }
0x4e60   :  { %12338 = vmatpush3.xpose.msk.msra.mxu1 %vm373_vm2, %v8928_v62 }
0x4e61   :  { %12347 = vmatprep.subr.mxu1 %v12870_v12 }
0x4e65   :  { %v12687_v59 = vpop.eup %12686 }
0x4e66   :  { %v8835_v0 = vsel %vm2931_vm10, %v12687_v59, 0.0 }
0x4e67   :  { %8836 = vadd.xlane.f32.xlu1 %v8835_v0 }
0x4e78   :  { %9003 = vrot.lane.b32.xlu1 %v14230_v49, %s14763_s14 }
0x4e7c   :  { %8925 = vrot.lane.b32.xlu1 %v14230_v49, %s14761_s19 }
0x4ef0   :  { %v8837_v31 = vpop.xlane.xlu1 %8836 }
0x4ef1   :  { %12688 = vrcp.f32 %v8837_v31 }
0x4ef4   :  { %v9004_v19 = vpop.permute.xlu1 %9003 }
0x4ef8   :  { %v8926_v4 = vpop.permute.xlu1 %8925 }
0x4ef9   :  { %12340 = vmatmul.mubr.msk.f32.vlgmr.msra.gmra.mxu1 %vm373_vm2, %v8926_v4 }
0x4efa   :  { %12351 = vmatprep.mubr.msk.f32.mxu1 %vm12871_vm1, %v12870_v12 }
0x4efe   :  { %v12689_v21 = vpop.eup %12688 }
0x4eff   :  { %v8839_v5 = vmul.f32 %v12689_v21, %v12687_v59 }
0x4f01   :  { %12335 = vmatmul.mubr.msk.f32.vlgmr.msra.gmra.mxu0 %vm536_vm3, %v8839_v5 }
0x4f02   :  { %12343 = vmatpush3.xpose.msk.msra.mxu0 %vm373_vm2, %v9006_v9  ;;  %12344 = vmatprep.mubr.msk.f32.mxu0 %vm12871_vm1, %v12870_v12 }
0x4f03   :  { %12354 = vmatprep.subr.mxu0 %v12870_v12 }
0x4f05   :  { %12345 = vmatmul.mubr.msk.f32.vlgmr.msra.gmra.mxu0 %vm373_vm2, %v9004_v19 }
0x4f06   :  { %12356 = vmatprep.mubr.msk.f32.mxu0 %vm12871_vm1, %v12870_v12 }
0x4fb9   :  { %v8999_v18 = vpop.f32.mrf.mxu1 }
0x4fbb   :  { %v12341_v3 = vpop.f32.mrf.mxu1 }
0x4fc1   :  { %v14384_v30 = vpop.f32.mrf.mxu0 }
0x4fc3   :  { %v12336_v23 = vpop.f32.mrf.mxu0 }
0x4fc5   :  { %v9077_v16 = vpop.f32.mrf.mxu0 }
0x4fc6   :  { %9082 = vrot.lane.b32.xlu0 %v9077_v16, %s14768_s8 }
0x4fc7   :  { %v12346_v39 = vpop.f32.mrf.mxu0 }
0x5038   :  { %v9083_v42 = vpop.permute.xlu0 %9082 }
0x5039   :  { %v9085_v54 = vsel %vm2923_vm9, %v8999_v18, %v9083_v42 }
0x503a   :  { %v9086_v7 = vmul.f32 0.35355338, %v9085_v54 }
0x503c   :  { %v9087_v10 = vadd.f32 %v9086_v7, %v13498_v60 }
0x503e   :  { %v9088_v22 = vsel %vm2931_vm10, %v9087_v10, -inf }
0x503f   :  { %9089 = vmax.xlane.f32.xlu1 %v9088_v22 }
0x5050   :  { %9099 = vrot.lane.b32.xlu1 %v14295_v35, %s14764_s20 }
0x5054   :  { %9264 = vrot.lane.b32.xlu1 %v14395_v41, %s14765_s21 }
0x50c8   :  { %v9090_v25 = vpop.xlane.xlu1 %9089 }
0x50c9   :  { %v9091_v28 = vsub.f32 %v9087_v10, %v9090_v25 }
0x50cb   :  { %v9092_v2 = vmul.f32 1.442695, %v9091_v28 }
0x50cc   :  { %v9100_v35 = vpop.permute.xlu1 %9099 }
0x50cd   :  { %12690 = vpow2.f32 %v9092_v2 }
0x50d0   :  { %v9265_v27 = vpop.permute.xlu1 %9264 }
0x50da   :  { %v12691_v60 = vpop.eup %12690 }
0x50db   :  { %v9094_v37 = vsel %vm2931_vm10, %v12691_v60, 0.0 }
0x50dc   :  { %9095 = vadd.xlane.f32.xlu0 %v9094_v37 }
0x50f2   :  { %9101 = vrot.lane.b32.xlu0 %v14279_v53, %s14764_s20 }
0x50f6   :  { %9188 = vrot.lane.b32.xlu0 %v14395_v41, %s14740_s5 }
0x5165   :  { %v9096_v15 = vpop.xlane.xlu0 %9095 }
0x5166   :  { %12692 = vrcp.f32 %v9096_v15 }
0x5169   :  { %v9102_v49 = vpop.permute.xlu0 %9101 }
0x516a   :  { %12348 = vmatpush3.msk.msra.mxu1 %vm558_vm4, %v9102_v49 }
0x516b   :  { %12349 = vmatprep.subr.mxu1 %v12870_v12 }
0x516c   :  { %12350 = vmatpush3.msra.mxu1 %v9100_v35 }
0x516d   :  { %v9189_v40 = vpop.permute.xlu0 %9188  ;;  %12359 = vmatprep.subr.mxu1 %v12870_v12 }
0x516e   :  { %12355 = vmatpush3.xpose.msk.msra.mxu0 %vm373_vm2, %v9189_v40 }
0x516f   :  { %12364 = vmatprep.subr.mxu0 %v12870_v12 }
0x5171   :  { %12357 = vmatmul.mubr.msk.f32.vlgmr.msra.gmra.mxu0 %vm373_vm2, %v14395_v41 }
0x5172   :  { %12368 = vmatprep.mubr.msk.f32.mxu0 %vm12871_vm1, %v12870_v12 }
0x5173   :  { %v12693_v53 = vpop.eup %12692 }
0x5174   :  { %v9098_v13 = vmul.f32 %v12693_v53, %v12691_v60 }
0x5176   :  { %12352 = vmatmul.mubr.msk.f32.vlgmr.msra.gmra.mxu1 %vm536_vm3, %v9098_v13 }
0x5177   :  { %12360 = vmatpush3.xpose.msk.msra.mxu1 %vm373_vm2, %v14263_v46  ;;  %12361 = vmatprep.mubr.msk.f32.mxu1 %vm12871_vm1, %v12870_v12 }
0x5178   :  { %12371 = vmatprep.subr.mxu1 %v12870_v12 }
0x517a   :  { %12362 = vmatmul.mubr.msk.f32.vlgmr.msra.gmra.mxu1 %vm373_vm2, %v9265_v27 }
0x517b   :  { %12373 = vmatprep.mubr.msk.f32.mxu1 %vm12871_vm1, %v12870_v12 }
0x5231   :  { %v9260_v29 = vpop.f32.mrf.mxu0 }
0x5233   :  { %v12358_v43 = vpop.f32.mrf.mxu0 }
0x5236   :  { %v14422_v6 = vpop.f32.mrf.mxu1 }
0x5238   :  { %v12353_v50 = vpop.f32.mrf.mxu1 }
0x523a   :  { %v9337_v45 = vpop.f32.mrf.mxu1 }
0x523b   :  { %9342 = vrot.lane.b32.xlu1 %v9337_v45, %s14768_s8 }
0x523c   :  { %v12363_v17 = vpop.f32.mrf.mxu1 }
0x523f   :  { %9361 = vrot.lane.b32.xlu1 %v9360_v61, %s14765_s21 }
0x52ad   :  { %v9343_v51 = vpop.permute.xlu1 %9342 }
0x52ae   :  { %v9345_v1 = vsel %vm2923_vm9, %v9260_v29, %v9343_v51 }
0x52af   :  { %v9346_v55 = vmul.f32 0.35355338, %v9345_v1 }
0x52b1   :  { %v9347_v26 = vadd.f32 %v9346_v55, %v13654_v24  ;;  %v14430_v58 = vpop.permute.xlu1 %9361 }
0x52b2   :  { %v14446_v59 = vsel %vm558_vm4, %v14395_v41, %v14430_v58 }
0x52b3   :  { %v9348_v8 = vsel %vm2931_vm10, %v9347_v26, -inf }
0x52b4   :  { %9349 = vmax.xlane.f32.xlu0 %v9348_v8 }
0x52ca   :  { %9368 = vrot.lane.b32.xlu0 %v14430_v58, %s14766_s1 }
0x52ce   :  { %9527 = vrot.lane.b32.xlu0 %v14263_v46, %s14767_s2 }
0x52d2   :  { %9525 = vrot.lane.b32.xlu0 %v14395_v41, %s14754_s25 }
0x52d6   :  { %9447 = vrot.lane.b32.xlu0 %v14395_v41, %s14767_s2 }
0x533d   :  { %v9350_v56 = vpop.xlane.xlu0 %9349 }
0x533e   :  { %v9351_v34 = vsub.f32 %v9347_v26, %v9350_v56 }
0x5340   :  { %v9352_v63 = vmul.f32 1.442695, %v9351_v34 }
0x5341   :  { %v9369_v57 = vpop.permute.xlu0 %9368 }
0x5342   :  { %12694 = vpow2.f32 %v9352_v63  ;;  %12365 = vmatpush3.msk.msra.mxu0 %vm558_vm4, %v9369_v57 }
0x5343   :  { %12366 = vmatprep.subr.mxu0 %v12870_v12 }
0x5345   :  { %v9528_v0 = vpop.permute.xlu0 %9527 }
0x5349   :  { %v9526_v4 = vpop.permute.xlu0 %9525 }
0x534d   :  { %v9448_v5 = vpop.permute.xlu0 %9447 }
0x534f   :  { %v12695_v9 = vpop.eup %12694 }
0x5350   :  { %v9354_v62 = vsel %vm2931_vm10, %v12695_v9, 0.0 }
0x5351   :  { %9355 = vadd.xlane.f32.xlu1 %v9354_v62 }
0x5362   :  { %9366 = vrot.lane.b32.xlu1 %v14446_v59, %s14766_s1 }
0x5366   :  { %9449 = vrot.lane.b32.xlu1 %v14395_v41, %s14755_s29 }
0x53da   :  { %v9356_v31 = vpop.xlane.xlu1 %9355 }
0x53db   :  { %12696 = vrcp.f32 %v9356_v31 }
0x53de   :  { %v9367_v19 = vpop.permute.xlu1 %9366 }
0x53df   :  { %12367 = vmatpush3.msra.mxu0 %v9367_v19 }
0x53e0   :  { %12376 = vmatprep.subr.mxu0 %v12870_v12 }
0x53e2   :  { %v9450_v21 = vpop.permute.xlu1 %9449 }
0x53e3   :  { %12372 = vmatpush3.xpose.msk.msra.mxu1 %vm373_vm2, %v9450_v21 }
0x53e4   :  { %12381 = vmatprep.subr.mxu1 %v12870_v12 }
0x53e6   :  { %12374 = vmatmul.mubr.msk.f32.vlgmr.msra.gmra.mxu1 %vm373_vm2, %v9448_v5 }
0x53e7   :  { %12385 = vmatprep.mubr.msk.f32.mxu1 %vm12871_vm1, %v12870_v12 }
0x53e8   :  { %v12697_v18 = vpop.eup %12696 }
0x53e9   :  { %v9358_v3 = vmul.f32 %v12697_v18, %v12695_v9 }
0x53eb   :  { %12369 = vmatmul.mubr.msk.f32.vlgmr.msra.gmra.mxu0 %vm536_vm3, %v9358_v3 }
0x53ec   :  { %12377 = vmatpush3.xpose.msk.msra.mxu0 %vm373_vm2, %v9528_v0  ;;  %12378 = vmatprep.mubr.msk.f32.mxu0 %vm12871_vm1, %v12870_v12 }
0x53ed   :  { %12388 = vmatprep.subr.mxu0 %v12870_v12 }
0x53ef   :  { %12379 = vmatmul.mubr.msk.f32.vlgmr.msra.gmra.mxu0 %vm373_vm2, %v9526_v4 }
0x53f0   :  { %12390 = vmatprep.mubr.msk.f32.mxu0 %vm12871_vm1, %v12870_v12 }
0x54a6   :  { %v9521_v23 = vpop.f32.mrf.mxu1 }
0x54a8   :  { %v12375_v16 = vpop.f32.mrf.mxu1 }
0x54ab   :  { %v9442_v39 = vpop.f32.mrf.mxu0 }
0x54ac   :  { %9446 = vst.msk [vmem:[#allocation3 + $0x6] sm:$0x3f] %vm3029_vm11, %v9442_v39 }
0x54ad   :  { %v12370_v42 = vpop.f32.mrf.mxu0 }
0x54af   :  { %v9599_v54 = vpop.f32.mrf.mxu0 }
0x54b0   :  { %9604 = vrot.lane.b32.xlu1 %v9599_v54, %s14768_s8 }
0x54b1   :  { %v12380_v7 = vpop.f32.mrf.mxu0 }
0x54b4   :  { %9621 = vrot.lane.b32.xlu1 %v14446_v59, %s14756_s3 }
0x5522   :  { %v9605_v10 = vpop.permute.xlu1 %9604 }
0x5523   :  { %v9607_v22 = vsel %vm2923_vm9, %v9521_v23, %v9605_v10 }
0x5524   :  { %v9608_v14 = vmul.f32 0.35355338, %v9607_v22 }
0x5526   :  { %v9609_v11 = vadd.f32 %v9608_v14, %v13654_v24  ;;  %v9622_v15 = vpop.permute.xlu1 %9621 }
0x5528   :  { %v9610_v25 = vsel %vm2931_vm10, %v9609_v11, -inf }
0x5529   :  { %9611 = vmax.xlane.f32.xlu0 %v9610_v25 }
0x553f   :  { %9623 = vrot.lane.b32.xlu0 %v14430_v58, %s14756_s3 }
0x5543   :  { %9786 = vrot.lane.b32.xlu0 %v14263_v46, %s14757_s13 }
0x5547   :  { %9708 = vrot.lane.b32.xlu0 %v14395_v41, %s14758_s27 }
0x55b2   :  { %v9612_v28 = vpop.xlane.xlu0 %9611 }
0x55b3   :  { %v9613_v2 = vsub.f32 %v9609_v11, %v9612_v28 }
0x55b5   :  { %v9614_v60 = vmul.f32 1.442695, %v9613_v2  ;;  %v7916_v2 = vadd.f32 %v14255_v32, %v14260_v33 }
0x55b6   :  { %v9624_v37 = vpop.permute.xlu0 %9623 }
0x55b7   :  { %12698 = vpow2.f32 %v9614_v60  ;;  %12382 = vmatpush3.msk.msra.mxu1 %vm558_vm4, %v9624_v37 }
0x55b8   :  { %12383 = vmatprep.subr.mxu1 %v12870_v12 }
0x55b9   :  { %12384 = vmatpush3.msra.mxu1 %v9622_v15 }
0x55ba   :  { %v9787_v49 = vpop.permute.xlu0 %9786  ;;  %12393 = vmatprep.subr.mxu1 %v12870_v12 }
0x55be   :  { %v9709_v35 = vpop.permute.xlu0 %9708 }
0x55bf   :  { %12389 = vmatpush3.xpose.msk.msra.mxu0 %vm373_vm2, %v9709_v35 }
0x55c0   :  { %12398 = vmatprep.subr.mxu0 %v12870_v12 }
0x55c4   :  { %v12699_v40 = vpop.eup %12698 }
0x55c5   :  { %v9616_v53 = vsel %vm2931_vm10, %v12699_v40, 0.0 }
0x55c6   :  { %9617 = vadd.xlane.f32.xlu1 %v9616_v53 }
0x55d7   :  { %9784 = vrot.lane.b32.xlu1 %v14395_v41, %s14759_s24 }
0x55db   :  { %9706 = vrot.lane.b32.xlu1 %v14395_v41, %s14757_s13 }
0x564f   :  { %v9618_v13 = vpop.xlane.xlu1 %9617 }
0x5650   :  { %12700 = vrcp.f32 %v9618_v13 }
0x5653   :  { %v9785_v27 = vpop.permute.xlu1 %9784 }
0x5657   :  { %v9707_v29 = vpop.permute.xlu1 %9706 }
0x5658   :  { %12391 = vmatmul.mubr.msk.f32.vlgmr.msra.gmra.mxu0 %vm373_vm2, %v9707_v29  ;;  %v10228_v29 = vld [vmem:[#allocation4 + $0x28] sm:$0xff] }
0x5659   :  { %12402 = vmatprep.mubr.msk.f32.mxu0 %vm12871_vm1, %v12870_v12 }
0x565d   :  { %v12701_v43 = vpop.eup %12700 }
0x565e   :  { %v9620_v50 = vmul.f32 %v12701_v43, %v12699_v40  ;;  %v10227_v43 = vld [vmem:[#allocation4 + $0x20] sm:$0xff] }
0x5660   :  { %12386 = vmatmul.mubr.msk.f32.vlgmr.msra.gmra.mxu1 %vm536_vm3, %v9620_v50 }
0x5661   :  { %12394 = vmatpush3.xpose.msk.msra.mxu1 %vm373_vm2, %v9787_v49  ;;  %12395 = vmatprep.mubr.msk.f32.mxu1 %vm12871_vm1, %v12870_v12 }
0x5662   :  { %12405 = vmatprep.subr.mxu1 %v12870_v12 }
0x5664   :  { %12396 = vmatmul.mubr.msk.f32.vlgmr.msra.gmra.mxu1 %vm373_vm2, %v9785_v27  ;;  %v10229_v27 = vld [vmem:[#allocation4 + $0x30] sm:$0xff] }
0x5665   :  { %12407 = vmatprep.mubr.msk.f32.mxu1 %vm12871_vm1, %v12870_v12 }
0x5718   :  { %v9780_v45 = vpop.f32.mrf.mxu0 }
0x571a   :  { %v12392_v17 = vpop.f32.mrf.mxu0 }
0x5720   :  { %v14500_v61 = vpop.f32.mrf.mxu1 }
0x5722   :  { %v12387_v51 = vpop.f32.mrf.mxu1 }
0x5723   :  { %v7925_v51 = vadd.f32 %v14258_v36, %v13889_v48 }
0x5724   :  { %v9858_v1 = vpop.f32.mrf.mxu1 }
0x5725   :  { %9863 = vrot.lane.b32.xlu0 %v9858_v1, %s14768_s8 }
0x5726   :  { %v12397_v55 = vpop.f32.mrf.mxu1 }
0x5727   :  { %v7933_v55 = vsel %vm196_vm0, %v7925_v51, 0.0 }
0x5797   :  { %v9864_v26 = vpop.permute.xlu0 %9863 }
0x5798   :  { %v9866_v8 = vsel %vm2923_vm9, %v9780_v45, %v9864_v26 }
0x5799   :  { %v9867_v56 = vmul.f32 0.35355338, %v9866_v8 }
0x579b   :  { %v9868_v34 = vadd.f32 %v9867_v56, %v13654_v24 }
0x579d   :  { %v9869_v63 = vsel %vm2931_vm10, %v9868_v34, -inf }
0x579e   :  { %9870 = vmax.xlane.f32.xlu1 %v9869_v63 }
0x57af   :  { %9880 = vrot.lane.b32.xlu1 %v14446_v59, %s14760_s4 }
0x57b3   :  { %10045 = vrot.lane.b32.xlu1 %v14263_v46, %s14761_s19 }
0x57b7   :  { %9967 = vrot.lane.b32.xlu1 %v14395_v41, %s14762_s0 }
0x5827   :  { %v9871_v57 = vpop.xlane.xlu1 %9870 }
0x5828   :  { %v9872_v9 = vsub.f32 %v9868_v34, %v9871_v57 }
0x582a   :  { %v9873_v62 = vmul.f32 1.442695, %v9872_v9 }
0x582b   :  { %v9881_v0 = vpop.permute.xlu1 %9880 }
0x582c   :  { %12702 = vpow2.f32 %v9873_v62 }
0x582f   :  { %v10046_v31 = vpop.permute.xlu1 %10045 }
0x5833   :  { %v9968_v19 = vpop.permute.xlu1 %9967 }
0x5834   :  { %12406 = vmatpush3.xpose.msk.msra.mxu1 %vm373_vm2, %v9968_v19  ;;  %v11224_v19 = vld [vmem:[%s14742_s26 + $0x1] ss:$0 sm:$0xff] }
0x5835   :  { %12415 = vmatprep.subr.mxu1 %v12870_v12 }
0x5839   :  { %v12703_v4 = vpop.eup %12702 }
0x583a   :  { %v9875_v21 = vsel %vm2931_vm10, %v12703_v4, 0.0 }
0x583b   :  { %9876 = vadd.xlane.f32.xlu0 %v9875_v21 }
0x5851   :  { %9882 = vrot.lane.b32.xlu0 %v14430_v58, %s14760_s4 }
0x5855   :  { %10043 = vrot.lane.b32.xlu0 %v14395_v41, %s14763_s14 }
0x5859   :  { %9965 = vrot.lane.b32.xlu0 %v14395_v41, %s14761_s19  ;;  %s14775_s19 = sld [smem:[#allocation29_spill]] }
0x58c4   :  { %v9877_v46 = vpop.xlane.xlu0 %9876 }
0x58c5   :  { %12704 = vrcp.f32 %v9877_v46 }
0x58c8   :  { %v9883_v5 = vpop.permute.xlu0 %9882 }
0x58c9   :  { %12399 = vmatpush3.msk.msra.mxu0 %vm558_vm4, %v9883_v5  ;;  %v11290_v5 = vld [vmem:[%s14743_s23 + $0x1] ss:$0 sm:$0xff] }
0x58ca   :  { %12400 = vmatprep.subr.mxu0 %v12870_v12 }
0x58cb   :  { %12401 = vmatpush3.msra.mxu0 %v9881_v0  ;;  %v11223_v0 = vld [vmem:[%s14741_s17 + $0x1] ss:$0 sm:$0xff] }
0x58cc   :  { %v10044_v18 = vpop.permute.xlu0 %10043  ;;  %12410 = vmatprep.subr.mxu0 %v12870_v12 }
0x58d0   :  { %v9966_v3 = vpop.permute.xlu0 %9965 }
0x58d1   :  { %12408 = vmatmul.mubr.msk.f32.vlgmr.msra.gmra.mxu1 %vm373_vm2, %v9966_v3 }
0x58d2   :  { %v12705_v23 = vpop.eup %12704  ;;  %12419 = vmatprep.mubr.msk.f32.mxu1 %vm12871_vm1, %v12870_v12 }
0x58d3   :  { %v9879_v16 = vmul.f32 %v12705_v23, %v12703_v4 }
0x58d5   :  { %12403 = vmatmul.mubr.msk.f32.vlgmr.msra.gmra.mxu0 %vm536_vm3, %v9879_v16 }
0x58d6   :  { %12411 = vmatpush3.xpose.msk.msra.mxu0 %vm373_vm2, %v10046_v31  ;;  %12412 = vmatprep.mubr.msk.f32.mxu0 %vm12871_vm1, %v12870_v12  ;;  %vm14769_vm1 = vcmask 128064  }
0x58d9   :  { %12413 = vmatmul.mubr.msk.f32.vlgmr.msra.gmra.mxu0 %vm373_vm2, %v10044_v18  ;;  %vm14770_vm2 = vcmask 193664  }
0x58da   :  { %vm14773_vm6 = vmmov %vm14770_vm2 }
0x5991   :  { %v10039_v41 = vpop.f32.mrf.mxu1 }
0x5993   :  { %v12409_v39 = vpop.f32.mrf.mxu1 }
0x5995   :  { %v9956_v42 = vpop.f32.mrf.mxu0 }
0x5997   :  { %v12404_v54 = vpop.f32.mrf.mxu0 }
0x5999   :  { %v10117_v7 = vpop.f32.mrf.mxu0 }
0x599a   :  { %10122 = vrot.lane.b32.xlu1 %v10117_v7, %s14768_s8 }
0x599b   :  { %v12414_v10 = vpop.f32.mrf.mxu0 }
0x5a0c   :  { %v10123_v22 = vpop.permute.xlu1 %10122 }
0x5a0d   :  { %v10125_v14 = vsel %vm2923_vm9, %v10039_v41, %v10123_v22 }
0x5a0e   :  { %v10126_v11 = vmul.f32 0.35355338, %v10125_v14  ;;  %v10372_v14 = vld [vmem:[#allocation7 + $0x38] sm:$0xff] }
0x5a10   :  { %v10127_v25 = vadd.f32 %v10126_v11, %v13654_v24  ;;  %v7924_v24 = vadd.f32 %v7916_v2, %v13887_v47  ;;  %v10371_v11 = vld [vmem:[#allocation7 + $0x30] sm:$0xff] }
0x5a12   :  { %v10128_v28 = vsel %vm2931_vm10, %v10127_v25, -inf  ;;  %v7930_v60 = vsel %vm196_vm0, %v7924_v24, 0.0 }
0x5a13   :  { %10129 = vmax.xlane.f32.xlu0 %v10128_v28 }
0x5a29   :  { %10141 = vrot.lane.b32.xlu0 %v14430_v58, %s14764_s20 }
0x5a2d   :  { %8662 = vrot.lane.b32.xlu0 %v14349_v38, %s14763_s14 }
0x5a31   :  { %8921 = vrot.lane.b32.xlu0 %v14384_v30, %s14759_s24 }
0x5a35   :  { %9180 = vrot.lane.b32.xlu0 %v14422_v6, %s14754_s25 }
0x5a54   :  { %7931 = vadd.xlane.f32.xlu0 %v7930_v60 }
0x5a9c   :  { %v10130_v37 = vpop.xlane.xlu0 %10129 }
0x5a9d   :  { %v10131_v15 = vsub.f32 %v10127_v25, %v10130_v37  ;;  %v10369_v25 = vld [vmem:[#allocation7 + $0x20] sm:$0xff] }
0x5a9f   :  { %v10132_v58 = vmul.f32 1.442695, %v10131_v15 }
0x5aa0   :  { %v10142_v49 = vpop.permute.xlu0 %10141 }
0x5aa1   :  { %12706 = vpow2.f32 %v10132_v58  ;;  %12416 = vmatpush3.msk.msra.mxu1 %vm558_vm4, %v10142_v49  ;;  %vm14772_vm4 = vmmov %vm14769_vm1 }
0x5aa2   :  { %12417 = vmatprep.subr.mxu1 %v12870_v12 }
0x5aa4   :  { %v8663_v38 = vpop.permute.xlu0 %8662 }
0x5aa5   :  { %8665 = vst.msk [vmem:[#allocation3] sm:$0x3f] %vm14769_vm1, %v8663_v38 }
0x5aa8   :  { %v8922_v30 = vpop.permute.xlu0 %8921 }
0x5aa9   :  { %8924 = vst.msk [vmem:[#allocation3] sm:$0x3f] %vm14770_vm2, %v8922_v30 }
0x5aac   :  { %v9181_v32 = vpop.permute.xlu0 %9180 }
0x5aad   :  { %9183 = vst.msk [vmem:[#allocation3] sm:$0x3f] %vm14771_vm5, %v9181_v32 }
0x5aae   :  { %v12707_v47 = vpop.eup %12706 }
0x5aaf   :  { %v10134_v33 = vsel %vm2931_vm10, %v12707_v47, 0.0 }
0x5ab0   :  { %10135 = vadd.xlane.f32.xlu1 %v10134_v33 }
0x5ac1   :  { %10139 = vrot.lane.b32.xlu1 %v14446_v59, %s14764_s20  ;;  %v10230_v59 = vld [vmem:[#allocation4 + $0x38] sm:$0xff]  ;;  %s10965_s20 = sshll.u32 %s12888_s12, 4  ;;  %s10966_s20 = int_to_ptr.vmem [resolvable:$true] %s10965_s20 }
0x5ac2   :  { %12422 = vmatprep.subr.mxu0 %v10230_v59  ;;  %s12806_s4 = scalar_lea.vmem %s10966_s20, 256  ;;  %p12811_p2 = scmp.lt.s32.totalorder %s10966_s20, %s10966_s20 }
0x5ac3   :  { %12423 = vmatpush3.msra.mxu0 %v10230_v59  ;;  %v10663_v59 = vld [vmem:[#allocation9 + $0x20] sm:$0xff]  ;;  %p12807_p1 = scmp.ne.s32.totalorder %s10966_s20, %s12806_s4  ;;  %p12812_p3 = scmp.lt.s32.totalorder %s12806_s4, %s12806_s4 }
0x5ac4   :  { %12424 = vmatprep.subr.mxu0 %v10229_v27 }
0x5ac5   :  { %9702 = vrot.lane.b32.xlu1 %v14500_v61, %s14763_s14  ;;  %12425 = vmatpush3.msra.mxu0 %v10229_v27  ;;  %v11308_v27 = vld [vmem:[%s14744_s9 + $0x78] sm:$0xff]  ;;  %p12813_p4 = por %p12812_p3, %p12811_p2 }
0x5ac6   :  { %12426 = vmatprep.subr.mxu0 %v10228_v29 }
0x5ac7   :  { %12427 = vmatpush3.msra.mxu0 %v10228_v29  ;;  %v11307_v29 = vld [vmem:[%s14744_s9 + $0x70] sm:$0xff]  ;;  %p12814_p5 = pnand %p12813_p4, %p12807_p1 }
0x5ac8   :  { %12428 = vmatprep.subr.mxu0 %v10227_v43 }
0x5ac9   :  { %9961 = vrot.lane.b32.xlu1 %v9956_v42, %s14759_s24  ;;  %12429 = vmatpush3.msra.mxu0 %v10227_v43  ;;  %v11306_v43 = vld [vmem:[%s14744_s9 + $0x68] sm:$0xff] }
0x5aca   :  { %12444 = vmatprep.subr.mxu0 %v11308_v27 }
0x5add   :  { %v7932_v17 = vpop.xlane.xlu0 %7931 }
0x5ade   :  { %v7936_v61 = vmul.f32 0.03125, %v7932_v17  ;;  %v11304_v17 = vld [vmem:[%s14744_s9 + $0x58] sm:$0xff] }
0x5ae0   :  { %v7938_v1 = vsub.f32 %v7924_v24, %v7936_v61 }
0x5ae2   :  { %v7940_v26 = vmul.f32 %v7938_v1, %v7938_v1 }
0x5ae4   :  { %v7942_v8 = vsel %vm196_vm0, %v7940_v26, 0.0  ;;  %v11302_v26 = vld [vmem:[%s14744_s9 + $0x48] sm:$0xff] }
0x5b39   :  { %v10136_v12 = vpop.xlane.xlu1 %10135 }
0x5b3a   :  { %12708 = vrcp.f32 %v10136_v12  ;;  %v10666_v12 = vld [vmem:[#allocation9 + $0x38] sm:$0xff] }
0x5b3d   :  { %v10140_v6 = vpop.permute.xlu1 %10139 }
0x5b3e   :  { %12418 = vmatpush3.msra.mxu1 %v10140_v6 }
0x5b3f   :  { %12433 = vmatprep.subr.mxu1 %v10372_v14 }
0x5b41   :  { %v9703_v35 = vpop.permute.xlu1 %9702 }
0x5b42   :  { %9705 = vst.msk [vmem:[#allocation3 + $0x6] sm:$0x3f] %vm14772_vm4, %v9703_v35 }
0x5b45   :  { %v9962_v40 = vpop.permute.xlu1 %9961 }
0x5b46   :  { %9964 = vst.msk [vmem:[#allocation3 + $0x6] sm:$0x3f] %vm14773_vm6, %v9962_v40 }
0x5b47   :  { %v12709_v53 = vpop.eup %12708 }
0x5b48   :  { %v10138_v13 = vmul.f32 %v12709_v53, %v12707_v47  ;;  %v10665_v53 = vld [vmem:[#allocation9 + $0x30] sm:$0xff] }
0x5b4a   :  { %12420 = vmatmul.mubr.msk.f32.vlgmr.msra.gmra.mxu1 %vm536_vm3, %v10138_v13  ;;  %vm14774_vm3 = vmmov %vm14771_vm5  ;;  %v10664_v13 = vld [vmem:[#allocation9 + $0x28] sm:$0xff] }
0x5b4b   :  { %12434 = vmatpush3.msra.mxu1 %v10372_v14 }
0x5b4c   :  { %12435 = vmatprep.subr.mxu1 %v10371_v11 }
0x5b4d   :  { %12436 = vmatpush3.msra.mxu1 %v10371_v11 }
0x5c0a   :  { %v10215_v50 = vpop.f32.mrf.mxu1 }
0x5c0b   :  { %10220 = vrot.lane.b32.xlu1 %v10215_v50, %s14754_s25  ;;  %v11305_v50 = vld [vmem:[%s14744_s9 + $0x60] sm:$0xff] }
0x5c0c   :  { %v12421_v45 = vpop.f32.mrf.mxu1 }
0x5c2f   :  { %7934 = vadd.xlane.f32.xlu1 %v7933_v55 }
0x5c33   :  { %7943 = vadd.xlane.f32.xlu1 %v7942_v8 }
0x5c7d   :  { %v10221_v56 = vpop.permute.xlu1 %10220 }
0x5c7e   :  { %10223 = vst.msk [vmem:[#allocation3 + $0x6] sm:$0x3f] %vm14774_vm3, %v10221_v56  ;;  %v11301_v56 = vld [vmem:[%s14744_s9 + $0x40] sm:$0xff] }
0x5c85   :  { %v10224_v34 = vld [vmem:[#allocation3] sm:$0xff]  ;;  %v10225_v63 = vld [vmem:[#allocation3 + $0x8] sm:$0xf] }
0x5c86   :  { %12430 = vmatprep.mubr.msk.f32.mxu0 %vm196_vm0, %v10224_v34 }
0x5c87   :  { %12431 = vmatmul.mubr.msk.f32.vlgmr.msra.gmra.mxu0 %vm196_vm0, %v10225_v63 }
0x5c88   :  { %12445 = vmatpush3.msra.mxu0 %v11308_v27 }
0x5c89   :  { %12446 = vmatprep.subr.mxu0 %v11307_v29 }
0x5c8a   :  { %12447 = vmatpush3.msra.mxu0 %v11307_v29 }
0x5c8b   :  { %12448 = vmatprep.subr.mxu0 %v11306_v43 }
0x5c8c   :  { %12449 = vmatpush3.msra.mxu0 %v11306_v43 }
0x5c8d   :  { %12450 = vmatprep.subr.mxu0 %v11305_v50 }
0x5c8e   :  { %12451 = vmatpush3.msra.mxu0 %v11305_v50 }
0x5c8f   :  { %12452 = vmatprep.subr.mxu0 %v11304_v17 }
0x5c90   :  { %12453 = vmatpush3.msra.mxu0 %v11304_v17 }
0x5cb8   :  { %v7935_v48 = vpop.xlane.xlu1 %7934 }
0x5cb9   :  { %v7937_v3 = vmul.f32 0.03125, %v7935_v48  ;;  %v11295_v48 = vld [vmem:[%s14745_s22 + $0x1] ss:$0 sm:$0xff] }
0x5cbb   :  { %v7939_v39 = vsub.f32 %v7925_v51, %v7937_v3  ;;  %v11303_v51 = vld [vmem:[%s14744_s9 + $0x50] sm:$0xff] }
0x5cbc   :  { %v7944_v36 = vpop.xlane.xlu1 %7943  ;;  %12454 = vmatprep.subr.mxu0 %v11303_v51 }
0x5cbd   :  { %v7948_v57 = vmul.f32 0.03125, %v7944_v36  ;;  %v7941_v10 = vmul.f32 %v7939_v39, %v7939_v39  ;;  %12455 = vmatpush3.msra.mxu0 %v11303_v51 }
0x5cbe   :  { %12456 = vmatprep.subr.mxu0 %v11302_v26 }
0x5cbf   :  { %v7950_v9 = vadd.f32 1e-12, %v7948_v57  ;;  %v7945_v22 = vsel %vm196_vm0, %v7941_v10, 0.0  ;;  %12457 = vmatpush3.msra.mxu0 %v11302_v26  ;;  %v11296_v57 = vld [vmem:[%s14746_s16 + $0x1] ss:$0 sm:$0xff] }
0x5cc0   :  { %12458 = vmatprep.subr.mxu0 %v11301_v56 }
0x5cc1   :  { %12710 = vrsqrt.f32 %v7950_v9  ;;  %12459 = vmatpush3.msra.mxu0 %v11301_v56 }
0x5cce   :  { %v12711_v62 = vpop.eup %12710 }
0x5ccf   :  { %v7954_v31 = vmul.f32 %v12711_v62, %v7938_v1 }
0x5cd1   :  { %v7962_v4 = vmul.f32 %v11223_v0, %v7954_v31 }
0x5cd3   :  { %v14572_v21 = vadd.f32 %v11224_v19, %v7962_v4 }
0x5cd5   :  { %12441 = vmatprep.mubr.msk.f32.mxu1 %vm196_vm0, %v14572_v21 }
0x5d47   :  { %v12432_v46 = vpop.f32.mrf.mxu0 }
0x5d48   :  { %v10317_v23 = vadd.f32 %v12432_v46, %v11290_v5  ;;  %v11298_v46 = vld [vmem:[%s14747_s15 + $0x1] ss:$0 sm:$0xff] }
0x5d49   :  { %v10311_v18 = vpop.f32.mrf.mxu0 }
0x5d4a   :  { %v10312_v16 = vadd.f32 %v11290_v5, %v10311_v18  ;;  %v10321_v42 = vadd.f32 %v10317_v23, %v13903_v52 }
0x5d4c   :  { %v10320_v41 = vadd.f32 %v10312_v16, %v13901_v20  ;;  %v10329_v7 = vsel %vm4956_vm15, %v10321_v42, 0.0  ;;  %v10370_v20 = vld [vmem:[#allocation7 + $0x28] sm:$0xff] }
0x5d4d   :  { %12437 = vmatprep.subr.mxu1 %v10370_v20 }
0x5d4e   :  { %v10326_v54 = vsel %vm196_vm0, %v10320_v41, 0.0  ;;  %12438 = vmatpush3.msra.mxu1 %v10370_v20 }
0x5d4f   :  { %10327 = vadd.xlane.f32.xlu0 %v10326_v54  ;;  %12439 = vmatprep.subr.mxu1 %v10369_v25 }
0x5d50   :  { %12440 = vmatpush3.msra.mxu1 %v10369_v25 }
0x5d51   :  { %12463 = vmatprep.subr.mxu1 %v10666_v12 }
0x5d53   :  { %10330 = vadd.xlane.f32.xlu0 %v10329_v7 }
0x5d57   :  { %7946 = vadd.xlane.f32.xlu0 %v7945_v22 }
0x5dd8   :  { %v10328_v52 = vpop.xlane.xlu0 %10327 }
0x5dd9   :  { %v10332_v28 = vmul.f32 0.03125, %v10328_v52 }
0x5ddb   :  { %v14582_v2 = vsub.f32 %v10320_v41, %v10332_v28 }
0x5ddc   :  { %v10331_v24 = vpop.xlane.xlu0 %10330 }
0x5ddd   :  { %v10333_v60 = vmul.f32 0.03125, %v10331_v24  ;;  %v10336_v37 = vmul.f32 %v14582_v2, %v14582_v2 }
0x5ddf   :  { %v14586_v15 = vsub.f32 %v10321_v42, %v10333_v60  ;;  %v10338_v58 = vsel %vm196_vm0, %v10336_v37, 0.0 }
0x5de0   :  { %10339 = vadd.xlane.f32.xlu1 %v10338_v58  ;;  %v7947_v49 = vpop.xlane.xlu0 %7946 }
0x5de1   :  { %v7949_v38 = vmul.f32 0.03125, %v7947_v49  ;;  %v10337_v30 = vmul.f32 %v14586_v15, %v14586_v15 }
0x5de3   :  { %v7951_v32 = vadd.f32 1e-12, %v7949_v38  ;;  %v10341_v47 = vsel %vm4956_vm15, %v10337_v30, 0.0 }
0x5de4   :  { %10342 = vadd.xlane.f32.xlu0 %v10341_v47 }
0x5de5   :  { %12712 = vrsqrt.f32 %v7951_v32 }
0x5df2   :  { %v12713_v33 = vpop.eup %12712 }
0x5df3   :  { %v7955_v6 = vmul.f32 %v12713_v33, %v7939_v39 }
0x5df5   :  { %v7963_v35 = vmul.f32 %v11223_v0, %v7955_v6 }
0x5df7   :  { %v14592_v40 = vadd.f32 %v11224_v19, %v7963_v35 }
0x5df9   :  { %12442 = vmatmul.mubr.msk.f32.vlgmr.msra.gmra.mxu1 %vm196_vm0, %v14592_v40 }
0x5dfa   :  { %12464 = vmatpush3.msra.mxu1 %v10666_v12 }
0x5dfb   :  { %12465 = vmatprep.subr.mxu1 %v10665_v53 }
0x5dfc   :  { %12466 = vmatpush3.msra.mxu1 %v10665_v53 }
0x5dfd   :  { %12467 = vmatprep.subr.mxu1 %v10664_v13 }
0x5dfe   :  { %12468 = vmatpush3.msra.mxu1 %v10664_v13 }
0x5dff   :  { %12469 = vmatprep.subr.mxu1 %v10663_v59 }
0x5e00   :  { %12470 = vmatpush3.msra.mxu1 %v10663_v59 }
0x5e69   :  { %v10340_v45 = vpop.xlane.xlu1 %10339 }
0x5e6a   :  { %v10344_v61 = vmul.f32 0.03125, %v10340_v45 }
0x5e6c   :  { %v10346_v1 = vadd.f32 1e-12, %v10344_v61 }
0x5e6d   :  { %v10343_v55 = vpop.xlane.xlu0 %10342 }
0x5e6e   :  { %12714 = vrsqrt.f32 %v10346_v1  ;;  %v10345_v8 = vmul.f32 0.03125, %v10343_v55 }
0x5e70   :  { %v10347_v34 = vadd.f32 1e-12, %v10345_v8 }
0x5e72   :  { %12716 = vrsqrt.f32 %v10347_v34 }
0x5e7b   :  { %v12715_v63 = vpop.eup %12714 }
0x5e7c   :  { %v10350_v36 = vmul.f32 %v12715_v63, %v14582_v2 }
0x5e7e   :  { %v10358_v9 = vmul.f32 %v11295_v48, %v10350_v36  ;;  %v11328_v36 = vld [vmem:[%s14748_s11 + $0x78] sm:$0xff] }
0x5e7f   :  { %v12717_v62 = vpop.eup %12716  ;;  %12474 = vmatprep.subr.mxu1 %v11328_v36 }
0x5e80   :  { %v10351_v0 = vmul.f32 %v12717_v62, %v14586_v15  ;;  %v14608_v31 = vadd.f32 %v11296_v57, %v10358_v9  ;;  %v11327_v62 = vld [vmem:[%s14748_s11 + $0x70] sm:$0xff] }
0x5e82   :  { %v10359_v19 = vmul.f32 %v11295_v48, %v10351_v0  ;;  %12471 = vmatprep.mubr.msk.f32.mxu1 %vm196_vm0, %v14608_v31  ;;  %v11326_v0 = vld [vmem:[%s14748_s11 + $0x68] sm:$0xff] }
0x5e84   :  { %v14612_v4 = vadd.f32 %v11296_v57, %v10359_v19  ;;  %v11325_v19 = vld [vmem:[%s14748_s11 + $0x60] sm:$0xff] }
0x5e86   :  { %12472 = vmatmul.mubr.msk.f32.vlgmr.msra.gmra.mxu1 %vm196_vm0, %v14612_v4 }
0x5e87   :  { %12475 = vmatpush3.msra.mxu1 %v11328_v36 }
0x5e88   :  { %12476 = vmatprep.subr.mxu1 %v11327_v62 }
0x5e89   :  { %12477 = vmatpush3.msra.mxu1 %v11327_v62 }
0x5e8a   :  { %12478 = vmatprep.subr.mxu1 %v11326_v0 }
0x5e8b   :  { %12479 = vmatpush3.msra.mxu1 %v11326_v0 }
0x5e8c   :  { %12480 = vmatprep.subr.mxu1 %v11325_v19 }
0x5e8d   :  { %12481 = vmatpush3.msra.mxu1 %v11325_v19 }
0x5eb9   :  { %v12443_v5 = vpop.f32.mrf.mxu1 }
0x5eba   :  { %v10459_v18 = vadd.f32 %v12443_v5, %v11298_v46  ;;  %v11323_v5 = vld [vmem:[%s14748_s11 + $0x50] sm:$0xff] }
0x5ebb   :  { %v10453_v3 = vpop.f32.mrf.mxu1 }
0x5ebc   :  { %v10465_v23 = vmul.f32 0.70710677, %v10459_v18  ;;  %v10454_v16 = vadd.f32 %v11298_v46, %v10453_v3  ;;  %v10463_v48 = vmul.f32 0.5, %v10459_v18  ;;  %v11324_v46 = vld [vmem:[%s14748_s11 + $0x58] sm:$0xff]  ;;  %v11322_v18 = vld [vmem:[%s14748_s11 + $0x48] sm:$0xff]  ;;  %v11321_v3 = vld [vmem:[%s14748_s11 + $0x40] sm:$0xff] }
0x5ebd   :  { %12482 = vmatprep.subr.mxu1 %v11324_v46 }
0x5ebe   :  { %v10471_v41 = vand.u32 2147483647, %v10465_v23  ;;  %v10464_v39 = vmul.f32 0.70710677, %v10454_v16  ;;  %vm10467_vm7 = vcmp.ge.f32.partialorder %v10465_v23, 0.0  ;;  %v10462_v34 = vmul.f32 0.5, %v10454_v16  ;;  %12483 = vmatpush3.msra.mxu1 %v11324_v46 }
0x5ebf   :  { %v10469_v61 = vsel %vm10467_vm7, 1.0, %v12887_v44  ;;  %12484 = vmatprep.subr.mxu1 %v11323_v5  ;;  %v11318_v23 = vld [vmem:[%s14749_s10 + $0x1] ss:$0 sm:$0xff] }
0x5ec0   :  { %v10473_v42 = vmul.f32 0.3275911, %v10471_v41  ;;  %v10470_v54 = vand.u32 2147483647, %v10464_v39  ;;  %v10499_v14 = vsub.f32 0.0, %v10471_v41  ;;  %vm10466_vm8 = vcmp.ge.f32.partialorder %v10464_v39, 0.0  ;;  %12485 = vmatpush3.msra.mxu1 %v11323_v5 }
0x5ec1   :  { %v10468_v26 = vsel %vm10466_vm8, 1.0, %v12887_v44  ;;  %12486 = vmatprep.subr.mxu1 %v11322_v18  ;;  %v11310_v46 = vld [vmem:[%s14750_s7 + $0x1] ss:$0 sm:$0xff] }
0x5ec2   :  { %v10475_v7 = vadd.f32 1.0, %v10473_v42  ;;  %v10472_v10 = vmul.f32 0.3275911, %v10470_v54  ;;  %v10498_v11 = vsub.f32 0.0, %v10470_v54  ;;  %v10501_v20 = vmul.f32 %v10499_v14, %v10471_v41  ;;  %12487 = vmatpush3.msra.mxu1 %v11322_v18 }
0x5ec3   :  { %12488 = vmatprep.subr.mxu1 %v11321_v3 }
0x5ec4   :  { %12718 = vrcp.f32 %v10475_v7  ;;  %v10474_v22 = vadd.f32 1.0, %v10472_v10  ;;  %v10500_v52 = vmul.f32 %v10498_v11, %v10470_v54  ;;  %v10504_v2 = vmul.f32 1.442695, %v10501_v20  ;;  %12489 = vmatpush3.msra.mxu1 %v11321_v3 }
0x5ec6   :  { %12720 = vrcp.f32 %v10474_v22  ;;  %v10502_v15 = vmul.f32 1.442695, %v10500_v52 }
0x5ec7   :  { %12722 = vpow2.f32 %v10504_v2 }
0x5ec8   :  { %12724 = vpow2.f32 %v10502_v15 }
0x5ed1   :  { %v12719_v25 = vpop.eup %12718 }
0x5ed2   :  { %v10481_v28 = vmul.f32 1.0614054, %v12719_v25 }
0x5ed3   :  { %v12721_v24 = vpop.eup %12720 }
0x5ed4   :  { %v10483_v60 = vadd.f32 -1.4531521, %v10481_v28  ;;  %v10480_v37 = vmul.f32 1.0614054, %v12721_v24  ;;  %v12723_v27 = vpop.eup %12722 }
0x5ed5   :  { %v12725_v45 = vpop.eup %12724 }
0x5ed6   :  { %v10485_v58 = vmul.f32 %v12719_v25, %v10483_v60  ;;  %v10482_v49 = vadd.f32 -1.4531521, %v10480_v37 }
0x5ed8   :  { %v10487_v38 = vadd.f32 1.4214138, %v10485_v58  ;;  %v10484_v30 = vmul.f32 %v12721_v24, %v10482_v49 }
0x5eda   :  { %v10489_v32 = vmul.f32 %v12719_v25, %v10487_v38  ;;  %v10486_v47 = vadd.f32 1.4214138, %v10484_v30 }
0x5edc   :  { %v10491_v33 = vadd.f32 -0.28449672, %v10489_v32  ;;  %v10488_v12 = vmul.f32 %v12721_v24, %v10486_v47 }
0x5ede   :  { %v10493_v6 = vmul.f32 %v12719_v25, %v10491_v33  ;;  %v10490_v35 = vadd.f32 -0.28449672, %v10488_v12 }
0x5ee0   :  { %v10495_v53 = vadd.f32 0.2548296, %v10493_v6  ;;  %v10492_v13 = vmul.f32 %v12721_v24, %v10490_v35 }
0x5ee2   :  { %v10497_v59 = vmul.f32 %v12719_v25, %v10495_v53  ;;  %v10494_v29 = vadd.f32 0.2548296, %v10492_v13 }
0x5ee4   :  { %v10507_v43 = vmul.f32 %v12723_v27, %v10497_v59  ;;  %v10496_v50 = vmul.f32 %v12721_v24, %v10494_v29 }
0x5ee6   :  { %v10509_v17 = vsub.f32 1.0, %v10507_v43  ;;  %v10506_v51 = vmul.f32 %v12725_v45, %v10496_v50 }
0x5ee8   :  { %v10511_v1 = vmul.f32 %v10509_v17, %v10469_v61  ;;  %v10508_v55 = vsub.f32 1.0, %v10506_v51 }
0x5eea   :  { %v10510_v8 = vmul.f32 %v10508_v55, %v10468_v26  ;;  %v10513_v56 = vadd.f32 1.0, %v10511_v1 }
0x5eec   :  { %v10512_v63 = vadd.f32 1.0, %v10510_v8  ;;  %v10515_v9 = vmul.f32 %v10513_v56, %v10463_v48 }
0x5eee   :  { %v10514_v57 = vmul.f32 %v10512_v63, %v10462_v34 }
0x5ef0   :  { %12460 = vmatprep.mubr.msk.f32.mxu0 %vm5157_vm12, %v10514_v57 }
0x5ef1   :  { %12461 = vmatmul.mubr.msk.f32.vlgmr.msra.gmra.mxu0 %vm5157_vm12, %v10515_v9 }
0x5f46   :  { %v12473_v16 = vpop.f32.mrf.mxu1 }
0x5f47   :  { %v10753_v41 = vadd.f32 %v12473_v16, %v11318_v23 }
0x5f48   :  { %v10747_v39 = vpop.f32.mrf.mxu1 }
0x5f49   :  { %v10759_v42 = vmul.f32 0.70710677, %v10753_v41  ;;  %v10748_v54 = vadd.f32 %v11318_v23, %v10747_v39  ;;  %v10757_v62 = vmul.f32 0.5, %v10753_v41 }
0x5f4b   :  { %v10765_v7 = vand.u32 2147483647, %v10759_v42  ;;  %v10758_v10 = vmul.f32 0.70710677, %v10748_v54  ;;  %vm10761_vm9 = vcmp.ge.f32.partialorder %v10759_v42, 0.0  ;;  %v10756_v57 = vmul.f32 0.5, %v10748_v54 }
0x5f4c   :  { %v10763_v26 = vsel %vm10761_vm9, 1.0, %v12887_v44  ;;  %v11330_v42 = vld [vmem:[%s14775_s19 + $0x1] ss:$0 sm:$0xff] }
0x5f4d   :  { %v10767_v22 = vmul.f32 0.3275911, %v10765_v7  ;;  %v10764_v14 = vand.u32 2147483647, %v10758_v10  ;;  %v10793_v52 = vsub.f32 0.0, %v10765_v7  ;;  %vm10760_vm10 = vcmp.ge.f32.partialorder %v10758_v10, 0.0 }
0x5f4e   :  { %v10762_v63 = vsel %vm10760_vm10, 1.0, %v12887_v44 }
0x5f4f   :  { %v10769_v11 = vadd.f32 1.0, %v10767_v22  ;;  %v10766_v20 = vmul.f32 0.3275911, %v10764_v14  ;;  %v10792_v28 = vsub.f32 0.0, %v10764_v14  ;;  %v10795_v2 = vmul.f32 %v10793_v52, %v10765_v7 }
0x5f51   :  { %12726 = vrcp.f32 %v10769_v11  ;;  %v10768_v25 = vadd.f32 1.0, %v10766_v20  ;;  %v10794_v60 = vmul.f32 %v10792_v28, %v10764_v14  ;;  %v10798_v15 = vmul.f32 1.442695, %v10795_v2 }
0x5f53   :  { %12728 = vrcp.f32 %v10768_v25  ;;  %v10796_v30 = vmul.f32 1.442695, %v10794_v60 }
0x5f54   :  { %12730 = vpow2.f32 %v10798_v15 }
0x5f55   :  { %12732 = vpow2.f32 %v10796_v30 }
0x5f5e   :  { %v12727_v24 = vpop.eup %12726 }
0x5f5f   :  { %v10775_v37 = vmul.f32 1.0614054, %v12727_v24 }
0x5f60   :  { %v12729_v58 = vpop.eup %12728 }
0x5f61   :  { %v10777_v49 = vadd.f32 -1.4531521, %v10775_v37  ;;  %v10774_v38 = vmul.f32 1.0614054, %v12729_v58  ;;  %v12731_v45 = vpop.eup %12730 }
0x5f62   :  { %v12733_v1 = vpop.eup %12732 }
0x5f63   :  { %v10779_v32 = vmul.f32 %v12727_v24, %v10777_v49  ;;  %v10776_v47 = vadd.f32 -1.4531521, %v10774_v38 }
0x5f65   :  { %v10781_v33 = vadd.f32 1.4214138, %v10779_v32  ;;  %v10778_v12 = vmul.f32 %v12729_v58, %v10776_v47 }
0x5f67   :  { %v10783_v6 = vmul.f32 %v12727_v24, %v10781_v33  ;;  %v10780_v35 = vadd.f32 1.4214138, %v10778_v12 }
0x5f69   :  { %v10785_v53 = vadd.f32 -0.28449672, %v10783_v6  ;;  %v10782_v13 = vmul.f32 %v12729_v58, %v10780_v35 }
0x5f6b   :  { %v10787_v59 = vmul.f32 %v12727_v24, %v10785_v53  ;;  %v10784_v27 = vadd.f32 -0.28449672, %v10782_v13 }
0x5f6d   :  { %v10789_v29 = vadd.f32 0.2548296, %v10787_v59  ;;  %v10786_v43 = vmul.f32 %v12729_v58, %v10784_v27 }
0x5f6f   :  { %v10791_v50 = vmul.f32 %v12727_v24, %v10789_v29  ;;  %v10788_v17 = vadd.f32 0.2548296, %v10786_v43 }
0x5f71   :  { %v10801_v61 = vmul.f32 %v12731_v45, %v10791_v50  ;;  %v10790_v51 = vmul.f32 %v12729_v58, %v10788_v17  ;;  %v11315_v50 = vld [vmem:[%s14776_s30 + $0x1] ss:$0 sm:$0xff] }
0x5f73   :  { %v10803_v55 = vsub.f32 1.0, %v10801_v61  ;;  %v10800_v8 = vmul.f32 %v12733_v1, %v10790_v51  ;;  %v11316_v61 = vld [vmem:[%s14777_s6 + $0x1] ss:$0 sm:$0xff] }
0x5f75   :  { %v10805_v56 = vmul.f32 %v10803_v55, %v10763_v26  ;;  %v10802_v34 = vsub.f32 1.0, %v10800_v8 }
0x5f77   :  { %v10804_v48 = vmul.f32 %v10802_v34, %v10762_v63  ;;  %v10807_v36 = vadd.f32 1.0, %v10805_v56 }
0x5f79   :  { %v10806_v9 = vadd.f32 1.0, %v10804_v48  ;;  %v10809_v19 = vmul.f32 %v10807_v36, %v10757_v62 }
0x5f7b   :  { %v10808_v0 = vmul.f32 %v10806_v9, %v10756_v57 }
0x5f7d   :  { %12490 = vmatprep.mubr.msk.f32.mxu1 %vm5157_vm12, %v10808_v0 }
0x5f7e   :  { %12491 = vmatmul.mubr.msk.f32.vlgmr.msra.gmra.mxu1 %vm5157_vm12, %v10809_v19 }
0x5fb1   :  { %v12462_v5 = vpop.f32.mrf.mxu0 }
0x5fb2   :  { %v10611_v18 = vadd.f32 %v12462_v5, %v11310_v46 }
0x5fb3   :  { %v10605_v3 = vpop.f32.mrf.mxu0 }
0x5fb4   :  { %v10615_v23 = vadd.f32 %v10611_v18, %v14592_v40  ;;  %v10606_v16 = vadd.f32 %v11310_v46, %v10605_v3 }
0x5fb6   :  { %v10614_v44 = vadd.f32 %v10606_v16, %v14572_v21  ;;  %v10623_v39 = vsel %vm196_vm0, %v10615_v23, 0.0 }
0x5fb7   :  { %10624 = vadd.xlane.f32.xlu0 %v10623_v39 }
0x5fb8   :  { %v10620_v41 = vsel %vm196_vm0, %v10614_v44, 0.0 }
0x5fb9   :  { %10621 = vadd.xlane.f32.xlu1 %v10620_v41 }
0x603e   :  { %v12492_v54 = vpop.f32.mrf.mxu1 }
0x603f   :  { %v10905_v7 = vadd.f32 %v12492_v54, %v11330_v42 }
0x6040   :  { %v10899_v10 = vpop.f32.mrf.mxu1  ;;  %v10625_v22 = vpop.xlane.xlu0 %10624 }
0x6041   :  { %v10909_v14 = vadd.f32 %v10905_v7, %v14612_v4  ;;  %v10900_v11 = vadd.f32 %v11330_v42, %v10899_v10  ;;  %v10627_v20 = vmul.f32 0.03125, %v10625_v22 }
0x6042   :  { %v10622_v25 = vpop.xlane.xlu1 %10621 }
0x6043   :  { %v10908_v40 = vadd.f32 %v10900_v11, %v14608_v31  ;;  %v10629_v52 = vsub.f32 %v10615_v23, %v10627_v20  ;;  %v10626_v21 = vmul.f32 0.03125, %v10622_v25  ;;  %v10917_v28 = vsel %vm4956_vm15, %v10909_v14, 0.0 }
0x6044   :  { %10918 = vadd.xlane.f32.xlu0 %v10917_v28 }
0x6045   :  { %v10628_v2 = vsub.f32 %v10614_v44, %v10626_v21  ;;  %v10914_v24 = vsel %vm196_vm0, %v10908_v40, 0.0  ;;  %v10631_v60 = vmul.f32 %v10629_v52, %v10629_v52 }
0x6046   :  { %10915 = vadd.xlane.f32.xlu1 %v10914_v24 }
0x6047   :  { %v10635_v37 = vsel %vm196_vm0, %v10631_v60, 0.0  ;;  %v10630_v15 = vmul.f32 %v10628_v2, %v10628_v2 }
0x6048   :  { %10636 = vadd.xlane.f32.xlu0 %v10635_v37 }
0x6049   :  { %v10632_v4 = vsel %vm196_vm0, %v10630_v15, 0.0 }
0x604a   :  { %10633 = vadd.xlane.f32.xlu1 %v10632_v4 }
0x60cd   :  { %v10919_v58 = vpop.xlane.xlu0 %10918 }
0x60ce   :  { %v10921_v49 = vmul.f32 0.03125, %v10919_v58 }
0x60cf   :  { %v10916_v31 = vpop.xlane.xlu1 %10915 }
0x60d0   :  { %v10923_v38 = vsub.f32 %v10909_v14, %v10921_v49  ;;  %v10920_v30 = vmul.f32 0.03125, %v10916_v31 }
0x60d1   :  { %v10637_v32 = vpop.xlane.xlu0 %10636 }
0x60d2   :  { %v10922_v47 = vsub.f32 %v10908_v40, %v10920_v30  ;;  %v10639_v33 = vmul.f32 0.03125, %v10637_v32  ;;  %v10925_v12 = vmul.f32 %v10923_v38, %v10923_v38 }
0x60d3   :  { %v10634_v6 = vpop.xlane.xlu1 %10633 }
0x60d4   :  { %v10641_v35 = vadd.f32 1e-12, %v10639_v33  ;;  %v10638_v53 = vmul.f32 0.03125, %v10634_v6  ;;  %v10929_v13 = vsel %vm4956_vm15, %v10925_v12, 0.0  ;;  %v10924_v59 = vmul.f32 %v10922_v47, %v10922_v47 }
0x60d5   :  { %10930 = vadd.xlane.f32.xlu0 %v10929_v13 }
0x60d6   :  { %12734 = vrsqrt.f32 %v10641_v35  ;;  %v10640_v27 = vadd.f32 1e-12, %v10638_v53  ;;  %v10926_v29 = vsel %vm196_vm0, %v10924_v59, 0.0 }
0x60d7   :  { %10927 = vadd.xlane.f32.xlu1 %v10926_v29 }
0x60d8   :  { %12736 = vrsqrt.f32 %v10640_v27 }
0x60e3   :  { %v12735_v43 = vpop.eup %12734 }
0x60e4   :  { %v10645_v45 = vmul.f32 %v12735_v43, %v10629_v52 }
0x60e5   :  { %v12737_v17 = vpop.eup %12736 }
0x60e6   :  { %v10644_v51 = vmul.f32 %v12737_v17, %v10628_v2  ;;  %v10653_v1 = vmul.f32 %v11315_v50, %v10645_v45 }
0x60e8   :  { %v10652_v55 = vmul.f32 %v11315_v50, %v10644_v51  ;;  %v10661_v26 = vadd.f32 %v11316_v61, %v10653_v1 }
0x60ea   :  { %v10660_v8 = vadd.f32 %v11316_v61, %v10652_v55  ;;  %10957 = vst.msk [vmem:[#allocation10 + $0x8] sm:$0xff] %vm196_vm0, %v10661_v26 }
0x60ec   :  { %10956 = vst.msk [vmem:[#allocation10] sm:$0xff] %vm196_vm0, %v10660_v8 }
0x60ed   :  { %12817 = shalt.err (!%p12814_p5)
}
0x60ee   :  { %s14778_s18 = smov 128   ;;  %s14779_s0 = sld [smem:[#allocation32_spill]] }
0x60ef   :  { %s14780_s17 = sld [smem:[#allocation30_spill]] }
0x60f0   :  { %s14781_s24 = sld [smem:[#allocation31_spill]] }
0x60f1   :  { %s14782_s27 = sld [smem:[#allocation33_spill]] }
0x60f4   :  { %10971 = dma.vmem_to_hbm [thread:$0]  %s10966_s20, 256, %s14779_s0, [#allocation6], %s14778_s18, %s14778_s18, %s14763_s14  }
0x60f5   :  { %v11335_v62 = vld [vmem:[%s14780_s17 + $0x1] ss:$0 sm:$0xff] }
0x60f6   :  { %v11336_v46 = vld [vmem:[%s14781_s24 + $0x1] ss:$0 sm:$0xff] }
0x615e   :  { %v10931_v56 = vpop.xlane.xlu0 %10930 }
0x615f   :  { %v10933_v34 = vmul.f32 0.03125, %v10931_v56 }
0x6160   :  { %v10928_v63 = vpop.xlane.xlu1 %10927 }
0x6161   :  { %v10935_v48 = vadd.f32 1e-12, %v10933_v34  ;;  %v10932_v36 = vmul.f32 0.03125, %v10928_v63 }
0x6163   :  { %12738 = vrsqrt.f32 %v10935_v48  ;;  %v10934_v57 = vadd.f32 1e-12, %v10932_v36 }
0x6165   :  { %12740 = vrsqrt.f32 %v10934_v57 }
0x6170   :  { %v12739_v9 = vpop.eup %12738 }
0x6171   :  { %v10939_v0 = vmul.f32 %v12739_v9, %v10923_v38 }
0x6172   :  { %v12741_v19 = vpop.eup %12740 }
0x6173   :  { %v10947_v5 = vmul.f32 %v11335_v62, %v10939_v0  ;;  %v10938_v18 = vmul.f32 %v12741_v19, %v10922_v47 }
0x6175   :  { %v10955_v3 = vadd.f32 %v11336_v46, %v10947_v5  ;;  %v10946_v23 = vmul.f32 %v11335_v62, %v10938_v18 }
0x6177   :  { %10959 = vst.msk [vmem:[%s14782_s27 + $0x8] sm:$0xf] %vm4956_vm15, %v10955_v3  ;;  %v10954_v16 = vadd.f32 %v11336_v46, %v10946_v23 }
0x6179   :  { %10958 = vst.msk [vmem:[%s14782_s27] sm:$0xff] %vm196_vm0, %v10954_v16 }
0x617a   :  { %12830 = dma.done.wait [#allocation6], 256  }
0x617b   :  { %12831 = vsyncadd [#allocation6], 4294967040 }
0x617c   :  { %10979 = vsyncpa [#allocation5], 1 }
0x617d   :  { %10980 = vsyncpa [#allocation8], 1 }
0x617e   :  { %10981 = vsyncpa [#allocation6], 1 }

</bundles_post_ra>
